<compile_context>
chip_gen: v5e
topology: v5e:2x2
jax: 0.10.0
libtpu: 0.0.40
codegen_flags: <defaults>
</compile_context>

<pallas_src>
import jax
import jax.numpy as jnp
from jax.experimental import pallas as pl
from jax.experimental.pallas import tpu as pltpu


def _vmem_limit_bytes():
    """Generation-dependent scoped-VMEM budget (leave ~1/8 headroom)."""
    try:
        cap = int(pltpu.get_tpu_info().vmem_capacity_bytes)
    except Exception:
        cap = 64 * 1024 * 1024            # conservative fallback (v7x-sized)
    return min(cap - cap // 8, 112 * 1024 * 1024)


_VMEM_LIMIT = _vmem_limit_bytes()

# Below this Cin the MXU contraction (K = Cin) is badly underfilled, so we pay
# 3 cheap shifted copies to fatten it to K = 3*Cin (one matmul per kh).
_K_FATTEN_MAX_CIN = 64


# ---------------------------------------------------------------------------
# Pallas kernels
# ---------------------------------------------------------------------------
def _make_conv_kernel(H, W, Cin, Cout, apply_input_act, fatten):
    """Fused [optional BN-affine+ReLU on input] + 3x3/pad=1 conv + BN stats."""
    Wp = W + 2                    # padded row width
    P = (H + 2) * Wp              # flat rows in the padded slab
    R = H * Wp                    # accumulator rows (2 junk cols per image row)
    inv_hw = 1.0 / float(H * W)

    def core(xin_bf16, w_ref, y_ref, stat_ref, pad_ref, slab_ref):
        # ---- fill the flat padded slab: border-only zeroing + interior store.
        zrow = jnp.zeros((Wp, Cin), jnp.bfloat16)
        pad_ref[0:Wp, :] = zrow                              # top padding row
        pad_ref[(H + 1) * Wp:P, :] = zrow                    # bottom padding row
        zcol = jnp.zeros((H, 1, Cin), jnp.bfloat16)
        interior = jnp.concatenate([zcol, xin_bf16, zcol], axis=1)  # (H, W+2, Cin)
        pad_ref[Wp:(H + 1) * Wp, :] = interior.reshape(R, Cin)

        # ---- pick tap source.
        if fatten:
            # im2col-in-W: slab[p, kw*Cin:(kw+1)*Cin] = pad[p + kw, :]
            for kw in range(3):
                lo = kw * Cin
                slab_ref[0:P - kw, lo:lo + Cin] = pad_ref[kw:P, :]
                if kw:
                    slab_ref[P - kw:P, lo:lo + Cin] = jnp.zeros((kw, Cin),
                                                                jnp.bfloat16)
            src = slab_ref
            offsets = [kh * Wp for kh in range(3)]           # K = 3*Cin per matmul
        else:
            src = pad_ref                                    # zero-copy 9 taps
            offsets = [kh * Wp + kw for kh in range(3) for kw in range(3)]

        # ---- conv as shifted contiguous-window MXU matmuls, f32 accumulation.
        acc = jnp.zeros((R, Cout), jnp.float32)
        for t, off in enumerate(offsets):
            acc = acc + jnp.dot(src[off:off + R, :], w_ref[t],
                                preferred_element_type=jnp.float32)

        valid = acc.reshape(H, Wp, Cout)[:, :W, :]           # drop junk columns
        y_ref[0] = valid.astype(jnp.bfloat16)                # bf16 intermediate

        # ---- per-sample BN statistics: sum + centered M2 (Chan-combined later).
        flat = valid.reshape(H * W, Cout)
        s = jnp.sum(flat, axis=0, keepdims=True)             # (1, Cout)
        d = flat - s * inv_hw
        m2 = jnp.sum(d * d, axis=0, keepdims=True)           # (1, Cout)
        stat_ref[0] = jnp.concatenate([s, m2], axis=0)       # (2, Cout)

    def prologue(x_ref, sc_ref, sh_ref):
        # Previous layer's BN affine + ReLU fused onto this conv's input
        # (f32 VPU math, single bf16 cast — no redundant round trips).
        scale = sc_ref[...].reshape(1, 1, Cin)
        shift = sh_ref[...].reshape(1, 1, Cin)
        xin = jnp.maximum(x_ref[0].astype(jnp.float32) * scale + shift, 0.0)
        return xin.astype(jnp.bfloat16)

    if apply_input_act and fatten:
        def kernel(x_ref, sc_ref, sh_ref, w_ref, y_ref, stat_ref, pad_ref, slab_ref):
            core(prologue(x_ref, sc_ref, sh_ref), w_ref, y_ref, stat_ref,
                 pad_ref, slab_ref)
    elif apply_input_act:
        def kernel(x_ref, sc_ref, sh_ref, w_ref, y_ref, stat_ref, pad_ref):
            core(prologue(x_ref, sc_ref, sh_ref), w_ref, y_ref, stat_ref,
                 pad_ref, None)
    elif fatten:
        def kernel(x_ref, w_ref, y_ref, stat_ref, pad_ref, slab_ref):
            core(x_ref[0], w_ref, y_ref, stat_ref, pad_ref, slab_ref)
    else:
        def kernel(x_ref, w_ref, y_ref, stat_ref, pad_ref):
            core(x_ref[0], w_ref, y_ref, stat_ref, pad_ref, None)
    return kernel


def _bn_relu_kernel(y_ref, sc_ref, sh_ref, o_ref):
    """Final fused BN affine (pre-folded scale/shift) + ReLU, NCHW-ready output."""
    _, H, W, C = y_ref.shape
    scale = sc_ref[...].reshape(1, 1, C)
    shift = sh_ref[...].reshape(1, 1, C)
    v = jnp.maximum(y_ref[0].astype(jnp.float32) * scale + shift, 0.0)  # (H, W, C)
    # Lane-dense (C, H*W) store; the caller's reshape to NCHW is free.
    o_ref[0] = jnp.transpose(v.reshape(H * W, C), (1, 0))


# ---------------------------------------------------------------------------
# pallas_call wrappers
# ---------------------------------------------------------------------------
def conv3x3_bn_stats(x_nhwc, w_taps, in_scale=None, in_shift=None):
    """Bias-free 3x3/pad=1 conv of a bf16 NHWC tensor.

    Returns (y_bf16, stats) with stats[:, 0] = per-sample channel sums and
    stats[:, 1] = per-sample centered sums of squares.  If in_scale/in_shift
    are given, the previous layer's BN affine + ReLU is fused onto the input.
    """
    N, H, W, Cin = x_nhwc.shape
    n_taps, K, Cout = w_taps.shape
    fatten = (n_taps == 3)
    apply_input_act = in_scale is not None

    kernel = _make_conv_kernel(H, W, Cin, Cout, apply_input_act, fatten)

    in_specs = [pl.BlockSpec((1, H, W, Cin), lambda n: (n, 0, 0, 0))]
    inputs = [x_nhwc]
    if apply_input_act:
        in_specs += [pl.BlockSpec((1, Cin), lambda n: (0, 0)),
                     pl.BlockSpec((1, Cin), lambda n: (0, 0))]
        inputs += [in_scale.reshape(1, -1).astype(jnp.float32),
                   in_shift.reshape(1, -1).astype(jnp.float32)]
    in_specs.append(pl.BlockSpec((n_taps, K, Cout), lambda n: (0, 0, 0)))
    inputs.append(w_taps)

    P = (H + 2) * (W + 2)
    scratch = [pltpu.VMEM((P, Cin), jnp.bfloat16)]
    if fatten:
        scratch.append(pltpu.VMEM((P, 3 * Cin), jnp.bfloat16))

    y, stats = pl.pallas_call(
        kernel,
        out_shape=(
            jax.ShapeDtypeStruct((N, H, W, Cout), jnp.bfloat16),
            jax.ShapeDtypeStruct((N, 2, Cout), jnp.float32),
        ),
        grid_spec=pltpu.PrefetchScalarGridSpec(
            num_scalar_prefetch=0,
            grid=(N,),
            in_specs=in_specs,
            out_specs=(
                pl.BlockSpec((1, H, W, Cout), lambda n: (n, 0, 0, 0)),
                pl.BlockSpec((1, 2, Cout), lambda n: (n, 0, 0)),
            ),
            scratch_shapes=scratch),
        compiler_params=pltpu.CompilerParams(
            dimension_semantics=("parallel",),
            vmem_limit_bytes=_VMEM_LIMIT),
    )(*inputs)
    return y, stats


def bn_relu_nchw(y_nhwc, scale, shift):
    """Final BN affine + ReLU; emits lane-dense (N, C, H*W) f32 whose free
    reshape in the caller yields NCHW (no standalone XLA transpose pass)."""
    # TODO(synk): row-tile (N, H-tiles) for very large H*W so the per-step
    #   block fits v7x's 64 MiB VMEM.
    N, H, W, C = y_nhwc.shape
    return pl.pallas_call(
        _bn_relu_kernel,
        out_shape=jax.ShapeDtypeStruct((N, C, H * W), jnp.float32),
        grid_spec=pltpu.PrefetchScalarGridSpec(
            num_scalar_prefetch=0,
            grid=(N,),
            in_specs=[pl.BlockSpec((1, H, W, C), lambda n: (n, 0, 0, 0)),
                      pl.BlockSpec((1, C), lambda n: (0, 0)),
                      pl.BlockSpec((1, C), lambda n: (0, 0))],
            out_specs=pl.BlockSpec((1, C, H * W), lambda n: (n, 0, 0))),
        compiler_params=pltpu.CompilerParams(
            dimension_semantics=("parallel",),
            vmem_limit_bytes=_VMEM_LIMIT),
    )(y_nhwc,
      scale.reshape(1, -1).astype(jnp.float32),
      shift.reshape(1, -1).astype(jnp.float32))


# ---------------------------------------------------------------------------
# Glue (parameter preparation / exact stats combine in plain JAX)
# ---------------------------------------------------------------------------
def _torch_weight_to_taps(w_oihw):
    """(Cout, Cin, 3, 3) -> bf16 tap-major weights.

    Small Cin : (3, 3*Cin, Cout)  — K fattened to 3*Cin, one matmul per kh.
    Large Cin : (9, Cin, Cout)    — zero-copy 9-tap path, K already fat.
    """
    Cout, Cin = w_oihw.shape[0], w_oihw.shape[1]
    wt = jnp.transpose(w_oihw, (2, 3, 1, 0))              # (kh, kw, Cin, Cout)
    if Cin < _K_FATTEN_MAX_CIN:
        return wt.reshape(3, 3 * Cin, Cout).astype(jnp.bfloat16)
    return wt.reshape(9, Cin, Cout).astype(jnp.bfloat16)


def _bn_affine(stats, gamma, beta, hw, eps=1e-5):
    """Exact train-mode BN fold from per-sample (sum, centered M2) via Chan's
    pairwise combine (biased variance over N*H*W, no E[x^2]-E[x]^2 cancel)."""
    s, m2 = stats[:, 0, :], stats[:, 1, :]                 # (N, Cout) each
    n = stats.shape[0]
    mean_i = s / hw
    mean = jnp.mean(mean_i, axis=0)                        # equal n per sample
    var = (jnp.sum(m2, axis=0)
           + hw * jnp.sum((mean_i - mean[None, :]) ** 2, axis=0)) / (n * hw)
    var = jnp.maximum(var, 0.0)
    scale = gamma / jnp.sqrt(var + eps)
    shift = beta - mean * scale
    return scale, shift


@jax.jit
def double_conv(x_nchw, params):
    """params: two layers of (w_oihw, bias, gamma, beta) — PyTorch shapes.

    Conv biases are ignored on purpose: under train-mode BatchNorm a per-channel
    constant cancels exactly when the batch mean is subtracted, so the forward
    output is unchanged (the f32 reference keeps the bias and still matches).
    NOTE: valid only for batch-stat (training) BN, not eval/running-stat mode.
    """
    (w1, _b1, g1, be1), (w2, _b2, g2, be2) = params
    N, _, H, W = x_nchw.shape
    hw = H * W

    x = jnp.transpose(x_nchw, (0, 2, 3, 1)).astype(jnp.bfloat16)      # NHWC bf16

    # Layer 1: conv + per-sample batch statistics.
    y1, st1 = conv3x3_bn_stats(x, _torch_weight_to_taps(w1))
    scale1, shift1 = _bn_affine(st1, g1, be1, hw)

    # Layer 2: conv with layer-1's BN affine + ReLU fused onto its input.
    # (Layer-2 stats inherit the bf16 rounding of y1 — fine at bf16 tolerance.)
    y2, st2 = conv3x3_bn_stats(y1, _torch_weight_to_taps(w2), scale1, shift1)
    scale2, shift2 = _bn_affine(st2, g2, be2, hw)

    out = bn_relu_nchw(y2, scale2, shift2)                 # (N, Cout, H*W) f32
    return out.reshape(N, -1, H, W)                        # free reshape -> NCHW


def ref_double_conv(x_nchw, params):
    """Pure-JAX f32 reference mirroring the PyTorch forward in train mode."""
    eps = 1e-5
    x = x_nchw.astype(jnp.float32)
    for (w_oihw, b, gamma, beta) in params:
        y = jax.lax.conv_general_dilated(
            x, w_oihw, window_strides=(1, 1), padding="SAME",
            dimension_numbers=("NCHW", "OIHW", "NCHW"))
        y = y + b[None, :, None, None]
        mean = jnp.mean(y, axis=(0, 2, 3))
        var = jnp.var(y, axis=(0, 2, 3))                   # biased (ddof=0)
        y = (y - mean[None, :, None, None]) / jnp.sqrt(var + eps)[None, :, None, None]
        y = gamma[None, :, None, None] * y + beta[None, :, None, None]
        x = jnp.maximum(y, 0.0)
    return x


# ---------------------------------------------------------------------------
if __name__ == "__main__":
    key = jax.random.PRNGKey(0)
    kx, k1, k2, k3, k4, k5, k6, k7, k8 = jax.random.split(key, 9)

    N, Cin, Cout, H, W = 2, 4, 8, 16, 16
    x = jax.random.normal(kx, (N, Cin, H, W), jnp.float32)

    # Deterministic synthetic parameters (PyTorch shapes).
    w1 = 0.1 * jax.random.normal(k1, (Cout, Cin, 3, 3), jnp.float32)
    b1 = 0.1 * jax.random.normal(k2, (Cout,), jnp.float32)
    g1 = 1.0 + 0.1 * jax.random.normal(k3, (Cout,), jnp.float32)
    be1 = 0.1 * jax.random.normal(k4, (Cout,), jnp.float32)

    w2 = 0.1 * jax.random.normal(k5, (Cout, Cout, 3, 3), jnp.float32)
    b2 = 0.1 * jax.random.normal(k6, (Cout,), jnp.float32)
    g2 = 1.0 + 0.1 * jax.random.normal(k7, (Cout,), jnp.float32)
    be2 = 0.1 * jax.random.normal(k8, (Cout,), jnp.float32)

    params = ((w1, b1, g1, be1), (w2, b2, g2, be2))

    out = jax.block_until_ready(double_conv(x, params))
    ref = jax.block_until_ready(ref_double_conv(x, params))

    assert out.shape == (N, Cout, H, W)
    # bf16 MXU operands / bf16 intermediates -> loosen tolerance vs f32 reference.
    max_err = float(jnp.max(jnp.abs(out - ref)))
    assert jnp.allclose(out, ref, atol=5e-2, rtol=5e-2), max_err

    print("KERNEL_OK")
</pallas_src>

<mosaic_0001>
module attributes {stable_mosaic.version = 11 : i64} {
  func.func @kernel(%arg0: i32, %arg1: memref<1x16x16x4xbf16, #tpu.memory_space<vmem>>, %arg2: memref<3x12x8xbf16, #tpu.memory_space<vmem>>, %arg3: memref<1x16x16x8xbf16, #tpu.memory_space<vmem>>, %arg4: memref<1x2x8xf32, #tpu.memory_space<vmem>>, %arg5: memref<324x4xbf16, #tpu.memory_space<vmem>>, %arg6: memref<324x12xbf16, #tpu.memory_space<vmem>>) attributes {dimension_semantics = [#tpu.dimension_semantics<parallel>], iteration_bounds = array<i64: 2>, scalar_prefetch = 0 : i64, scratch_operands = 2 : i64, tpu.core_type = #tpu.core_type<tc>, window_params = [{transform_indices = @transform_0, window_bounds = array<i64: 1, 16, 16, 4>}, {pipeline_mode = #tpu.pipeline_mode<synchronous>, transform_indices = @transform_1, window_bounds = array<i64: 3, 12, 8>}, {transform_indices = @transform_2, window_bounds = array<i64: 1, 16, 16, 8>}, {transform_indices = @transform_3, window_bounds = array<i64: 1, 2, 8>}]} {
    %c0 = arith.constant 0 : index
    %c0_0 = arith.constant 0 : index
    %c0_1 = arith.constant 0 : index
    %c0_2 = arith.constant 0 : index
    %0 = vector.load %arg1[%c0, %c0_0, %c0_1, %c0_2] : memref<1x16x16x4xbf16, #tpu.memory_space<vmem>>, vector<1x16x16x4xbf16>
    %1 = vector.shape_cast %0 : vector<1x16x16x4xbf16> to vector<16x16x4xbf16>
    %cst = arith.constant 0.000000e+00 : bf16
    %2 = vector.broadcast %cst : bf16 to vector<18x4xbf16>
    %c0_3 = arith.constant 0 : index
    %c0_4 = arith.constant 0 : index
    %3 = vector.load %arg5[%c0_3, %c0_4] : memref<324x4xbf16, #tpu.memory_space<vmem>>, vector<18x4xbf16>
    tpu.vector_store %arg5[%c0_3, %c0_4], %2 {strides = array<i32>} : memref<324x4xbf16, #tpu.memory_space<vmem>>, vector<18x4xbf16>,
    %c306 = arith.constant 306 : index
    %c0_5 = arith.constant 0 : index
    %4 = vector.load %arg5[%c306, %c0_5] : memref<324x4xbf16, #tpu.memory_space<vmem>>, vector<18x4xbf16>
    tpu.vector_store %arg5[%c306, %c0_5], %2 {strides = array<i32>} : memref<324x4xbf16, #tpu.memory_space<vmem>>, vector<18x4xbf16>,
    %cst_6 = arith.constant 0.000000e+00 : bf16
    %5 = vector.broadcast %cst_6 : bf16 to vector<16x1x4xbf16>
    %6 = tpu.concatenate %5, %1, %5 in 1 : vector<16x1x4xbf16>, vector<16x16x4xbf16>, vector<16x1x4xbf16> -> vector<16x18x4xbf16>
    %7 = vector.shape_cast %6 : vector<16x18x4xbf16> to vector<288x4xbf16>
    %c18 = arith.constant 18 : index
    %c0_7 = arith.constant 0 : index
    %8 = vector.load %arg5[%c18, %c0_7] : memref<324x4xbf16, #tpu.memory_space<vmem>>, vector<288x4xbf16>
    tpu.vector_store %arg5[%c18, %c0_7], %7 {strides = array<i32>} : memref<324x4xbf16, #tpu.memory_space<vmem>>, vector<288x4xbf16>,
    %c0_8 = arith.constant 0 : index
    %c0_9 = arith.constant 0 : index
    %9 = vector.load %arg5[%c0_8, %c0_9] : memref<324x4xbf16, #tpu.memory_space<vmem>>, vector<324x4xbf16>
    %c0_10 = arith.constant 0 : index
    %c0_11 = arith.constant 0 : index
    %10 = vector.load %arg6[%c0_10, %c0_11] : memref<324x12xbf16, #tpu.memory_space<vmem>>, vector<324x4xbf16>
    tpu.vector_store %arg6[%c0_10, %c0_11], %9 {strides = array<i32>} : memref<324x12xbf16, #tpu.memory_space<vmem>>, vector<324x4xbf16>,
    %c1 = arith.constant 1 : index
    %c0_12 = arith.constant 0 : index
    %11 = vector.load %arg5[%c1, %c0_12] : memref<324x4xbf16, #tpu.memory_space<vmem>>, vector<323x4xbf16>
    %c0_13 = arith.constant 0 : index
    %c4 = arith.constant 4 : index
    %12 = vector.load %arg6[%c0_13, %c4] : memref<324x12xbf16, #tpu.memory_space<vmem>>, vector<323x4xbf16>
    tpu.vector_store %arg6[%c0_13, %c4], %11 {strides = array<i32>} : memref<324x12xbf16, #tpu.memory_space<vmem>>, vector<323x4xbf16>,
    %cst_14 = arith.constant 0.000000e+00 : bf16
    %13 = vector.broadcast %cst_14 : bf16 to vector<1x4xbf16>
    %c323 = arith.constant 323 : index
    %c4_15 = arith.constant 4 : index
    %14 = vector.load %arg6[%c323, %c4_15] : memref<324x12xbf16, #tpu.memory_space<vmem>>, vector<1x4xbf16>
    tpu.vector_store %arg6[%c323, %c4_15], %13 {strides = array<i32>} : memref<324x12xbf16, #tpu.memory_space<vmem>>, vector<1x4xbf16>,
    %c2 = arith.constant 2 : index
    %c0_16 = arith.constant 0 : index
    %15 = vector.load %arg5[%c2, %c0_16] : memref<324x4xbf16, #tpu.memory_space<vmem>>, vector<322x4xbf16>
    %c0_17 = arith.constant 0 : index
    %c8 = arith.constant 8 : index
    %16 = vector.load %arg6[%c0_17, %c8] : memref<324x12xbf16, #tpu.memory_space<vmem>>, vector<322x4xbf16>
    tpu.vector_store %arg6[%c0_17, %c8], %15 {strides = array<i32>} : memref<324x12xbf16, #tpu.memory_space<vmem>>, vector<322x4xbf16>,
    %cst_18 = arith.constant 0.000000e+00 : bf16
    %17 = vector.broadcast %cst_18 : bf16 to vector<2x4xbf16>
    %c322 = arith.constant 322 : index
    %c8_19 = arith.constant 8 : index
    %18 = vector.load %arg6[%c322, %c8_19] : memref<324x12xbf16, #tpu.memory_space<vmem>>, vector<2x4xbf16>
    tpu.vector_store %arg6[%c322, %c8_19], %17 {strides = array<i32>} : memref<324x12xbf16, #tpu.memory_space<vmem>>, vector<2x4xbf16>,
    %cst_20 = arith.constant 0.000000e+00 : f32
    %19 = vector.broadcast %cst_20 : f32 to vector<288x8xf32>
    %c0_21 = arith.constant 0 : index
    %c0_22 = arith.constant 0 : index
    %20 = vector.load %arg6[%c0_21, %c0_22] : memref<324x12xbf16, #tpu.memory_space<vmem>>, vector<288x12xbf16>
    %c0_23 = arith.constant 0 : index
    %c0_24 = arith.constant 0 : index
    %c0_25 = arith.constant 0 : index
    %21 = vector.load %arg2[%c0_23, %c0_24, %c0_25] : memref<3x12x8xbf16, #tpu.memory_space<vmem>>, vector<1x12x8xbf16>
    %22 = vector.shape_cast %21 : vector<1x12x8xbf16> to vector<12x8xbf16>
    %cst_26 = arith.constant dense<0.000000e+00> : vector<288x8xf32>
    %23 = tpu.matmul %20, %22, %cst_26 {dimension_numbers = #tpu.dot_dimension_numbers<[1], [0], [0], [1], [0, 0, 1, 1], [], []>} : vector<288x12xbf16>, vector<12x8xbf16>, vector<288x8xf32> -> vector<288x8xf32>
    %24 = arith.addf %19, %23 : vector<288x8xf32>
    %c18_27 = arith.constant 18 : index
    %c0_28 = arith.constant 0 : index
    %25 = vector.load %arg6[%c18_27, %c0_28] : memref<324x12xbf16, #tpu.memory_space<vmem>>, vector<288x12xbf16>
    %c1_29 = arith.constant 1 : index
    %c0_30 = arith.constant 0 : index
    %c0_31 = arith.constant 0 : index
    %26 = vector.load %arg2[%c1_29, %c0_30, %c0_31] : memref<3x12x8xbf16, #tpu.memory_space<vmem>>, vector<1x12x8xbf16>
    %27 = vector.shape_cast %26 : vector<1x12x8xbf16> to vector<12x8xbf16>
    %cst_32 = arith.constant dense<0.000000e+00> : vector<288x8xf32>
    %28 = tpu.matmul %25, %27, %cst_32 {dimension_numbers = #tpu.dot_dimension_numbers<[1], [0], [0], [1], [0, 0, 1, 1], [], []>} : vector<288x12xbf16>, vector<12x8xbf16>, vector<288x8xf32> -> vector<288x8xf32>
    %29 = arith.addf %24, %28 : vector<288x8xf32>
    %c36 = arith.constant 36 : index
    %c0_33 = arith.constant 0 : index
    %30 = vector.load %arg6[%c36, %c0_33] : memref<324x12xbf16, #tpu.memory_space<vmem>>, vector<288x12xbf16>
    %c2_34 = arith.constant 2 : index
    %c0_35 = arith.constant 0 : index
    %c0_36 = arith.constant 0 : index
    %31 = vector.load %arg2[%c2_34, %c0_35, %c0_36] : memref<3x12x8xbf16, #tpu.memory_space<vmem>>, vector<1x12x8xbf16>
    %32 = vector.shape_cast %31 : vector<1x12x8xbf16> to vector<12x8xbf16>
    %cst_37 = arith.constant dense<0.000000e+00> : vector<288x8xf32>
    %33 = tpu.matmul %30, %32, %cst_37 {dimension_numbers = #tpu.dot_dimension_numbers<[1], [0], [0], [1], [0, 0, 1, 1], [], []>} : vector<288x12xbf16>, vector<12x8xbf16>, vector<288x8xf32> -> vector<288x8xf32>
    %34 = arith.addf %29, %33 : vector<288x8xf32>
    %35 = vector.shape_cast %34 : vector<288x8xf32> to vector<16x18x8xf32>
    %36 = vector.extract_strided_slice %35 {offsets = [0, 0, 0], sizes = [16, 16, 8], strides = [1, 1, 1]} : vector<16x18x8xf32> to vector<16x16x8xf32>
    %37 = arith.truncf %36 : vector<16x16x8xf32> to vector<16x16x8xbf16>
    %c0_38 = arith.constant 0 : index
    %c0_39 = arith.constant 0 : index
    %c0_40 = arith.constant 0 : index
    %c0_41 = arith.constant 0 : index
    %38 = vector.load %arg3[%c0_38, %c0_39, %c0_40, %c0_41] : memref<1x16x16x8xbf16, #tpu.memory_space<vmem>>, vector<1x16x16x8xbf16>
    %39 = vector.shape_cast %38 : vector<1x16x16x8xbf16> to vector<16x16x8xbf16>
    %40 = vector.shape_cast %37 : vector<16x16x8xbf16> to vector<1x16x16x8xbf16>
    tpu.vector_store %arg3[%c0_38, %c0_39, %c0_40, %c0_41], %40 {strides = array<i32>} : memref<1x16x16x8xbf16, #tpu.memory_space<vmem>>, vector<1x16x16x8xbf16>,
    %41 = vector.shape_cast %36 : vector<16x16x8xf32> to vector<256x8xf32>
    %cst_42 = arith.constant dense<0.000000e+00> : vector<8xf32>
    %42 = vector.multi_reduction <add>, %41, %cst_42 [0] : vector<256x8xf32> to vector<8xf32>
    %43 = vector.shape_cast %42 : vector<8xf32> to vector<1x8xf32>
    %cst_43 = arith.constant 3.906250e-03 : f32
    %44 = vector.broadcast %cst_43 : f32 to vector<1x8xf32>
    %45 = arith.mulf %43, %44 : vector<1x8xf32>
    %46 = vector.broadcast %45 : vector<1x8xf32> to vector<256x8xf32>
    %47 = arith.subf %41, %46 : vector<256x8xf32>
    %48 = arith.mulf %47, %47 : vector<256x8xf32>
    %cst_44 = arith.constant dense<0.000000e+00> : vector<8xf32>
    %49 = vector.multi_reduction <add>, %48, %cst_44 [0] : vector<256x8xf32> to vector<8xf32>
    %50 = vector.shape_cast %49 : vector<8xf32> to vector<1x8xf32>
    %51 = tpu.concatenate %43, %50 in 0 : vector<1x8xf32>, vector<1x8xf32> -> vector<2x8xf32>
    %c0_45 = arith.constant 0 : index
    %c0_46 = arith.constant 0 : index
    %c0_47 = arith.constant 0 : index
    %52 = vector.load %arg4[%c0_45, %c0_46, %c0_47] : memref<1x2x8xf32, #tpu.memory_space<vmem>>, vector<1x2x8xf32>
    %53 = vector.shape_cast %52 : vector<1x2x8xf32> to vector<2x8xf32>
    %54 = vector.shape_cast %51 : vector<2x8xf32> to vector<1x2x8xf32>
    tpu.vector_store %arg4[%c0_45, %c0_46, %c0_47], %54 {strides = array<i32>} : memref<1x2x8xf32, #tpu.memory_space<vmem>>, vector<1x2x8xf32>,
    return
  }
  func.func @transform_0(%arg0: i32) -> (i32, i32, i32, i32) {
    %c0_i32 = arith.constant 0 : i32
    %c0_i32_0 = arith.constant 0 : i32
    %c0_i32_1 = arith.constant 0 : i32
    %c0_i32_2 = arith.constant 0 : i32
    return %arg0, %c0_i32, %c0_i32_0, %c0_i32_1 : i32, i32, i32, i32
  }
  func.func @transform_1(%arg0: i32) -> (i32, i32, i32) {
    %c0_i32 = arith.constant 0 : i32
    %c0_i32_0 = arith.constant 0 : i32
    %c0_i32_1 = arith.constant 0 : i32
    %c0_i32_2 = arith.constant 0 : i32
    return %c0_i32, %c0_i32_0, %c0_i32_1 : i32, i32, i32
  }
  func.func @transform_2(%arg0: i32) -> (i32, i32, i32, i32) {
    %c0_i32 = arith.constant 0 : i32
    %c0_i32_0 = arith.constant 0 : i32
    %c0_i32_1 = arith.constant 0 : i32
    %c0_i32_2 = arith.constant 0 : i32
    return %arg0, %c0_i32, %c0_i32_0, %c0_i32_1 : i32, i32, i32, i32
  }
  func.func @transform_3(%arg0: i32) -> (i32, i32, i32) {
    %c0_i32 = arith.constant 0 : i32
    %c0_i32_0 = arith.constant 0 : i32
    %c0_i32_1 = arith.constant 0 : i32
    return %arg0, %c0_i32, %c0_i32_0 : i32, i32, i32
  }
}

module attributes {stable_mosaic.version = 11 : i64} {
  func.func @kernel(%arg0: i32, %arg1: memref<1x16x16x8xbf16, #tpu.memory_space<vmem>>, %arg2: memref<1x8xf32, #tpu.memory_space<vmem>>, %arg3: memref<1x8xf32, #tpu.memory_space<vmem>>, %arg4: memref<3x24x8xbf16, #tpu.memory_space<vmem>>, %arg5: memref<1x16x16x8xbf16, #tpu.memory_space<vmem>>, %arg6: memref<1x2x8xf32, #tpu.memory_space<vmem>>, %arg7: memref<324x8xbf16, #tpu.memory_space<vmem>>, %arg8: memref<324x24xbf16, #tpu.memory_space<vmem>>) attributes {dimension_semantics = [#tpu.dimension_semantics<parallel>], iteration_bounds = array<i64: 2>, scalar_prefetch = 0 : i64, scratch_operands = 2 : i64, tpu.core_type = #tpu.core_type<tc>, window_params = [{transform_indices = @transform_0, window_bounds = array<i64: 1, 16, 16, 8>}, {pipeline_mode = #tpu.pipeline_mode<synchronous>, transform_indices = @transform_1, window_bounds = array<i64: 1, 8>}, {pipeline_mode = #tpu.pipeline_mode<synchronous>, transform_indices = @transform_2, window_bounds = array<i64: 1, 8>}, {pipeline_mode = #tpu.pipeline_mode<synchronous>, transform_indices = @transform_3, window_bounds = array<i64: 3, 24, 8>}, {transform_indices = @transform_4, window_bounds = array<i64: 1, 16, 16, 8>}, {transform_indices = @transform_5, window_bounds = array<i64: 1, 2, 8>}]} {
    %c0 = arith.constant 0 : index
    %c0_0 = arith.constant 0 : index
    %0 = vector.load %arg2[%c0, %c0_0] : memref<1x8xf32, #tpu.memory_space<vmem>>, vector<1x8xf32>
    %1 = vector.shape_cast %0 : vector<1x8xf32> to vector<1x1x8xf32>
    %c0_1 = arith.constant 0 : index
    %c0_2 = arith.constant 0 : index
    %2 = vector.load %arg3[%c0_1, %c0_2] : memref<1x8xf32, #tpu.memory_space<vmem>>, vector<1x8xf32>
    %3 = vector.shape_cast %2 : vector<1x8xf32> to vector<1x1x8xf32>
    %c0_3 = arith.constant 0 : index
    %c0_4 = arith.constant 0 : index
    %c0_5 = arith.constant 0 : index
    %c0_6 = arith.constant 0 : index
    %4 = vector.load %arg1[%c0_3, %c0_4, %c0_5, %c0_6] : memref<1x16x16x8xbf16, #tpu.memory_space<vmem>>, vector<1x16x16x8xbf16>
    %5 = vector.shape_cast %4 : vector<1x16x16x8xbf16> to vector<16x16x8xbf16>
    %6 = arith.extf %5 : vector<16x16x8xbf16> to vector<16x16x8xf32>
    %7 = vector.broadcast %1 : vector<1x1x8xf32> to vector<16x16x8xf32>
    %8 = arith.mulf %6, %7 : vector<16x16x8xf32>
    %9 = vector.broadcast %3 : vector<1x1x8xf32> to vector<16x16x8xf32>
    %10 = arith.addf %8, %9 : vector<16x16x8xf32>
    %cst = arith.constant 0.000000e+00 : f32
    %11 = vector.broadcast %cst : f32 to vector<16x16x8xf32>
    %12 = arith.maximumf %10, %11 : vector<16x16x8xf32>
    %13 = arith.truncf %12 : vector<16x16x8xf32> to vector<16x16x8xbf16>
    %cst_7 = arith.constant 0.000000e+00 : bf16
    %14 = vector.broadcast %cst_7 : bf16 to vector<18x8xbf16>
    %c0_8 = arith.constant 0 : index
    %c0_9 = arith.constant 0 : index
    %15 = vector.load %arg7[%c0_8, %c0_9] : memref<324x8xbf16, #tpu.memory_space<vmem>>, vector<18x8xbf16>
    tpu.vector_store %arg7[%c0_8, %c0_9], %14 {strides = array<i32>} : memref<324x8xbf16, #tpu.memory_space<vmem>>, vector<18x8xbf16>,
    %c306 = arith.constant 306 : index
    %c0_10 = arith.constant 0 : index
    %16 = vector.load %arg7[%c306, %c0_10] : memref<324x8xbf16, #tpu.memory_space<vmem>>, vector<18x8xbf16>
    tpu.vector_store %arg7[%c306, %c0_10], %14 {strides = array<i32>} : memref<324x8xbf16, #tpu.memory_space<vmem>>, vector<18x8xbf16>,
    %cst_11 = arith.constant 0.000000e+00 : bf16
    %17 = vector.broadcast %cst_11 : bf16 to vector<16x1x8xbf16>
    %18 = tpu.concatenate %17, %13, %17 in 1 : vector<16x1x8xbf16>, vector<16x16x8xbf16>, vector<16x1x8xbf16> -> vector<16x18x8xbf16>
    %19 = vector.shape_cast %18 : vector<16x18x8xbf16> to vector<288x8xbf16>
    %c18 = arith.constant 18 : index
    %c0_12 = arith.constant 0 : index
    %20 = vector.load %arg7[%c18, %c0_12] : memref<324x8xbf16, #tpu.memory_space<vmem>>, vector<288x8xbf16>
    tpu.vector_store %arg7[%c18, %c0_12], %19 {strides = array<i32>} : memref<324x8xbf16, #tpu.memory_space<vmem>>, vector<288x8xbf16>,
    %c0_13 = arith.constant 0 : index
    %c0_14 = arith.constant 0 : index
    %21 = vector.load %arg7[%c0_13, %c0_14] : memref<324x8xbf16, #tpu.memory_space<vmem>>, vector<324x8xbf16>
    %c0_15 = arith.constant 0 : index
    %c0_16 = arith.constant 0 : index
    %22 = vector.load %arg8[%c0_15, %c0_16] : memref<324x24xbf16, #tpu.memory_space<vmem>>, vector<324x8xbf16>
    tpu.vector_store %arg8[%c0_15, %c0_16], %21 {strides = array<i32>} : memref<324x24xbf16, #tpu.memory_space<vmem>>, vector<324x8xbf16>,
    %c1 = arith.constant 1 : index
    %c0_17 = arith.constant 0 : index
    %23 = vector.load %arg7[%c1, %c0_17] : memref<324x8xbf16, #tpu.memory_space<vmem>>, vector<323x8xbf16>
    %c0_18 = arith.constant 0 : index
    %c8 = arith.constant 8 : index
    %24 = vector.load %arg8[%c0_18, %c8] : memref<324x24xbf16, #tpu.memory_space<vmem>>, vector<323x8xbf16>
    tpu.vector_store %arg8[%c0_18, %c8], %23 {strides = array<i32>} : memref<324x24xbf16, #tpu.memory_space<vmem>>, vector<323x8xbf16>,
    %cst_19 = arith.constant 0.000000e+00 : bf16
    %25 = vector.broadcast %cst_19 : bf16 to vector<1x8xbf16>
    %c323 = arith.constant 323 : index
    %c8_20 = arith.constant 8 : index
    %26 = vector.load %arg8[%c323, %c8_20] : memref<324x24xbf16, #tpu.memory_space<vmem>>, vector<1x8xbf16>
    tpu.vector_store %arg8[%c323, %c8_20], %25 {strides = array<i32>} : memref<324x24xbf16, #tpu.memory_space<vmem>>, vector<1x8xbf16>,
    %c2 = arith.constant 2 : index
    %c0_21 = arith.constant 0 : index
    %27 = vector.load %arg7[%c2, %c0_21] : memref<324x8xbf16, #tpu.memory_space<vmem>>, vector<322x8xbf16>
    %c0_22 = arith.constant 0 : index
    %c16 = arith.constant 16 : index
    %28 = vector.load %arg8[%c0_22, %c16] : memref<324x24xbf16, #tpu.memory_space<vmem>>, vector<322x8xbf16>
    tpu.vector_store %arg8[%c0_22, %c16], %27 {strides = array<i32>} : memref<324x24xbf16, #tpu.memory_space<vmem>>, vector<322x8xbf16>,
    %cst_23 = arith.constant 0.000000e+00 : bf16
    %29 = vector.broadcast %cst_23 : bf16 to vector<2x8xbf16>
    %c322 = arith.constant 322 : index
    %c16_24 = arith.constant 16 : index
    %30 = vector.load %arg8[%c322, %c16_24] : memref<324x24xbf16, #tpu.memory_space<vmem>>, vector<2x8xbf16>
    tpu.vector_store %arg8[%c322, %c16_24], %29 {strides = array<i32>} : memref<324x24xbf16, #tpu.memory_space<vmem>>, vector<2x8xbf16>,
    %cst_25 = arith.constant 0.000000e+00 : f32
    %31 = vector.broadcast %cst_25 : f32 to vector<288x8xf32>
    %c0_26 = arith.constant 0 : index
    %c0_27 = arith.constant 0 : index
    %32 = vector.load %arg8[%c0_26, %c0_27] : memref<324x24xbf16, #tpu.memory_space<vmem>>, vector<288x24xbf16>
    %c0_28 = arith.constant 0 : index
    %c0_29 = arith.constant 0 : index
    %c0_30 = arith.constant 0 : index
    %33 = vector.load %arg4[%c0_28, %c0_29, %c0_30] : memref<3x24x8xbf16, #tpu.memory_space<vmem>>, vector<1x24x8xbf16>
    %34 = vector.shape_cast %33 : vector<1x24x8xbf16> to vector<24x8xbf16>
    %cst_31 = arith.constant dense<0.000000e+00> : vector<288x8xf32>
    %35 = tpu.matmul %32, %34, %cst_31 {dimension_numbers = #tpu.dot_dimension_numbers<[1], [0], [0], [1], [0, 0, 1, 1], [], []>} : vector<288x24xbf16>, vector<24x8xbf16>, vector<288x8xf32> -> vector<288x8xf32>
    %36 = arith.addf %31, %35 : vector<288x8xf32>
    %c18_32 = arith.constant 18 : index
    %c0_33 = arith.constant 0 : index
    %37 = vector.load %arg8[%c18_32, %c0_33] : memref<324x24xbf16, #tpu.memory_space<vmem>>, vector<288x24xbf16>
    %c1_34 = arith.constant 1 : index
    %c0_35 = arith.constant 0 : index
    %c0_36 = arith.constant 0 : index
    %38 = vector.load %arg4[%c1_34, %c0_35, %c0_36] : memref<3x24x8xbf16, #tpu.memory_space<vmem>>, vector<1x24x8xbf16>
    %39 = vector.shape_cast %38 : vector<1x24x8xbf16> to vector<24x8xbf16>
    %cst_37 = arith.constant dense<0.000000e+00> : vector<288x8xf32>
    %40 = tpu.matmul %37, %39, %cst_37 {dimension_numbers = #tpu.dot_dimension_numbers<[1], [0], [0], [1], [0, 0, 1, 1], [], []>} : vector<288x24xbf16>, vector<24x8xbf16>, vector<288x8xf32> -> vector<288x8xf32>
    %41 = arith.addf %36, %40 : vector<288x8xf32>
    %c36 = arith.constant 36 : index
    %c0_38 = arith.constant 0 : index
    %42 = vector.load %arg8[%c36, %c0_38] : memref<324x24xbf16, #tpu.memory_space<vmem>>, vector<288x24xbf16>
    %c2_39 = arith.constant 2 : index
    %c0_40 = arith.constant 0 : index
    %c0_41 = arith.constant 0 : index
    %43 = vector.load %arg4[%c2_39, %c0_40, %c0_41] : memref<3x24x8xbf16, #tpu.memory_space<vmem>>, vector<1x24x8xbf16>
    %44 = vector.shape_cast %43 : vector<1x24x8xbf16> to vector<24x8xbf16>
    %cst_42 = arith.constant dense<0.000000e+00> : vector<288x8xf32>
    %45 = tpu.matmul %42, %44, %cst_42 {dimension_numbers = #tpu.dot_dimension_numbers<[1], [0], [0], [1], [0, 0, 1, 1], [], []>} : vector<288x24xbf16>, vector<24x8xbf16>, vector<288x8xf32> -> vector<288x8xf32>
    %46 = arith.addf %41, %45 : vector<288x8xf32>
    %47 = vector.shape_cast %46 : vector<288x8xf32> to vector<16x18x8xf32>
    %48 = vector.extract_strided_slice %47 {offsets = [0, 0, 0], sizes = [16, 16, 8], strides = [1, 1, 1]} : vector<16x18x8xf32> to vector<16x16x8xf32>
    %49 = arith.truncf %48 : vector<16x16x8xf32> to vector<16x16x8xbf16>
    %c0_43 = arith.constant 0 : index
    %c0_44 = arith.constant 0 : index
    %c0_45 = arith.constant 0 : index
    %c0_46 = arith.constant 0 : index
    %50 = vector.load %arg5[%c0_43, %c0_44, %c0_45, %c0_46] : memref<1x16x16x8xbf16, #tpu.memory_space<vmem>>, vector<1x16x16x8xbf16>
    %51 = vector.shape_cast %50 : vector<1x16x16x8xbf16> to vector<16x16x8xbf16>
    %52 = vector.shape_cast %49 : vector<16x16x8xbf16> to vector<1x16x16x8xbf16>
    tpu.vector_store %arg5[%c0_43, %c0_44, %c0_45, %c0_46], %52 {strides = array<i32>} : memref<1x16x16x8xbf16, #tpu.memory_space<vmem>>, vector<1x16x16x8xbf16>,
    %53 = vector.shape_cast %48 : vector<16x16x8xf32> to vector<256x8xf32>
    %cst_47 = arith.constant dense<0.000000e+00> : vector<8xf32>
    %54 = vector.multi_reduction <add>, %53, %cst_47 [0] : vector<256x8xf32> to vector<8xf32>
    %55 = vector.shape_cast %54 : vector<8xf32> to vector<1x8xf32>
    %cst_48 = arith.constant 3.906250e-03 : f32
    %56 = vector.broadcast %cst_48 : f32 to vector<1x8xf32>
    %57 = arith.mulf %55, %56 : vector<1x8xf32>
    %58 = vector.broadcast %57 : vector<1x8xf32> to vector<256x8xf32>
    %59 = arith.subf %53, %58 : vector<256x8xf32>
    %60 = arith.mulf %59, %59 : vector<256x8xf32>
    %cst_49 = arith.constant dense<0.000000e+00> : vector<8xf32>
    %61 = vector.multi_reduction <add>, %60, %cst_49 [0] : vector<256x8xf32> to vector<8xf32>
    %62 = vector.shape_cast %61 : vector<8xf32> to vector<1x8xf32>
    %63 = tpu.concatenate %55, %62 in 0 : vector<1x8xf32>, vector<1x8xf32> -> vector<2x8xf32>
    %c0_50 = arith.constant 0 : index
    %c0_51 = arith.constant 0 : index
    %c0_52 = arith.constant 0 : index
    %64 = vector.load %arg6[%c0_50, %c0_51, %c0_52] : memref<1x2x8xf32, #tpu.memory_space<vmem>>, vector<1x2x8xf32>
    %65 = vector.shape_cast %64 : vector<1x2x8xf32> to vector<2x8xf32>
    %66 = vector.shape_cast %63 : vector<2x8xf32> to vector<1x2x8xf32>
    tpu.vector_store %arg6[%c0_50, %c0_51, %c0_52], %66 {strides = array<i32>} : memref<1x2x8xf32, #tpu.memory_space<vmem>>, vector<1x2x8xf32>,
    return
  }
  func.func @transform_0(%arg0: i32) -> (i32, i32, i32, i32) {
    %c0_i32 = arith.constant 0 : i32
    %c0_i32_0 = arith.constant 0 : i32
    %c0_i32_1 = arith.constant 0 : i32
    %c0_i32_2 = arith.constant 0 : i32
    return %arg0, %c0_i32, %c0_i32_0, %c0_i32_1 : i32, i32, i32, i32
  }
  func.func @transform_1(%arg0: i32) -> (i32, i32) {
    %c0_i32 = arith.constant 0 : i32
    %c0_i32_0 = arith.constant 0 : i32
    %c0_i32_1 = arith.constant 0 : i32
    return %c0_i32, %c0_i32_0 : i32, i32
  }
  func.func @transform_2(%arg0: i32) -> (i32, i32) {
    %c0_i32 = arith.constant 0 : i32
    %c0_i32_0 = arith.constant 0 : i32
    %c0_i32_1 = arith.constant 0 : i32
    return %c0_i32, %c0_i32_0 : i32, i32
  }
  func.func @transform_3(%arg0: i32) -> (i32, i32, i32) {
    %c0_i32 = arith.constant 0 : i32
    %c0_i32_0 = arith.constant 0 : i32
    %c0_i32_1 = arith.constant 0 : i32
    %c0_i32_2 = arith.constant 0 : i32
    return %c0_i32, %c0_i32_0, %c0_i32_1 : i32, i32, i32
  }
  func.func @transform_4(%arg0: i32) -> (i32, i32, i32, i32) {
    %c0_i32 = arith.constant 0 : i32
    %c0_i32_0 = arith.constant 0 : i32
    %c0_i32_1 = arith.constant 0 : i32
    %c0_i32_2 = arith.constant 0 : i32
    return %arg0, %c0_i32, %c0_i32_0, %c0_i32_1 : i32, i32, i32, i32
  }
  func.func @transform_5(%arg0: i32) -> (i32, i32, i32) {
    %c0_i32 = arith.constant 0 : i32
    %c0_i32_0 = arith.constant 0 : i32
    %c0_i32_1 = arith.constant 0 : i32
    return %arg0, %c0_i32, %c0_i32_0 : i32, i32, i32
  }
}

module attributes {stable_mosaic.version = 11 : i64} {
  func.func @_bn_relu_kernel(%arg0: i32, %arg1: memref<1x16x16x8xbf16, #tpu.memory_space<vmem>>, %arg2: memref<1x8xf32, #tpu.memory_space<vmem>>, %arg3: memref<1x8xf32, #tpu.memory_space<vmem>>, %arg4: memref<1x8x256xf32, #tpu.memory_space<vmem>>) attributes {dimension_semantics = [#tpu.dimension_semantics<parallel>], iteration_bounds = array<i64: 2>, scalar_prefetch = 0 : i64, scratch_operands = 0 : i64, tpu.core_type = #tpu.core_type<tc>, window_params = [{transform_indices = @transform_0, window_bounds = array<i64: 1, 16, 16, 8>}, {pipeline_mode = #tpu.pipeline_mode<synchronous>, transform_indices = @transform_1, window_bounds = array<i64: 1, 8>}, {pipeline_mode = #tpu.pipeline_mode<synchronous>, transform_indices = @transform_2, window_bounds = array<i64: 1, 8>}, {transform_indices = @transform_3, window_bounds = array<i64: 1, 8, 256>}]} {
    %c0 = arith.constant 0 : index
    %c0_0 = arith.constant 0 : index
    %0 = vector.load %arg2[%c0, %c0_0] : memref<1x8xf32, #tpu.memory_space<vmem>>, vector<1x8xf32>
    %1 = vector.shape_cast %0 : vector<1x8xf32> to vector<1x1x8xf32>
    %c0_1 = arith.constant 0 : index
    %c0_2 = arith.constant 0 : index
    %2 = vector.load %arg3[%c0_1, %c0_2] : memref<1x8xf32, #tpu.memory_space<vmem>>, vector<1x8xf32>
    %3 = vector.shape_cast %2 : vector<1x8xf32> to vector<1x1x8xf32>
    %c0_3 = arith.constant 0 : index
    %c0_4 = arith.constant 0 : index
    %c0_5 = arith.constant 0 : index
    %c0_6 = arith.constant 0 : index
    %4 = vector.load %arg1[%c0_3, %c0_4, %c0_5, %c0_6] : memref<1x16x16x8xbf16, #tpu.memory_space<vmem>>, vector<1x16x16x8xbf16>
    %5 = vector.shape_cast %4 : vector<1x16x16x8xbf16> to vector<16x16x8xbf16>
    %6 = arith.extf %5 : vector<16x16x8xbf16> to vector<16x16x8xf32>
    %7 = vector.broadcast %1 : vector<1x1x8xf32> to vector<16x16x8xf32>
    %8 = arith.mulf %6, %7 : vector<16x16x8xf32>
    %9 = vector.broadcast %3 : vector<1x1x8xf32> to vector<16x16x8xf32>
    %10 = arith.addf %8, %9 : vector<16x16x8xf32>
    %cst = arith.constant 0.000000e+00 : f32
    %11 = vector.broadcast %cst : f32 to vector<16x16x8xf32>
    %12 = arith.maximumf %10, %11 : vector<16x16x8xf32>
    %13 = vector.shape_cast %12 : vector<16x16x8xf32> to vector<256x8xf32>
    %14 = tpu.transpose %13, [1, 0] : vector<256x8xf32> -> vector<8x256xf32>
    %c0_7 = arith.constant 0 : index
    %c0_8 = arith.constant 0 : index
    %c0_9 = arith.constant 0 : index
    %15 = vector.load %arg4[%c0_7, %c0_8, %c0_9] : memref<1x8x256xf32, #tpu.memory_space<vmem>>, vector<1x8x256xf32>
    %16 = vector.shape_cast %15 : vector<1x8x256xf32> to vector<8x256xf32>
    %17 = vector.shape_cast %14 : vector<8x256xf32> to vector<1x8x256xf32>
    tpu.vector_store %arg4[%c0_7, %c0_8, %c0_9], %17 {strides = array<i32>} : memref<1x8x256xf32, #tpu.memory_space<vmem>>, vector<1x8x256xf32>,
    return
  }
  func.func @transform_0(%arg0: i32) -> (i32, i32, i32, i32) {
    %c0_i32 = arith.constant 0 : i32
    %c0_i32_0 = arith.constant 0 : i32
    %c0_i32_1 = arith.constant 0 : i32
    %c0_i32_2 = arith.constant 0 : i32
    return %arg0, %c0_i32, %c0_i32_0, %c0_i32_1 : i32, i32, i32, i32
  }
  func.func @transform_1(%arg0: i32) -> (i32, i32) {
    %c0_i32 = arith.constant 0 : i32
    %c0_i32_0 = arith.constant 0 : i32
    %c0_i32_1 = arith.constant 0 : i32
    return %c0_i32, %c0_i32_0 : i32, i32
  }
  func.func @transform_2(%arg0: i32) -> (i32, i32) {
    %c0_i32 = arith.constant 0 : i32
    %c0_i32_0 = arith.constant 0 : i32
    %c0_i32_1 = arith.constant 0 : i32
    return %c0_i32, %c0_i32_0 : i32, i32
  }
  func.func @transform_3(%arg0: i32) -> (i32, i32, i32) {
    %c0_i32 = arith.constant 0 : i32
    %c0_i32_0 = arith.constant 0 : i32
    %c0_i32_1 = arith.constant 0 : i32
    return %arg0, %c0_i32, %c0_i32_0 : i32, i32, i32
  }
}

</mosaic_0001>

<bundles_post_ra>
// kernel: double_conv.5
= control target key start
LH: loop header
LB: loop body
LE: loop exit
PB: predicated region body
PF: predicated region fallthrough
CT: control target
= control target key end

     0   :  { %s590_s12 = smov 0   ;;  %s703_s0 = inlined_call_operand.vmem [shape: bf16[2,16,16,8], index: 0, kind: input, shape index: {}]   ;;  %s704_s1 = inlined_call_operand.vmem [shape: f32[1,8], index: 1, kind: input, shape index: {}]   ;;  %s705_s2 = inlined_call_operand.vmem [shape: f32[1,8], index: 2, kind: input, shape index: {}]   ;;  %s706_s3 = inlined_call_operand.vmem [shape: f32[2,8,256], index: 3, kind: output, shape index: {}]  }
   0x1 LB: > { %s460_s13 = sadd.s32 4294967295, %s568_s12   ;;  %p464_p0 = scmp.ge.s32.totalorder %s568_s12, 1  ;;  %s568_s12 = sphi %s590_s12, %s13_s12  }
   0x2   : > { %p137_p1 = scmp.lt.s32.totalorder %s568_s12, 3 }
   0x4   : > { %p138_p2 = pnand %p464_p0, %p137_p1 }
   0x5   : > { %p161_p3 = scmp.lt.s32.totalorder (!%p138_p2), %s460_s13, 1 }
   0x6   : > { %141 = sbr.rel (%p138_p2) target bundleno = 190 (0xbe), region = 32 }
   0xb   : > { %s708_s13 = smov (!%p161_p3, %s460_s13), 1  ;;  %v609_v0 = vld [vmem:[%s704_s1] ss:$0 sm:$0xff] }
   0xc   : > { %s471_s14 = sshll.u32 %s708_s13, 7  ;;  %v616_v4 = vld [vmem:[%s705_s2] ss:$0 sm:$0xff]  ;;  %s472_s22 = sshll.u32 %s708_s13, 4 }
   0xd   : > { %s604_s17 = scalar_lea.vmem %s703_s0, %s471_s14  ;;  %s170_s25 = scalar_lea.vmem %s706_s3, %s472_s22 }
   0xe   : > { %v544_v1 = vld [vmem:[%s604_s17 + $0x40] sm:$0xff]   ;;  %v545_v14 = vld [vmem:[%s604_s17 + $0x48] sm:$0xff]   ;;  %v546_v34 = vld [vmem:[%s604_s17 + $0x50] sm:$0xff]  }
   0xf   : > { %v474_v2 = vld [vmem:[%s604_s17] sm:$0xff]   ;;  %v507_v3 = vunpack.c.l.bf16 %v544_v1  ;;  %v508_v6 = vunpack.c.h.bf16 %v544_v1  ;;  %v537_v15 = vld [vmem:[%s604_s17 + $0x8] sm:$0xff]   ;;  %v511_v20 = vunpack.c.l.bf16 %v545_v14  ;;  %v512_v28 = vunpack.c.h.bf16 %v545_v14  ;;  %v538_v35 = vld [vmem:[%s604_s17 + $0x10] sm:$0xff]  }
  0x10   : > { %v475_v5 = vunpack.c.l.bf16 %v474_v2  ;;  %v476_v7 = vunpack.c.h.bf16 %v474_v2  ;;  %v479_v21 = vunpack.c.l.bf16 %v537_v15  ;;  %v480_v29 = vunpack.c.h.bf16 %v537_v15  ;;  %v547_v52 = vld [vmem:[%s604_s17 + $0x58] sm:$0xff]  }
  0x11   : > { %v256_v8 = vmul.f32 %v609_v0, %v507_v3  ;;  %v257_v12 = vmul.f32 %v609_v0, %v508_v6  ;;  %v258_v24 = vmul.f32 %v609_v0, %v511_v20  ;;  %v259_v32 = vmul.f32 %v609_v0, %v512_v28  ;;  %v539_v53 = vld [vmem:[%s604_s17 + $0x18] sm:$0xff]  }
  0x12   : > { %v240_v9 = vmul.f32 %v609_v0, %v475_v5  ;;  %v241_v13 = vmul.f32 %v609_v0, %v476_v7  ;;  %v242_v25 = vmul.f32 %v609_v0, %v479_v21  ;;  %v243_v33 = vmul.f32 %v609_v0, %v480_v29 }
  0x13   : > { %v291_v10 = vadd.f32 %v616_v4, %v256_v8  ;;  %v292_v18 = vadd.f32 %v616_v4, %v257_v12  ;;  %v293_v26 = vadd.f32 %v616_v4, %v258_v24  ;;  %v294_v36 = vadd.f32 %v616_v4, %v259_v32  ;;  %v548_v8 = vld [vmem:[%s604_s17 + $0x60] sm:$0xff]  }
  0x14   : > { %v275_v11 = vadd.f32 %v616_v4, %v240_v9  ;;  %v276_v19 = vadd.f32 %v616_v4, %v241_v13  ;;  %v277_v27 = vadd.f32 %v616_v4, %v242_v25  ;;  %v278_v37 = vadd.f32 %v616_v4, %v243_v33  ;;  %v540_v9 = vld [vmem:[%s604_s17 + $0x20] sm:$0xff]  }
  0x15   : > { %v323_v16 = vmax.f32 %v291_v10, 0.0  ;;  %v324_v22 = vmax.f32 %v292_v18, 0.0  ;;  %v325_v30 = vmax.f32 %v293_v26, 0.0  ;;  %v515_v38 = vunpack.c.l.bf16 %v546_v34  ;;  %v549_v26 = vld [vmem:[%s604_s17 + $0x68] sm:$0xff]  }
  0x16   : > { %v307_v17 = vmax.f32 %v275_v11, 0.0  ;;  %v308_v23 = vmax.f32 %v276_v19, 0.0  ;;  %v309_v31 = vmax.f32 %v277_v27, 0.0  ;;  %v483_v39 = vunpack.c.l.bf16 %v538_v35  ;;  %v541_v27 = vld [vmem:[%s604_s17 + $0x28] sm:$0xff]  }
  0x17   : > { %371 = vxpose.xlu1.b32.start [1/16] (narrow) %v323_v16, 8  ;;  %v326_v40 = vmax.f32 %v294_v36, 0.0  ;;  %v310_v41 = vmax.f32 %v278_v37, 0.0  ;;  %v260_v42 = vmul.f32 %v609_v0, %v515_v38  ;;  %v516_v46 = vunpack.c.h.bf16 %v546_v34 }
  0x18   : > { %339 = vxpose.xlu0.b32.start [1/16] (narrow) %v307_v17, 8  ;;  %v244_v43 = vmul.f32 %v609_v0, %v483_v39  ;;  %v484_v47 = vunpack.c.h.bf16 %v538_v35  ;;  %v519_v56 = vunpack.c.l.bf16 %v547_v52  ;;  %v487_v57 = vunpack.c.l.bf16 %v539_v53 }
  0x19   : > { %v295_v44 = vadd.f32 %v616_v4, %v260_v42  ;;  %v261_v50 = vmul.f32 %v609_v0, %v516_v46  ;;  %v520_v1 = vunpack.c.h.bf16 %v547_v52  ;;  %v488_v2 = vunpack.c.h.bf16 %v539_v53 }
  0x1a   : > { %v279_v45 = vadd.f32 %v616_v4, %v244_v43  ;;  %v245_v51 = vmul.f32 %v609_v0, %v484_v47  ;;  %v262_v60 = vmul.f32 %v609_v0, %v519_v56  ;;  %v246_v61 = vmul.f32 %v609_v0, %v487_v57 }
  0x1b   : > { %v327_v48 = vmax.f32 %v295_v44, 0.0  ;;  %v296_v54 = vadd.f32 %v616_v4, %v261_v50  ;;  %v263_v6 = vmul.f32 %v609_v0, %v520_v1  ;;  %v247_v7 = vmul.f32 %v609_v0, %v488_v2  ;;  %v550_v44 = vld [vmem:[%s604_s17 + $0x70] sm:$0xff]  }
  0x1c   : > { %v311_v49 = vmax.f32 %v279_v45, 0.0  ;;  %v280_v55 = vadd.f32 %v616_v4, %v245_v51  ;;  %v297_v62 = vadd.f32 %v616_v4, %v262_v60  ;;  %v281_v63 = vadd.f32 %v616_v4, %v246_v61  ;;  %v542_v45 = vld [vmem:[%s604_s17 + $0x30] sm:$0xff]  }
  0x1d   : > { %v328_v58 = vmax.f32 %v296_v54, 0.0  ;;  %v298_v10 = vadd.f32 %v616_v4, %v263_v6  ;;  %v282_v11 = vadd.f32 %v616_v4, %v247_v7  ;;  %v523_v12 = vunpack.c.l.bf16 %v548_v8 }
  0x1e   : > { %v312_v59 = vmax.f32 %v280_v55, 0.0  ;;  %v329_v3 = vmax.f32 %v297_v62, 0.0  ;;  %v313_v5 = vmax.f32 %v281_v63, 0.0  ;;  %v491_v13 = vunpack.c.l.bf16 %v540_v9  ;;  %v551_v62 = vld [vmem:[%s604_s17 + $0x78] sm:$0xff]  }
  0x1f   : > { %372 = vxpose.xlu1.b32.cont [2/16] (narrow) %v324_v22, 8  ;;  %v330_v14 = vmax.f32 %v298_v10, 0.0  ;;  %v314_v15 = vmax.f32 %v282_v11, 0.0  ;;  %v264_v16 = vmul.f32 %v609_v0, %v523_v12  ;;  %v524_v20 = vunpack.c.h.bf16 %v548_v8  ;;  %v543_v63 = vld [vmem:[%s604_s17 + $0x38] sm:$0xff]  }
  0x20   : > { %340 = vxpose.xlu0.b32.cont [2/16] (narrow) %v308_v23, 8  ;;  %v248_v17 = vmul.f32 %v609_v0, %v491_v13  ;;  %v492_v21 = vunpack.c.h.bf16 %v540_v9  ;;  %v528_v38 = vunpack.c.h.bf16 %v549_v26  ;;  %v496_v39 = vunpack.c.h.bf16 %v541_v27 }
  0x21   : > { %v299_v18 = vadd.f32 %v616_v4, %v264_v16  ;;  %v265_v24 = vmul.f32 %v609_v0, %v524_v20  ;;  %v532_v56 = vunpack.c.h.bf16 %v550_v44  ;;  %v500_v57 = vunpack.c.h.bf16 %v542_v45 }
  0x22   : > { %v283_v19 = vadd.f32 %v616_v4, %v248_v17  ;;  %v249_v25 = vmul.f32 %v609_v0, %v492_v21  ;;  %v267_v42 = vmul.f32 %v609_v0, %v528_v38  ;;  %v251_v43 = vmul.f32 %v609_v0, %v496_v39 }
  0x23   : > { %v331_v22 = vmax.f32 %v299_v18, 0.0  ;;  %v300_v28 = vadd.f32 %v616_v4, %v265_v24  ;;  %v269_v60 = vmul.f32 %v609_v0, %v532_v56  ;;  %v253_v61 = vmul.f32 %v609_v0, %v500_v57 }
  0x24   : > { %v315_v23 = vmax.f32 %v283_v19, 0.0  ;;  %v284_v29 = vadd.f32 %v616_v4, %v249_v25  ;;  %v302_v46 = vadd.f32 %v616_v4, %v267_v42  ;;  %v286_v47 = vadd.f32 %v616_v4, %v251_v43 }
  0x25   : > { %v332_v32 = vmax.f32 %v300_v28, 0.0  ;;  %v304_v1 = vadd.f32 %v616_v4, %v269_v60  ;;  %v288_v2 = vadd.f32 %v616_v4, %v253_v61  ;;  %v536_v12 = vunpack.c.h.bf16 %v551_v62 }
  0x26   : > { %v316_v33 = vmax.f32 %v284_v29, 0.0  ;;  %v334_v50 = vmax.f32 %v302_v46, 0.0  ;;  %v318_v51 = vmax.f32 %v286_v47, 0.0  ;;  %v504_v13 = vunpack.c.h.bf16 %v543_v63 }
  0x27   : > { %373 = vxpose.xlu1.b32.cont [3/16] (narrow) %v325_v30, 8  ;;  %v527_v30 = vunpack.c.l.bf16 %v549_v26  ;;  %v336_v6 = vmax.f32 %v304_v1, 0.0  ;;  %v320_v7 = vmax.f32 %v288_v2, 0.0  ;;  %v271_v16 = vmul.f32 %v609_v0, %v536_v12 }
  0x28   : > { %341 = vxpose.xlu0.b32.cont [3/16] (narrow) %v309_v31, 8  ;;  %v495_v31 = vunpack.c.l.bf16 %v541_v27  ;;  %v255_v17 = vmul.f32 %v609_v0, %v504_v13 }
  0x29   : > { %v266_v34 = vmul.f32 %v609_v0, %v527_v30  ;;  %v306_v18 = vadd.f32 %v616_v4, %v271_v16 }
  0x2a   : > { %v250_v35 = vmul.f32 %v609_v0, %v495_v31  ;;  %v290_v19 = vadd.f32 %v616_v4, %v255_v17 }
  0x2b   : > { %v301_v36 = vadd.f32 %v616_v4, %v266_v34  ;;  %v338_v20 = vmax.f32 %v306_v18, 0.0 }
  0x2c   : > { %v285_v37 = vadd.f32 %v616_v4, %v250_v35  ;;  %v322_v21 = vmax.f32 %v290_v19, 0.0 }
  0x2f   : > { %374 = vxpose.xlu1.b32.cont [4/16] (narrow) %v326_v40, 8  ;;  %v333_v40 = vmax.f32 %v301_v36, 0.0 }
  0x30   : > { %342 = vxpose.xlu0.b32.cont [4/16] (narrow) %v310_v41, 8  ;;  %v317_v41 = vmax.f32 %v285_v37, 0.0 }
  0x37   : > { %375 = vxpose.xlu1.b32.cont [5/16] (narrow) %v327_v48, 8  ;;  %v531_v48 = vunpack.c.l.bf16 %v550_v44 }
  0x38   : > { %343 = vxpose.xlu0.b32.cont [5/16] (narrow) %v311_v49, 8  ;;  %v499_v49 = vunpack.c.l.bf16 %v542_v45 }
  0x39   : > { %v268_v52 = vmul.f32 %v609_v0, %v531_v48 }
  0x3a   : > { %v252_v53 = vmul.f32 %v609_v0, %v499_v49 }
  0x3b   : > { %v303_v54 = vadd.f32 %v616_v4, %v268_v52 }
  0x3c   : > { %v287_v55 = vadd.f32 %v616_v4, %v252_v53 }
  0x3f   : > { %376 = vxpose.xlu1.b32.cont [6/16] (narrow) %v328_v58, 8  ;;  %v335_v58 = vmax.f32 %v303_v54, 0.0 }
  0x40   : > { %344 = vxpose.xlu0.b32.cont [6/16] (narrow) %v312_v59, 8  ;;  %v319_v59 = vmax.f32 %v287_v55, 0.0 }
  0x47   : > { %377 = vxpose.xlu1.b32.cont [7/16] (narrow) %v329_v3, 8  ;;  %v535_v3 = vunpack.c.l.bf16 %v551_v62 }
  0x48   : > { %345 = vxpose.xlu0.b32.cont [7/16] (narrow) %v313_v5, 8  ;;  %v503_v5 = vunpack.c.l.bf16 %v543_v63 }
  0x49   : > { %v270_v8 = vmul.f32 %v609_v0, %v535_v3 }
  0x4a   : > { %v254_v9 = vmul.f32 %v609_v0, %v503_v5 }
  0x4b   : > { %v305_v10 = vadd.f32 %v616_v4, %v270_v8 }
  0x4c   : > { %v289_v11 = vadd.f32 %v616_v4, %v254_v9 }
  0x4f   : > { %378 = vxpose.xlu1.b32.cont [8/16] (narrow) %v330_v14, 8  ;;  %v337_v14 = vmax.f32 %v305_v10, 0.0 }
  0x50   : > { %346 = vxpose.xlu0.b32.cont [8/16] (narrow) %v314_v15, 8  ;;  %v321_v15 = vmax.f32 %v289_v11, 0.0 }
  0x57   : > { %379 = vxpose.xlu1.b32.cont [9/16] (narrow) %v331_v22, 8 }
  0x58   : > { %347 = vxpose.xlu0.b32.cont [9/16] (narrow) %v315_v23, 8 }
  0x5f   : > { %380 = vxpose.xlu1.b32.cont [10/16] (narrow) %v332_v32, 8 }
  0x60   : > { %348 = vxpose.xlu0.b32.cont [10/16] (narrow) %v316_v33, 8 }
  0x67   : > { %381 = vxpose.xlu1.b32.cont [11/16] (narrow) %v333_v40, 8 }
  0x68   : > { %349 = vxpose.xlu0.b32.cont [11/16] (narrow) %v317_v41, 8 }
  0x6f   : > { %382 = vxpose.xlu1.b32.cont [12/16] (narrow) %v334_v50, 8 }
  0x70   : > { %350 = vxpose.xlu0.b32.cont [12/16] (narrow) %v318_v51, 8 }
  0x77   : > { %383 = vxpose.xlu1.b32.cont [13/16] (narrow) %v335_v58, 8 }
  0x78   : > { %351 = vxpose.xlu0.b32.cont [13/16] (narrow) %v319_v59, 8 }
  0x7f   : > { %384 = vxpose.xlu1.b32.cont [14/16] (narrow) %v336_v6, 8 }
  0x80   : > { %352 = vxpose.xlu0.b32.cont [14/16] (narrow) %v320_v7, 8 }
  0x87   : > { %385 = vxpose.xlu1.b32.cont [15/16] (narrow) %v337_v14, 8 }
  0x88   : > { %353 = vxpose.xlu0.b32.cont [15/16] (narrow) %v321_v15, 8 }
  0x8f   : > { %386 = vxpose.xlu1.b32.end [16/16] (narrow) %v338_v20, 8 }
  0x90   : > { %354 = vxpose.xlu0.b32.end [16/16] (narrow) %v322_v21, 8 }
  0xbb   : > { %v387_v22 = vpop.trf.xlu1 }
  0xbc   : > { %v355_v23 = vpop.trf.xlu0  ;;  %404 = vst [vmem:[%s170_s25 + $0x8] sm:$0xff] %v387_v22 }
  0xbd   : > { %403 = vst [vmem:[%s170_s25] sm:$0xff] %v355_v23 }
  0xbe PF: > { %s13_s12 = sadd.s32 1, %s568_s12  }
  0xbf   : > { %p10_p4 = scmp.ge.s32.totalorder %s13_s12, 4  }
  0xc1   :  { %12 = sbr.rel (!%p10_p4) target bundleno = 1 (0x1), region = 62 }

// kernel: double_conv.4
= control target key start
LH: loop header
LB: loop body
LE: loop exit
PB: predicated region body
PF: predicated region fallthrough
CT: control target
= control target key end

     0   :  { %s5145_s18 = smov 0   ;;  %s7569_s0 = inlined_call_operand.vmem [shape: bf16[2,16,16,8], index: 0, kind: input, shape index: {}]   ;;  %s7570_s1 = inlined_call_operand.vmem [shape: f32[1,8], index: 1, kind: input, shape index: {}]   ;;  %s7571_s2 = inlined_call_operand.vmem [shape: f32[1,8], index: 2, kind: input, shape index: {}]   ;;  %s7572_s3 = inlined_call_operand.vmem [shape: bf16[3,24,8], index: 3, kind: input, shape index: {}]   ;;  %s7573_s4 = inlined_call_operand.vmem [shape: bf16[2,16,16,8], index: 4, kind: output, shape index: {0}]   ;;  %s7574_s5 = inlined_call_operand.vmem [shape: f32[2,2,8], index: 5, kind: output, shape index: {1}]  }
   0x1 LB: > { %s4726_s19 = sadd.s32 4294967295, %s5110_s18   ;;  %p4730_p0 = scmp.ge.s32.totalorder %s5110_s18, 1  ;;  %s5110_s18 = sphi %s5145_s18, %s16_s18  }
   0x2   : > { %p190_p1 = scmp.lt.s32.totalorder %s5110_s18, 3 }
   0x4   : > { %p191_p2 = pnand %p4730_p0, %p190_p1 }
   0x6   : > { %194 = sbr.rel (%p191_p2) target bundleno = 1166 (0x48e), region = 36 }
   0xb   : > { %vm437_vm0 = vcmask 60416   ;;  %v5112_v0 = vmov 0   ;;  %p222_p3 = scmp.lt.s32.totalorder %s4726_s19, 1  ;;  %vm440_vm1 = vcmask 57344   ;;  %vm442_vm2 = vcmask 60417   ;;  %s5113_s28 = smov 8  }
   0xc   : > { %438 = vst.msk [vmem:[#allocation2] sm:$0xf] %vm437_vm0, %v5112_v0  ;;  %v5176_v1 = vld [vmem:[%s7570_s1] ss:$0 sm:$0xff]  ;;  %vm1363_vm3 = vsmask.f32 3328 }
   0xd   : > { %439 = vst.msk [vmem:[#allocation2 + $0x4] sm:$0xf] %vm437_vm0, %v5112_v0  ;;  %s8021_s19 = smov (!%p222_p3, %s4726_s19), 1  ;;  %v5184_v8 = vld [vmem:[%s7571_s2] ss:$0 sm:$0xff]  ;;  %vm671_vm6 = vcmask 1040384  }
   0xe   : > { %444 = vst.msk [vmem:[#allocation2 + $0x9c] sm:$0xf] %vm437_vm0, %v5112_v0  ;;  %s4955_s20 = sshll.u32 %s8021_s19, 7  ;;  %vm1364_vm4 = vsmask.f32 7440  ;;  %vm2033_vm9 = vcmask 1042432  }
   0xf   : > { %441 = vst.msk [vmem:[#allocation2 + $0x8] sm:$0x1] %vm440_vm1, %v5112_v0  ;;  %s5171_s23 = scalar_lea.vmem %s7569_s0, %s4955_s20  ;;  %vm5202_vm5 = vmor %vm1363_vm3, %vm1364_vm4  ;;  %vm672_vm7 = vsmask.f32 256  ;;  %vm2034_vm10 = vcmask 1046532   ;;  %s5114_s29 = smov 16  }
  0x10   : > { %443 = vst.msk [vmem:[#allocation2 + $0x98] sm:$0xe] %vm442_vm2, %v5112_v0  ;;  %v4997_v2 = vld [vmem:[%s5171_s23] sm:$0xff]   ;;  %v5064_v3 = vld [vmem:[%s5171_s23 + $0x8] sm:$0xff]   ;;  %v5065_v4 = vld [vmem:[%s5171_s23 + $0x10] sm:$0xff]   ;;  %vm1898_vm12 = vcmask 126016   ;;  %s6267_s26 = scalar_lea.vmem %s7573_s4, %s4955_s20 }
  0x11   : > { %v4998_v6 = vunpack.c.l.bf16 %v4997_v2  ;;  %v4999_v7 = vunpack.c.h.bf16 %v4997_v2  ;;  %v5002_v9 = vunpack.c.l.bf16 %v5064_v3  ;;  %v5003_v10 = vunpack.c.h.bf16 %v5064_v3  ;;  %v5066_v51 = vld [vmem:[%s5171_s23 + $0x18] sm:$0xff]   ;;  %vm5215_vm8 = vmand %vm671_vm6, %vm672_vm7  ;;  %s4735_s20 = sshll.u32 %s8021_s19, 1 }
  0x12   : > { %v5006_v14 = vunpack.c.l.bf16 %v5065_v4  ;;  %v5007_v18 = vunpack.c.h.bf16 %v5065_v4  ;;  %v5010_v58 = vunpack.c.l.bf16 %v5066_v51  ;;  %v5011_v60 = vunpack.c.h.bf16 %v5066_v51  ;;  %vm5245_vm11 = vmor %vm2033_vm9, %vm2034_vm10 }
  0x13   : > { %v1322_v5 = vld [vmem:[#allocation2] sm:$0xf]  ;;  %v306_v16 = vmul.f32 %v5176_v1, %v4998_v6  ;;  %v307_v17 = vmul.f32 %v5176_v1, %v4999_v7  ;;  %v308_v21 = vmul.f32 %v5176_v1, %v5002_v9  ;;  %v309_v22 = vmul.f32 %v5176_v1, %v5003_v10 }
  0x14   : > { %v5186_v11 = vld [vmem:[#allocation2 + $0x4] sm:$0xf]  ;;  %v1367_v12 = vshrl.u32 %v1322_v5, 16  ;;  %v1370_v13 = vshll.u32 %v1322_v5, 16  ;;  %v310_v29 = vmul.f32 %v5176_v1, %v5006_v14  ;;  %v311_v33 = vmul.f32 %v5176_v1, %v5007_v18 }
  0x15   : > { %v1376_v15 = vshll.u32 %v5186_v11, 16  ;;  %v341_v24 = vadd.f32 %v5184_v8, %v306_v16  ;;  %v342_v25 = vadd.f32 %v5184_v8, %v307_v17  ;;  %v343_v27 = vadd.f32 %v5184_v8, %v308_v21  ;;  %v1952_v21 = vld [vmem:[#allocation2 + $0x4] sm:$0xf] }
  0x16   : > { %v1369_v19 = vrot.slane %v1367_v12, 4  ;;  %v1372_v20 = vrot.slane %v1370_v13, 5  ;;  %v344_v28 = vadd.f32 %v5184_v8, %v309_v22  ;;  %v345_v39 = vadd.f32 %v5184_v8, %v310_v29 }
  0x17   : > { %v5193_v23 = vrot.slane %v1376_v15, 5  ;;  %v373_v31 = vmax.f32 %v341_v24, 0.0  ;;  %v374_v32 = vmax.f32 %v342_v25, 0.0  ;;  %v375_v35 = vmax.f32 %v343_v27, 0.0 }
  0x18   : > { %v1373_v26 = vor.u32 %v1372_v20, %v1369_v19  ;;  %v376_v36 = vmax.f32 %v344_v28, 0.0  ;;  %v346_v40 = vadd.f32 %v5184_v8, %v311_v33  ;;  %v377_v49 = vmax.f32 %v345_v39, 0.0  ;;  %v5067_v20 = vld [vmem:[%s5171_s23 + $0x20] sm:$0xff]  }
  0x19   : > { %v405_v37 = vpack.c.bf16 %v373_v31, %v373_v31  ;;  %v406_v38 = vpack.c.bf16 %v374_v32, %v374_v32  ;;  %v407_v42 = vpack.c.bf16 %v375_v35, %v375_v35  ;;  %v312_v4 = vmul.f32 %v5176_v1, %v5010_v58 }
  0x1a   : > { %v1374_v34 = vrot.slane %v1373_v26, 4  ;;  %v408_v43 = vpack.c.bf16 %v376_v36, %v376_v36  ;;  %v378_v50 = vmax.f32 %v346_v40, 0.0  ;;  %v409_v56 = vpack.c.bf16 %v377_v49, %v377_v49 }
  0x1b   : > { %v479_v44 = vunpack.c.l.b16 %v405_v37  ;;  %v480_v45 = vunpack.c.l.b16 %v406_v38  ;;  %v481_v46 = vunpack.c.l.b16 %v407_v42  ;;  %v313_v9 = vmul.f32 %v5176_v1, %v5011_v60  ;;  %v1951_v37 = vld [vmem:[#allocation2] sm:$0xe] }
  0x1c   : > { %v1379_v41 = vsel %vm5202_vm5, %v1374_v34, %v5193_v23  ;;  %v482_v47 = vunpack.c.l.b16 %v408_v43  ;;  %v410_v57 = vpack.c.bf16 %v378_v50, %v378_v50  ;;  %v483_v2 = vunpack.c.l.b16 %v409_v56 }
  0x1d   : > { %1775 = vrot.lane.b32.xlu0 %v1379_v41, %s5113_s28  ;;  %v511_v48 = vpack.c.b16 %v480_v45, %v479_v44  ;;  %v347_v17 = vadd.f32 %v5184_v8, %v312_v4  ;;  %v348_v18 = vadd.f32 %v5184_v8, %v313_v9  ;;  %v5014_v28 = vunpack.c.l.bf16 %v5067_v20 }
  0x1e   : > { %v512_v54 = vpack.c.b16 %v482_v47, %v481_v46  ;;  %v484_v3 = vunpack.c.l.b16 %v410_v57  ;;  %v5015_v29 = vunpack.c.h.bf16 %v5067_v20  ;;  %v1380_v31 = vshrl.u32 %v5186_v11, 16 }
  0x1f   : > { %v528_v52 = vshrl.u32 %v511_v48, 16  ;;  %v531_v53 = vshll.u32 %v511_v48, 16  ;;  %v379_v25 = vmax.f32 %v347_v17, 0.0  ;;  %v380_v26 = vmax.f32 %v348_v18, 0.0 }
  0x20   : > { %v535_v62 = vshrl.u32 %v512_v54, 16  ;;  %v538_v13 = vshll.u32 %v512_v54, 16  ;;  %v513_v16 = vpack.c.b16 %v484_v3, %v483_v2  ;;  %v2038_v34 = vrot.slane %v1952_v21, 5 }
  0x21   : > { %v530_v55 = vrot.slane %v528_v52, 7  ;;  %v411_v39 = vpack.c.bf16 %v379_v25, %v379_v25  ;;  %v412_v40 = vpack.c.bf16 %v380_v26, %v380_v26  ;;  %v4736_v41 = vrot.slane %v1951_v37, 9 }
  0x22   : > { %v5223_v12 = vrot.slane %v535_v62, 7  ;;  %v542_v24 = vshrl.u32 %v513_v16, 16  ;;  %v545_v35 = vshll.u32 %v513_v16, 16  ;;  %v314_v42 = vmul.f32 %v5176_v1, %v5014_v28 }
  0x23   : > { %v533_v61 = vor.u32 %v531_v53, %v530_v55  ;;  %v690_v33 = vsel %vm5215_vm8, %v530_v55, 0  ;;  %v315_v43 = vmul.f32 %v5176_v1, %v5015_v29  ;;  %v2039_v48 = vsel %vm5245_vm11, %v4736_v41, %v2038_v34 }
  0x24   : > { %v540_v19 = vor.u32 %v538_v13, %v5223_v12  ;;  %v5238_v38 = vrot.slane %v542_v24, 7  ;;  %2158 = vrot.lane.b32.xlu2 %v2039_v48, %s5114_s29  ;;  %v485_v51 = vunpack.c.l.b16 %v411_v39  ;;  %v486_v52 = vunpack.c.l.b16 %v412_v40 }
  0x25   : > { %v674_v63 = vsel %vm5215_vm8, 0, %v533_v61  ;;  %v1382_v53 = vrot.slane %v1380_v31, 4  ;;  %v2040_v54 = vrot.slane %v2038_v34, 4  ;;  %v349_v55 = vadd.f32 %v5184_v8, %v314_v42 }
  0x26   : > { %v722_v5 = vrot.slane %v674_v63, 1  ;;  %v723_v6 = vrot.slane %v674_v63, 2  ;;  %v724_v7 = vrot.slane %v674_v63, 3  ;;  %836 = vst [vmem:[#allocation1 + $0x1] ss:$4 sm:$0xff] %v674_v63  ;;  %v725_v10 = vrot.slane %v674_v63, 4 }
  0x27   : > { %v726_v14 = vrot.slane %v674_v63, 5  ;;  %v727_v15 = vrot.slane %v674_v63, 6  ;;  %v728_v22 = vrot.slane %v674_v63, 7  ;;  %v5231_v27 = vsel %vm5215_vm8, 0, %v540_v19  ;;  %v5068_v63 = vld [vmem:[%s5171_s23 + $0x28] sm:$0xff]  }
  0x28   : > { %839 = vst [vmem:[#allocation1 + $0x2] ss:$4 sm:$0xff] %v722_v5  ;;  %v729_v36 = vrot.slane %v5231_v27, 1  ;;  %v730_v11 = vrot.slane %v5231_v27, 2  ;;  %v731_v46 = vrot.slane %v5231_v27, 3  ;;  %v732_v47 = vrot.slane %v5231_v27, 4 }
  0x29   : > { %842 = vst [vmem:[#allocation1 + $0x3] ss:$4 sm:$0xff] %v723_v6  ;;  %v733_v49 = vrot.slane %v5231_v27, 5  ;;  %v547_v50 = vor.u32 %v545_v35, %v5238_v38  ;;  %v350_v56 = vadd.f32 %v5184_v8, %v315_v43  ;;  %v734_v3 = vrot.slane %v5231_v27, 6 }
  0x2a   : > { %845 = vst [vmem:[#allocation1 + $0x20] ss:$4 sm:$0xff] %v724_v7  ;;  %v735_v4 = vrot.slane %v5231_v27, 7  ;;  %v5267_v5 = vpack.c.b16 %v486_v52, %v485_v51  ;;  %v381_v9 = vmax.f32 %v349_v55, 0.0  ;;  %v5018_v18 = vunpack.c.l.bf16 %v5068_v63 }
  0x2b   : > { %848 = vst [vmem:[#allocation1 + $0x21] ss:$4 sm:$0xff] %v725_v10  ;;  %v5263_v2 = vsel %vm5215_vm8, 0, %v547_v50  ;;  %v382_v10 = vmax.f32 %v350_v56, 0.0  ;;  %v5019_v24 = vunpack.c.h.bf16 %v5068_v63  ;;  %v691_v25 = vsel %vm5215_vm8, %v5223_v12, 0 }
  0x2c   : > { %851 = vst [vmem:[#allocation1 + $0x22] ss:$4 sm:$0xff] %v726_v14  ;;  %v1383_v14 = vor.u32 %v1382_v53, %v5193_v23  ;;  %v549_v29 = vshrl.u32 %v5267_v5, 16  ;;  %v413_v34 = vpack.c.bf16 %v381_v9, %v381_v9  ;;  %v737_v12 = vrot.slane %v5263_v2, 2 }
  0x2d   : > { %854 = vst [vmem:[#allocation1 + $0x23] ss:$4 sm:$0xff] %v727_v15  ;;  %v316_v37 = vmul.f32 %v5176_v1, %v5018_v18  ;;  %v317_v39 = vmul.f32 %v5176_v1, %v5019_v24  ;;  %v739_v42 = vrot.slane %v5263_v2, 4  ;;  %v741_v63 = vrot.slane %v5263_v2, 6 }
  0x2e   : > { %v1384_v31 = vrot.slane %v1383_v14, 4  ;;  %v5292_v43 = vrot.slane %v549_v29, 7  ;;  %vm2281_vm13 = vcmask 191616   ;;  %vm2568_vm14 = vcmask 1043456  }
  0x2f   : > { %v351_v52 = vadd.f32 %v5184_v8, %v316_v37  ;;  %v352_v53 = vadd.f32 %v5184_v8, %v317_v39  ;;  %vm2513_vm15 = vcmask 195584   ;;  %vm2978_vm3 = vcmask 1045504  }
  0x30   : > { %v855_v32 = vld [vmem:[#allocation1] sm:$0xff]  ;;  %vm1939_vm4 = vcmask 123968   ;;  %vm1945_vm9 = vcmask 123969  }
  0x31   : > { %1203 = vst.msk [vmem:[#allocation2 + $0x8] sm:$0xe] %vm442_vm2, %v855_v32  ;;  %v736_v32 = vrot.slane %v5263_v2, 1  ;;  %v384_v9 = vmax.f32 %v352_v53, 0.0  ;;  %vm2466_vm2 = vcmask 1046528  }
  0x32   : > { %858 = vst [vmem:[#allocation1] ss:$4 sm:$0xff] %v728_v22 }
  0x33   : > { %860 = vst [vmem:[#allocation1 + $0x1] ss:$4 sm:$0xff] %v690_v33  ;;  %v416_v29 = vpack.c.bf16 %v384_v9, %v384_v9  ;;  %v5070_v9 = vld [vmem:[%s5171_s23 + $0x38] sm:$0xff]  }
  0x34   : > { %v856_v44 = vld [vmem:[#allocation1 + $0x20] sm:$0xff]  ;;  %862 = vst [vmem:[#allocation1 + $0x2] ss:$4 sm:$0xff] %v5231_v27 }
  0x35   : > { %1204 = vst.msk [vmem:[#allocation2 + $0xc] sm:$0xf] %vm437_vm0, %v856_v44  ;;  %v552_v44 = vshll.u32 %v5267_v5, 16  ;;  %v742_v5 = vrot.slane %v5263_v2, 7 }
  0x36   : > { %864 = vst [vmem:[#allocation1 + $0x3] ss:$4 sm:$0xff] %v729_v36  ;;  %v414_v36 = vpack.c.bf16 %v382_v10, %v382_v10 }
  0x37   : > { %866 = vst [vmem:[#allocation1 + $0x20] ss:$4 sm:$0xff] %v730_v11  ;;  %v738_v11 = vrot.slane %v5263_v2, 3 }
  0x38   : > { %v1953_v57 = vld [vmem:[#allocation2 + $0x8] sm:$0xf]  ;;  %868 = vst [vmem:[#allocation1 + $0x21] ss:$4 sm:$0xff] %v731_v46  ;;  %v488_v51 = vunpack.c.l.b16 %v414_v36 }
  0x39   : > { %v1324_v58 = vld [vmem:[#allocation2 + $0x8] sm:$0xf]  ;;  %v2041_v60 = vrot.slane %v1953_v57, 5  ;;  %870 = vst [vmem:[#allocation1 + $0x22] ss:$4 sm:$0xff] %v732_v47  ;;  %v487_v47 = vunpack.c.l.b16 %v413_v34 }
  0x3a   : > { %v1386_v61 = vshll.u32 %v1324_v58, 16  ;;  %v1390_v62 = vshrl.u32 %v1324_v58, 16  ;;  %872 = vst [vmem:[#allocation1 + $0x23] ss:$4 sm:$0xff] %v733_v49  ;;  %v740_v58 = vrot.slane %v5263_v2, 5 }
  0x3b   : > { %v2043_v6 = vrot.slane %v2041_v60, 4  ;;  %v2042_v7 = vsel %vm5245_vm11, %v2040_v54, %v2041_v60  ;;  %v554_v60 = vor.u32 %v552_v44, %v5292_v43 }
  0x3c   : > { %v1954_v13 = vld [vmem:[#allocation2 + $0xc] sm:$0xf]  ;;  %2160 = vrot.lane.b32.xlu0 %v2042_v7, %s5114_s29  ;;  %v1388_v15 = vrot.slane %v1386_v61, 5  ;;  %v1392_v17 = vrot.slane %v1390_v62, 4  ;;  %v383_v7 = vmax.f32 %v351_v52, 0.0 }
  0x3d   : > { %v1325_v16 = vld [vmem:[#allocation2 + $0xc] sm:$0xf]  ;;  %v2044_v19 = vrot.slane %v1954_v13, 5  ;;  %v873_v20 = vld [vmem:[#allocation1] sm:$0xff] }
  0x3e   : > { %v1396_v21 = vshll.u32 %v1325_v16, 16  ;;  %v1400_v22 = vshrl.u32 %v1325_v16, 16  ;;  %1205 = vst.msk [vmem:[#allocation2 + $0x10] sm:$0xf] %vm437_vm0, %v873_v20  ;;  %v1393_v26 = vor.u32 %v1392_v17, %v1388_v15  ;;  %v1389_v48 = vsel %vm5202_vm5, %v1384_v31, %v1388_v15 }
  0x3f   : > { %v2045_v27 = vsel %vm5245_vm11, %v2043_v6, %v2044_v19  ;;  %876 = vst [vmem:[#allocation1] ss:$4 sm:$0xff] %v734_v3  ;;  %v2046_v46 = vrot.slane %v2044_v19, 4  ;;  %v515_v6 = vpack.c.b16 %v488_v51, %v487_v47  ;;  %v5313_v17 = vsel %vm5215_vm8, 0, %v554_v60 }
  0x40   : > { %v1398_v23 = vrot.slane %v1396_v21, 5  ;;  %v1402_v28 = vrot.slane %v1400_v22, 4  ;;  %2162 = vrot.lane.b32.xlu1 %v2045_v27, %s5114_s29  ;;  %878 = vst [vmem:[#allocation1 + $0x1] ss:$4 sm:$0xff] %v735_v4  ;;  %v1394_v33 = vrot.slane %v1393_v26, 4  ;;  %v692_v22 = vsel %vm5215_vm8, %v5238_v38, 0 }
  0x41   : > { %v874_v35 = vld [vmem:[#allocation1 + $0x20] sm:$0xff]  ;;  %880 = vst [vmem:[#allocation1 + $0x2] ss:$4 sm:$0xff] %v691_v25  ;;  %v556_v25 = vshrl.u32 %v515_v6, 16  ;;  %v744_v31 = vrot.slane %v5313_v17, 2  ;;  %v559_v37 = vshll.u32 %v515_v6, 16 }
  0x42   : > { %v1403_v40 = vor.u32 %v1402_v28, %v1398_v23  ;;  %1206 = vst.msk [vmem:[#allocation2 + $0x14] sm:$0xf] %vm437_vm0, %v874_v35  ;;  %v1399_v41 = vsel %vm5202_vm5, %v1394_v33, %v1398_v23  ;;  %v743_v23 = vrot.slane %v5313_v17, 1  ;;  %v415_v28 = vpack.c.bf16 %v383_v7, %v383_v7 }
  0x43   : > { %882 = vst [vmem:[#allocation1 + $0x3] ss:$4 sm:$0xff] %v5263_v2  ;;  %1779 = vrot.lane.b32.xlu2 %v1399_v41, %s5113_s28  ;;  %v5069_v2 = vld [vmem:[%s5171_s23 + $0x30] sm:$0xff]   ;;  %v5328_v36 = vrot.slane %v556_v25, 7  ;;  %v746_v52 = vrot.slane %v5313_v17, 4  ;;  %v749_v7 = vrot.slane %v5313_v17, 7  ;;  %v5027_v25 = vunpack.c.h.bf16 %v5070_v9 }
  0x44   : > { %884 = vst [vmem:[#allocation1 + $0x20] ss:$4 sm:$0xff] %v736_v32  ;;  %v1404_v54 = vrot.slane %v1403_v40, 4  ;;  %v5022_v32 = vunpack.c.l.bf16 %v5069_v2  ;;  %v5023_v33 = vunpack.c.h.bf16 %v5069_v2  ;;  %v489_v40 = vunpack.c.l.b16 %v415_v28 }
  0x45   : > { %v1326_v49 = vld [vmem:[#allocation2 + $0x10] sm:$0xf]  ;;  %886 = vst [vmem:[#allocation1 + $0x21] ss:$4 sm:$0xff] %v737_v12  ;;  %v745_v12 = vrot.slane %v5313_v17, 3  ;;  %v561_v53 = vor.u32 %v559_v37, %v5328_v36  ;;  %v693_v2 = vsel %vm5215_vm8, %v5292_v43, 0  ;;  %v321_v37 = vmul.f32 %v5176_v1, %v5027_v25 }
  0x46   : > { %v1955_v50 = vld [vmem:[#allocation2 + $0x10] sm:$0xf]  ;;  %v1406_v55 = vshll.u32 %v1326_v49, 16  ;;  %v1410_v56 = vshrl.u32 %v1326_v49, 16  ;;  %888 = vst [vmem:[#allocation1 + $0x22] ss:$4 sm:$0xff] %v738_v11  ;;  %v490_v11 = vunpack.c.l.b16 %v416_v29  ;;  %v319_v47 = vmul.f32 %v5176_v1, %v5023_v33 }
  0x47   : > { %v2047_v57 = vrot.slane %v1955_v50, 5  ;;  %890 = vst [vmem:[#allocation1 + $0x23] ss:$4 sm:$0xff] %v739_v42 }
  0x48   : > { %1777 = vrot.lane.b32.xlu1 %v1389_v48, %s5113_s28  ;;  %v1408_v61 = vrot.slane %v1406_v55, 5  ;;  %v1412_v62 = vrot.slane %v1410_v56, 4  ;;  %v747_v56 = vrot.slane %v5313_v17, 5 }
  0x49   : > { %v2048_v3 = vsel %vm5245_vm11, %v2046_v46, %v2047_v57  ;;  %v1327_v4 = vld [vmem:[#allocation2 + $0x14] sm:$0xf]  ;;  %v2049_v21 = vrot.slane %v2047_v57, 4  ;;  %v318_v46 = vmul.f32 %v5176_v1, %v5022_v32  ;;  %v748_v57 = vrot.slane %v5313_v17, 6 }
  0x4a   : > { %v1409_v10 = vsel %vm5202_vm5, %v1404_v54, %v1408_v61  ;;  %v1413_v13 = vor.u32 %v1412_v62, %v1408_v61  ;;  %v1416_v14 = vshll.u32 %v1327_v4, 16  ;;  %v1420_v15 = vshrl.u32 %v1327_v4, 16  ;;  %v891_v16 = vld [vmem:[#allocation1] sm:$0xff]  ;;  %v1956_v24 = vld [vmem:[#allocation2 + $0x14] sm:$0xf] }
  0x4b   : > { %1781 = vrot.lane.b32.xlu0 %v1409_v10, %s5113_s28  ;;  %1207 = vst.msk [vmem:[#allocation2 + $0x18] sm:$0xf] %vm437_vm0, %v891_v16  ;;  %2164 = vrot.lane.b32.xlu2 %v2048_v3, %s5114_s29  ;;  %v2050_v27 = vrot.slane %v1956_v24, 5  ;;  %v353_v3 = vadd.f32 %v5184_v8, %v318_v46  ;;  %v354_v4 = vadd.f32 %v5184_v8, %v319_v47 }
  0x4c   : > { %v1414_v18 = vrot.slane %v1413_v13, 4  ;;  %v1418_v19 = vrot.slane %v1416_v14, 5  ;;  %v1422_v20 = vrot.slane %v1420_v15, 4  ;;  %894 = vst [vmem:[#allocation1] ss:$4 sm:$0xff] %v740_v58  ;;  %v5338_v58 = vpack.c.b16 %v490_v11, %v489_v40 }
  0x4d   : > { %896 = vst [vmem:[#allocation1 + $0x1] ss:$4 sm:$0xff] %v741_v63  ;;  %v2051_v35 = vsel %vm5245_vm11, %v2049_v21, %v2050_v27  ;;  %v2052_v49 = vrot.slane %v2050_v27, 4  ;;  %v5351_v15 = vsel %vm5215_vm8, 0, %v561_v53  ;;  %v386_v21 = vmax.f32 %v354_v4, 0.0 }
  0x4e   : > { %v892_v26 = vld [vmem:[#allocation1 + $0x20] sm:$0xff]  ;;  %898 = vst [vmem:[#allocation1 + $0x2] ss:$4 sm:$0xff] %v742_v5  ;;  %v1419_v34 = vsel %vm5202_vm5, %v1414_v18, %v1418_v19  ;;  %v1423_v38 = vor.u32 %v1422_v20, %v1418_v19  ;;  %v563_v18 = vshrl.u32 %v5338_v58, 16  ;;  %v385_v20 = vmax.f32 %v353_v3, 0.0 }
  0x4f   : > { %1208 = vst.msk [vmem:[#allocation2 + $0x1c] sm:$0xf] %vm437_vm0, %v892_v26  ;;  %v750_v43 = vrot.slane %v5351_v15, 1  ;;  %v751_v27 = vrot.slane %v5351_v15, 2  ;;  %v566_v29 = vshll.u32 %v5338_v58, 16  ;;  %v754_v46 = vrot.slane %v5351_v15, 5 }
  0x50   : > { %900 = vst [vmem:[#allocation1 + $0x3] ss:$4 sm:$0xff] %v692_v22  ;;  %v1424_v48 = vrot.slane %v1423_v38, 4  ;;  %v5026_v22 = vunpack.c.l.bf16 %v5070_v9  ;;  %v5365_v28 = vrot.slane %v563_v18, 7  ;;  %v417_v33 = vpack.c.bf16 %v385_v20, %v385_v20  ;;  %v5071_v20 = vld [vmem:[%s5171_s23 + $0x40] sm:$0xff]  }
  0x51   : > { %902 = vst [vmem:[#allocation1 + $0x20] ss:$4 sm:$0xff] %v5313_v17 }
  0x52   : > { %v1328_v39 = vld [vmem:[#allocation2 + $0x18] sm:$0xf]  ;;  %904 = vst [vmem:[#allocation1 + $0x21] ss:$4 sm:$0xff] %v743_v23  ;;  %v320_v38 = vmul.f32 %v5176_v1, %v5026_v22 }
  0x53   : > { %1783 = vrot.lane.b32.xlu0 %v1419_v34, %s5113_s28  ;;  %v1426_v41 = vshll.u32 %v1328_v39, 16  ;;  %v1430_v42 = vshrl.u32 %v1328_v39, 16  ;;  %v1957_v44 = vld [vmem:[#allocation2 + $0x18] sm:$0xf]  ;;  %2166 = vrot.lane.b32.xlu2 %v2051_v35, %s5114_s29  ;;  %906 = vst [vmem:[#allocation1 + $0x22] ss:$4 sm:$0xff] %v744_v31  ;;  %v418_v34 = vpack.c.bf16 %v386_v21, %v386_v21 }
  0x54   : > { %908 = vst [vmem:[#allocation1 + $0x23] ss:$4 sm:$0xff] %v745_v12  ;;  %v2053_v55 = vrot.slane %v1957_v44, 5  ;;  %v753_v44 = vrot.slane %v5351_v15, 4 }
  0x55   : > { %v1428_v50 = vrot.slane %v1426_v41, 5  ;;  %v1432_v51 = vrot.slane %v1430_v42, 4  ;;  %v752_v42 = vrot.slane %v5351_v15, 3 }
  0x56   : > { %v1329_v54 = vld [vmem:[#allocation2 + $0x1c] sm:$0xf]  ;;  %v2054_v6 = vsel %vm5245_vm11, %v2052_v49, %v2053_v55  ;;  %v2055_v24 = vrot.slane %v2053_v55, 4  ;;  %v568_v49 = vor.u32 %v566_v29, %v5365_v28 }
  0x57   : > { %v1433_v60 = vor.u32 %v1432_v51, %v1428_v50  ;;  %v1436_v61 = vshll.u32 %v1329_v54, 16  ;;  %v909_v62 = vld [vmem:[#allocation1] sm:$0xff]  ;;  %v1429_v5 = vsel %vm5202_vm5, %v1424_v48, %v1428_v50  ;;  %v1440_v14 = vshrl.u32 %v1329_v54, 16 }
  0x58   : > { %v1958_v63 = vld [vmem:[#allocation2 + $0x1c] sm:$0xf]  ;;  %1209 = vst.msk [vmem:[#allocation2 + $0x20] sm:$0xf] %vm437_vm0, %v909_v62  ;;  %v491_v50 = vunpack.c.l.b16 %v417_v33  ;;  %v492_v51 = vunpack.c.l.b16 %v418_v34  ;;  %v755_v62 = vrot.slane %v5351_v15, 6 }
  0x59   : > { %v1434_v10 = vrot.slane %v1433_v60, 4  ;;  %v1438_v13 = vrot.slane %v1436_v61, 5  ;;  %912 = vst [vmem:[#allocation1] ss:$4 sm:$0xff] %v746_v52  ;;  %v2056_v16 = vrot.slane %v1958_v63, 5  ;;  %v1442_v26 = vrot.slane %v1440_v14, 4 }
  0x5a   : > { %914 = vst [vmem:[#allocation1 + $0x1] ss:$4 sm:$0xff] %v747_v56  ;;  %v355_v52 = vadd.f32 %v5184_v8, %v320_v38  ;;  %v5031_v38 = vunpack.c.h.bf16 %v5071_v20 }
  0x5b   : > { %v1439_v17 = vsel %vm5202_vm5, %v1434_v10, %v1438_v13  ;;  %1785 = vrot.lane.b32.xlu0 %v1429_v5, %s5113_s28  ;;  %v910_v19 = vld [vmem:[#allocation1 + $0x20] sm:$0xff]  ;;  %2168 = vrot.lane.b32.xlu2 %v2054_v6, %s5114_s29  ;;  %916 = vst [vmem:[#allocation1 + $0x2] ss:$4 sm:$0xff] %v748_v57  ;;  %v2058_v23 = vrot.slane %v2056_v16, 4  ;;  %v2057_v12 = vsel %vm5245_vm11, %v2055_v24, %v2056_v16  ;;  %v5390_v5 = vsel %vm5215_vm8, 0, %v568_v49 }
  0x5c   : > { %1787 = vrot.lane.b32.xlu1 %v1439_v17, %s5113_s28  ;;  %1210 = vst.msk [vmem:[#allocation2 + $0x24] sm:$0xf] %vm437_vm0, %v910_v19  ;;  %v1443_v39 = vor.u32 %v1442_v26, %v1438_v13  ;;  %v356_v57 = vadd.f32 %v5184_v8, %v321_v37  ;;  %v756_v6 = vrot.slane %v5351_v15, 7  ;;  %v387_v13 = vmax.f32 %v355_v52, 0.0 }
  0x5d   : > { %918 = vst [vmem:[#allocation1 + $0x3] ss:$4 sm:$0xff] %v749_v7  ;;  %v517_v7 = vpack.c.b16 %v492_v51, %v491_v50  ;;  %v694_v17 = vsel %vm5215_vm8, %v5328_v36, 0  ;;  %v758_v36 = vrot.slane %v5390_v5, 2  ;;  %v761_v37 = vrot.slane %v5390_v5, 5 }
  0x5e   : > { %920 = vst [vmem:[#allocation1 + $0x20] ss:$4 sm:$0xff] %v693_v2  ;;  %v1444_v58 = vrot.slane %v1443_v39, 4  ;;  %v388_v14 = vmax.f32 %v356_v57, 0.0  ;;  %v419_v22 = vpack.c.bf16 %v387_v13, %v387_v13  ;;  %v762_v49 = vrot.slane %v5390_v5, 6 }
  0x5f   : > { %v1959_v31 = vld [vmem:[#allocation2 + $0x20] sm:$0xf]  ;;  %922 = vst [vmem:[#allocation1 + $0x21] ss:$4 sm:$0xff] %v5351_v15  ;;  %v757_v15 = vrot.slane %v5390_v5, 1  ;;  %v570_v19 = vshrl.u32 %v517_v7, 16 }
  0x60   : > { %v1330_v32 = vld [vmem:[#allocation2 + $0x20] sm:$0xf]  ;;  %v2059_v35 = vrot.slane %v1959_v31, 5  ;;  %924 = vst [vmem:[#allocation1 + $0x22] ss:$4 sm:$0xff] %v750_v43  ;;  %v420_v24 = vpack.c.bf16 %v388_v14, %v388_v14  ;;  %v573_v29 = vshll.u32 %v517_v7, 16  ;;  %v5030_v31 = vunpack.c.l.bf16 %v5071_v20 }
  0x61   : > { %v1446_v40 = vshll.u32 %v1330_v32, 16  ;;  %v1450_v11 = vshrl.u32 %v1330_v32, 16  ;;  %926 = vst [vmem:[#allocation1 + $0x23] ss:$4 sm:$0xff] %v751_v27  ;;  %v5408_v34 = vrot.slane %v570_v19, 7  ;;  %v493_v39 = vunpack.c.l.b16 %v419_v22 }
  0x62   : > { %v2060_v41 = vsel %vm5245_vm11, %v2058_v23, %v2059_v35  ;;  %v2061_v55 = vrot.slane %v2059_v35, 4  ;;  %v759_v23 = vrot.slane %v5390_v5, 3  ;;  %v322_v50 = vmul.f32 %v5176_v1, %v5030_v31 }
  0x63   : > { %2170 = vrot.lane.b32.xlu0 %v2057_v12, %s5114_s29  ;;  %v1331_v47 = vld [vmem:[#allocation2 + $0x24] sm:$0xf]  ;;  %v1448_v60 = vrot.slane %v1446_v40, 5  ;;  %v1452_v61 = vrot.slane %v1450_v11, 4  ;;  %v760_v12 = vrot.slane %v5390_v5, 4  ;;  %v494_v40 = vunpack.c.l.b16 %v420_v24 }
  0x64   : > { %v5379_v48 = vld [vmem:[#allocation2 + $0x24] sm:$0xf]  ;;  %2172 = vrot.lane.b32.xlu1 %v2060_v41, %s5114_s29  ;;  %v1456_v53 = vshll.u32 %v1331_v47, 16  ;;  %v1460_v54 = vshrl.u32 %v1331_v47, 16  ;;  %v927_v56 = vld [vmem:[#allocation1] sm:$0xff] }
  0x65   : > { %1211 = vst.msk [vmem:[#allocation2 + $0x28] sm:$0xf] %vm437_vm0, %v927_v56  ;;  %v2062_v63 = vrot.slane %v5379_v48, 5  ;;  %v1449_v16 = vsel %vm5202_vm5, %v1444_v58, %v1448_v60  ;;  %v1453_v2 = vor.u32 %v1452_v61, %v1448_v60  ;;  %v518_v58 = vpack.c.b16 %v494_v40, %v493_v39  ;;  %v5072_v39 = vld [vmem:[%s5171_s23 + $0x48] sm:$0xff]  }
  0x66   : > { %930 = vst [vmem:[#allocation1] ss:$4 sm:$0xff] %v752_v42  ;;  %v1462_v3 = vrot.slane %v1460_v54, 4  ;;  %v1458_v4 = vrot.slane %v1456_v53, 5  ;;  %v575_v53 = vor.u32 %v573_v29, %v5408_v34  ;;  %v323_v54 = vmul.f32 %v5176_v1, %v5031_v38 }
  0x67   : > { %932 = vst [vmem:[#allocation1 + $0x1] ss:$4 sm:$0xff] %v753_v44  ;;  %v2063_v9 = vsel %vm5245_vm11, %v2061_v55, %v2062_v63  ;;  %v1454_v43 = vrot.slane %v1453_v2, 4  ;;  %v2064_v51 = vrot.slane %v2062_v63, 4  ;;  %v763_v61 = vrot.slane %v5390_v5, 7 }
  0x68   : > { %v928_v10 = vld [vmem:[#allocation1 + $0x20] sm:$0xff]  ;;  %934 = vst [vmem:[#allocation1 + $0x2] ss:$4 sm:$0xff] %v754_v46  ;;  %v1463_v18 = vor.u32 %v1462_v3, %v1458_v4  ;;  %v357_v63 = vadd.f32 %v5184_v8, %v322_v50  ;;  %v358_v13 = vadd.f32 %v5184_v8, %v323_v54 }
  0x69   : > { %936 = vst [vmem:[#allocation1 + $0x3] ss:$4 sm:$0xff] %v755_v62  ;;  %v1459_v11 = vsel %vm5202_vm5, %v1454_v43, %v1458_v4  ;;  %v695_v4 = vsel %vm5215_vm8, %v5365_v28, 0 }
  0x6a   : > { %1212 = vst.msk [vmem:[#allocation2 + $0x2c] sm:$0xf] %vm437_vm0, %v928_v10  ;;  %v1464_v25 = vrot.slane %v1463_v18, 4  ;;  %v577_v10 = vshrl.u32 %v518_v58, 16 }
  0x6b   : > { %2174 = vrot.lane.b32.xlu0 %v2063_v9, %s5114_s29  ;;  %938 = vst [vmem:[#allocation1 + $0x20] ss:$4 sm:$0xff] %v756_v6 }
  0x6c   : > { %1789 = vrot.lane.b32.xlu1 %v1449_v16, %s5113_s28  ;;  %v1332_v21 = vld [vmem:[#allocation2 + $0x28] sm:$0xf]  ;;  %940 = vst [vmem:[#allocation1 + $0x21] ss:$4 sm:$0xff] %v694_v17  ;;  %v5444_v43 = vrot.slane %v577_v10, 7 }
  0x6d   : > { %v1466_v26 = vshll.u32 %v1332_v21, 16  ;;  %v1470_v27 = vshrl.u32 %v1332_v21, 16  ;;  %942 = vst [vmem:[#allocation1 + $0x22] ss:$4 sm:$0xff] %v5390_v5  ;;  %v1961_v41 = vld [vmem:[#allocation2 + $0x28] sm:$0xf] }
  0x6e   : > { %944 = vst [vmem:[#allocation1 + $0x23] ss:$4 sm:$0xff] %v757_v15  ;;  %v2065_v55 = vrot.slane %v1961_v41, 5  ;;  %v5435_v5 = vsel %vm5215_vm8, 0, %v575_v53  ;;  %v389_v15 = vmax.f32 %v357_v63, 0.0  ;;  %v5035_v53 = vunpack.c.h.bf16 %v5072_v39 }
  0x6f   : > { %v1468_v32 = vrot.slane %v1466_v26, 5  ;;  %v1472_v33 = vrot.slane %v1470_v27, 4  ;;  %v764_v28 = vrot.slane %v5435_v5, 1  ;;  %v765_v17 = vrot.slane %v5435_v5, 2 }
  0x70   : > { %v945_v35 = vld [vmem:[#allocation1] sm:$0xff]  ;;  %v2066_v6 = vsel %vm5245_vm11, %v2064_v51, %v2065_v55  ;;  %v766_v24 = vrot.slane %v5435_v5, 3  ;;  %v390_v26 = vmax.f32 %v358_v13, 0.0  ;;  %v767_v31 = vrot.slane %v5435_v5, 4 }
  0x71   : > { %1213 = vst.msk [vmem:[#allocation2 + $0x30] sm:$0xf] %vm437_vm0, %v945_v35  ;;  %v1333_v42 = vld [vmem:[#allocation2 + $0x2c] sm:$0xf]  ;;  %v1469_v44 = vsel %vm5202_vm5, %v1464_v25, %v1468_v32  ;;  %v1473_v46 = vor.u32 %v1472_v33, %v1468_v32  ;;  %v580_v25 = vshll.u32 %v518_v58, 16  ;;  %v421_v40 = vpack.c.bf16 %v389_v15, %v389_v15 }
  0x72   : > { %v1476_v47 = vshll.u32 %v1333_v42, 16  ;;  %v1480_v48 = vshrl.u32 %v1333_v42, 16  ;;  %1793 = vrot.lane.b32.xlu2 %v1469_v44, %s5113_s28  ;;  %948 = vst [vmem:[#allocation1] ss:$4 sm:$0xff] %v758_v36  ;;  %v1962_v3 = vld [vmem:[#allocation2 + $0x2c] sm:$0xf]  ;;  %v422_v44 = vpack.c.bf16 %v390_v26, %v390_v26 }
  0x73   : > { %v1474_v52 = vrot.slane %v1473_v46, 4  ;;  %950 = vst [vmem:[#allocation1 + $0x1] ss:$4 sm:$0xff] %v759_v23  ;;  %v2068_v18 = vrot.slane %v1962_v3, 5  ;;  %v2067_v36 = vrot.slane %v2065_v55, 4  ;;  %v582_v42 = vor.u32 %v580_v25, %v5444_v43 }
  0x74   : > { %1791 = vrot.lane.b32.xlu1 %v1459_v11, %s5113_s28  ;;  %v1478_v56 = vrot.slane %v1476_v47, 5  ;;  %v1482_v57 = vrot.slane %v1480_v48, 4  ;;  %952 = vst [vmem:[#allocation1 + $0x2] ss:$4 sm:$0xff] %v760_v12  ;;  %v768_v47 = vrot.slane %v5435_v5, 5  ;;  %v769_v48 = vrot.slane %v5435_v5, 6 }
  0x75   : > { %v946_v60 = vld [vmem:[#allocation1 + $0x20] sm:$0xff]  ;;  %954 = vst [vmem:[#allocation1 + $0x3] ss:$4 sm:$0xff] %v761_v37  ;;  %v2070_v21 = vrot.slane %v2068_v18, 4  ;;  %v1240_v37 = vld [vmem:[#allocation2] sm:$0xf]  ;;  %v2069_v46 = vsel %vm5245_vm11, %v2067_v36, %v2068_v18 }
  0x76   : > { %v1483_v62 = vor.u32 %v1482_v57, %v1478_v56  ;;  %1214 = vst.msk [vmem:[#allocation2 + $0x34] sm:$0xf] %vm437_vm0, %v946_v60  ;;  %v1479_v1 = vsel %vm5202_vm5, %v1474_v52, %v1478_v56  ;;  %v5034_v52 = vunpack.c.l.bf16 %v5072_v39  ;;  %v770_v56 = vrot.slane %v5435_v5, 7 }
  0x77   : > { %956 = vst [vmem:[#allocation1 + $0x20] ss:$4 sm:$0xff] %v762_v49  ;;  %v5468_v60 = vsel %vm5215_vm8, 0, %v582_v42 }
  0x78   : > { %v1334_v7 = vld [vmem:[#allocation2 + $0x30] sm:$0xf]  ;;  %v1484_v14 = vrot.slane %v1483_v62, 4  ;;  %958 = vst [vmem:[#allocation1 + $0x21] ss:$4 sm:$0xff] %v763_v61  ;;  %v495_v61 = vunpack.c.l.b16 %v421_v40  ;;  %v496_v62 = vunpack.c.l.b16 %v422_v44  ;;  %v772_v18 = vrot.slane %v5468_v60, 2 }
  0x79   : > { %v1963_v9 = vld [vmem:[#allocation2 + $0x30] sm:$0xf]  ;;  %v1486_v16 = vshll.u32 %v1334_v7, 16  ;;  %v1490_v2 = vshrl.u32 %v1334_v7, 16  ;;  %960 = vst [vmem:[#allocation1 + $0x22] ss:$4 sm:$0xff] %v695_v4 }
  0x7a   : > { %1795 = vrot.lane.b32.xlu2 %v1479_v1, %s5113_s28  ;;  %v2071_v22 = vrot.slane %v1963_v9, 5  ;;  %962 = vst [vmem:[#allocation1 + $0x23] ss:$4 sm:$0xff] %v5435_v5  ;;  %v696_v4 = vsel %vm5215_vm8, %v5408_v34, 0  ;;  %v5477_v9 = vld [vmem:[%s7570_s1] ss:$0 sm:$0xff] }
  0x7b   : > { %v1488_v19 = vrot.slane %v1486_v16, 5  ;;  %v1492_v20 = vrot.slane %v1490_v2, 4  ;;  %1281 = vst.msk [vmem:[#allocation3] sm:$0xf] %vm437_vm0, %v1240_v37  ;;  %v324_v5 = vmul.f32 %v5477_v9, %v5034_v52  ;;  %v325_v10 = vmul.f32 %v5477_v9, %v5035_v53 }
  0x7c   : > { %2176 = vrot.lane.b32.xlu1 %v2066_v6, %s5114_s29  ;;  %v963_v8 = vld [vmem:[#allocation1] sm:$0xff]  ;;  %v2072_v12 = vsel %vm5245_vm11, %v2070_v21, %v2071_v22  ;;  %v2073_v55 = vrot.slane %v2071_v22, 4  ;;  %v771_v16 = vrot.slane %v5468_v60, 1  ;;  %v773_v15 = vrot.slane %v5468_v60, 3 }
  0x7d   : > { %v1489_v27 = vsel %vm5202_vm5, %v1484_v14, %v1488_v19  ;;  %v1335_v23 = vld [vmem:[#allocation2 + $0x34] sm:$0xf]  ;;  %v1493_v29 = vor.u32 %v1492_v20, %v1488_v19  ;;  %1215 = vst.msk [vmem:[#allocation2 + $0x38] sm:$0xf] %vm437_vm0, %v963_v8  ;;  %v5496_v22 = vld [vmem:[%s7571_s2] ss:$0 sm:$0xff] }
  0x7e   : > { %1797 = vrot.lane.b32.xlu0 %v1489_v27, %s5113_s28  ;;  %v1496_v32 = vshll.u32 %v1335_v23, 16  ;;  %v1500_v33 = vshrl.u32 %v1335_v23, 16  ;;  %v1964_v38 = vld [vmem:[#allocation2 + $0x34] sm:$0xf]  ;;  %966 = vst [vmem:[#allocation1] ss:$4 sm:$0xff] %v764_v28  ;;  %v519_v28 = vpack.c.b16 %v496_v62, %v495_v61  ;;  %v359_v8 = vadd.f32 %v5496_v22, %v324_v5  ;;  %v2159_v42 = vpop.permute.xlu2 %2158 }
  0x7f   : > { %v1494_v35 = vrot.slane %v1493_v29, 4  ;;  %968 = vst [vmem:[#allocation1 + $0x1] ss:$4 sm:$0xff] %v765_v17  ;;  %v2074_v49 = vrot.slane %v1964_v38, 5  ;;  %v5073_v38 = vld [vmem:[%s5171_s23 + $0x50] sm:$0xff]  }
  0x80   : > { %v1498_v11 = vrot.slane %v1496_v32, 5  ;;  %v1502_v41 = vrot.slane %v1500_v33, 4  ;;  %970 = vst [vmem:[#allocation1 + $0x2] ss:$4 sm:$0xff] %v766_v24  ;;  %v360_v24 = vadd.f32 %v5496_v22, %v325_v10  ;;  %v584_v23 = vshrl.u32 %v519_v28, 16 }
  0x81   : > { %972 = vst [vmem:[#allocation1 + $0x3] ss:$4 sm:$0xff] %v767_v31  ;;  %v964_v51 = vld [vmem:[#allocation1 + $0x20] sm:$0xff]  ;;  %v2076_v6 = vrot.slane %v2074_v49, 4  ;;  %v2075_v34 = vsel %vm5245_vm11, %v2073_v55, %v2074_v49  ;;  %v5038_v44 = vunpack.c.l.bf16 %v5073_v38  ;;  %v5039_v52 = vunpack.c.h.bf16 %v5073_v38 }
  0x82   : > { %2180 = vrot.lane.b32.xlu2 %v2072_v12, %s5114_s29  ;;  %v1503_v50 = vor.u32 %v1502_v41, %v1498_v11  ;;  %v1499_v54 = vsel %vm5202_vm5, %v1494_v35, %v1498_v11  ;;  %1216 = vst.msk [vmem:[#allocation2 + $0x3c] sm:$0xf] %vm437_vm0, %v964_v51  ;;  %v391_v35 = vmax.f32 %v359_v8, 0.0  ;;  %v392_v11 = vmax.f32 %v360_v24, 0.0  ;;  %v5074_v24 = vld [vmem:[%s5171_s23 + $0x58] sm:$0xff]  }
  0x83   : > { %974 = vst [vmem:[#allocation1 + $0x20] ss:$4 sm:$0xff] %v768_v47  ;;  %v326_v61 = vmul.f32 %v5477_v9, %v5038_v44  ;;  %v5043_v38 = vunpack.c.h.bf16 %v5074_v24 }
  0x84   : > { %2178 = vrot.lane.b32.xlu1 %v2069_v46, %s5114_s29  ;;  %v1965_v57 = vld [vmem:[#allocation2 + $0x38] sm:$0xf]  ;;  %v1504_v3 = vrot.slane %v1503_v50, 4  ;;  %976 = vst [vmem:[#allocation1 + $0x21] ss:$4 sm:$0xff] %v769_v48  ;;  %v5507_v46 = vrot.slane %v584_v23, 7  ;;  %v423_v53 = vpack.c.bf16 %v391_v35, %v391_v35 }
  0x85   : > { %v1336_v58 = vld [vmem:[#allocation2 + $0x38] sm:$0xf]  ;;  %v2077_v7 = vrot.slane %v1965_v57, 5  ;;  %978 = vst [vmem:[#allocation1 + $0x22] ss:$4 sm:$0xff] %v770_v56  ;;  %v587_v50 = vshll.u32 %v519_v28, 16  ;;  %v424_v57 = vpack.c.bf16 %v392_v11, %v392_v11  ;;  %v361_v28 = vadd.f32 %v5496_v22, %v326_v61 }
  0x86   : > { %v1506_v63 = vshll.u32 %v1336_v58, 16  ;;  %v1510_v1 = vshrl.u32 %v1336_v58, 16  ;;  %1799 = vrot.lane.b32.xlu0 %v1499_v54, %s5113_s28  ;;  %980 = vst [vmem:[#allocation1 + $0x23] ss:$4 sm:$0xff] %v696_v4  ;;  %v327_v4 = vmul.f32 %v5477_v9, %v5039_v52  ;;  %v697_v23 = vsel %vm5215_vm8, %v5444_v43, 0 }
  0x87   : > { %v2078_v19 = vsel %vm5245_vm11, %v2076_v6, %v2077_v7  ;;  %v2079_v36 = vrot.slane %v2077_v7, 4  ;;  %v775_v43 = vrot.slane %v5468_v60, 5  ;;  %v777_v11 = vrot.slane %v5468_v60, 7 }
  0x88   : > { %v1508_v13 = vrot.slane %v1506_v63, 5  ;;  %v1512_v14 = vrot.slane %v1510_v1, 4  ;;  %v981_v2 = vld [vmem:[#allocation1] sm:$0xff]  ;;  %v589_v1 = vor.u32 %v587_v50, %v5507_v46 }
  0x89   : > { %1217 = vst.msk [vmem:[#allocation2 + $0x40] sm:$0xf] %vm437_vm0, %v981_v2  ;;  %v1337_v20 = vld [vmem:[#allocation2 + $0x3c] sm:$0xf] }
  0x8a   : > { %v1509_v17 = vsel %vm5202_vm5, %v1504_v3, %v1508_v13  ;;  %2182 = vrot.lane.b32.xlu2 %v2075_v34, %s5114_s29  ;;  %v1966_v21 = vld [vmem:[#allocation2 + $0x3c] sm:$0xf]  ;;  %984 = vst [vmem:[#allocation1] ss:$4 sm:$0xff] %v5468_v60  ;;  %v1513_v25 = vor.u32 %v1512_v14, %v1508_v13  ;;  %v1516_v26 = vshll.u32 %v1337_v20, 16  ;;  %v1520_v27 = vshrl.u32 %v1337_v20, 16 }
  0x8b   : > { %986 = vst [vmem:[#allocation1 + $0x1] ss:$4 sm:$0xff] %v771_v16  ;;  %v2080_v32 = vrot.slane %v1966_v21, 5  ;;  %v497_v13 = vunpack.c.l.b16 %v423_v53  ;;  %v498_v14 = vunpack.c.l.b16 %v424_v57  ;;  %v362_v20 = vadd.f32 %v5496_v22, %v327_v4  ;;  %v5075_v53 = vld [vmem:[%s5171_s23 + $0x60] sm:$0xff]  }
  0x8c   : > { %1801 = vrot.lane.b32.xlu1 %v1509_v17, %s5113_s28  ;;  %988 = vst [vmem:[#allocation1 + $0x2] ss:$4 sm:$0xff] %v772_v18  ;;  %v1518_v29 = vrot.slane %v1516_v26, 5  ;;  %v1522_v31 = vrot.slane %v1520_v27, 4  ;;  %v1514_v12 = vrot.slane %v1513_v25, 4  ;;  %v5527_v17 = vsel %vm5215_vm8, 0, %v589_v1 }
  0x8d   : > { %990 = vst [vmem:[#allocation1 + $0x3] ss:$4 sm:$0xff] %v773_v15  ;;  %v2081_v39 = vsel %vm5245_vm11, %v2079_v36, %v2080_v32  ;;  %v982_v40 = vld [vmem:[#allocation1 + $0x20] sm:$0xff]  ;;  %v2082_v6 = vrot.slane %v2080_v32, 4  ;;  %v520_v36 = vpack.c.b16 %v498_v14, %v497_v13  ;;  %v394_v35 = vmax.f32 %v362_v20, 0.0 }
  0x8e   : > { %2184 = vrot.lane.b32.xlu0 %v2078_v19, %s5114_s29  ;;  %v1523_v37 = vor.u32 %v1522_v31, %v1518_v29  ;;  %1218 = vst.msk [vmem:[#allocation2 + $0x44] sm:$0xf] %vm437_vm0, %v982_v40  ;;  %v1519_v54 = vsel %vm5202_vm5, %v1514_v12, %v1518_v29  ;;  %v393_v31 = vmax.f32 %v361_v28, 0.0  ;;  %v779_v44 = vrot.slane %v5527_v17, 2 }
  0x8f   : > { %v1776_v33 = vpop.permute.xlu0 %1775  ;;  %v591_v40 = vshrl.u32 %v520_v36, 16  ;;  %994 = vst [vmem:[#allocation1 + $0x21] ss:$4 sm:$0xff] %v775_v43  ;;  %v426_v50 = vpack.c.bf16 %v394_v35, %v394_v35  ;;  %v781_v61 = vrot.slane %v5527_v17, 4  ;;  %v782_v1 = vrot.slane %v5527_v17, 5 }
  0x90   : > { %1899 = vst.msk [vmem:[#allocation3] sm:$0xf] %vm1898_vm12, %v1776_v33  ;;  %v1338_v41 = vld [vmem:[#allocation2 + $0x40] sm:$0xf]  ;;  %v1524_v47 = vrot.slane %v1523_v37, 4  ;;  %v5042_v33 = vunpack.c.l.bf16 %v5074_v24  ;;  %v774_v37 = vrot.slane %v5468_v60, 4 }
  0x91   : > { %v1526_v48 = vshll.u32 %v1338_v41, 16  ;;  %v1530_v49 = vshrl.u32 %v1338_v41, 16  ;;  %2282 = vst.msk [vmem:[#allocation3] sm:$0xf] %vm2281_vm13, %v2159_v42  ;;  %v1967_v51 = vld [vmem:[#allocation2 + $0x40] sm:$0xf] }
  0x92   : > { %2186 = vrot.lane.b32.xlu2 %v2081_v39, %s5114_s29  ;;  %v2083_v3 = vrot.slane %v1967_v51, 5  ;;  %v776_v39 = vrot.slane %v5468_v60, 6  ;;  %v778_v41 = vrot.slane %v5527_v17, 1  ;;  %992 = vst [vmem:[#allocation1 + $0x20] ss:$4 sm:$0xff] %v774_v37  ;;  %v328_v42 = vmul.f32 %v5477_v9, %v5042_v33 }
  0x93   : > { %v1528_v55 = vrot.slane %v1526_v48, 5  ;;  %v1532_v56 = vrot.slane %v1530_v49, 4  ;;  %v329_v48 = vmul.f32 %v5477_v9, %v5043_v38  ;;  %v425_v49 = vpack.c.bf16 %v393_v31, %v393_v31  ;;  %998 = vst [vmem:[#allocation1 + $0x23] ss:$4 sm:$0xff] %v777_v11 }
  0x94   : > { %v999_v58 = vld [vmem:[#allocation1] sm:$0xff]  ;;  %v2085_v10 = vrot.slane %v2083_v3, 4  ;;  %v2084_v21 = vsel %vm5245_vm11, %v2082_v6, %v2083_v3  ;;  %996 = vst [vmem:[#allocation1 + $0x22] ss:$4 sm:$0xff] %v776_v39  ;;  %v5562_v51 = vrot.slane %v591_v40, 7  ;;  %v594_v60 = vshll.u32 %v520_v36, 16 }
  0x95   : > { %v1529_v62 = vsel %vm5202_vm5, %v1524_v47, %v1528_v55  ;;  %v1533_v63 = vor.u32 %v1532_v56, %v1528_v55  ;;  %1219 = vst.msk [vmem:[#allocation2 + $0x48] sm:$0xf] %vm437_vm0, %v999_v58  ;;  %v1339_v7 = vld [vmem:[#allocation2 + $0x44] sm:$0xf]  ;;  %v363_v52 = vadd.f32 %v5496_v22, %v328_v42  ;;  %v499_v55 = vunpack.c.l.b16 %v425_v49 }
  0x96   : > { %1803 = vrot.lane.b32.xlu0 %v1519_v54, %s5113_s28  ;;  %1805 = vrot.lane.b32.xlu1 %v1529_v62, %s5113_s28  ;;  %v5521_v5 = vld [vmem:[#allocation2 + $0x44] sm:$0xf]  ;;  %v1536_v16 = vshll.u32 %v1339_v7, 16  ;;  %v1540_v2 = vshrl.u32 %v1339_v7, 16  ;;  %1004 = vst [vmem:[#allocation1 + $0x1] ss:$4 sm:$0xff] %v5527_v17  ;;  %v364_v54 = vadd.f32 %v5496_v22, %v329_v48  ;;  %v500_v56 = vunpack.c.l.b16 %v426_v50 }
  0x97   : > { %v1534_v34 = vrot.slane %v1533_v63, 4  ;;  %v2086_v18 = vrot.slane %v5521_v5, 5  ;;  %1002 = vst [vmem:[#allocation1] ss:$4 sm:$0xff] %v697_v23  ;;  %v596_v57 = vor.u32 %v594_v60, %v5562_v51  ;;  %v780_v58 = vrot.slane %v5527_v17, 3 }
  0x98   : > { %v1538_v15 = vrot.slane %v1536_v16, 5  ;;  %v1542_v19 = vrot.slane %v1540_v2, 4  ;;  %1006 = vst [vmem:[#allocation1 + $0x2] ss:$4 sm:$0xff] %v778_v41  ;;  %v5046_v62 = vunpack.c.l.bf16 %v5075_v53  ;;  %v5047_v3 = vunpack.c.h.bf16 %v5075_v53 }
  0x99   : > { %v2087_v8 = vsel %vm5245_vm11, %v2085_v10, %v2086_v18  ;;  %1008 = vst [vmem:[#allocation1 + $0x3] ss:$4 sm:$0xff] %v779_v44  ;;  %v395_v63 = vmax.f32 %v363_v52, 0.0  ;;  %v396_v4 = vmax.f32 %v364_v54, 0.0  ;;  %v521_v6 = vpack.c.b16 %v500_v56, %v499_v55 }
  0x9a   : > { %v1539_v25 = vsel %vm5202_vm5, %v1534_v34, %v1538_v15  ;;  %v1543_v27 = vor.u32 %v1542_v19, %v1538_v15  ;;  %v783_v7 = vrot.slane %v5527_v17, 6  ;;  %v683_v13 = vsel %vm5215_vm8, 0, %v596_v57 }
  0x9b   : > { %1807 = vrot.lane.b32.xlu2 %v1539_v25, %s5113_s28  ;;  %v1000_v10 = vld [vmem:[#allocation1 + $0x20] sm:$0xff]  ;;  %v784_v14 = vrot.slane %v5527_v17, 7  ;;  %v330_v16 = vmul.f32 %v5477_v9, %v5046_v62  ;;  %v331_v2 = vmul.f32 %v5477_v9, %v5047_v3  ;;  %v427_v28 = vpack.c.bf16 %v395_v63, %v395_v63  ;;  %v5076_v25 = vld [vmem:[%s5171_s23 + $0x68] sm:$0xff]  }
  0x9c   : > { %v5540_v26 = vld [vmem:[#allocation2 + $0x48] sm:$0xf]  ;;  %v1544_v32 = vrot.slane %v1543_v27, 4  ;;  %1010 = vst [vmem:[#allocation1 + $0x20] ss:$4 sm:$0xff] %v780_v58  ;;  %v698_v15 = vsel %vm5215_vm8, %v5507_v46, 0  ;;  %v428_v19 = vpack.c.bf16 %v396_v4, %v396_v4  ;;  %v5051_v33 = vunpack.c.h.bf16 %v5076_v25 }
  0x9d   : > { %v1546_v29 = vshll.u32 %v5540_v26, 16  ;;  %1012 = vst [vmem:[#allocation1 + $0x21] ss:$4 sm:$0xff] %v781_v61  ;;  %v598_v20 = vshrl.u32 %v521_v6, 16  ;;  %v365_v17 = vadd.f32 %v5496_v22, %v330_v16  ;;  %v501_v24 = vunpack.c.l.b16 %v427_v28 }
  0x9e   : > { %2188 = vrot.lane.b32.xlu0 %v2084_v21, %s5114_s29  ;;  %2190 = vrot.lane.b32.xlu1 %v2087_v8, %s5114_s29  ;;  %1014 = vst [vmem:[#allocation1 + $0x22] ss:$4 sm:$0xff] %v782_v1  ;;  %v785_v21 = vrot.slane %v683_v13, 1  ;;  %v366_v8 = vadd.f32 %v5496_v22, %v331_v2  ;;  %v502_v27 = vunpack.c.l.b16 %v428_v19  ;;  %v601_v23 = vshll.u32 %v521_v6, 16 }
  0x9f   : > { %v5549_v12 = vrot.slane %v1546_v29, 5  ;;  %1016 = vst [vmem:[#allocation1 + $0x23] ss:$4 sm:$0xff] %v783_v7  ;;  %v5584_v36 = vrot.slane %v598_v20, 7  ;;  %v786_v29 = vrot.slane %v683_v13, 2  ;;  %v787_v46 = vrot.slane %v683_v13, 3 }
  0xa0   : > { %v1017_v34 = vld [vmem:[#allocation1] sm:$0xff]  ;;  %1220 = vst.msk [vmem:[#allocation2 + $0x4c] sm:$0xf] %vm437_vm0, %v1000_v10  ;;  %v788_v31 = vrot.slane %v683_v13, 4  ;;  %v397_v38 = vmax.f32 %v365_v17, 0.0  ;;  %v789_v35 = vrot.slane %v683_v13, 5  ;;  %v522_v39 = vpack.c.b16 %v502_v27, %v501_v24 }
  0xa1   : > { %v1549_v47 = vsel %vm5202_vm5, %v1544_v32, %v5549_v12  ;;  %1020 = vst [vmem:[#allocation1] ss:$4 sm:$0xff] %v784_v14  ;;  %v5050_v32 = vunpack.c.l.bf16 %v5076_v25  ;;  %v398_v43 = vmax.f32 %v366_v8, 0.0  ;;  %v603_v40 = vor.u32 %v601_v23, %v5584_v36  ;;  %v5077_v20 = vld [vmem:[%s5171_s23 + $0x70] sm:$0xff]  }
  0xa2   : > { %1022 = vst [vmem:[#allocation1 + $0x1] ss:$4 sm:$0xff] %v698_v15  ;;  %v790_v11 = vrot.slane %v683_v13, 6  ;;  %v791_v41 = vrot.slane %v683_v13, 7  ;;  %v333_v44 = vmul.f32 %v5477_v9, %v5051_v33  ;;  %v699_v48 = vsel %vm5215_vm8, %v5562_v51, 0 }
  0xa3   : > { %1024 = vst [vmem:[#allocation1 + $0x2] ss:$4 sm:$0xff] %v683_v13  ;;  %v332_v42 = vmul.f32 %v5477_v9, %v5050_v32  ;;  %v430_v50 = vpack.c.bf16 %v398_v43, %v398_v43  ;;  %v605_v60 = vshrl.u32 %v522_v39, 16  ;;  %v684_v52 = vsel %vm5215_vm8, 0, %v603_v40 }
  0xa4   : > { %1026 = vst [vmem:[#allocation1 + $0x3] ss:$4 sm:$0xff] %v785_v21  ;;  %v368_v54 = vadd.f32 %v5496_v22, %v333_v44  ;;  %v792_v56 = vrot.slane %v684_v52, 1  ;;  %v608_v51 = vshll.u32 %v522_v39, 16  ;;  %v793_v61 = vrot.slane %v684_v52, 2 }
  0xa5   : > { %1221 = vst.msk [vmem:[#allocation2 + $0x50] sm:$0xf] %vm437_vm0, %v1017_v34  ;;  %v367_v53 = vadd.f32 %v5496_v22, %v332_v42  ;;  %v504_v57 = vunpack.c.l.b16 %v430_v50  ;;  %v5598_v58 = vrot.slane %v605_v60, 7  ;;  %v794_v62 = vrot.slane %v684_v52, 3 }
  0xa6   : > { %1809 = vrot.lane.b32.xlu0 %v1549_v47, %s5113_s28  ;;  %v1018_v37 = vld [vmem:[#allocation1 + $0x20] sm:$0xff]  ;;  %v429_v47 = vpack.c.bf16 %v397_v38, %v397_v38  ;;  %v795_v3 = vrot.slane %v684_v52, 4  ;;  %v796_v4 = vrot.slane %v684_v52, 5  ;;  %v400_v6 = vmax.f32 %v368_v54, 0.0 }
  0xa7   : > { %1028 = vst [vmem:[#allocation1 + $0x20] ss:$4 sm:$0xff] %v786_v29  ;;  %v399_v1 = vmax.f32 %v367_v53, 0.0  ;;  %v610_v10 = vor.u32 %v608_v51, %v5598_v58  ;;  %v797_v13 = vrot.slane %v684_v52, 6  ;;  %v798_v14 = vrot.slane %v684_v52, 7 }
  0xa8   : > { %1030 = vst [vmem:[#allocation1 + $0x21] ss:$4 sm:$0xff] %v787_v46  ;;  %v503_v55 = vunpack.c.l.b16 %v429_v47  ;;  %v700_v2 = vsel %vm5215_vm8, %v5584_v36, 0  ;;  %v432_v28 = vpack.c.bf16 %v400_v6, %v400_v6  ;;  %v5054_v29 = vunpack.c.l.bf16 %v5077_v20 }
  0xa9   : > { %1032 = vst [vmem:[#allocation1 + $0x22] ss:$4 sm:$0xff] %v788_v31  ;;  %v431_v16 = vpack.c.bf16 %v399_v1, %v399_v1  ;;  %v685_v19 = vsel %vm5215_vm8, 0, %v610_v10  ;;  %v5055_v46 = vunpack.c.h.bf16 %v5077_v20  ;;  %v701_v47 = vsel %vm5215_vm8, %v5598_v58, 0  ;;  %v1242_v10 = vld [vmem:[#allocation2 + $0x8] sm:$0xf] }
  0xaa   : > { %1034 = vst [vmem:[#allocation1 + $0x23] ss:$4 sm:$0xff] %v789_v35  ;;  %v523_v7 = vpack.c.b16 %v504_v57, %v503_v55  ;;  %v799_v17 = vrot.slane %v685_v19, 1  ;;  %v506_v8 = vunpack.c.l.b16 %v432_v28  ;;  %v800_v27 = vrot.slane %v685_v19, 2 }
  0xab   : > { %v1035_v49 = vld [vmem:[#allocation1] sm:$0xff]  ;;  %1222 = vst.msk [vmem:[#allocation2 + $0x54] sm:$0xf] %vm437_vm0, %v1018_v37  ;;  %v505_v21 = vunpack.c.l.b16 %v431_v16  ;;  %v801_v36 = vrot.slane %v685_v19, 3  ;;  %v802_v31 = vrot.slane %v685_v19, 4  ;;  %v803_v32 = vrot.slane %v685_v19, 5 }
  0xac   : > { %1038 = vst [vmem:[#allocation1] ss:$4 sm:$0xff] %v790_v11  ;;  %v612_v15 = vshrl.u32 %v523_v7, 16  ;;  %v615_v25 = vshll.u32 %v523_v7, 16  ;;  %v804_v35 = vrot.slane %v685_v19, 6  ;;  %v805_v37 = vrot.slane %v685_v19, 7 }
  0xad   : > { %1040 = vst [vmem:[#allocation1 + $0x1] ss:$4 sm:$0xff] %v791_v41  ;;  %v524_v33 = vpack.c.b16 %v506_v8, %v505_v21  ;;  %v334_v39 = vmul.f32 %v5477_v9, %v5054_v29  ;;  %v335_v40 = vmul.f32 %v5477_v9, %v5055_v46 }
  0xae   : > { %1042 = vst [vmem:[#allocation1 + $0x2] ss:$4 sm:$0xff] %v699_v48  ;;  %v5610_v24 = vrot.slane %v612_v15, 7 }
  0xaf   : > { %1044 = vst [vmem:[#allocation1 + $0x3] ss:$4 sm:$0xff] %v684_v52  ;;  %v619_v11 = vshrl.u32 %v524_v33, 16  ;;  %v369_v42 = vadd.f32 %v5496_v22, %v334_v39  ;;  %v370_v44 = vadd.f32 %v5496_v22, %v335_v40  ;;  %v622_v50 = vshll.u32 %v524_v33, 16 }
  0xb0   : > { %1223 = vst.msk [vmem:[#allocation2 + $0x58] sm:$0xf] %vm437_vm0, %v1035_v49  ;;  %v617_v38 = vor.u32 %v615_v25, %v5610_v24 }
  0xb1   : > { %v1036_v63 = vld [vmem:[#allocation1 + $0x20] sm:$0xff]  ;;  %v5625_v49 = vrot.slane %v619_v11, 7  ;;  %v401_v54 = vmax.f32 %v369_v42, 0.0  ;;  %v402_v55 = vmax.f32 %v370_v44, 0.0  ;;  %1283 = vst.msk [vmem:[#allocation3 + $0x8] sm:$0xf] %vm437_vm0, %v1242_v10 }
  0xb2   : > { %1046 = vst [vmem:[#allocation1 + $0x20] ss:$4 sm:$0xff] %v792_v56  ;;  %v686_v41 = vsel %vm5215_vm8, 0, %v617_v38 }
  0xb3   : > { %1048 = vst [vmem:[#allocation1 + $0x21] ss:$4 sm:$0xff] %v793_v61  ;;  %v806_v48 = vrot.slane %v686_v41, 1  ;;  %v807_v60 = vrot.slane %v686_v41, 2  ;;  %v808_v53 = vrot.slane %v686_v41, 3  ;;  %v809_v56 = vrot.slane %v686_v41, 4 }
  0xb4   : > { %1050 = vst [vmem:[#allocation1 + $0x22] ss:$4 sm:$0xff] %v794_v62  ;;  %v810_v57 = vrot.slane %v686_v41, 5  ;;  %v624_v58 = vor.u32 %v622_v50, %v5625_v49  ;;  %v811_v51 = vrot.slane %v686_v41, 6  ;;  %v433_v62 = vpack.c.bf16 %v401_v54, %v401_v54  ;;  %v1243_v50 = vld [vmem:[#allocation2 + $0xc] sm:$0xf] }
  0xb5   : > { %1052 = vst [vmem:[#allocation1 + $0x23] ss:$4 sm:$0xff] %v795_v3  ;;  %v434_v3 = vpack.c.bf16 %v402_v55, %v402_v55  ;;  %v812_v7 = vrot.slane %v686_v41, 7 }
  0xb6   : > { %v1053_v34 = vld [vmem:[#allocation1] sm:$0xff]  ;;  %1224 = vst.msk [vmem:[#allocation2 + $0x5c] sm:$0xf] %vm437_vm0, %v1036_v63  ;;  %v5078_v63 = vld [vmem:[%s5171_s23 + $0x78] sm:$0xff]   ;;  %v5631_v6 = vsel %vm5215_vm8, 0, %v624_v58 }
  0xb7   : > { %1056 = vst [vmem:[#allocation1] ss:$4 sm:$0xff] %v796_v4  ;;  %v5058_v1 = vunpack.c.l.bf16 %v5078_v63  ;;  %v5059_v4 = vunpack.c.h.bf16 %v5078_v63  ;;  %v813_v28 = vrot.slane %v5631_v6, 1  ;;  %v815_v25 = vrot.slane %v5631_v6, 3 }
  0xb8   : > { %1058 = vst [vmem:[#allocation1 + $0x1] ss:$4 sm:$0xff] %v797_v13  ;;  %v507_v13 = vunpack.c.l.b16 %v433_v62  ;;  %v819_v63 = vrot.slane %v5631_v6, 7 }
  0xb9   : > { %1060 = vst [vmem:[#allocation1 + $0x2] ss:$4 sm:$0xff] %v798_v14  ;;  %v508_v14 = vunpack.c.l.b16 %v434_v3  ;;  %v336_v16 = vmul.f32 %v5477_v9, %v5058_v1  ;;  %v818_v3 = vrot.slane %v5631_v6, 6 }
  0xba   : > { %1062 = vst [vmem:[#allocation1 + $0x3] ss:$4 sm:$0xff] %v700_v2  ;;  %v337_v2 = vmul.f32 %v5477_v9, %v5059_v4  ;;  %v814_v9 = vrot.slane %v5631_v6, 2 }
  0xbb   : > { %1225 = vst.msk [vmem:[#allocation2 + $0x60] sm:$0xf] %vm437_vm0, %v1053_v34  ;;  %v702_v34 = vsel %vm5215_vm8, %v5610_v24, 0  ;;  %v525_v20 = vpack.c.b16 %v508_v14, %v507_v13  ;;  %v371_v21 = vadd.f32 %v5496_v22, %v336_v16  ;;  %v1780_v24 = vpop.permute.xlu2 %1779 }
  0xbc   : > { %v1054_v23 = vld [vmem:[#allocation1 + $0x20] sm:$0xff]  ;;  %1901 = vst.msk [vmem:[#allocation3 + $0x8] sm:$0xf] %vm1898_vm12, %v1780_v24 }
  0xbd   : > { %1064 = vst [vmem:[#allocation1 + $0x20] ss:$4 sm:$0xff] %v685_v19  ;;  %v2163_v19 = vpop.permute.xlu1 %2162  ;;  %v403_v29 = vmax.f32 %v371_v21, 0.0  ;;  %v629_v38 = vshll.u32 %v525_v20, 16 }
  0xbe   : > { %1066 = vst [vmem:[#allocation1 + $0x21] ss:$4 sm:$0xff] %v799_v17  ;;  %v372_v17 = vadd.f32 %v5496_v22, %v337_v2  ;;  %v2364_v22 = vld [vmem:[%s7572_s3 + $0x8] sm:$0xf] }
  0xbf   : > { %1068 = vst [vmem:[#allocation1 + $0x22] ss:$4 sm:$0xff] %v800_v27  ;;  %v626_v27 = vshrl.u32 %v525_v20, 16  ;;  %v435_v39 = vpack.c.bf16 %v403_v29, %v403_v29 }
  0xc0   : > { %1070 = vst [vmem:[#allocation1 + $0x23] ss:$4 sm:$0xff] %v801_v36  ;;  %v2161_v36 = vpop.permute.xlu0 %2160  ;;  %v404_v46 = vmax.f32 %v372_v17, 0.0 }
  0xc1   : > { %v1071_v43 = vld [vmem:[#allocation1] sm:$0xff]  ;;  %1226 = vst.msk [vmem:[#allocation2 + $0x64] sm:$0xf] %vm437_vm0, %v1054_v23  ;;  %v816_v23 = vrot.slane %v5631_v6, 4  ;;  %v5656_v33 = vrot.slane %v626_v27, 7  ;;  %v509_v55 = vunpack.c.l.b16 %v435_v39 }
  0xc2   : > { %1074 = vst [vmem:[#allocation1] ss:$4 sm:$0xff] %v802_v31  ;;  %v817_v31 = vrot.slane %v5631_v6, 5  ;;  %v436_v40 = vpack.c.bf16 %v404_v46, %v404_v46  ;;  %v1244_v46 = vld [vmem:[#allocation2 + $0x10] sm:$0xf] }
  0xc3   : > { %1076 = vst [vmem:[#allocation1 + $0x1] ss:$4 sm:$0xff] %v803_v32  ;;  %v2684_v32 = vunpack.c.l.b16 %v2364_v22 }
  0xc4   : > { %1078 = vst [vmem:[#allocation1 + $0x2] ss:$4 sm:$0xff] %v804_v35 }
  0xc5   : > { %1080 = vst [vmem:[#allocation1 + $0x3] ss:$4 sm:$0xff] %v805_v37  ;;  %v1241_v37 = vld [vmem:[#allocation2 + $0x4] sm:$0xf]  ;;  %v1778_v42 = vpop.permute.xlu1 %1777 }
  0xc6   : > { %1227 = vst.msk [vmem:[#allocation2 + $0x68] sm:$0xf] %vm437_vm0, %v1071_v43  ;;  %v2686_v43 = vpack.c.b16 %v2684_v32, %v2684_v32 }
  0xc7   : > { %v1072_v52 = vld [vmem:[#allocation1 + $0x20] sm:$0xff]  ;;  %2284 = vst.msk [vmem:[#allocation3 + $0x8] sm:$0xf] %vm2281_vm13, %v2163_v19 }
  0xc8   : > { %1082 = vst [vmem:[#allocation1 + $0x20] ss:$4 sm:$0xff] %v701_v47 }
  0xc9   : > { %1084 = vst [vmem:[#allocation1 + $0x21] ss:$4 sm:$0xff] %v686_v41 }
  0xca   : > { %1086 = vst [vmem:[#allocation1 + $0x22] ss:$4 sm:$0xff] %v806_v48 }
  0xcb   : > { %1088 = vst [vmem:[#allocation1 + $0x23] ss:$4 sm:$0xff] %v807_v60  ;;  %v631_v60 = vor.u32 %v629_v38, %v5656_v33 }
  0xcc   : > { %v1089_v61 = vld [vmem:[#allocation1] sm:$0xff]  ;;  %1228 = vst.msk [vmem:[#allocation2 + $0x6c] sm:$0xf] %vm437_vm0, %v1072_v52  ;;  %v5665_v52 = vsel %vm2568_vm14, %v2686_v43, 0 }
  0xcd   : > { %1092 = vst [vmem:[#allocation1] ss:$4 sm:$0xff] %v808_v53  ;;  %2751 = vmatpush.bf16.msra.mxu1 %v5665_v52  ;;  %v5686_v10 = vsel %vm5215_vm8, 0, %v631_v60  ;;  %v4739_v60 = vld [vmem:[%s7572_s3 + $0x14] sm:$0xf] }
  0xce   : > { %1094 = vst [vmem:[#allocation1 + $0x1] ss:$4 sm:$0xff] %v809_v56  ;;  %v510_v56 = vunpack.c.l.b16 %v436_v40  ;;  %v1788_v21 = vpop.permute.xlu1 %1787  ;;  %v821_v17 = vrot.slane %v5686_v10, 2  ;;  %v822_v24 = vrot.slane %v5686_v10, 3  ;;  %v823_v27 = vrot.slane %v5686_v10, 4 }
  0xcf   : > { %1096 = vst [vmem:[#allocation1 + $0x2] ss:$4 sm:$0xff] %v810_v57  ;;  %v5675_v57 = vld [vmem:[%s7572_s3] sm:$0xff] }
  0xd0   : > { %1098 = vst [vmem:[#allocation1 + $0x3] ss:$4 sm:$0xff] %v811_v51  ;;  %v1782_v51 = vpop.permute.xlu0 %1781  ;;  %v526_v13 = vpack.c.b16 %v510_v56, %v509_v55 }
  0xd1   : > { %1229 = vst.msk [vmem:[#allocation2 + $0x70] sm:$0xf] %vm437_vm0, %v1089_v61  ;;  %v2165_v61 = vpop.permute.xlu2 %2164  ;;  %2752 = vmatpush.bf16.msra.mxu1 %v5675_v57 }
  0xd2   : > { %v1090_v15 = vld [vmem:[#allocation1 + $0x20] sm:$0xff]  ;;  %1282 = vst.msk [vmem:[#allocation3 + $0x4] sm:$0xf] %vm437_vm0, %v1241_v37 }
  0xd3   : > { %1100 = vst [vmem:[#allocation1 + $0x20] ss:$4 sm:$0xff] %v812_v7 }
  0xd4   : > { %1102 = vst [vmem:[#allocation1 + $0x21] ss:$4 sm:$0xff] %v702_v34 }
  0xd5   : > { %1104 = vst [vmem:[#allocation1 + $0x22] ss:$4 sm:$0xff] %v5631_v6  ;;  %v703_v6 = vsel %vm5215_vm8, %v5625_v49, 0 }
  0xd6   : > { %1106 = vst [vmem:[#allocation1 + $0x23] ss:$4 sm:$0xff] %v813_v28  ;;  %v820_v28 = vrot.slane %v5686_v10, 1 }
  0xd7   : > { %v1107_v8 = vld [vmem:[#allocation1] sm:$0xff]  ;;  %1230 = vst.msk [vmem:[#allocation2 + $0x74] sm:$0xf] %vm437_vm0, %v1090_v15 }
  0xd8   : > { %1231 = vst.msk [vmem:[#allocation2 + $0x78] sm:$0xf] %vm437_vm0, %v1107_v8  ;;  %v1784_v29 = vpop.permute.xlu0 %1783 }
  0xd9   : > { %1110 = vst [vmem:[#allocation1] ss:$4 sm:$0xff] %v814_v9  ;;  %v633_v9 = vshrl.u32 %v526_v13, 16  ;;  %v2167_v22 = vpop.permute.xlu2 %2166 }
  0xda   : > { %1112 = vst [vmem:[#allocation1 + $0x1] ss:$4 sm:$0xff] %v815_v25 }
  0xdb   : > { %1114 = vst [vmem:[#allocation1 + $0x2] ss:$4 sm:$0xff] %v816_v23 }
  0xdc   : > { %1116 = vst [vmem:[#allocation1 + $0x3] ss:$4 sm:$0xff] %v817_v31  ;;  %v5706_v31 = vrot.slane %v633_v9, 7 }
  0xdd   : > { %v1108_v35 = vld [vmem:[#allocation1 + $0x20] sm:$0xff]  ;;  %1900 = vst.msk [vmem:[#allocation3 + $0x4] sm:$0xf] %vm1898_vm12, %v1778_v42 }
  0xde   : > { %1232 = vst.msk [vmem:[#allocation2 + $0x7c] sm:$0xf] %vm437_vm0, %v1108_v35  ;;  %v1246_v42 = vld [vmem:[#allocation2 + $0x18] sm:$0xf] }
  0xdf   : > { %v5659_v11 = vld [vmem:[#allocation2 + $0x78] sm:$0xf]  ;;  %2283 = vst.msk [vmem:[#allocation3 + $0x4] sm:$0xf] %vm2281_vm13, %v2161_v36  ;;  %v636_v36 = vshll.u32 %v526_v13, 16 }
  0xe0   : > { %v1352_v41 = vld [vmem:[#allocation2 + $0x78] sm:$0xf]  ;;  %v2125_v48 = vrot.slane %v5659_v11, 5  ;;  %1284 = vst.msk [vmem:[#allocation3 + $0xc] sm:$0xf] %vm437_vm0, %v1243_v50  ;;  %v5715_v50 = vpop.permute.xlu1 %2172 }
  0xe1   : > { %v1666_v44 = vshll.u32 %v1352_v41, 16  ;;  %v1670_v47 = vshrl.u32 %v1352_v41, 16  ;;  %1902 = vst.msk [vmem:[#allocation3 + $0xc] sm:$0xf] %vm1898_vm12, %v1782_v51  ;;  %v825_v51 = vrot.slane %v5686_v10, 6  ;;  %v2169_v13 = vpop.permute.xlu2 %2168 }
  0xe2   : > { %v2127_v62 = vrot.slane %v2125_v48, 4  ;;  %2285 = vst.msk [vmem:[#allocation3 + $0xc] sm:$0xf] %vm2281_vm13, %v2165_v61  ;;  %v826_v61 = vrot.slane %v5686_v10, 7 }
  0xe3   : > { %v5667_v53 = vrot.slane %v1666_v44, 5  ;;  %v1672_v54 = vrot.slane %v1670_v47, 4  ;;  %v1125_v2 = vld [vmem:[#allocation1] sm:$0xff]  ;;  %1118 = vst [vmem:[#allocation1 + $0x20] ss:$4 sm:$0xff] %v818_v3  ;;  %v824_v47 = vrot.slane %v5686_v10, 5 }
  0xe4   : > { %1233 = vst.msk [vmem:[#allocation2 + $0x80] sm:$0xf] %vm437_vm0, %v1125_v2 }
  0xe5   : > { %v1673_v58 = vor.u32 %v1672_v54, %v5667_v53  ;;  %v1982_v1 = vld [vmem:[#allocation2 + $0x7c] sm:$0xf]  ;;  %1120 = vst [vmem:[#allocation1 + $0x21] ss:$4 sm:$0xff] %v819_v63  ;;  %v638_v54 = vor.u32 %v636_v36, %v5706_v31 }
  0xe6   : > { %v1353_v4 = vld [vmem:[#allocation2 + $0x7c] sm:$0xf]  ;;  %v2128_v14 = vrot.slane %v1982_v1, 5  ;;  %v4957_v8 = vld [vmem:[#allocation3] sm:$0xff]  ;;  %1122 = vst [vmem:[#allocation1 + $0x22] ss:$4 sm:$0xff] %v703_v6 }
  0xe7   : > { %v1674_v7 = vrot.slane %v1673_v58, 4  ;;  %v1676_v34 = vshll.u32 %v1353_v4, 16  ;;  %v1680_v16 = vshrl.u32 %v1353_v4, 16  ;;  %1124 = vst [vmem:[#allocation1 + $0x23] ss:$4 sm:$0xff] %v5686_v10  ;;  %4838 = vmatmul.msk.bf16.vlgmr.msra.gmra.mxu1 %vm2513_vm15, %v4957_v8  ;;  %v2509_v58 = vunpack.c.l.b16 %v4739_v60 }
  0xe8   : > { %v2129_v15 = vsel %vm5245_vm11, %v2127_v62, %v2128_v14  ;;  %1128 = vst [vmem:[#allocation1] ss:$4 sm:$0xff] %v820_v28  ;;  %v2130_v23 = vrot.slane %v2128_v14, 4  ;;  %v5731_v63 = vsel %vm5215_vm8, 0, %v638_v54  ;;  %v704_v4 = vsel %vm5215_vm8, %v5656_v33, 0  ;;  %v1790_v9 = vpop.permute.xlu1 %1789 }
  0xe9   : > { %v1678_v19 = vrot.slane %v1676_v34, 5  ;;  %v1682_v20 = vrot.slane %v1680_v16, 4  ;;  %2218 = vrot.lane.b32.xlu2 %v2129_v15, %s5114_s29  ;;  %1130 = vst [vmem:[#allocation1 + $0x1] ss:$4 sm:$0xff] %v821_v17  ;;  %v2511_v62 = vpack.c.b16 %v2509_v58, %v2509_v58  ;;  %v1245_v10 = vld [vmem:[#allocation2 + $0x14] sm:$0xf] }
  0xea   : > { %1132 = vst [vmem:[#allocation1 + $0x2] ss:$4 sm:$0xff] %v822_v24  ;;  %v4976_v34 = vld [vmem:[%s7572_s3 + $0xc] sm:$0xff]  ;;  %v5079_v16 = vld [vmem:[#allocation3 + $0x8] sm:$0xff]   ;;  %v827_v6 = vrot.slane %v5731_v63, 1  ;;  %v828_v28 = vrot.slane %v5731_v63, 2 }
  0xeb   : > { %v1679_v49 = vsel %vm5202_vm5, %v1674_v7, %v1678_v19  ;;  %v1683_v25 = vor.u32 %v1682_v20, %v1678_v19  ;;  %v1983_v32 = vld [vmem:[#allocation2 + $0x80] sm:$0xf]  ;;  %1134 = vst [vmem:[#allocation1 + $0x3] ss:$4 sm:$0xff] %v823_v27  ;;  %v1786_v7 = vpop.permute.xlu0 %1785  ;;  %v2570_v14 = vsel %vm2568_vm14, %v2511_v62, 0  ;;  %v829_v33 = vrot.slane %v5731_v63, 3 }
  0xec   : > { %1835 = vrot.lane.b32.xlu1 %v1679_v49, %s5113_s28  ;;  %v1354_v38 = vld [vmem:[#allocation2 + $0x80] sm:$0xf]  ;;  %v2131_v35 = vrot.slane %v1983_v32, 5  ;;  %1285 = vst.msk [vmem:[#allocation3 + $0x10] sm:$0xf] %vm437_vm0, %v1244_v46  ;;  %2578 = vmatpush.bf16.msra.mxu0 %v2570_v14  ;;  %v832_v58 = vrot.slane %v5731_v63, 6 }
  0xed   : > { %v1684_v37 = vrot.slane %v1683_v25, 4  ;;  %v1686_v43 = vshll.u32 %v1354_v38, 16  ;;  %v1690_v39 = vshrl.u32 %v1354_v38, 16  ;;  %1903 = vst.msk [vmem:[#allocation3 + $0x10] sm:$0xf] %vm1898_vm12, %v1784_v29  ;;  %5083 = vmatpush.bf16.msra.mxu3 %v2570_v14 }
  0xee   : > { %v2132_v40 = vsel %vm5245_vm11, %v2130_v23, %v2131_v35  ;;  %v1126_v44 = vld [vmem:[#allocation1 + $0x20] sm:$0xff]  ;;  %2286 = vst.msk [vmem:[#allocation3 + $0x10] sm:$0xf] %vm2281_vm13, %v2167_v22  ;;  %v2133_v2 = vrot.slane %v2131_v35, 4  ;;  %v5080_v49 = vld [vmem:[#allocation3 + $0x8] sm:$0xf0] }
  0xef   : > { %v1688_v41 = vrot.slane %v1686_v43, 5  ;;  %2220 = vrot.lane.b32.xlu0 %v2132_v40, %s5114_s29  ;;  %1234 = vst.msk [vmem:[#allocation2 + $0x84] sm:$0xf] %vm437_vm0, %v1126_v44  ;;  %v1692_v56 = vrot.slane %v1690_v39, 4  ;;  %v5081_v24 = vld [vmem:[#allocation3 + $0x8] sm:$0xe]  ;;  %v5759_v39 = vpop.permute.xlu2 %1793 }
  0xf0   : > { %1287 = vst.msk [vmem:[#allocation3 + $0x18] sm:$0xf] %vm437_vm0, %v1246_v42  ;;  %2579 = vmatpush.bf16.msra.mxu0 %v4976_v34  ;;  %v1247_v40 = vld [vmem:[#allocation2 + $0x1c] sm:$0xf] }
  0xf1   : > { %v1689_v55 = vsel %vm5202_vm5, %v1684_v37, %v1688_v41  ;;  %1905 = vst.msk [vmem:[#allocation3 + $0x18] sm:$0xf] %vm1898_vm12, %v1788_v21  ;;  %v1693_v1 = vor.u32 %v1692_v56, %v1688_v41  ;;  %5084 = vmatpush.bf16.msra.mxu3 %v4976_v34  ;;  %v5755_v37 = vld [vmem:[#allocation2 + $0x48] sm:$0xf]  ;;  %v5082_v41 = vor.u32 %v5081_v24, %v5080_v49  ;;  %v831_v56 = vrot.slane %v5731_v63, 5  ;;  %v1792_v34 = vpop.permute.xlu1 %1791 }
  0xf2   : > { %1837 = vrot.lane.b32.xlu2 %v1689_v55, %s5113_s28  ;;  %v1143_v3 = vld [vmem:[#allocation1] sm:$0xff]  ;;  %1136 = vst [vmem:[#allocation1 + $0x20] ss:$4 sm:$0xff] %v824_v47  ;;  %v830_v55 = vrot.slane %v5731_v63, 4  ;;  %v2089_v62 = vrot.slane %v5755_v37, 5  ;;  %v705_v37 = vsel %vm5215_vm8, %v5706_v31, 0 }
  0xf3   : > { %1235 = vst.msk [vmem:[#allocation2 + $0x88] sm:$0xf] %vm437_vm0, %v1143_v3  ;;  %v1694_v21 = vrot.slane %v1693_v1, 4  ;;  %v5757_v43 = vpop.permute.xlu0 %2170  ;;  %v2467_v1 = vrot.slane %v5082_v41, 1  ;;  %v1250_v41 = vld [vmem:[#allocation2 + $0x28] sm:$0xf] }
  0xf4   : > { %1138 = vst [vmem:[#allocation1 + $0x21] ss:$4 sm:$0xff] %v825_v51  ;;  %vm1946_vm8 = vsmask.f32 7942 }
  0xf5   : > { %1140 = vst [vmem:[#allocation1 + $0x22] ss:$4 sm:$0xff] %v826_v61  ;;  %5085 = vmatpush.bf16.msrb.mxu3 %v5665_v52  ;;  %v2088_v61 = vrot.slane %v2086_v18, 4  ;;  %v833_v18 = vrot.slane %v5731_v63, 7  ;;  %vm1947_vm10 = vmand %vm1945_vm9, %vm1946_vm8 }
  0xf6   : > { %v1984_v15 = vld [vmem:[#allocation2 + $0x84] sm:$0xf]  ;;  %1142 = vst [vmem:[#allocation1 + $0x23] ss:$4 sm:$0xff] %v704_v4  ;;  %v5782_v4 = vld [vmem:[#allocation2 + $0x4c] sm:$0xf] }
  0xf7   : > { %v1355_v19 = vld [vmem:[#allocation2 + $0x84] sm:$0xf]  ;;  %v2134_v20 = vrot.slane %v1984_v15, 5  ;;  %1286 = vst.msk [vmem:[#allocation3 + $0x14] sm:$0xf] %vm437_vm0, %v1245_v10  ;;  %4839 = vmatmul.msk.bf16.gmra.mxu1 %vm2513_vm15, %v5079_v16 }
  0xf8   : > { %v1696_v17 = vshll.u32 %v1355_v19, 16  ;;  %v1700_v8 = vshrl.u32 %v1355_v19, 16  ;;  %1904 = vst.msk [vmem:[#allocation3 + $0x14] sm:$0xf] %vm1898_vm12, %v1786_v7  ;;  %v1560_v19 = vshrl.u32 %v5782_v4, 16 }
  0xf9   : > { %v2135_v25 = vsel %vm5245_vm11, %v2133_v2, %v2134_v20  ;;  %v2136_v36 = vrot.slane %v2134_v20, 4  ;;  %2287 = vst.msk [vmem:[#allocation3 + $0x14] sm:$0xf] %vm2281_vm13, %v2169_v13  ;;  %5086 = vmatpush.bf16.msrb.mxu3 %v5675_v57  ;;  %v4858_v57 = vld [vmem:[%s7572_s3 + $0x20] sm:$0xf]  ;;  %v1550_v13 = vshrl.u32 %v5540_v26, 16  ;;  %v2090_v2 = vsel %vm5245_vm11, %v2088_v61, %v2089_v62 }
  0xfa   : > { %v1698_v27 = vrot.slane %v1696_v17, 5  ;;  %v1702_v23 = vrot.slane %v1700_v8, 4  ;;  %2222 = vrot.lane.b32.xlu1 %v2135_v25, %s5114_s29  ;;  %v1985_v29 = vld [vmem:[#allocation2 + $0x88] sm:$0xf]  ;;  %1146 = vst [vmem:[#allocation1] ss:$4 sm:$0xff] %v5731_v63  ;;  %v3021_v7 = vunpack.c.l.b16 %v4858_v57 }
  0xfb   : > { %v1356_v46 = vld [vmem:[#allocation2 + $0x88] sm:$0xf]  ;;  %v2137_v32 = vrot.slane %v1985_v29, 5  ;;  %1148 = vst [vmem:[#allocation1 + $0x1] ss:$4 sm:$0xff] %v827_v6  ;;  %v1556_v6 = vshll.u32 %v5782_v4, 16 }
  0xfc   : > { %v1699_v22 = vsel %vm5202_vm5, %v1694_v21, %v1698_v27  ;;  %v1703_v38 = vor.u32 %v1702_v23, %v1698_v27  ;;  %v1706_v35 = vshll.u32 %v1356_v46, 16  ;;  %v1710_v52 = vshrl.u32 %v1356_v46, 16  ;;  %1150 = vst [vmem:[#allocation1 + $0x2] ss:$4 sm:$0xff] %v828_v28  ;;  %v1249_v26 = vld [vmem:[#allocation2 + $0x24] sm:$0xf]  ;;  %v5795_v28 = vpop.permute.xlu0 %2174 }
  0xfd   : > { %1839 = vrot.lane.b32.xlu0 %v1699_v22, %s5113_s28  ;;  %v2138_v42 = vsel %vm5245_vm11, %v2136_v36, %v2137_v32  ;;  %v1144_v60 = vld [vmem:[#allocation1 + $0x20] sm:$0xff]  ;;  %1152 = vst [vmem:[#allocation1 + $0x3] ss:$4 sm:$0xff] %v829_v33  ;;  %v3023_v10 = vpack.c.b16 %v3021_v7, %v3021_v7  ;;  %v2139_v16 = vrot.slane %v2137_v32, 4  ;;  %v5797_v33 = vld [vmem:[#allocation2 + $0x4c] sm:$0xf] }
  0xfe   : > { %v1704_v44 = vrot.slane %v1703_v38, 4  ;;  %v1708_v47 = vrot.slane %v1706_v35, 5  ;;  %2224 = vrot.lane.b32.xlu2 %v2138_v42, %s5114_s29  ;;  %1236 = vst.msk [vmem:[#allocation2 + $0x8c] sm:$0xf] %vm437_vm0, %v1144_v60  ;;  %v1712_v54 = vrot.slane %v1710_v52, 4  ;;  %v5809_v21 = vld [vmem:[%s7572_s3 + $0x18] sm:$0xff] }
  0xff   : > { %1288 = vst.msk [vmem:[#allocation3 + $0x1c] sm:$0xf] %vm437_vm0, %v1247_v40  ;;  %v5804_v20 = vsel %vm2568_vm14, %v3023_v10, 0  ;;  %v4861_v36 = vld [vmem:[#allocation3 + $0x10] sm:$0xc]  ;;  %v2091_v32 = vrot.slane %v2089_v62, 4 }
 0x100   : > { %v1709_v51 = vsel %vm5202_vm5, %v1704_v44, %v1708_v47  ;;  %1906 = vst.msk [vmem:[#allocation3 + $0x1c] sm:$0xf] %vm1898_vm12, %v1790_v9  ;;  %v5780_v3 = vld [vmem:[#allocation3 + $0x10] sm:$0xff]  ;;  %v1713_v5 = vor.u32 %v1712_v54, %v1708_v47  ;;  %3088 = vmatpush.bf16.msra.mxu2 %v5804_v20  ;;  %v1248_v9 = vld [vmem:[#allocation2 + $0x20] sm:$0xf]  ;;  %v2092_v38 = vrot.slane %v5797_v33, 5 }
 0x101   : > { %2289 = vst.msk [vmem:[#allocation3 + $0x1c] sm:$0xf] %vm2281_vm13, %v5715_v50  ;;  %v2468_v14 = vrot.slane %v5780_v3, 1  ;;  %v5793_v50 = vpop.permute.xlu2 %1795  ;;  %v4977_v23 = vld [vmem:[#allocation3 + $0x10] sm:$0xf0]  ;;  %v1552_v35 = vrot.slane %v1550_v13, 4 }
 0x102   : > { %1841 = vrot.lane.b32.xlu1 %v1709_v51, %s5113_s28  ;;  %1154 = vst [vmem:[#allocation1 + $0x20] ss:$4 sm:$0xff] %v830_v55  ;;  %v1714_v24 = vrot.slane %v1713_v5, 4  ;;  %v5832_v52 = vrot.slane %v1556_v6, 5  ;;  %v4862_v42 = vor.u32 %v4977_v23, %v4861_v36  ;;  %v5837_v44 = vld [vmem:[#allocation2 + $0x50] sm:$0xf]  ;;  %v2177_v55 = vpop.permute.xlu1 %2176  ;;  %v2093_v57 = vsel %vm5245_vm11, %v2091_v32, %v2092_v38 }
 0x103   : > { %1156 = vst [vmem:[#allocation1 + $0x21] ss:$4 sm:$0xff] %v831_v56  ;;  %v2469_v15 = vsel %vm2466_vm2, %v2467_v1, %v2468_v14  ;;  %v1562_v59 = vrot.slane %v1560_v19, 4  ;;  %v1566_v10 = vshll.u32 %v5837_v44, 16 }
 0x104   : > { %v1161_v63 = vld [vmem:[#allocation1] sm:$0xff]  ;;  %1158 = vst [vmem:[#allocation1 + $0x22] ss:$4 sm:$0xff] %v832_v58  ;;  %4812 = vmatmul.msk.bf16.vlgmr.msra.gmra.mxu0 %vm2513_vm15, %v2469_v15  ;;  %3089 = vmatpush.bf16.msra.mxu2 %v5809_v21  ;;  %v1798_v47 = vpop.permute.xlu0 %1797  ;;  %v2979_v4 = vrot.slane %v4862_v42, 2 }
 0x105   : > { %v1986_v17 = vld [vmem:[#allocation2 + $0x8c] sm:$0xf]  ;;  %1237 = vst.msk [vmem:[#allocation2 + $0x90] sm:$0xf] %vm437_vm0, %v1161_v63 }
 0x106   : > { %v1357_v8 = vld [vmem:[#allocation2 + $0x8c] sm:$0xf]  ;;  %v2140_v49 = vrot.slane %v1986_v17, 5  ;;  %2192 = vrot.lane.b32.xlu2 %v2090_v2, %s5114_s29  ;;  %1160 = vst [vmem:[#allocation1 + $0x23] ss:$4 sm:$0xff] %v833_v18  ;;  %v1563_v18 = vor.u32 %v1562_v59, %v5832_v52  ;;  %v5880_v17 = vrot.slane %v1566_v10, 5 }
 0x107   : > { %v1716_v25 = vshll.u32 %v1357_v8, 16  ;;  %v1720_v27 = vshrl.u32 %v1357_v8, 16  ;;  %2288 = vst.msk [vmem:[#allocation3 + $0x18] sm:$0xf] %vm2281_vm13, %v5757_v43  ;;  %4840 = vmatmul.msk.bf16.gmra.mxu1 %vm2513_vm15, %v5780_v3  ;;  %v1251_v63 = vld [vmem:[#allocation2 + $0x2c] sm:$0xf] }
 0x108   : > { %v2141_v29 = vsel %vm5245_vm11, %v2139_v16, %v2140_v49  ;;  %1290 = vst.msk [vmem:[#allocation3 + $0x24] sm:$0xf] %vm437_vm0, %v1249_v26  ;;  %v1553_v16 = vor.u32 %v1552_v35, %v5549_v12  ;;  %v1971_v10 = vld [vmem:[#allocation2 + $0x50] sm:$0xf] }
 0x109   : > { %v1718_v46 = vrot.slane %v1716_v25, 5  ;;  %v1722_v22 = vrot.slane %v1720_v27, 4  ;;  %2226 = vrot.lane.b32.xlu0 %v2141_v29, %s5114_s29  ;;  %1908 = vst.msk [vmem:[#allocation3 + $0x24] sm:$0xf] %vm1898_vm12, %v5759_v39  ;;  %v2142_v39 = vrot.slane %v2140_v49, 4  ;;  %v2181_v31 = vpop.permute.xlu2 %2180 }
 0x10a   : > { %1289 = vst.msk [vmem:[#allocation3 + $0x20] sm:$0xf] %vm437_vm0, %v1248_v9  ;;  %v1554_v9 = vrot.slane %v1553_v16, 4  ;;  %v2179_v49 = vpop.permute.xlu1 %2178  ;;  %v1252_v25 = vld [vmem:[#allocation2 + $0x30] sm:$0xf] }
 0x10b   : > { %v1719_v43 = vsel %vm5202_vm5, %v1714_v24, %v1718_v46  ;;  %v1723_v40 = vor.u32 %v1722_v22, %v1718_v46  ;;  %1907 = vst.msk [vmem:[#allocation3 + $0x20] sm:$0xf] %vm1898_vm12, %v1792_v34 }
 0x10c   : > { %1843 = vrot.lane.b32.xlu1 %v1719_v43, %s5113_s28  ;;  %v5839_v60 = vld [vmem:[#allocation2 + $0x90] sm:$0xf]  ;;  %1164 = vst [vmem:[#allocation1] ss:$4 sm:$0xff] %v705_v37  ;;  %v1800_v24 = vpop.permute.xlu0 %1799  ;;  %v1559_v32 = vsel %vm5202_vm5, %v1554_v9, %v5832_v52 }
 0x10d   : > { %v1358_v54 = vld [vmem:[#allocation2 + $0x90] sm:$0xf]  ;;  %v2143_v56 = vrot.slane %v5839_v60, 5  ;;  %v1162_v58 = vld [vmem:[#allocation1 + $0x20] sm:$0xff]  ;;  %v1724_v62 = vrot.slane %v1723_v40, 4 }
 0x10e   : > { %v1726_v51 = vshll.u32 %v1358_v54, 16  ;;  %v1730_v61 = vshrl.u32 %v1358_v54, 16  ;;  %1238 = vst.msk [vmem:[#allocation2 + $0x94] sm:$0xf] %vm437_vm0, %v1162_v58  ;;  %v5847_v1 = vld [vmem:[#allocation3 + $0x18] sm:$0xff] }
 0x10f   : > { %v5849_v7 = vld [vmem:[#allocation3 + $0x18] sm:$0xff]  ;;  %1291 = vst.msk [vmem:[#allocation3 + $0x28] sm:$0xf] %vm437_vm0, %v1250_v41  ;;  %v2144_v34 = vsel %vm5245_vm11, %v2142_v39, %v2143_v56  ;;  %v2980_v2 = vrot.slane %v5847_v1, 2  ;;  %v2145_v59 = vrot.slane %v2143_v56, 4 }
 0x110   : > { %v1728_v13 = vrot.slane %v1726_v51, 5  ;;  %v1732_v5 = vrot.slane %v1730_v61, 4  ;;  %1909 = vst.msk [vmem:[#allocation3 + $0x28] sm:$0xf] %vm1898_vm12, %v5793_v50  ;;  %v2470_v26 = vrot.slane %v5849_v7, 1 }
 0x111   : > { %2194 = vrot.lane.b32.xlu0 %v2093_v57, %s5114_s29  ;;  %2290 = vst.msk [vmem:[#allocation3 + $0x20] sm:$0xf] %vm2281_vm13, %v5795_v28  ;;  %v2981_v12 = vsel %vm2978_vm3, %v2979_v4, %v2980_v2  ;;  %v1564_v28 = vrot.slane %v1563_v18, 4  ;;  %v2183_v8 = vpop.permute.xlu2 %2182  ;;  %v5904_v41 = vld [vmem:[#allocation2 + $0x9c] sm:$0xf] }
 0x112   : > { %v1729_v6 = vsel %vm5202_vm5, %v1724_v62, %v1728_v13  ;;  %v1733_v15 = vor.u32 %v1732_v5, %v1728_v13  ;;  %2291 = vst.msk [vmem:[#allocation3 + $0x24] sm:$0xf] %vm2281_vm13, %v2177_v55  ;;  %v2471_v50 = vsel %vm2466_vm2, %v2468_v14, %v2470_v26  ;;  %4935 = vmatmul.msk.bf16.vlgmr.msra.gmra.mxu2 %vm2513_vm15, %v2981_v12  ;;  %v1570_v62 = vshrl.u32 %v5837_v44, 16  ;;  %v1343_v13 = vld [vmem:[#allocation2 + $0x54] sm:$0xf] }
 0x113   : > { %1845 = vrot.lane.b32.xlu2 %v1729_v6, %s5113_s28  ;;  %v1165_v19 = vld [vmem:[#allocation1] sm:$0xff]  ;;  %1292 = vst.msk [vmem:[#allocation3 + $0x2c] sm:$0xf] %vm437_vm0, %v1251_v63  ;;  %v1569_v46 = vsel %vm5202_vm5, %v1564_v28, %v5880_v17  ;;  %v1256_v18 = vld [vmem:[#allocation2 + $0x40] sm:$0xf]  ;;  %v1580_v56 = vshrl.u32 %v1343_v13, 16 }
 0x114   : > { %2228 = vrot.lane.b32.xlu1 %v2144_v34, %s5114_s29  ;;  %1239 = vst.msk [vmem:[#allocation2 + $0x98] sm:$0x1] %vm440_vm1, %v1165_v19  ;;  %4813 = vmatmul.msk.bf16.gmra.mxu0 %vm2513_vm15, %v2471_v50  ;;  %v1734_v14 = vrot.slane %v1733_v15, 4  ;;  %v2185_v61 = vpop.permute.xlu0 %2184  ;;  %v1756_v34 = vshll.u32 %v5904_v41, 16  ;;  %v5924_v6 = vld [vmem:[#allocation2 + $0x9c] sm:$0xf] }
 0x115   : > { %v1359_v3 = vld [vmem:[#allocation2 + $0x94] sm:$0xf]  ;;  %1910 = vst.msk [vmem:[#allocation3 + $0x2c] sm:$0xf] %vm1898_vm12, %v1798_v47  ;;  %v1576_v12 = vshll.u32 %v1343_v13, 16  ;;  %v2094_v19 = vrot.slane %v2092_v38, 4 }
 0x116   : > { %v1988_v27 = vld [vmem:[#allocation2 + $0x94] sm:$0xf]  ;;  %v1736_v36 = vshll.u32 %v1359_v3, 16  ;;  %v1740_v23 = vshrl.u32 %v1359_v3, 16  ;;  %2293 = vst.msk [vmem:[#allocation3 + $0x2c] sm:$0xf] %vm2281_vm13, %v2181_v31 }
 0x117   : > { %v2146_v29 = vrot.slane %v1988_v27, 5  ;;  %4841 = vmatmul.msk.bf16.gmra.mxu1 %vm2513_vm15, %v5849_v7  ;;  %2292 = vst.msk [vmem:[#allocation3 + $0x28] sm:$0xf] %vm2281_vm13, %v2179_v49  ;;  %v2095_v28 = vrot.slane %v1971_v10, 5  ;;  %v5938_v49 = vrot.slane %v1756_v34, 5  ;;  %v1582_v1 = vrot.slane %v1580_v56, 4 }
 0x118   : > { %v1738_v22 = vrot.slane %v1736_v36, 5  ;;  %v1742_v35 = vrot.slane %v1740_v23, 4  ;;  %1293 = vst.msk [vmem:[#allocation3 + $0x30] sm:$0xf] %vm437_vm0, %v1252_v25  ;;  %v1572_v33 = vrot.slane %v1570_v62, 4  ;;  %v1578_v36 = vrot.slane %v1576_v12, 5 }
 0x119   : > { %v5897_v37 = vld [vmem:[#allocation3 + $0x20] sm:$0xff]  ;;  %1911 = vst.msk [vmem:[#allocation3 + $0x30] sm:$0xf] %vm1898_vm12, %v1800_v24  ;;  %v2148_v42 = vrot.slane %v2146_v29, 4  ;;  %v5910_v31 = vpop.permute.xlu2 %2186  ;;  %v2147_v60 = vsel %vm5245_vm11, %v2145_v59, %v2146_v29  ;;  %v5940_v24 = vld [vmem:[#allocation2 + $0x58] sm:$0xf] }
 0x11a   : > { %v1739_v43 = vsel %vm5202_vm5, %v1734_v14, %v1738_v22  ;;  %v1743_v40 = vor.u32 %v1742_v35, %v1738_v22  ;;  %2294 = vst.msk [vmem:[#allocation3 + $0x30] sm:$0xf] %vm2281_vm13, %v2183_v8  ;;  %v5912_v51 = vld [vmem:[#allocation3 + $0x20] sm:$0xff]  ;;  %v2982_v57 = vrot.slane %v5897_v37, 2  ;;  %v2152_v8 = vrot.slane %v5924_v6, 5 }
 0x11b   : > { %1813 = vrot.lane.b32.xlu2 %v1569_v46, %s5113_s28  ;;  %1847 = vrot.lane.b32.xlu0 %v1739_v43, %s5113_s28  ;;  %v1989_v52 = vld [vmem:[#allocation2 + $0x98] sm:$0xf]  ;;  %1297 = vst.msk [vmem:[#allocation3 + $0x40] sm:$0xf] %vm437_vm0, %v1256_v18  ;;  %v2472_v15 = vrot.slane %v5912_v51, 1  ;;  %v2096_v46 = vsel %vm5245_vm11, %v2094_v19, %v2095_v28  ;;  %v1586_v22 = vshll.u32 %v5940_v24, 16  ;;  %v1583_v35 = vor.u32 %v1582_v1, %v1578_v36 }
 0x11c   : > { %1811 = vrot.lane.b32.xlu1 %v1559_v32, %s5113_s28  ;;  %v1360_v39 = vld [vmem:[#allocation2 + $0x98] sm:$0xf]  ;;  %v2149_v47 = vrot.slane %v1989_v52, 5  ;;  %v1744_v54 = vrot.slane %v1743_v40, 4  ;;  %v2983_v50 = vsel %vm2978_vm3, %v2980_v2, %v2982_v57  ;;  %v1802_v2 = vpop.permute.xlu1 %1801  ;;  %v1804_v27 = vpop.permute.xlu0 %1803  ;;  %v1350_v14 = vld [vmem:[#allocation2 + $0x70] sm:$0xf] }
 0x11d   : > { %v1746_v55 = vshll.u32 %v1360_v39, 16  ;;  %v1750_v58 = vshrl.u32 %v1360_v39, 16  ;;  %v2473_v38 = vsel %vm2466_vm2, %v2470_v26, %v2472_v15  ;;  %v1351_v23 = vld [vmem:[#allocation2 + $0x74] sm:$0xf]  ;;  %v1254_v32 = vld [vmem:[#allocation2 + $0x38] sm:$0xf] }
 0x11e   : > { %v2150_v16 = vsel %vm5245_vm11, %v2148_v42, %v2149_v47  ;;  %v2151_v3 = vrot.slane %v2149_v47, 4  ;;  %v1253_v29 = vld [vmem:[#allocation2 + $0x34] sm:$0xf]  ;;  %v1646_v43 = vshll.u32 %v1350_v14, 16  ;;  %v1650_v40 = vshrl.u32 %v1350_v14, 16  ;;  %v5966_v47 = vld [vmem:[#allocation3 + $0x28] sm:$0xff] }
 0x11f   : > { %v1748_v4 = vrot.slane %v1746_v55, 5  ;;  %v1752_v5 = vrot.slane %v1750_v58, 4  ;;  %1294 = vst.msk [vmem:[#allocation3 + $0x34] sm:$0xf] %vm437_vm0, %v1253_v29  ;;  %v1972_v7 = vld [vmem:[#allocation2 + $0x54] sm:$0xf]  ;;  %v1573_v42 = vor.u32 %v1572_v33, %v5880_v17 }
 0x120   : > { %1912 = vst.msk [vmem:[#allocation3 + $0x34] sm:$0xf] %vm1898_vm12, %v1802_v2  ;;  %v2153_v52 = vsel %vm5245_vm11, %v2151_v3, %v2152_v8  ;;  %v1656_v39 = vshll.u32 %v1351_v23, 16  ;;  %v1660_v59 = vshrl.u32 %v1351_v23, 16  ;;  %v2098_v55 = vrot.slane %v1972_v7, 5  ;;  %v5977_v10 = vld [vmem:[#allocation3 + $0x28] sm:$0xff] }
 0x121   : > { %v1749_v44 = vsel %vm5202_vm5, %v1744_v54, %v1748_v4  ;;  %v1753_v63 = vor.u32 %v1752_v5, %v1748_v4  ;;  %v1808_v25 = vpop.permute.xlu2 %1807  ;;  %2295 = vst.msk [vmem:[#allocation3 + $0x34] sm:$0xf] %vm2281_vm13, %v2185_v61  ;;  %v2097_v54 = vrot.slane %v2095_v28, 4  ;;  %v1584_v58 = vrot.slane %v1583_v35, 4  ;;  %v5990_v19 = vld [vmem:[#allocation2 + $0x58] sm:$0xf] }
 0x122   : > { %4936 = vmatmul.msk.bf16.gmra.mxu2 %vm2513_vm15, %v2983_v50  ;;  %1915 = vst.msk [vmem:[#allocation3 + $0x40] sm:$0xf] %vm1898_vm12, %v1808_v25  ;;  %v1588_v17 = vrot.slane %v1586_v22, 5  ;;  %v5975_v61 = vrot.slane %v1646_v43, 5  ;;  %v1652_v62 = vrot.slane %v1650_v40, 4  ;;  %v1574_v13 = vrot.slane %v1573_v42, 4 }
 0x123   : > { %2230 = vrot.lane.b32.xlu2 %v2147_v60, %s5114_s29  ;;  %2232 = vrot.lane.b32.xlu0 %v2150_v16, %s5114_s29  ;;  %v1754_v9 = vrot.slane %v1753_v63, 4  ;;  %1295 = vst.msk [vmem:[#allocation3 + $0x38] sm:$0xf] %vm437_vm0, %v1254_v32  ;;  %v1658_v5 = vrot.slane %v1656_v39, 5  ;;  %v1662_v18 = vrot.slane %v1660_v59, 4  ;;  %v2984_v34 = vrot.slane %v5966_v47, 2 }
 0x124   : > { %1849 = vrot.lane.b32.xlu1 %v1749_v44, %s5113_s28  ;;  %4814 = vmatmul.msk.bf16.gmra.mxu0 %vm2513_vm15, %v2473_v38  ;;  %1913 = vst.msk [vmem:[#allocation3 + $0x38] sm:$0xf] %vm1898_vm12, %v1804_v27  ;;  %v1806_v4 = vpop.permute.xlu1 %1805  ;;  %v1255_v60 = vld [vmem:[#allocation2 + $0x3c] sm:$0xf]  ;;  %v2189_v56 = vpop.permute.xlu0 %2188  ;;  %v1589_v44 = vsel %vm5202_vm5, %v1584_v58, %v1588_v17  ;;  %v1653_v63 = vor.u32 %v1652_v62, %v5975_v61  ;;  %v1590_v28 = vshrl.u32 %v5940_v24, 16  ;;  %v2100_v25 = vrot.slane %v2098_v55, 4 }
 0x125   : > { %v1759_v26 = vsel %vm5202_vm5, %v1754_v9, %v5938_v49  ;;  %2296 = vst.msk [vmem:[#allocation3 + $0x38] sm:$0xf] %vm2281_vm13, %v5910_v31  ;;  %v1271_v16 = vld [vmem:[#allocation2 + $0x7c] sm:$0xf]  ;;  %v2099_v31 = vsel %vm5245_vm11, %v2097_v54, %v2098_v55  ;;  %v1579_v12 = vsel %vm5202_vm5, %v1574_v13, %v1578_v36  ;;  %v1663_v50 = vor.u32 %v1662_v18, %v1658_v5  ;;  %v6004_v38 = vld [vmem:[#allocation2 + $0x70] sm:$0xf] }
 0x126   : > { %1296 = vst.msk [vmem:[#allocation3 + $0x3c] sm:$0xf] %vm437_vm0, %v1255_v60  ;;  %v2474_v9 = vrot.slane %v5977_v10, 1  ;;  %v2985_v1 = vsel %vm2978_vm3, %v2982_v57, %v2984_v34  ;;  %v2101_v2 = vrot.slane %v5990_v19, 5  ;;  %v1654_v24 = vrot.slane %v1653_v63, 4 }
 0x127   : > { %4842 = vmatmul.msk.bf16.gmra.mxu1 %vm2513_vm15, %v5912_v51  ;;  %1914 = vst.msk [vmem:[#allocation3 + $0x3c] sm:$0xf] %vm1898_vm12, %v1806_v4  ;;  %v1664_v3 = vrot.slane %v1663_v50, 4  ;;  %v1592_v33 = vrot.slane %v1590_v28, 4  ;;  %v1345_v57 = vld [vmem:[#allocation2 + $0x5c] sm:$0xf] }
 0x128   : > { %2297 = vst.msk [vmem:[#allocation3 + $0x3c] sm:$0xf] %vm2281_vm13, %v2189_v56  ;;  %v2475_v37 = vsel %vm2466_vm2, %v2472_v15, %v2474_v9  ;;  %v1980_v27 = vld [vmem:[#allocation2 + $0x74] sm:$0xf]  ;;  %v2102_v14 = vsel %vm5245_vm11, %v2100_v25, %v2101_v2  ;;  %v1600_v36 = vshrl.u32 %v1345_v57, 16  ;;  %v2119_v23 = vrot.slane %v6004_v38, 5 }
 0x129   : > { %1312 = vst.msk [vmem:[#allocation3 + $0x7c] sm:$0xf] %vm437_vm0, %v1271_v16  ;;  %v1659_v29 = vsel %vm5202_vm5, %v1654_v24, %v1658_v5  ;;  %v1669_v51 = vsel %vm5202_vm5, %v1664_v3, %v5667_v53  ;;  %v1593_v15 = vor.u32 %v1592_v33, %v1588_v17  ;;  %vm445_vm1 = vcmask 58368   ;;  %v6023_v32 = vld [vmem:[#allocation3 + $0x30] sm:$0xff]  ;;  %v1346_v59 = vld [vmem:[#allocation2 + $0x60] sm:$0xf] }
 0x12a   : > { %v2122_v22 = vrot.slane %v1980_v27, 5  ;;  %446 = vst.msk [vmem:[#allocation2 + $0xa0] sm:$0x3] %vm445_vm1, %v5112_v0  ;;  %v2121_v7 = vrot.slane %v2119_v23, 4  ;;  %v1602_v53 = vrot.slane %v1600_v36, 4  ;;  %v6032_v42 = vld [vmem:[#allocation3 + $0x30] sm:$0xff] }
 0x12b   : > { %1851 = vrot.lane.b32.xlu2 %v1759_v26, %s5113_s28  ;;  %2234 = vrot.lane.b32.xlu0 %v2153_v52, %s5114_s29  ;;  %v1974_v26 = vld [vmem:[#allocation2 + $0x5c] sm:$0xf]  ;;  %v1594_v40 = vrot.slane %v1593_v15, 4  ;;  %v2986_v54 = vrot.slane %v6023_v32, 2  ;;  %v1257_v55 = vld [vmem:[#allocation2 + $0x44] sm:$0xf] }
 0x12c   : > { %2196 = vrot.lane.b32.xlu1 %v2096_v46, %s5114_s29  ;;  %v1596_v46 = vshll.u32 %v1345_v57, 16  ;;  %v2124_v35 = vrot.slane %v2122_v22, 4  ;;  %v2191_v43 = vpop.permute.xlu1 %2190  ;;  %v1810_v39 = vpop.permute.xlu0 %1809  ;;  %v2104_v58 = vrot.slane %v1974_v26, 5  ;;  %v1347_v17 = vld [vmem:[#allocation2 + $0x64] sm:$0xf]  ;;  %v2123_v62 = vsel %vm5245_vm11, %v2121_v7, %v2122_v22 }
 0x12d   : > { %2298 = vst.msk [vmem:[#allocation3 + $0x40] sm:$0xf] %vm2281_vm13, %v2191_v43  ;;  %v1975_v4 = vld [vmem:[#allocation2 + $0x60] sm:$0xf]  ;;  %v1620_v18 = vshrl.u32 %v1347_v17, 16  ;;  %v1606_v16 = vshll.u32 %v1346_v59, 16  ;;  %v2987_v11 = vsel %vm2978_vm3, %v2984_v34, %v2986_v54 }
 0x12e   : > { %v1598_v52 = vrot.slane %v1596_v46, 5  ;;  %1298 = vst.msk [vmem:[#allocation3 + $0x44] sm:$0xf] %vm437_vm0, %v1257_v55  ;;  %v2126_v5 = vsel %vm5245_vm11, %v2124_v35, %v2125_v48  ;;  %v1616_v63 = vshll.u32 %v1347_v17, 16  ;;  %v2106_v48 = vrot.slane %v2104_v58, 4 }
 0x12f   : > { %1916 = vst.msk [vmem:[#allocation3 + $0x44] sm:$0xf] %vm1898_vm12, %v1810_v39  ;;  %v2103_v19 = vrot.slane %v2101_v2, 4  ;;  %v1622_v28 = vrot.slane %v1620_v18, 4  ;;  %v1348_v34 = vld [vmem:[#allocation2 + $0x68] sm:$0xf] }
 0x130   : > { %v1603_v13 = vor.u32 %v1602_v53, %v1598_v52  ;;  %v1599_v60 = vsel %vm5202_vm5, %v1594_v40, %v1598_v52  ;;  %v1270_v24 = vld [vmem:[#allocation2 + $0x78] sm:$0xf]  ;;  %v1618_v3 = vrot.slane %v1616_v63, 5  ;;  %v1349_v33 = vld [vmem:[#allocation2 + $0x6c] sm:$0xf]  ;;  %v1626_v27 = vshll.u32 %v1348_v34, 16 }
 0x131   : > { %1311 = vst.msk [vmem:[#allocation3 + $0x78] sm:$0xf] %vm437_vm0, %v1270_v24  ;;  %v1636_v36 = vshll.u32 %v1349_v33, 16  ;;  %v6077_v26 = vld [vmem:[#allocation3 + $0x38] sm:$0xff]  ;;  %v1760_v55 = vshrl.u32 %v5904_v41, 16  ;;  %v2154_v30 = vrot.slane %v2152_v8, 4 }
 0x132   : > { %4937 = vmatmul.msk.bf16.gmra.mxu2 %vm2513_vm15, %v2985_v1  ;;  %v1604_v50 = vrot.slane %v1603_v13, 4  ;;  %v1608_v1 = vrot.slane %v1606_v16, 5  ;;  %v1623_v57 = vor.u32 %v1622_v28, %v1618_v3  ;;  %v1628_v7 = vrot.slane %v1626_v27, 5  ;;  %v6079_v39 = vld [vmem:[#allocation3 + $0x38] sm:$0xff]  ;;  %v1977_v16 = vld [vmem:[#allocation2 + $0x68] sm:$0xf] }
 0x133   : > { %1817 = vrot.lane.b32.xlu2 %v1589_v44, %s5113_s28  ;;  %2198 = vrot.lane.b32.xlu0 %v2099_v31, %s5114_s29  ;;  %v1610_v31 = vshrl.u32 %v1346_v59, 16  ;;  %v2476_v44 = vrot.slane %v6032_v42, 1  ;;  %v1638_v40 = vrot.slane %v1636_v36, 5  ;;  %v1272_v59 = vld [vmem:[#allocation2 + $0x80] sm:$0xf]  ;;  %v2988_v17 = vrot.slane %v6077_v26, 2 }
 0x134   : > { %1815 = vrot.lane.b32.xlu1 %v1579_v12, %s5113_s28  ;;  %4815 = vmatmul.msk.bf16.gmra.mxu0 %vm2513_vm15, %v2475_v37  ;;  %v2107_v12 = vrot.slane %v1975_v4, 5  ;;  %v2105_v37 = vsel %vm5245_vm11, %v2103_v19, %v2104_v58  ;;  %v1624_v22 = vrot.slane %v1623_v57, 4  ;;  %1313 = vst.msk [vmem:[#allocation3 + $0x80] sm:$0xf] %vm437_vm0, %v1272_v59  ;;  %v2478_v18 = vrot.slane %v6079_v39, 1 }
 0x135   : > { %v1612_v25 = vrot.slane %v1610_v31, 4  ;;  %v2477_v47 = vsel %vm2466_vm2, %v2474_v9, %v2476_v44  ;;  %v2989_v31 = vsel %vm2978_vm3, %v2986_v54, %v2988_v17  ;;  %v1362_v19 = vld [vmem:[#allocation2 + $0xa0] sm:$0x3]  ;;  %v1978_v28 = vld [vmem:[#allocation2 + $0x6c] sm:$0xf] }
 0x136   : > { %v2108_v2 = vsel %vm5245_vm11, %v2106_v48, %v2107_v12  ;;  %v2109_v46 = vrot.slane %v2107_v12, 4  ;;  %v1629_v58 = vsel %vm5202_vm5, %v1624_v22, %v1628_v7  ;;  %v2113_v48 = vrot.slane %v1977_v16, 5  ;;  %v1991_v36 = vld [vmem:[#allocation2 + $0xa0] sm:$0x3]  ;;  %v1258_v26 = vld [vmem:[#allocation2 + $0x48] sm:$0xf] }
 0x137   : > { %4843 = vmatmul.msk.bf16.gmra.mxu1 %vm2513_vm15, %v5977_v10  ;;  %v1609_v10 = vsel %vm5202_vm5, %v1604_v50, %v1608_v1  ;;  %v1613_v9 = vor.u32 %v1612_v25, %v1608_v1  ;;  %v1762_v12 = vrot.slane %v1760_v55, 4  ;;  %v2479_v50 = vsel %vm2466_vm2, %v2476_v44, %v2478_v18  ;;  %1299 = vst.msk [vmem:[#allocation3 + $0x48] sm:$0xf] %vm437_vm0, %v1258_v26  ;;  %v1278_v55 = vld [vmem:[#allocation2 + $0x98] sm:$0xf] }
 0x138   : > { %v1766_v25 = vshll.u32 %v1362_v19, 16  ;;  %v1770_v24 = vshrl.u32 %v1362_v19, 16  ;;  %v2155_v38 = vrot.slane %v1991_v36, 5  ;;  %1319 = vst.msk [vmem:[#allocation3 + $0x98] sm:$0xf] %vm437_vm0, %v1278_v55 }
 0x139   : > { %v1614_v43 = vrot.slane %v1613_v9, 4  ;;  %v1763_v44 = vor.u32 %v1762_v12, %v5938_v49  ;;  %v2115_v49 = vrot.slane %v2113_v48, 4  ;;  %v1260_v19 = vld [vmem:[#allocation2 + $0x50] sm:$0xf] }
 0x13a   : > { %v1772_v57 = vrot.slane %v1770_v24, 4  ;;  %1301 = vst.msk [vmem:[#allocation3 + $0x50] sm:$0xf] %vm437_vm0, %v1260_v19 }
 0x13b   : > { %1831 = vrot.lane.b32.xlu2 %v1659_v29, %s5113_s28  ;;  %1833 = vrot.lane.b32.xlu0 %v1669_v51, %s5113_s28  ;;  %v1640_v29 = vshrl.u32 %v1349_v33, 16  ;;  %v1976_v51 = vld [vmem:[#allocation2 + $0x64] sm:$0xf]  ;;  %v1619_v13 = vsel %vm5202_vm5, %v1614_v43, %v1618_v3  ;;  %v1275_v3 = vld [vmem:[#allocation2 + $0x8c] sm:$0xf]  ;;  %v1764_v33 = vrot.slane %v1763_v44, 4 }
 0x13c   : > { %2200 = vrot.lane.b32.xlu1 %v2102_v14, %s5114_s29  ;;  %v1630_v14 = vshrl.u32 %v1348_v34, 16  ;;  %v2110_v35 = vrot.slane %v1976_v51, 5  ;;  %1316 = vst.msk [vmem:[#allocation3 + $0x8c] sm:$0xf] %vm437_vm0, %v1275_v3 }
 0x13d   : > { %v1642_v52 = vrot.slane %v1640_v29, 4 }
 0x13e   : > { %v1632_v53 = vrot.slane %v1630_v14, 4  ;;  %v2111_v4 = vsel %vm5245_vm11, %v2109_v46, %v2110_v35  ;;  %v2112_v41 = vrot.slane %v2110_v35, 4  ;;  %v2156_v46 = vsel %vm5245_vm11, %v2154_v30, %v2155_v38 }
 0x142   : > { %4938 = vmatmul.msk.bf16.gmra.mxu2 %vm2513_vm15, %v2987_v11 }
 0x143   : > { %v6046_v56 = vpop.permute.xlu2 %2218  ;;  %2216 = vrot.lane.b32.xlu2 %v2126_v5, %s5114_s29  ;;  %1819 = vrot.lane.b32.xlu0 %v1599_v60, %s5113_s28  ;;  %v1643_v5 = vor.u32 %v1642_v52, %v1638_v40  ;;  %v1273_v60 = vld [vmem:[#allocation2 + $0x84] sm:$0xf] }
 0x144   : > { %2214 = vrot.lane.b32.xlu1 %v2123_v62, %s5114_s29  ;;  %4816 = vmatmul.msk.bf16.gmra.mxu0 %vm2513_vm15, %v2477_v47  ;;  %v1633_v62 = vor.u32 %v1632_v53, %v1628_v7  ;;  %1314 = vst.msk [vmem:[#allocation3 + $0x84] sm:$0xf] %vm437_vm0, %v1273_v60  ;;  %v2116_v47 = vrot.slane %v1978_v28, 5  ;;  %v1269_v28 = vld [vmem:[#allocation2 + $0x74] sm:$0xf] }
 0x145   : > { %v1644_v11 = vrot.slane %v1643_v5, 4  ;;  %1310 = vst.msk [vmem:[#allocation3 + $0x74] sm:$0xf] %vm437_vm0, %v1269_v28 }
 0x146   : > { %v1634_v63 = vrot.slane %v1633_v62, 4 }
 0x147   : > { %4844 = vmatmul.msk.bf16.gmra.mxu1 %vm2513_vm15, %v6032_v42  ;;  %v1649_v1 = vsel %vm5202_vm5, %v1644_v11, %v5975_v61  ;;  %v2114_v42 = vsel %vm5245_vm11, %v2112_v41, %v2113_v48  ;;  %v2118_v61 = vrot.slane %v2116_v47, 4  ;;  %v1268_v41 = vld [vmem:[#allocation2 + $0x70] sm:$0xf] }
 0x148   : > { %v1639_v32 = vsel %vm5202_vm5, %v1634_v63, %v1638_v40  ;;  %v1276_v40 = vld [vmem:[#allocation2 + $0x90] sm:$0xf]  ;;  %1309 = vst.msk [vmem:[#allocation3 + $0x70] sm:$0xf] %vm437_vm0, %v1268_v41 }
 0x149   : > { %v2120_v27 = vsel %vm5245_vm11, %v2118_v61, %v2119_v23  ;;  %v1259_v23 = vld [vmem:[#allocation2 + $0x4c] sm:$0xf]  ;;  %1317 = vst.msk [vmem:[#allocation3 + $0x90] sm:$0xf] %vm437_vm0, %v1276_v40 }
 0x14a   : > { %1300 = vst.msk [vmem:[#allocation3 + $0x4c] sm:$0xf] %vm437_vm0, %v1259_v23 }
 0x14b   : > { %2202 = vrot.lane.b32.xlu2 %v2105_v37, %s5114_s29  ;;  %2204 = vrot.lane.b32.xlu0 %v2108_v2, %s5114_s29  ;;  %v1768_v2 = vrot.slane %v1766_v25, 5  ;;  %v1274_v37 = vld [vmem:[#allocation2 + $0x88] sm:$0xf] }
 0x14c   : > { %v1838_v15 = vpop.permute.xlu2 %1837  ;;  %1821 = vrot.lane.b32.xlu1 %v1609_v10, %s5113_s28  ;;  %1315 = vst.msk [vmem:[#allocation3 + $0x88] sm:$0xf] %vm437_vm0, %v1274_v37  ;;  %v2117_v10 = vsel %vm5245_vm11, %v2115_v49, %v2116_v47  ;;  %vm2324_vm11 = vcmask 189569  }
 0x14d   : > { %1930 = vst.msk [vmem:[#allocation3 + $0x7c] sm:$0xf] %vm1898_vm12, %v1838_v15  ;;  %v1773_v29 = vor.u32 %v1772_v57, %v1768_v2  ;;  %v2157_v15 = vrot.slane %v2155_v38, 4  ;;  %v1265_v57 = vld [vmem:[#allocation2 + $0x64] sm:$0xf] }
 0x14e   : > { %1306 = vst.msk [vmem:[#allocation3 + $0x64] sm:$0xf] %vm437_vm0, %v1265_v57  ;;  %v1263_v38 = vld [vmem:[#allocation2 + $0x5c] sm:$0xf] }
 0x14f   : > { %v1774_v51 = vrot.slane %v1773_v29, 4  ;;  %1304 = vst.msk [vmem:[#allocation3 + $0x5c] sm:$0xf] %vm437_vm0, %v1263_v38 }
 0x152   : > { %4939 = vmatmul.msk.bf16.gmra.mxu2 %vm2513_vm15, %v2989_v31 }
 0x153   : > { %1825 = vrot.lane.b32.xlu2 %v1629_v58, %s5113_s28  ;;  %2206 = vrot.lane.b32.xlu0 %v2111_v4, %s5114_s29  ;;  %v1277_v58 = vld [vmem:[#allocation2 + $0x94] sm:$0xf] }
 0x154   : > { %1823 = vrot.lane.b32.xlu1 %v1619_v13, %s5113_s28  ;;  %4817 = vmatmul.msk.bf16.gmra.mxu0 %vm2513_vm15, %v2479_v50  ;;  %1318 = vst.msk [vmem:[#allocation3 + $0x94] sm:$0xf] %vm437_vm0, %v1277_v58 }
 0x157   : > { %4845 = vmatmul.msk.bf16.gmra.mxu1 %vm2513_vm15, %v6079_v39 }
 0x158   : > { %v6111_v54 = vpop.permute.xlu2 %2224 }
 0x15b   : > { %1827 = vrot.lane.b32.xlu2 %v1639_v32, %s5113_s28  ;;  %1829 = vrot.lane.b32.xlu0 %v1649_v1, %s5113_s28 }
 0x15c   : > { %2208 = vrot.lane.b32.xlu1 %v2114_v42, %s5114_s29 }
 0x15e   : > { %v1836_v34 = vpop.permute.xlu1 %1835 }
 0x15f   : > { %1929 = vst.msk [vmem:[#allocation3 + $0x78] sm:$0xf] %vm1898_vm12, %v1836_v34 }
 0x160   : > { %2312 = vst.msk [vmem:[#allocation3 + $0x78] sm:$0xf] %vm2281_vm13, %v6046_v56  ;;  %v2193_v14 = vpop.permute.xlu2 %2192  ;;  %v1769_v56 = vsel %vm5202_vm5, %v1764_v33, %v1768_v2  ;;  %vm1940_vm5 = vsmask.f32 1280 }
 0x161   : > { %v2221_v9 = vpop.permute.xlu0 %2220  ;;  %2299 = vst.msk [vmem:[#allocation3 + $0x44] sm:$0xf] %vm2281_vm13, %v2193_v14  ;;  %vm6377_vm7 = vmand %vm1939_vm4, %vm1940_vm5 }
 0x162   : > { %2313 = vst.msk [vmem:[#allocation3 + $0x7c] sm:$0xf] %vm2281_vm13, %v2221_v9 }
 0x163   : > { %2212 = vrot.lane.b32.xlu2 %v2120_v27, %s5114_s29  ;;  %1853 = vrot.lane.b32.xlu0 %v1769_v56, %s5113_s28 }
 0x164   : > { %2210 = vrot.lane.b32.xlu1 %v2117_v10, %s5114_s29  ;;  %v2754_v63 = vpop.f32.mrf.mxu1 }
 0x168   : > { %v6145_v22 = vld [vmem:[#allocation3 + $0x40] sm:$0xff] }
 0x169   : > { %v6147_v7 = vld [vmem:[#allocation3 + $0x40] sm:$0xff]  ;;  %v2990_v53 = vrot.slane %v6145_v22, 2  ;;  %v6179_v62 = vld [vmem:[#allocation3 + $0x78] sm:$0xff] }
 0x16a   : > { %v2480_v35 = vrot.slane %v6147_v7, 1  ;;  %4846 = vmatmul.msk.bf16.gmra.mxu1 %vm2513_vm15, %v6147_v7  ;;  %v2494_v60 = vrot.slane %v6179_v62, 1 }
 0x16b   : > { %1855 = vrot.lane.b32.xlu2 %v1774_v51, %s5113_s28  ;;  %2238 = vrot.lane.b32.xlu0 %v2157_v15, %s5114_s29  ;;  %v2991_v45 = vsel %vm2978_vm3, %v2988_v17, %v2990_v53 }
 0x16c   : > { %2236 = vrot.lane.b32.xlu1 %v2156_v46, %s5114_s29  ;;  %v2223_v6 = vpop.permute.xlu1 %2222  ;;  %v2481_v8 = vsel %vm2466_vm2, %v2478_v18, %v2480_v35  ;;  %4940 = vmatmul.msk.bf16.gmra.mxu2 %vm2513_vm15, %v2991_v45  ;;  %v1261_v18 = vld [vmem:[#allocation2 + $0x54] sm:$0xf]  ;;  %v1266_v46 = vld [vmem:[#allocation2 + $0x68] sm:$0xf]  ;;  %s235_s29 = scalar_lea.vmem %s7574_s5, %s4735_s20 }
 0x16d   : > { %v1846_v43 = vpop.permute.xlu2 %1845  ;;  %4818 = vmatmul.msk.bf16.gmra.mxu0 %vm2513_vm15, %v2481_v8  ;;  %1302 = vst.msk [vmem:[#allocation3 + $0x54] sm:$0xf] %vm437_vm0, %v1261_v18 }
 0x16e   : > { %1934 = vst.msk [vmem:[#allocation3 + $0x8c] sm:$0xf] %vm1898_vm12, %v1846_v43 }
 0x16f   : > { %v1840_v52 = vpop.permute.xlu0 %1839  ;;  %1307 = vst.msk [vmem:[#allocation3 + $0x68] sm:$0xf] %vm437_vm0, %v1266_v46 }
 0x170   : > { %1931 = vst.msk [vmem:[#allocation3 + $0x80] sm:$0xf] %vm1898_vm12, %v1840_v52 }
 0x171   : > { %2314 = vst.msk [vmem:[#allocation3 + $0x80] sm:$0xf] %vm2281_vm13, %v2223_v6 }
 0x174   : > { %v1842_v39 = vpop.permute.xlu1 %1841 }
 0x175   : > { %v1814_v59 = vpop.permute.xlu2 %1813  ;;  %1932 = vst.msk [vmem:[#allocation3 + $0x84] sm:$0xf] %vm1898_vm12, %v1842_v39 }
 0x176   : > { %2315 = vst.msk [vmem:[#allocation3 + $0x84] sm:$0xf] %vm2281_vm13, %v6111_v54  ;;  %v2756_v54 = vpop.f32.mrf.mxu1 }
 0x177   : > { %1918 = vst.msk [vmem:[#allocation3 + $0x4c] sm:$0xf] %vm1898_vm12, %v1814_v59 }
 0x17b   : > { %v2227_v17 = vpop.permute.xlu0 %2226 }
 0x17d   : > { %v2231_v4 = vpop.permute.xlu2 %2230  ;;  %v6181_v5 = vld [vmem:[#allocation3 + $0x80] sm:$0xff] }
 0x17e   : > { %v1844_v13 = vpop.permute.xlu1 %1843  ;;  %v2496_v16 = vrot.slane %v6181_v5, 1  ;;  %v2759_v2 = vpop.f32.mrf.mxu1 }
 0x17f   : > { %1933 = vst.msk [vmem:[#allocation3 + $0x88] sm:$0xf] %vm1898_vm12, %v1844_v13 }
 0x180   : > { %2316 = vst.msk [vmem:[#allocation3 + $0x88] sm:$0xf] %vm2281_vm13, %v2227_v17  ;;  %v2497_v31 = vsel %vm2466_vm2, %v2494_v60, %v2496_v16  ;;  %v1264_v17 = vld [vmem:[#allocation2 + $0x60] sm:$0xf] }
 0x181   : > { %4826 = vmatmul.msk.bf16.vlgmr.msra.gmra.mxu3 %vm2513_vm15, %v2497_v31  ;;  %v2581_v11 = vpop.f32.mrf.mxu0  ;;  %1305 = vst.msk [vmem:[#allocation3 + $0x60] sm:$0xf] %vm437_vm0, %v1264_v17 }
 0x182   : > { %5087 = vmatpush.bf16.msra.mxu3 %v5804_v20  ;;  %v2755_v3 = vadd.f32 %v2754_v63, %v2581_v11 }
 0x183   : > { %v2195_v48 = vpop.permute.xlu0 %2194 }
 0x185   : > { %v1852_v12 = vpop.permute.xlu2 %1851 }
 0x186   : > { %v2229_v50 = vpop.permute.xlu1 %2228  ;;  %1937 = vst.msk [vmem:[#allocation3 + $0x98] sm:$0xf] %vm1898_vm12, %v1852_v12  ;;  %5088 = vmatpush.bf16.msra.mxu3 %v5809_v21  ;;  %v1262_v21 = vld [vmem:[#allocation2 + $0x58] sm:$0xf]  ;;  %v2761_v6 = vpop.f32.mrf.mxu1 }
 0x187   : > { %2317 = vst.msk [vmem:[#allocation3 + $0x8c] sm:$0xf] %vm2281_vm13, %v2229_v50  ;;  %v1267_v50 = vld [vmem:[#allocation2 + $0x6c] sm:$0xf] }
 0x188   : > { %1303 = vst.msk [vmem:[#allocation3 + $0x58] sm:$0xf] %vm437_vm0, %v1262_v21 }
 0x189   : > { %v2583_v32 = vpop.f32.mrf.mxu0  ;;  %1308 = vst.msk [vmem:[#allocation3 + $0x6c] sm:$0xf] %vm437_vm0, %v1267_v50 }
 0x18a   : > { %v2757_v36 = vadd.f32 %v2756_v54, %v2583_v32 }
 0x18d   : > { %v1818_v1 = vpop.permute.xlu2 %1817  ;;  %v1848_v42 = vpop.permute.xlu0 %1847 }
 0x18e   : > { %v1812_v44 = vpop.permute.xlu1 %1811  ;;  %v6199_v20 = vld [vmem:[#allocation3 + $0x88] sm:$0xff]  ;;  %1920 = vst.msk [vmem:[#allocation3 + $0x54] sm:$0xf] %vm1898_vm12, %v1818_v1  ;;  %v2764_v19 = vpop.f32.mrf.mxu1 }
 0x18f   : > { %1935 = vst.msk [vmem:[#allocation3 + $0x90] sm:$0xf] %vm1898_vm12, %v1848_v42  ;;  %v2498_v25 = vrot.slane %v6199_v20, 1 }
 0x190   : > { %2318 = vst.msk [vmem:[#allocation3 + $0x90] sm:$0xf] %vm2281_vm13, %v2231_v4 }
 0x191   : > { %1917 = vst.msk [vmem:[#allocation3 + $0x48] sm:$0xf] %vm1898_vm12, %v1812_v44  ;;  %v2499_v47 = vsel %vm2466_vm2, %v2496_v16, %v2498_v25  ;;  %v2586_v24 = vpop.f32.mrf.mxu0 }
 0x192   : > { %2300 = vst.msk [vmem:[#allocation3 + $0x48] sm:$0xf] %vm2281_vm13, %v2195_v48  ;;  %4827 = vmatmul.msk.bf16.gmra.mxu3 %vm2513_vm15, %v2499_v47  ;;  %v2760_v13 = vadd.f32 %v2759_v2, %v2586_v24 }
 0x195   : > { %v1832_v34 = vpop.permute.xlu2 %1831  ;;  %v2233_v61 = vpop.permute.xlu0 %2232 }
 0x196   : > { %v1850_v33 = vpop.permute.xlu1 %1849  ;;  %1927 = vst.msk [vmem:[#allocation3 + $0x70] sm:$0xf] %vm1898_vm12, %v1832_v34  ;;  %v3091_v49 = vpop.f32.mrf.mxu2 }
 0x197   : > { %1936 = vst.msk [vmem:[#allocation3 + $0x94] sm:$0xf] %vm1898_vm12, %v1850_v33  ;;  %v6213_v37 = vadd.f32 %v3091_v49, %v2755_v3  ;;  %v2766_v2 = vpop.f32.mrf.mxu1 }
 0x198   : > { %2319 = vst.msk [vmem:[#allocation3 + $0x94] sm:$0xf] %vm2281_vm13, %v2233_v61 }
 0x199   : > { %v6216_v27 = vrot.slane %v6213_v37, 2  ;;  %v6219_v14 = vrot.slane %v6213_v37, 4  ;;  %v6222_v56 = vrot.slane %v6213_v37, 6  ;;  %3445 = vst [vmem:[#allocation1] ss:$4 sm:$0xff] %v6213_v37  ;;  %v2588_v30 = vpop.f32.mrf.mxu0 }
 0x19a   : > { %v2762_v22 = vadd.f32 %v2761_v6, %v2588_v30 }
 0x19b   : > { %7755 = vst [vmem:[#allocation4_spill] sm:$0xff] %v6222_v56 }
 0x19c   : > { %3447 = vst [vmem:[#allocation1 + $0x1] ss:$4 sm:$0xff] %v6216_v27 }
 0x19d   : > { %3449 = vst [vmem:[#allocation1 + $0x2] ss:$4 sm:$0xff] %v6219_v14  ;;  %v6228_v10 = vpop.permute.xlu2 %2216  ;;  %v2235_v9 = vpop.permute.xlu0 %2234 }
 0x19e   : > { %v2197_v29 = vpop.permute.xlu1 %2196  ;;  %3451 = vst [vmem:[#allocation1 + $0x3] ss:$4 sm:$0xff] %v6222_v56  ;;  %v3093_v51 = vpop.f32.mrf.mxu2 }
 0x19f   : > { %2320 = vst.msk [vmem:[#allocation3 + $0x98] sm:$0xf] %vm2281_vm13, %v2235_v9  ;;  %v6232_v23 = vld [vmem:[#allocation3 + $0x90] sm:$0xff]  ;;  %v6235_v15 = vadd.f32 %v3093_v51, %v2757_v36 }
 0x1a0   : > { %2301 = vst.msk [vmem:[#allocation3 + $0x4c] sm:$0xf] %vm2281_vm13, %v2197_v29  ;;  %v2500_v45 = vrot.slane %v6232_v23, 1 }
 0x1a1   : > { %v6240_v8 = vrot.slane %v6235_v15, 2  ;;  %v6243_v43 = vrot.slane %v6235_v15, 4  ;;  %v6246_v40 = vrot.slane %v6235_v15, 6  ;;  %3453 = vst [vmem:[#allocation1 + $0x20] ss:$4 sm:$0xff] %v6235_v15  ;;  %v2591_v48 = vpop.f32.mrf.mxu0 }
 0x1a2   : > { %v2501_v52 = vsel %vm2466_vm2, %v2498_v25, %v2500_v45  ;;  %v2765_v36 = vadd.f32 %v2764_v19, %v2591_v48 }
 0x1a3   : > { %4828 = vmatmul.msk.bf16.gmra.mxu3 %vm2513_vm15, %v2501_v52  ;;  %3455 = vst [vmem:[#allocation1 + $0x21] ss:$4 sm:$0xff] %v6240_v8 }
 0x1a4   : > { %3457 = vst [vmem:[#allocation1 + $0x22] ss:$4 sm:$0xff] %v6243_v43 }
 0x1a5   : > { %v3460_v26 = vld.sshfl [vmem:[#allocation1] sm:$0xff pattern:$0x73625140]  ;;  %v6254_v39 = vpop.permute.xlu2 %2202  ;;  %v2199_v59 = vpop.permute.xlu0 %2198  ;;  %3459 = vst [vmem:[#allocation1 + $0x23] ss:$4 sm:$0xff] %v6246_v40 }
 0x1a6   : > { %v1816_v55 = vpop.permute.xlu1 %1815  ;;  %v2368_v58 = vld [vmem:[#allocation3 + $0x98] sm:$0x1]  ;;  %v3644_v4 = vpack.c.bf16 %v3460_v26, %v3460_v26  ;;  %v3096_v31 = vpop.f32.mrf.mxu2 }
 0x1a7   : > { %1919 = vst.msk [vmem:[#allocation3 + $0x50] sm:$0xf] %vm1898_vm12, %v1816_v55  ;;  %v6258_v18 = vld [vmem:[#allocation3 + $0x48] sm:$0xff]  ;;  %v2446_v41 = vunpack.c.l.b16 %v2368_v58  ;;  %v3183_v12 = vadd.f32 %v3096_v31, %v2760_v13  ;;  %v2769_v13 = vpop.f32.mrf.mxu1 }
 0x1a8   : > { %v6260_v16 = vld [vmem:[#allocation3 + $0x48] sm:$0xff]  ;;  %2302 = vst.msk [vmem:[#allocation3 + $0x50] sm:$0xf] %vm2281_vm13, %v2199_v59  ;;  %v2482_v63 = vrot.slane %v6258_v18, 1  ;;  %4847 = vmatmul.msk.bf16.gmra.mxu1 %vm2513_vm15, %v6258_v18 }
 0x1a9   : > { %v2992_v11 = vrot.slane %v6260_v16, 2  ;;  %3676 = vst.msk [vmem:[%s6267_s26] sm:$0xf] %vm437_vm0, %v3644_v4  ;;  %v2465_v54 = vpack.c.b16 %v2446_v41, %v2446_v41  ;;  %v6283_v1 = vrot.slane %v3183_v12, 2  ;;  %v6288_v42 = vrot.slane %v3183_v12, 4  ;;  %v2593_v24 = vpop.f32.mrf.mxu0 }
 0x1aa   : > { %v2483_v28 = vsel %vm2466_vm2, %v2480_v35, %v2482_v63  ;;  %v6291_v25 = vrot.slane %v3183_v12, 6  ;;  %v1280_v4 = vld [vmem:[#allocation2 + $0xa0] sm:$0x3]  ;;  %v2767_v18 = vadd.f32 %v2766_v2, %v2593_v24  ;;  %v1279_v16 = vld [vmem:[#allocation2 + $0x9c] sm:$0xf] }
 0x1ab   : > { %v2993_v32 = vsel %vm2978_vm3, %v2990_v53, %v2992_v11  ;;  %4819 = vmatmul.msk.bf16.gmra.mxu0 %vm2513_vm15, %v2483_v28  ;;  %3462 = vst [vmem:[#allocation1] ss:$4 sm:$0xff] %v6283_v1  ;;  %v2502_v53 = vrot.slane %v2465_v54, 1 }
 0x1ac   : > { %4941 = vmatmul.msk.bf16.gmra.mxu2 %vm2513_vm15, %v2993_v32  ;;  %3463 = vst [vmem:[#allocation1 + $0x1] ss:$4 sm:$0xff] %v6288_v42  ;;  %v6309_v33 = vld.sshfl [vmem:[#allocation1 + $0x20] sm:$0xff pattern:$0x73625140] }
 0x1ad   : > { %v1826_v7 = vpop.permute.xlu2 %1825  ;;  %v1834_v44 = vpop.permute.xlu0 %1833  ;;  %3464 = vst [vmem:[#allocation1 + $0x2] ss:$4 sm:$0xff] %v6291_v25  ;;  %v2503_v34 = vsel %vm2466_vm2, %v2500_v45, %v2502_v53 }
 0x1ae   : > { %v2201_v35 = vpop.permute.xlu1 %2200  ;;  %1928 = vst.msk [vmem:[#allocation3 + $0x74] sm:$0xf] %vm1898_vm12, %v1834_v44  ;;  %v3098_v21 = vpop.f32.mrf.mxu2 }
 0x1af   : > { %2311 = vst.msk [vmem:[#allocation3 + $0x74] sm:$0xf] %vm2281_vm13, %v6228_v10  ;;  %v6298_v47 = vadd.f32 %v3098_v21, %v2762_v22  ;;  %v2771_v24 = vpop.f32.mrf.mxu1 }
 0x1b0   : > { %2303 = vst.msk [vmem:[#allocation3 + $0x54] sm:$0xf] %vm2281_vm13, %v2201_v35 }
 0x1b1   : > { %1924 = vst.msk [vmem:[#allocation3 + $0x64] sm:$0xf] %vm1898_vm12, %v1826_v7  ;;  %v6304_v61 = vrot.slane %v6298_v47, 2  ;;  %v6307_v3 = vrot.slane %v6298_v47, 4  ;;  %v6315_v9 = vrot.slane %v6298_v47, 6  ;;  %v2596_v59 = vpop.f32.mrf.mxu0 }
 0x1b2   : > { %3465 = vst [vmem:[#allocation1 + $0x3] ss:$4 sm:$0xff] %v6298_v47  ;;  %v2770_v7 = vadd.f32 %v2769_v13, %v2596_v59 }
 0x1b3   : > { %4829 = vmatmul.msk.bf16.gmra.mxu3 %vm2513_vm15, %v2503_v34  ;;  %3466 = vst [vmem:[#allocation1 + $0x20] ss:$4 sm:$0xff] %v6304_v61  ;;  %v3645_v34 = vpack.c.bf16 %v6309_v33, %v6309_v33 }
 0x1b4   : > { %7756 = vst [vmem:[#allocation5_spill] sm:$0xff] %v6315_v9 }
 0x1b5   : > { %v1828_v49 = vpop.permute.xlu2 %1827  ;;  %v1820_v57 = vpop.permute.xlu0 %1819  ;;  %3467 = vst [vmem:[#allocation1 + $0x21] ss:$4 sm:$0xff] %v6307_v3 }
 0x1b6   : > { %v2215_v10 = vpop.permute.xlu1 %2214  ;;  %1921 = vst.msk [vmem:[#allocation3 + $0x58] sm:$0xf] %vm1898_vm12, %v1820_v57  ;;  %v3101_v23 = vpop.f32.mrf.mxu2 }
 0x1b7   : > { %2304 = vst.msk [vmem:[#allocation3 + $0x58] sm:$0xf] %vm2281_vm13, %v6254_v39  ;;  %v6321_v29 = vld [vmem:[#allocation3 + $0x50] sm:$0xff]  ;;  %v6326_v30 = vadd.f32 %v3101_v23, %v2765_v36 }
 0x1b8   : > { %v6323_v38 = vld [vmem:[#allocation3 + $0x50] sm:$0xff]  ;;  %2310 = vst.msk [vmem:[#allocation3 + $0x70] sm:$0xf] %vm2281_vm13, %v2215_v10  ;;  %v2484_v51 = vrot.slane %v6321_v29, 1  ;;  %4848 = vmatmul.msk.bf16.gmra.mxu1 %vm2513_vm15, %v6321_v29 }
 0x1b9   : > { %7757 = vst [vmem:[#allocation6_spill] sm:$0xff] %v6326_v30  ;;  %v2994_v46 = vrot.slane %v6323_v38, 2  ;;  %v6335_v6 = vrot.slane %v6326_v30, 4  ;;  %v6341_v26 = vld.sshfl [vmem:[#allocation1] sm:$0xff pattern:$0x73625140]  ;;  %v2598_v22 = vpop.f32.mrf.mxu0 }
 0x1ba   : > { %3468 = vst [vmem:[#allocation1 + $0x22] ss:$4 sm:$0xff] %v6315_v9  ;;  %v2485_v45 = vsel %vm2466_vm2, %v2482_v63, %v2484_v51  ;;  %v6344_v39 = vrot.slane %v6326_v30, 6 }
 0x1bb   : > { %1925 = vst.msk [vmem:[#allocation3 + $0x68] sm:$0xf] %vm1898_vm12, %v1828_v49  ;;  %v2995_v52 = vsel %vm2978_vm3, %v2992_v11, %v2994_v46  ;;  %4820 = vmatmul.msk.bf16.gmra.mxu0 %vm2513_vm15, %v2485_v45 }
 0x1bc   : > { %7758 = vst [vmem:[#allocation7_spill] sm:$0xff] %v6335_v6  ;;  %4942 = vmatmul.msk.bf16.gmra.mxu2 %vm2513_vm15, %v2995_v52  ;;  %v2772_v52 = vadd.f32 %v2771_v24, %v2598_v22 }
 0x1bd   : > { %7759 = vst [vmem:[#allocation8_spill] sm:$0xff] %v6344_v39  ;;  %v6350_v55 = vpop.permute.xlu2 %2212  ;;  %v2205_v58 = vpop.permute.xlu0 %2204 }
 0x1be   : > { %3469 = vst [vmem:[#allocation1 + $0x23] ss:$4 sm:$0xff] %v6326_v30  ;;  %v1822_v17 = vpop.permute.xlu1 %1821  ;;  %v3103_v41 = vpop.f32.mrf.mxu2 }
 0x1bf   : > { %3472 = vst [vmem:[#allocation1] ss:$4 sm:$0xff] %v6335_v6  ;;  %v6355_v31 = vadd.f32 %v3103_v41, %v2767_v18  ;;  %v6358_v63 = vld [vmem:[#allocation3 + $0x70] sm:$0xff] }
 0x1c0   : > { %3473 = vst [vmem:[#allocation1 + $0x1] ss:$4 sm:$0xff] %v6344_v39 }
 0x1c1   : > { %1922 = vst.msk [vmem:[#allocation3 + $0x5c] sm:$0xf] %vm1898_vm12, %v1822_v17  ;;  %v6362_v11 = vrot.slane %v6355_v31, 2  ;;  %v6365_v48 = vrot.slane %v6355_v31, 4  ;;  %v6373_v50 = vrot.slane %v6355_v31, 6  ;;  %v2601_v13 = vpop.f32.mrf.mxu0 }
 0x1c2   : > { %2305 = vst.msk [vmem:[#allocation3 + $0x5c] sm:$0xf] %vm2281_vm13, %v2205_v58 }
 0x1c3   : > { %7760 = vst [vmem:[#allocation9_spill] sm:$0xff] %v6355_v31  ;;  %4852 = vmatmul.msk.bf16.vlgmr.msrb.gmra.mxu3 %vm2513_vm15, %v6358_v63 }
 0x1c4   : > { %1321 = vst.msk [vmem:[#allocation3 + $0xa0] sm:$0x3] %vm445_vm1, %v1280_v4 }
 0x1c5   : > { %1320 = vst.msk [vmem:[#allocation3 + $0x9c] sm:$0xf] %vm437_vm0, %v1279_v16  ;;  %v6370_v12 = vld.sshfl [vmem:[#allocation1 + $0x20] sm:$0xff pattern:$0x73625140]  ;;  %v1856_v19 = vpop.permute.xlu2 %1855  ;;  %v2207_v28 = vpop.permute.xlu0 %2206 }
 0x1c6   : > { %7761 = vst [vmem:[#allocation10_spill] sm:$0xff] %v6362_v11  ;;  %v1824_v32 = vpop.permute.xlu1 %1823  ;;  %v3106_v21 = vpop.f32.mrf.mxu2  ;;  %v3647_v22 = vpack.c.bf16 %v6370_v12, %v6370_v12 }
 0x1c7   : > { %7762 = vst [vmem:[#allocation11_spill] sm:$0xff] %v6365_v48  ;;  %v6394_v10 = vadd.f32 %v3106_v21, %v2770_v7 }
 0x1c8   : > { %3474 = vst [vmem:[#allocation1 + $0x2] ss:$4 sm:$0xff] %v6355_v31 }
 0x1c9   : > { %7763 = vst [vmem:[#allocation12_spill] sm:$0xff] %v6373_v50  ;;  %v6382_v44 = vld [vmem:[#allocation3 + $0x58] sm:$0xff]  ;;  %v6407_v38 = vrot.slane %v6394_v10, 2  ;;  %v6410_v23 = vrot.slane %v6394_v10, 6 }
 0x1ca   : > { %3475 = vst [vmem:[#allocation1 + $0x3] ss:$4 sm:$0xff] %v6362_v11  ;;  %v6384_v35 = vld [vmem:[#allocation3 + $0x58] sm:$0xff]  ;;  %v2486_v2 = vrot.slane %v6382_v44, 1  ;;  %4849 = vmatmul.msk.bf16.gmra.mxu1 %vm2513_vm15, %v6382_v44 }
 0x1cb   : > { %3476 = vst [vmem:[#allocation1 + $0x20] ss:$4 sm:$0xff] %v6365_v48  ;;  %v1942_v53 = vld [vmem:[#allocation3 + $0xa0] sm:$0x3]  ;;  %v2996_v49 = vrot.slane %v6384_v35, 2 }
 0x1cc   : > { %1923 = vst.msk [vmem:[#allocation3 + $0x60] sm:$0xf] %vm1898_vm12, %v1824_v32  ;;  %v1943_v57 = vsel %vm6377_vm7, %v1856_v19, %v1942_v53  ;;  %v2487_v33 = vsel %vm2466_vm2, %v2484_v51, %v2486_v2 }
 0x1cd   : > { %2306 = vst.msk [vmem:[#allocation3 + $0x60] sm:$0xf] %vm2281_vm13, %v2207_v28  ;;  %v2997_v36 = vsel %vm2978_vm3, %v2994_v46, %v2996_v49  ;;  %4821 = vmatmul.msk.bf16.gmra.mxu0 %vm2513_vm15, %v2487_v33  ;;  %v1830_v29 = vpop.permute.xlu0 %1829  ;;  %v3646_v46 = vpack.c.bf16 %v6341_v26, %v6341_v26  ;;  %v2774_v26 = vpop.f32.mrf.mxu1 }
 0x1ce   : > { %3477 = vst [vmem:[#allocation1 + $0x21] ss:$4 sm:$0xff] %v6373_v50  ;;  %4943 = vmatmul.msk.bf16.gmra.mxu2 %vm2513_vm15, %v2997_v36  ;;  %v2209_v51 = vpop.permute.xlu1 %2208  ;;  %v3108_v59 = vpop.f32.mrf.mxu2  ;;  %v2775_v28 = vadd.f32 %v2774_v26, %v2601_v13 }
 0x1cf   : > { %7766 = vst [vmem:[#allocation13_spill] sm:$0xff] %v6394_v10  ;;  %v6428_v17 = vadd.f32 %v3108_v59, %v2772_v52  ;;  %v2603_v36 = vpop.f32.mrf.mxu0 }
 0x1d0   : > { %1944 = vst [vmem:[#allocation3 + $0xa0] sm:$0x3] %v1943_v57 }
 0x1d1   : > { %7767 = vst [vmem:[#allocation14_spill] sm:$0xff] %v6407_v38  ;;  %v6413_v45 = vld.sshfl [vmem:[#allocation1] sm:$0xff pattern:$0x73625140]  ;;  %v6433_v18 = vrot.slane %v6428_v17, 2  ;;  %v6443_v19 = vrot.slane %v6428_v17, 6 }
 0x1d2   : > { %7768 = vst [vmem:[#allocation15_spill] sm:$0xff] %v6410_v23  ;;  %v3648_v44 = vpack.c.bf16 %v6413_v45, %v6413_v45 }
 0x1d3   : > { %3478 = vst [vmem:[#allocation1 + $0x22] ss:$4 sm:$0xff] %v6394_v10  ;;  %4853 = vmatmul.msk.bf16.gmra.mxu3 %vm2513_vm15, %v6179_v62 }
 0x1d4   : > { %3677 = vst.msk [vmem:[%s6267_s26 + $0x4] sm:$0xf] %vm437_vm0, %v3645_v34 }
 0x1d5   : > { %3479 = vst [vmem:[#allocation1 + $0x23] ss:$4 sm:$0xff] %v6407_v38  ;;  %v1854_v16 = vpop.permute.xlu0 %1853 }
 0x1d6   : > { %3482 = vst [vmem:[#allocation1] ss:$4 sm:$0xff] %v6410_v23  ;;  %v2211_v41 = vpop.permute.xlu1 %2210  ;;  %v3111_v7 = vpop.f32.mrf.mxu2 }
 0x1d7   : > { %1926 = vst.msk [vmem:[#allocation3 + $0x6c] sm:$0xf] %vm1898_vm12, %v1830_v29  ;;  %v1948_v58 = vld [vmem:[#allocation3 + $0xa0] sm:$0x2]  ;;  %v6451_v53 = vadd.f32 %v3111_v7, %v2775_v28  ;;  %v2776_v29 = vpop.f32.mrf.mxu1 }
 0x1d8   : > { %2309 = vst.msk [vmem:[#allocation3 + $0x6c] sm:$0xf] %vm2281_vm13, %v6350_v55  ;;  %v1949_v4 = vsel %vm1947_vm10, 0, %v1948_v58  ;;  %v6439_v55 = vrot.slane %v6428_v17, 4 }
 0x1d9   : > { %2307 = vst.msk [vmem:[#allocation3 + $0x64] sm:$0xf] %vm2281_vm13, %v2209_v51  ;;  %v6456_v24 = vrot.slane %v6451_v53, 2  ;;  %v6459_v57 = vrot.slane %v6451_v53, 4 }
 0x1da   : > { %7769 = vst [vmem:[#allocation16_spill] sm:$0xff] %v6428_v17 }
 0x1db   : > { %3678 = vst.msk [vmem:[%s6267_s26 + $0x8] sm:$0xf] %vm437_vm0, %v3646_v46 }
 0x1dc   : > { %1950 = vst [vmem:[#allocation3 + $0xa0] sm:$0x2] %v1949_v4  ;;  %v3481_v32 = vld.sshfl [vmem:[#allocation1 + $0x20] sm:$0xff pattern:$0x73625140] }
 0x1dd   : > { %7770 = vst [vmem:[#allocation17_spill] sm:$0xff] %v6433_v18  ;;  %v3649_v35 = vpack.c.bf16 %v3481_v32, %v3481_v32 }
 0x1de   : > { %2325 = vst.msk [vmem:[#allocation3 + $0xa0] sm:$0x2] %vm2324_vm11, %v5112_v0  ;;  %v2237_v51 = vpop.permute.xlu1 %2236  ;;  %v3113_v52 = vpop.f32.mrf.mxu2 }
 0x1df   : > { %7771 = vst [vmem:[#allocation18_spill] sm:$0xff] %v6439_v55 }
 0x1e0   : > { %3483 = vst [vmem:[#allocation1 + $0x1] ss:$4 sm:$0xff] %v6428_v17  ;;  %v4968_v0 = vld [vmem:[#allocation3 + $0x60] sm:$0xff] }
 0x1e1   : > { %7772 = vst [vmem:[#allocation19_spill] sm:$0xff] %v6443_v19  ;;  %v4987_v54 = vld [vmem:[#allocation3 + $0x60] sm:$0xff]  ;;  %4850 = vmatmul.msk.bf16.gmra.mxu1 %vm2513_vm15, %v4968_v0  ;;  %v2488_v21 = vrot.slane %v4968_v0, 1 }
 0x1e2   : > { %3484 = vst [vmem:[#allocation1 + $0x2] ss:$4 sm:$0xff] %v6433_v18  ;;  %v2998_v34 = vrot.slane %v4987_v54, 2 }
 0x1e3   : > { %1938 = vst.msk [vmem:[#allocation3 + $0x9c] sm:$0xf] %vm1898_vm12, %v1854_v16  ;;  %vm2322_vm12 = vcmask 188544   ;;  %v2489_v12 = vsel %vm2466_vm2, %v2486_v2, %v2488_v21  ;;  %v2239_v2 = vpop.permute.xlu0 %2238  ;;  %4854 = vmatmul.msk.bf16.gmra.mxu3 %vm2513_vm15, %v6181_v5  ;;  %v2606_v5 = vpop.f32.mrf.mxu0 }
 0x1e4   : > { %2308 = vst.msk [vmem:[#allocation3 + $0x68] sm:$0xf] %vm2281_vm13, %v2211_v41  ;;  %v2999_v33 = vsel %vm2978_vm3, %v2996_v49, %v2998_v34  ;;  %4822 = vmatmul.msk.bf16.gmra.mxu0 %vm2513_vm15, %v2489_v12  ;;  %v2777_v49 = vadd.f32 %v2776_v29, %v2603_v36 }
 0x1e5   : > { %3485 = vst [vmem:[#allocation1 + $0x3] ss:$4 sm:$0xff] %v6439_v55  ;;  %4944 = vmatmul.msk.bf16.gmra.mxu2 %vm2513_vm15, %v2999_v33 }
 0x1e6   : > { %7773 = vst [vmem:[#allocation20_spill] sm:$0xff] %v6451_v53  ;;  %v6477_v59 = vadd.f32 %v3113_v52, %v2777_v49 }
 0x1e7   : > { %3486 = vst [vmem:[#allocation1 + $0x20] ss:$4 sm:$0xff] %v6443_v19 }
 0x1e8   : > { %7774 = vst [vmem:[#allocation21_spill] sm:$0xff] %v6456_v24  ;;  %v6484_v45 = vrot.slane %v6477_v59, 2  ;;  %v6487_v4 = vrot.slane %v6477_v59, 4  ;;  %v6493_v16 = vrot.slane %v6477_v59, 6 }
 0x1e9   : > { %7775 = vst [vmem:[#allocation22_spill] sm:$0xff] %v6459_v57 }
 0x1ea   : > { %3487 = vst [vmem:[#allocation1 + $0x21] ss:$4 sm:$0xff] %v6451_v53 }
 0x1eb   : > { %3679 = vst.msk [vmem:[%s6267_s26 + $0xc] sm:$0xf] %vm437_vm0, %v3647_v22  ;;  %v4969_v13 = vld [vmem:[#allocation3 + $0x68] sm:$0xff]  ;;  %v2779_v22 = vpop.f32.mrf.mxu1 }
 0x1ec   : > { %3488 = vst [vmem:[#allocation1 + $0x22] ss:$4 sm:$0xff] %v6456_v24  ;;  %v3490_v46 = vld.sshfl [vmem:[#allocation1] sm:$0xff pattern:$0x73625140]  ;;  %v4988_v26 = vld [vmem:[#allocation3 + $0x68] sm:$0xff]  ;;  %v2780_v36 = vadd.f32 %v2779_v22, %v2606_v5 }
 0x1ed   : > { %3489 = vst [vmem:[#allocation1 + $0x23] ss:$4 sm:$0xff] %v6459_v57  ;;  %v3650_v58 = vpack.c.bf16 %v3490_v46, %v3490_v46  ;;  %v2490_v32 = vrot.slane %v4969_v13, 1  ;;  %v3000_v0 = vrot.slane %v4988_v26, 2 }
 0x1ee   : > { %2323 = vst.msk [vmem:[#allocation3 + $0xa0] sm:$0x1] %vm2322_vm12, %v2239_v2 }
 0x1ef   : > { %2321 = vst.msk [vmem:[#allocation3 + $0x9c] sm:$0xf] %vm2281_vm13, %v2237_v51  ;;  %v2491_v54 = vsel %vm2466_vm2, %v2488_v21, %v2490_v32  ;;  %v3001_v7 = vsel %vm2978_vm3, %v2998_v34, %v3000_v0  ;;  %v3116_v29 = vpop.f32.mrf.mxu2  ;;  %v2608_v51 = vpop.f32.mrf.mxu0 }
 0x1f0   : > { %7776 = vst [vmem:[#allocation23_spill] sm:$0xff] %v6477_v59 }
 0x1f1   : > { %3680 = vst.msk [vmem:[%s6267_s26 + $0x10] sm:$0xf] %vm437_vm0, %v3648_v44  ;;  %4851 = vmatmul.msk.bf16.gmra.mxu1 %vm2513_vm15, %v4969_v13  ;;  %v6509_v44 = vadd.f32 %v3116_v29, %v2780_v36  ;;  %v4990_v29 = vld [vmem:[#allocation3 + $0x78] sm:$0xff] }
 0x1f2   : > { %3681 = vst.msk [vmem:[%s6267_s26 + $0x14] sm:$0xf] %vm437_vm0, %v3649_v35  ;;  %v4989_v35 = vld [vmem:[#allocation3 + $0x70] sm:$0xff] }
 0x1f3   : > { %7777 = vst [vmem:[#allocation24_spill] sm:$0xff] %v6484_v45  ;;  %4855 = vmatmul.msk.bf16.gmra.mxu3 %vm2513_vm15, %v6199_v20  ;;  %v6514_v21 = vrot.slane %v6509_v44, 2  ;;  %v6517_v34 = vrot.slane %v6509_v44, 4  ;;  %v6520_v2 = vrot.slane %v6509_v44, 6  ;;  %v2781_v49 = vpop.f32.mrf.mxu1  ;;  %v2492_v20 = vrot.slane %v6358_v63, 1  ;;  %v4991_v63 = vld [vmem:[#allocation3 + $0x80] sm:$0xff] }
 0x1f4   : > { %7778 = vst [vmem:[#allocation25_spill] sm:$0xff] %v6487_v4  ;;  %v3491_v41 = vld.sshfl [vmem:[#allocation1 + $0x20] sm:$0xff pattern:$0x73625140]  ;;  %4823 = vmatmul.msk.bf16.gmra.mxu0 %vm2513_vm15, %v2491_v54  ;;  %v2782_v46 = vadd.f32 %v2781_v49, %v2608_v51  ;;  %v3004_v51 = vrot.slane %v4990_v29, 2 }
 0x1f5   : > { %3492 = vst [vmem:[#allocation1] ss:$4 sm:$0xff] %v6477_v59  ;;  %v3651_v28 = vpack.c.bf16 %v3491_v41, %v3491_v41  ;;  %4945 = vmatmul.msk.bf16.gmra.mxu2 %vm2513_vm15, %v3001_v7  ;;  %v2493_v26 = vsel %vm2466_vm2, %v2490_v32, %v2492_v20  ;;  %v4992_v41 = vld [vmem:[#allocation3 + $0x88] sm:$0xff]  ;;  %v2495_v49 = vsel %vm2466_vm2, %v2492_v20, %v2494_v60 }
 0x1f6   : > { %7779 = vst [vmem:[#allocation26_spill] sm:$0xff] %v6493_v16  ;;  %v3008_v32 = vrot.slane %v4992_v41, 2 }
 0x1f7   : > { %3682 = vst.msk [vmem:[%s6267_s26 + $0x18] sm:$0xf] %vm437_vm0, %v3650_v58  ;;  %v3118_v52 = vpop.f32.mrf.mxu2  ;;  %v3002_v58 = vrot.slane %v4989_v35, 2  ;;  %v4993_v35 = vld [vmem:[#allocation3 + $0x90] sm:$0xff] }
 0x1f8   : > { %3493 = vst [vmem:[#allocation1 + $0x1] ss:$4 sm:$0xff] %v6484_v45  ;;  %v3192_v13 = vadd.f32 %v3118_v52, %v2782_v46 }
 0x1f9   : > { %3494 = vst [vmem:[#allocation1 + $0x2] ss:$4 sm:$0xff] %v6487_v4  ;;  %v3005_v46 = vsel %vm2978_vm3, %v3002_v58, %v3004_v51 }
 0x1fa   : > { %3495 = vst [vmem:[#allocation1 + $0x3] ss:$4 sm:$0xff] %v6493_v16  ;;  %v6529_v5 = vrot.slane %v3192_v13, 2  ;;  %v6531_v54 = vrot.slane %v3192_v13, 4  ;;  %v6533_v7 = vrot.slane %v3192_v13, 6  ;;  %v3010_v13 = vrot.slane %v4993_v35, 2 }
 0x1fb   : > { %3683 = vst.msk [vmem:[%s6267_s26 + $0x1c] sm:$0xf] %vm437_vm0, %v3651_v28  ;;  %v3003_v28 = vsel %vm2978_vm3, %v3000_v0, %v3002_v58 }
 0x1fc   : > { %7780 = vst [vmem:[#allocation27_spill] sm:$0xff] %v6509_v44  ;;  %v3011_v41 = vsel %vm2978_vm3, %v3008_v32, %v3010_v13 }
 0x1fd   : > { %7781 = vst [vmem:[#allocation28_spill] sm:$0xff] %v6514_v21 }
 0x1fe   : > { %7782 = vst [vmem:[#allocation29_spill] sm:$0xff] %v6517_v34 }
 0x1ff   : > { %7783 = vst [vmem:[#allocation30_spill] sm:$0xff] %v6520_v2 }
 0x200   : > { %3496 = vst [vmem:[#allocation1 + $0x20] ss:$4 sm:$0xff] %v6509_v44 }
 0x201   : > { %v3500_v12 = vld.sshfl [vmem:[#allocation1] sm:$0xff pattern:$0x73625140]  ;;  %3497 = vst [vmem:[#allocation1 + $0x21] ss:$4 sm:$0xff] %v6514_v21 }
 0x202   : > { %v3652_v33 = vpack.c.bf16 %v3500_v12, %v3500_v12  ;;  %3498 = vst [vmem:[#allocation1 + $0x22] ss:$4 sm:$0xff] %v6517_v34  ;;  %v3006_v12 = vrot.slane %v4991_v63, 2  ;;  %v2611_v63 = vpop.f32.mrf.mxu0 }
 0x203   : > { %3499 = vst [vmem:[#allocation1 + $0x23] ss:$4 sm:$0xff] %v6520_v2 }
 0x204   : > { %3684 = vst.msk [vmem:[%s6267_s26 + $0x20] sm:$0xf] %vm437_vm0, %v3652_v33  ;;  %4824 = vmatmul.msk.bf16.gmra.mxu0 %vm2513_vm15, %v2493_v26  ;;  %v3009_v33 = vsel %vm2978_vm3, %v3006_v12, %v3008_v32  ;;  %v6544_v36 = vpop.f32.mrf.mxu3  ;;  %v2784_v26 = vpop.f32.mrf.mxu1  ;;  %v3007_v60 = vsel %vm2978_vm3, %v3004_v51, %v3006_v12  ;;  %v2880_v32 = vld [vmem:[#allocation3 + $0xa0] sm:$0x3] }
 0x205   : > { %7784 = vst [vmem:[#allocation31_spill] sm:$0xff] %v6529_v5  ;;  %4946 = vmatmul.msk.bf16.gmra.mxu2 %vm2513_vm15, %v3003_v28  ;;  %4949 = vmatmul.msk.bf16.vlgmr.msra.gmra.mxu3 %vm2513_vm15, %v3009_v33  ;;  %v2785_v2 = vadd.f32 %v2784_v26, %v2611_v63 }
 0x206   : > { %7785 = vst [vmem:[#allocation32_spill] sm:$0xff] %v6531_v54 }
 0x207   : > { %7786 = vst [vmem:[#allocation33_spill] sm:$0xff] %v6533_v7 }
 0x208   : > { %3502 = vst [vmem:[#allocation1] ss:$4 sm:$0xff] %v6529_v5 }
 0x209   : > { %3503 = vst [vmem:[#allocation1 + $0x1] ss:$4 sm:$0xff] %v6531_v54 }
 0x20a   : > { %v3501_v22 = vld.sshfl [vmem:[#allocation1 + $0x20] sm:$0xff pattern:$0x73625140]  ;;  %3504 = vst [vmem:[#allocation1 + $0x2] ss:$4 sm:$0xff] %v6533_v7 }
 0x20b   : > { %v3653_v0 = vpack.c.bf16 %v3501_v22, %v3501_v22  ;;  %v4994_v22 = vld [vmem:[#allocation3 + $0x98] sm:$0xff] }
 0x20c   : > { %v6552_v52 = vpop.f32.mrf.mxu3  ;;  %v2786_v62 = vpop.f32.mrf.mxu1  ;;  %v3012_v58 = vrot.slane %v4994_v22, 2 }
 0x20d   : > { %3685 = vst.msk [vmem:[%s6267_s26 + $0x24] sm:$0xf] %vm437_vm0, %v3653_v0  ;;  %v2613_v0 = vpop.f32.mrf.mxu0 }
 0x20e   : > { %v3013_v33 = vsel %vm2978_vm3, %v3010_v13, %v3012_v58 }
 0x214   : > { %4825 = vmatmul.msk.bf16.gmra.mxu0 %vm2513_vm15, %v2495_v49  ;;  %v2789_v29 = vpop.f32.mrf.mxu1  ;;  %v2958_v49 = vunpack.c.l.b16 %v2880_v32 }
 0x215   : > { %4947 = vmatmul.msk.bf16.gmra.mxu2 %vm2513_vm15, %v3005_v46  ;;  %4950 = vmatmul.msk.bf16.gmra.mxu3 %vm2513_vm15, %v3011_v41  ;;  %v6556_v28 = vpop.f32.mrf.mxu3 }
 0x216   : > { %v2977_v41 = vpack.c.b16 %v2958_v49, %v2958_v49 }
 0x21c   : > { %v2791_v34 = vpop.f32.mrf.mxu1 }
 0x21d   : > { %v6560_v20 = vpop.f32.mrf.mxu3 }
 0x225   : > { %4948 = vmatmul.msk.bf16.gmra.mxu2 %vm2513_vm15, %v3007_v60  ;;  %4951 = vmatmul.msk.bf16.gmra.mxu3 %vm2513_vm15, %v3013_v33  ;;  %v3014_v60 = vrot.slane %v2977_v41, 2  ;;  %v2794_v41 = vpop.f32.mrf.mxu1 }
 0x226   : > { %v6564_v35 = vpop.f32.mrf.mxu3 }
 0x227   : > { %v3015_v26 = vsel %vm2978_vm3, %v3012_v58, %v3014_v60 }
 0x228   : > { %v2616_v46 = vpop.f32.mrf.mxu0 }
 0x22d   : > { %v2796_v7 = vpop.f32.mrf.mxu1 }
 0x22e   : > { %v6566_v51 = vpop.f32.mrf.mxu3 }
 0x22f   : > { %v3121_v12 = vpop.f32.mrf.mxu2 }
 0x230   : > { %v6568_v21 = vadd.f32 %v3121_v12, %v2785_v2  ;;  %v2618_v22 = vpop.f32.mrf.mxu0  ;;  %v2787_v2 = vadd.f32 %v2786_v62, %v2613_v0  ;;  %v2790_v62 = vadd.f32 %v2789_v29, %v2616_v46 }
 0x231   : > { %v2792_v29 = vadd.f32 %v2791_v34, %v2618_v22 }
 0x232   : > { %7787 = vst [vmem:[#allocation34_spill] sm:$0xff] %v6568_v21  ;;  %v6571_v13 = vrot.slane %v6568_v21, 2  ;;  %v6574_v33 = vrot.slane %v6568_v21, 4  ;;  %v6577_v44 = vrot.slane %v6568_v21, 6 }
 0x233   : > { %3505 = vst [vmem:[#allocation1 + $0x3] ss:$4 sm:$0xff] %v6568_v21 }
 0x234   : > { %7788 = vst [vmem:[#allocation35_spill] sm:$0xff] %v6571_v13 }
 0x235   : > { %7789 = vst [vmem:[#allocation36_spill] sm:$0xff] %v6574_v33  ;;  %4952 = vmatmul.msk.bf16.gmra.mxu3 %vm2513_vm15, %v3015_v26 }
 0x236   : > { %7790 = vst [vmem:[#allocation37_spill] sm:$0xff] %v6577_v44  ;;  %v6587_v49 = vpop.f32.mrf.mxu3 }
 0x237   : > { %3506 = vst [vmem:[#allocation1 + $0x20] ss:$4 sm:$0xff] %v6571_v13  ;;  %v3123_v63 = vpop.f32.mrf.mxu2 }
 0x238   : > { %3507 = vst [vmem:[#allocation1 + $0x21] ss:$4 sm:$0xff] %v6574_v33  ;;  %v6585_v32 = vadd.f32 %v3123_v63, %v2787_v2  ;;  %v2621_v60 = vpop.f32.mrf.mxu0 }
 0x239   : > { %3508 = vst [vmem:[#allocation1 + $0x22] ss:$4 sm:$0xff] %v6577_v44 }
 0x23a   : > { %7791 = vst [vmem:[#allocation38_spill] sm:$0xff] %v6585_v32  ;;  %v3510_v12 = vld.sshfl [vmem:[#allocation1] sm:$0xff pattern:$0x73625140]  ;;  %v6590_v21 = vrot.slane %v6585_v32, 4  ;;  %v6593_v58 = vrot.slane %v6585_v32, 6 }
 0x23b   : > { %3509 = vst [vmem:[#allocation1 + $0x23] ss:$4 sm:$0xff] %v6585_v32  ;;  %v3654_v26 = vpack.c.bf16 %v3510_v12, %v3510_v12 }
 0x23c   : > { %7792 = vst [vmem:[#allocation39_spill] sm:$0xff] %v6590_v21 }
 0x23d   : > { %7793 = vst [vmem:[#allocation40_spill] sm:$0xff] %v6593_v58 }
 0x23e   : > { %3512 = vst [vmem:[#allocation1] ss:$4 sm:$0xff] %v6590_v21  ;;  %v6600_v2 = vpop.f32.mrf.mxu3  ;;  %v2799_v21 = vpop.f32.mrf.mxu1 }
 0x23f   : > { %3513 = vst [vmem:[#allocation1 + $0x1] ss:$4 sm:$0xff] %v6593_v58  ;;  %v3126_v0 = vpop.f32.mrf.mxu2 }
 0x240   : > { %3686 = vst.msk [vmem:[%s6267_s26 + $0x28] sm:$0xf] %vm437_vm0, %v3654_v26  ;;  %v6602_v44 = vadd.f32 %v3126_v0, %v2790_v62  ;;  %v2623_v33 = vpop.f32.mrf.mxu0 }
 0x242   : > { %v3511_v63 = vld.sshfl [vmem:[#allocation1 + $0x20] sm:$0xff pattern:$0x73625140]  ;;  %7794 = vst [vmem:[#allocation41_spill] sm:$0xff] %v6602_v44  ;;  %v6605_v32 = vrot.slane %v6602_v44, 2  ;;  %v6608_v12 = vrot.slane %v6602_v44, 4 }
 0x243   : > { %v3655_v13 = vpack.c.bf16 %v3511_v63, %v3511_v63  ;;  %v6611_v58 = vrot.slane %v6602_v44, 6  ;;  %3514 = vst [vmem:[#allocation1 + $0x2] ss:$4 sm:$0xff] %v6602_v44 }
 0x244   : > { %7795 = vst [vmem:[#allocation42_spill] sm:$0xff] %v6605_v32 }
 0x245   : > { %7796 = vst [vmem:[#allocation43_spill] sm:$0xff] %v6608_v12 }
 0x246   : > { %7797 = vst [vmem:[#allocation44_spill] sm:$0xff] %v6611_v58  ;;  %v2824_v26 = vpop.f32.mrf.mxu3 }
 0x247   : > { %3687 = vst.msk [vmem:[%s6267_s26 + $0x2c] sm:$0xf] %vm437_vm0, %v3655_v13  ;;  %v3128_v46 = vpop.f32.mrf.mxu2  ;;  %v6622_v0 = vadd.f32 %v2824_v26, %v6544_v36 }
 0x248   : > { %3515 = vst [vmem:[#allocation1 + $0x3] ss:$4 sm:$0xff] %v6605_v32  ;;  %v6619_v62 = vadd.f32 %v3128_v46, %v2792_v29  ;;  %v2795_v29 = vadd.f32 %v2794_v41, %v2621_v60 }
 0x249   : > { %3516 = vst [vmem:[#allocation1 + $0x20] ss:$4 sm:$0xff] %v6608_v12 }
 0x24a   : > { %3517 = vst [vmem:[#allocation1 + $0x21] ss:$4 sm:$0xff] %v6611_v58  ;;  %v2626_v63 = vpop.f32.mrf.mxu0  ;;  %v6625_v44 = vrot.slane %v6619_v62, 2  ;;  %v6628_v13 = vrot.slane %v6619_v62, 6 }
 0x24b   : > { %7798 = vst [vmem:[#allocation45_spill] sm:$0xff] %v6619_v62 }
 0x24c   : > { %7799 = vst [vmem:[#allocation46_spill] sm:$0xff] %v6625_v44 }
 0x24d   : > { %7800 = vst [vmem:[#allocation47_spill] sm:$0xff] %v6628_v13 }
 0x24e   : > { %3518 = vst [vmem:[#allocation1 + $0x22] ss:$4 sm:$0xff] %v6619_v62  ;;  %v2826_v36 = vpop.f32.mrf.mxu3 }
 0x24f   : > { %v3520_v34 = vld.sshfl [vmem:[#allocation1] sm:$0xff pattern:$0x73625140]  ;;  %3519 = vst [vmem:[#allocation1 + $0x23] ss:$4 sm:$0xff] %v6625_v44  ;;  %v6636_v26 = vadd.f32 %v2826_v36, %v6552_v52 }
 0x250   : > { %v3656_v22 = vpack.c.bf16 %v3520_v34, %v3520_v34  ;;  %3522 = vst [vmem:[#allocation1] ss:$4 sm:$0xff] %v6628_v13 }
 0x251   : > { %v3131_v46 = vpop.f32.mrf.mxu2 }
 0x252   : > { %3688 = vst.msk [vmem:[%s6267_s26 + $0x30] sm:$0xf] %vm437_vm0, %v3656_v22  ;;  %v6638_v58 = vadd.f32 %v3131_v46, %v2795_v29  ;;  %v2628_v41 = vpop.f32.mrf.mxu0  ;;  %v2801_v22 = vpop.f32.mrf.mxu1  ;;  %v2797_v29 = vadd.f32 %v2796_v7, %v2623_v33 }
 0x254   : > { %7801 = vst [vmem:[#allocation48_spill] sm:$0xff] %v6638_v58  ;;  %v6641_v12 = vrot.slane %v6638_v58, 2  ;;  %v6644_v62 = vrot.slane %v6638_v58, 4  ;;  %v6647_v34 = vrot.slane %v6638_v58, 6 }
 0x255   : > { %3523 = vst [vmem:[#allocation1 + $0x1] ss:$4 sm:$0xff] %v6638_v58 }
 0x256   : > { %7802 = vst [vmem:[#allocation49_spill] sm:$0xff] %v6641_v12  ;;  %v3521_v60 = vld.sshfl [vmem:[#allocation1 + $0x20] sm:$0xff pattern:$0x73625140]  ;;  %v2829_v36 = vpop.f32.mrf.mxu3 }
 0x257   : > { %7803 = vst [vmem:[#allocation50_spill] sm:$0xff] %v6644_v62  ;;  %v3657_v52 = vpack.c.bf16 %v3521_v60, %v3521_v60  ;;  %v6656_v44 = vadd.f32 %v2829_v36, %v6556_v28  ;;  %v2800_v28 = vadd.f32 %v2799_v21, %v2626_v63  ;;  %v2802_v63 = vadd.f32 %v2801_v22, %v2628_v41 }
 0x258   : > { %7804 = vst [vmem:[#allocation51_spill] sm:$0xff] %v6647_v34 }
 0x259   : > { %3524 = vst [vmem:[#allocation1 + $0x2] ss:$4 sm:$0xff] %v6641_v12  ;;  %v3133_v46 = vpop.f32.mrf.mxu2 }
 0x25a   : > { %3525 = vst [vmem:[#allocation1 + $0x3] ss:$4 sm:$0xff] %v6644_v62  ;;  %v6658_v58 = vadd.f32 %v3133_v46, %v2797_v29 }
 0x25b   : > { %3526 = vst [vmem:[#allocation1 + $0x20] ss:$4 sm:$0xff] %v6647_v34  ;;  %v2804_v34 = vpop.f32.mrf.mxu1 }
 0x25c   : > { %3689 = vst.msk [vmem:[%s6267_s26 + $0x34] sm:$0xf] %vm437_vm0, %v3657_v52  ;;  %v6661_v13 = vrot.slane %v6658_v58, 2  ;;  %v6664_v60 = vrot.slane %v6658_v58, 4 }
 0x25d   : > { %7805 = vst [vmem:[#allocation52_spill] sm:$0xff] %v6658_v58 }
 0x25e   : > { %7806 = vst [vmem:[#allocation53_spill] sm:$0xff] %v6661_v13  ;;  %v2831_v36 = vpop.f32.mrf.mxu3 }
 0x25f   : > { %7807 = vst [vmem:[#allocation54_spill] sm:$0xff] %v6664_v60  ;;  %v6672_v46 = vadd.f32 %v2831_v36, %v6560_v20 }
 0x260   : > { %3527 = vst [vmem:[#allocation1 + $0x21] ss:$4 sm:$0xff] %v6658_v58 }
 0x261   : > { %v3530_v7 = vld.sshfl [vmem:[#allocation1] sm:$0xff pattern:$0x73625140]  ;;  %3528 = vst [vmem:[#allocation1 + $0x22] ss:$4 sm:$0xff] %v6661_v13  ;;  %v2631_v33 = vpop.f32.mrf.mxu0 }
 0x262   : > { %3529 = vst [vmem:[#allocation1 + $0x23] ss:$4 sm:$0xff] %v6664_v60  ;;  %v3658_v52 = vpack.c.bf16 %v3530_v7, %v3530_v7 }
 0x264   : > { %3690 = vst.msk [vmem:[%s6267_s26 + $0x38] sm:$0xf] %vm437_vm0, %v3658_v52 }
 0x268   : > { %v3136_v29 = vpop.f32.mrf.mxu2 }
 0x269   : > { %v6674_v62 = vadd.f32 %v3136_v29, %v2800_v28  ;;  %v3531_v21 = vld.sshfl [vmem:[#allocation1 + $0x20] sm:$0xff pattern:$0x73625140]  ;;  %v2633_v52 = vpop.f32.mrf.mxu0  ;;  %v2834_v28 = vpop.f32.mrf.mxu3 }
 0x26a   : > { %v3659_v20 = vpack.c.bf16 %v3531_v21, %v3531_v21  ;;  %v6692_v29 = vadd.f32 %v2834_v28, %v6564_v35  ;;  %v2805_v35 = vadd.f32 %v2804_v34, %v2631_v33 }
 0x26b   : > { %7808 = vst [vmem:[#allocation55_spill] sm:$0xff] %v6674_v62  ;;  %v6677_v58 = vrot.slane %v6674_v62, 2  ;;  %v6680_v13 = vrot.slane %v6674_v62, 4  ;;  %v6683_v7 = vrot.slane %v6674_v62, 6 }
 0x26c   : > { %3532 = vst [vmem:[#allocation1] ss:$4 sm:$0xff] %v6674_v62  ;;  %v2806_v62 = vpop.f32.mrf.mxu1 }
 0x26d   : > { %7809 = vst [vmem:[#allocation56_spill] sm:$0xff] %v6677_v58  ;;  %v2807_v33 = vadd.f32 %v2806_v62, %v2633_v52 }
 0x26e   : > { %7810 = vst [vmem:[#allocation57_spill] sm:$0xff] %v6680_v13 }
 0x26f   : > { %7811 = vst [vmem:[#allocation58_spill] sm:$0xff] %v6683_v7 }
 0x270   : > { %3533 = vst [vmem:[#allocation1 + $0x1] ss:$4 sm:$0xff] %v6677_v58  ;;  %v3138_v36 = vpop.f32.mrf.mxu2 }
 0x271   : > { %3534 = vst [vmem:[#allocation1 + $0x2] ss:$4 sm:$0xff] %v6680_v13  ;;  %v6694_v60 = vadd.f32 %v3138_v36, %v2802_v63  ;;  %v6709_v63 = vpop.f32.mrf.mxu3 }
 0x272   : > { %3535 = vst [vmem:[#allocation1 + $0x3] ss:$4 sm:$0xff] %v6683_v7  ;;  %v2636_v7 = vpop.f32.mrf.mxu0 }
 0x273   : > { %3691 = vst.msk [vmem:[%s6267_s26 + $0x3c] sm:$0xf] %vm437_vm0, %v3659_v20  ;;  %v6697_v58 = vrot.slane %v6694_v60, 2  ;;  %v6700_v21 = vrot.slane %v6694_v60, 4  ;;  %v6703_v41 = vrot.slane %v6694_v60, 6 }
 0x274   : > { %7812 = vst [vmem:[#allocation59_spill] sm:$0xff] %v6694_v60  ;;  %v2809_v12 = vpop.f32.mrf.mxu1 }
 0x275   : > { %7813 = vst [vmem:[#allocation60_spill] sm:$0xff] %v6697_v58 }
 0x276   : > { %7814 = vst [vmem:[#allocation61_spill] sm:$0xff] %v6700_v21 }
 0x277   : > { %7815 = vst [vmem:[#allocation62_spill] sm:$0xff] %v6703_v41 }
 0x278   : > { %3536 = vst [vmem:[#allocation1 + $0x20] ss:$4 sm:$0xff] %v6694_v60  ;;  %v3141_v28 = vpop.f32.mrf.mxu2 }
 0x279   : > { %3537 = vst [vmem:[#allocation1 + $0x21] ss:$4 sm:$0xff] %v6697_v58  ;;  %v3540_v22 = vld.sshfl [vmem:[#allocation1] sm:$0xff pattern:$0x73625140]  ;;  %v3201_v36 = vadd.f32 %v3141_v28, %v2805_v35  ;;  %v6722_v35 = vpop.f32.mrf.mxu3 }
 0x27a   : > { %3538 = vst [vmem:[#allocation1 + $0x22] ss:$4 sm:$0xff] %v6700_v21  ;;  %v3660_v20 = vpack.c.bf16 %v3540_v22, %v3540_v22  ;;  %v2638_v62 = vpop.f32.mrf.mxu0 }
 0x27b   : > { %3539 = vst [vmem:[#allocation1 + $0x23] ss:$4 sm:$0xff] %v6703_v41  ;;  %v6713_v13 = vrot.slane %v3201_v36, 2  ;;  %v6715_v60 = vrot.slane %v3201_v36, 4  ;;  %v6717_v58 = vrot.slane %v3201_v36, 6 }
 0x27c   : > { %3692 = vst.msk [vmem:[%s6267_s26 + $0x40] sm:$0xf] %vm437_vm0, %v3660_v20  ;;  %v2811_v52 = vpop.f32.mrf.mxu1 }
 0x27d   : > { %7816 = vst [vmem:[#allocation63_spill] sm:$0xff] %v6713_v13 }
 0x27e   : > { %7817 = vst [vmem:[#allocation64_spill] sm:$0xff] %v6715_v60 }
 0x27f   : > { %7818 = vst [vmem:[#allocation65_spill] sm:$0xff] %v6717_v58 }
 0x280   : > { %3542 = vst [vmem:[#allocation1] ss:$4 sm:$0xff] %v6713_v13  ;;  %v3143_v20 = vpop.f32.mrf.mxu2 }
 0x281   : > { %3543 = vst [vmem:[#allocation1 + $0x1] ss:$4 sm:$0xff] %v6715_v60  ;;  %v6724_v28 = vadd.f32 %v3143_v20, %v2807_v33  ;;  %v2841_v33 = vpop.f32.mrf.mxu3 }
 0x282   : > { %v3541_v34 = vld.sshfl [vmem:[#allocation1 + $0x20] sm:$0xff pattern:$0x73625140]  ;;  %3544 = vst [vmem:[#allocation1 + $0x2] ss:$4 sm:$0xff] %v6717_v58  ;;  %v6742_v20 = vadd.f32 %v2841_v33, %v6600_v2 }
 0x283   : > { %v3661_v22 = vpack.c.bf16 %v3541_v34, %v3541_v34  ;;  %7819 = vst [vmem:[#allocation66_spill] sm:$0xff] %v6724_v28  ;;  %v6729_v36 = vrot.slane %v6724_v28, 2  ;;  %v6732_v41 = vrot.slane %v6724_v28, 4  ;;  %v6735_v21 = vrot.slane %v6724_v28, 6 }
 0x284   : > { %3545 = vst [vmem:[#allocation1 + $0x3] ss:$4 sm:$0xff] %v6724_v28  ;;  %v2810_v34 = vadd.f32 %v2809_v12, %v2636_v7  ;;  %v2641_v12 = vpop.f32.mrf.mxu0  ;;  %v2812_v7 = vadd.f32 %v2811_v52, %v2638_v62  ;;  %v2814_v2 = vpop.f32.mrf.mxu1 }
 0x285   : > { %3693 = vst.msk [vmem:[%s6267_s26 + $0x44] sm:$0xf] %vm437_vm0, %v3661_v22 }
 0x286   : > { %7820 = vst [vmem:[#allocation67_spill] sm:$0xff] %v6729_v36 }
 0x287   : > { %7821 = vst [vmem:[#allocation68_spill] sm:$0xff] %v6732_v41 }
 0x288   : > { %7822 = vst [vmem:[#allocation69_spill] sm:$0xff] %v6735_v21  ;;  %v3146_v22 = vpop.f32.mrf.mxu2 }
 0x289   : > { %3546 = vst [vmem:[#allocation1 + $0x20] ss:$4 sm:$0xff] %v6729_v36  ;;  %v6744_v58 = vadd.f32 %v3146_v22, %v2810_v34 }
 0x28a   : > { %3547 = vst [vmem:[#allocation1 + $0x21] ss:$4 sm:$0xff] %v6732_v41 }
 0x28b   : > { %3548 = vst [vmem:[#allocation1 + $0x22] ss:$4 sm:$0xff] %v6735_v21  ;;  %v3550_v60 = vld.sshfl [vmem:[#allocation1] sm:$0xff pattern:$0x73625140]  ;;  %v6747_v28 = vrot.slane %v6744_v58, 4  ;;  %v3161_v21 = vpop.f32.mrf.mxu3 }
 0x28c   : > { %7823 = vst [vmem:[#allocation70_spill] sm:$0xff] %v6744_v58  ;;  %v6750_v36 = vrot.slane %v6744_v58, 6  ;;  %v3662_v41 = vpack.c.bf16 %v3550_v60, %v3550_v60  ;;  %v2643_v52 = vpop.f32.mrf.mxu0 }
 0x28d   : > { %7824 = vst [vmem:[#allocation71_spill] sm:$0xff] %v6747_v28 }
 0x28e   : > { %7825 = vst [vmem:[#allocation72_spill] sm:$0xff] %v6750_v36 }
 0x28f   : > { %3549 = vst [vmem:[#allocation1 + $0x23] ss:$4 sm:$0xff] %v6744_v58 }
 0x290   : > { %3552 = vst [vmem:[#allocation1] ss:$4 sm:$0xff] %v6747_v28  ;;  %v3148_v34 = vpop.f32.mrf.mxu2 }
 0x291   : > { %3553 = vst [vmem:[#allocation1 + $0x1] ss:$4 sm:$0xff] %v6750_v36  ;;  %v6757_v33 = vadd.f32 %v3148_v34, %v2812_v7  ;;  %v2816_v36 = vpop.f32.mrf.mxu1 }
 0x292   : > { %3694 = vst.msk [vmem:[%s6267_s26 + $0x48] sm:$0xf] %vm437_vm0, %v3662_v41  ;;  %v2815_v41 = vadd.f32 %v2814_v2, %v2641_v12 }
 0x293   : > { %7826 = vst [vmem:[#allocation73_spill] sm:$0xff] %v6757_v33  ;;  %v6760_v13 = vrot.slane %v6757_v33, 2  ;;  %v6763_v60 = vrot.slane %v6757_v33, 4  ;;  %v6766_v58 = vrot.slane %v6757_v33, 6  ;;  %v3163_v12 = vpop.f32.mrf.mxu3 }
 0x294   : > { %3554 = vst [vmem:[#allocation1 + $0x2] ss:$4 sm:$0xff] %v6757_v33 }
 0x295   : > { %7827 = vst [vmem:[#allocation74_spill] sm:$0xff] %v6760_v13 }
 0x296   : > { %v3551_v22 = vld.sshfl [vmem:[#allocation1 + $0x20] sm:$0xff pattern:$0x73625140]  ;;  %7828 = vst [vmem:[#allocation75_spill] sm:$0xff] %v6763_v60 }
 0x297   : > { %7829 = vst [vmem:[#allocation76_spill] sm:$0xff] %v6766_v58  ;;  %v3663_v62 = vpack.c.bf16 %v3551_v22, %v3551_v22 }
 0x298   : > { %3555 = vst [vmem:[#allocation1 + $0x3] ss:$4 sm:$0xff] %v6760_v13  ;;  %v3151_v7 = vpop.f32.mrf.mxu2 }
 0x299   : > { %3556 = vst [vmem:[#allocation1 + $0x20] ss:$4 sm:$0xff] %v6763_v60  ;;  %v6774_v34 = vadd.f32 %v3151_v7, %v2815_v41  ;;  %v2646_v7 = vpop.f32.mrf.mxu0 }
 0x29a   : > { %3557 = vst [vmem:[#allocation1 + $0x21] ss:$4 sm:$0xff] %v6766_v58  ;;  %v2817_v58 = vadd.f32 %v2816_v36, %v2643_v52 }
 0x29b   : > { %3695 = vst.msk [vmem:[%s6267_s26 + $0x4c] sm:$0xf] %vm437_vm0, %v3663_v62  ;;  %v6777_v28 = vrot.slane %v6774_v34, 2  ;;  %v6780_v22 = vrot.slane %v6774_v34, 6 }
 0x29c   : > { %7830 = vst [vmem:[#allocation77_spill] sm:$0xff] %v6774_v34 }
 0x29d   : > { %7831 = vst [vmem:[#allocation78_spill] sm:$0xff] %v6777_v28 }
 0x29e   : > { %7832 = vst [vmem:[#allocation79_spill] sm:$0xff] %v6780_v22 }
 0x29f   : > { %3558 = vst [vmem:[#allocation1 + $0x22] ss:$4 sm:$0xff] %v6774_v34  ;;  %v3560_v60 = vld.sshfl [vmem:[#allocation1] sm:$0xff pattern:$0x73625140] }
 0x2a0   : > { %3559 = vst [vmem:[#allocation1 + $0x23] ss:$4 sm:$0xff] %v6777_v28  ;;  %v3664_v2 = vpack.c.bf16 %v3560_v60, %v3560_v60  ;;  %v3153_v62 = vpop.f32.mrf.mxu2  ;;  %v2819_v60 = vpop.f32.mrf.mxu1 }
 0x2a1   : > { %3562 = vst [vmem:[#allocation1] ss:$4 sm:$0xff] %v6780_v22  ;;  %v6787_v41 = vadd.f32 %v3153_v62, %v2817_v58  ;;  %v3166_v58 = vpop.f32.mrf.mxu3 }
 0x2a2   : > { %3696 = vst.msk [vmem:[%s6267_s26 + $0x50] sm:$0xf] %vm437_vm0, %v3664_v2  ;;  %v2820_v2 = vadd.f32 %v2819_v60, %v2646_v7 }
 0x2a3   : > { %7833 = vst [vmem:[#allocation80_spill] sm:$0xff] %v6787_v41  ;;  %v6790_v13 = vrot.slane %v6787_v41, 2  ;;  %v6793_v34 = vrot.slane %v6787_v41, 4  ;;  %v6796_v33 = vrot.slane %v6787_v41, 6 }
 0x2a4   : > { %3563 = vst [vmem:[#allocation1 + $0x1] ss:$4 sm:$0xff] %v6787_v41 }
 0x2a5   : > { %7834 = vst [vmem:[#allocation81_spill] sm:$0xff] %v6790_v13 }
 0x2a6   : > { %7835 = vst [vmem:[#allocation82_spill] sm:$0xff] %v6793_v34 }
 0x2a7   : > { %7836 = vst [vmem:[#allocation83_spill] sm:$0xff] %v6796_v33  ;;  %v3561_v36 = vld.sshfl [vmem:[#allocation1 + $0x20] sm:$0xff pattern:$0x73625140] }
 0x2a8   : > { %3564 = vst [vmem:[#allocation1 + $0x2] ss:$4 sm:$0xff] %v6790_v13  ;;  %v3665_v52 = vpack.c.bf16 %v3561_v36, %v3561_v36  ;;  %v3156_v62 = vpop.f32.mrf.mxu2  ;;  %v2648_v36 = vpop.f32.mrf.mxu0 }
 0x2a9   : > { %3565 = vst [vmem:[#allocation1 + $0x3] ss:$4 sm:$0xff] %v6793_v34  ;;  %v6804_v28 = vadd.f32 %v3156_v62, %v2820_v2  ;;  %v2821_v7 = vpop.f32.mrf.mxu1  ;;  %v6818_v62 = vadd.f32 %v3161_v21, %v6622_v0 }
 0x2aa   : > { %3566 = vst [vmem:[#allocation1 + $0x20] ss:$4 sm:$0xff] %v6796_v33  ;;  %v2822_v33 = vadd.f32 %v2821_v7, %v2648_v36 }
 0x2ab   : > { %3697 = vst.msk [vmem:[%s6267_s26 + $0x54] sm:$0xf] %vm437_vm0, %v3665_v52  ;;  %v6807_v22 = vrot.slane %v6804_v28, 2  ;;  %v6810_v41 = vrot.slane %v6804_v28, 4  ;;  %v3168_v52 = vpop.f32.mrf.mxu3  ;;  %v6831_v36 = vrot.slane %v6818_v62, 4  ;;  %v6838_v21 = vrot.slane %v6818_v62, 6 }
 0x2ac   : > { %7837 = vst [vmem:[#allocation84_spill] sm:$0xff] %v6804_v28 }
 0x2ad   : > { %7838 = vst [vmem:[#allocation85_spill] sm:$0xff] %v6807_v22 }
 0x2ae   : > { %7839 = vst [vmem:[#allocation86_spill] sm:$0xff] %v6810_v41 }
 0x2af   : > { %3567 = vst [vmem:[#allocation1 + $0x21] ss:$4 sm:$0xff] %v6804_v28 }
 0x2b0   : > { %v3570_v34 = vld.sshfl [vmem:[#allocation1] sm:$0xff pattern:$0x73625140]  ;;  %3568 = vst [vmem:[#allocation1 + $0x22] ss:$4 sm:$0xff] %v6807_v22  ;;  %v3158_v2 = vpop.f32.mrf.mxu2  ;;  %v6827_v22 = vrot.slane %v6818_v62, 2 }
 0x2b1   : > { %3569 = vst [vmem:[#allocation1 + $0x23] ss:$4 sm:$0xff] %v6810_v41  ;;  %v3666_v60 = vpack.c.bf16 %v3570_v34, %v3570_v34  ;;  %v6820_v13 = vadd.f32 %v3158_v2, %v2822_v33  ;;  %v6848_v2 = vadd.f32 %v3166_v58, %v6656_v44  ;;  %v6866_v44 = vadd.f32 %v3168_v52, %v6672_v46 }
 0x2b2   : > { %7840 = vst [vmem:[#allocation87_spill] sm:$0xff] %v6818_v62 }
 0x2b3   : > { %3698 = vst.msk [vmem:[%s6267_s26 + $0x58] sm:$0xf] %vm437_vm0, %v3666_v60  ;;  %v6823_v28 = vrot.slane %v6820_v13, 2  ;;  %v6835_v0 = vrot.slane %v6820_v13, 4  ;;  %v6842_v33 = vrot.slane %v6820_v13, 6  ;;  %v3171_v60 = vpop.f32.mrf.mxu3 }
 0x2b4   : > { %3572 = vst [vmem:[#allocation1] ss:$4 sm:$0xff] %v6820_v13  ;;  %v6879_v46 = vadd.f32 %v3171_v60, %v6692_v29  ;;  %v6909_v60 = vrot.slane %v6866_v44, 6 }
 0x2b5   : > { %7841 = vst [vmem:[#allocation88_spill] sm:$0xff] %v6823_v28 }
 0x2b6   : > { %7842 = vst [vmem:[#allocation89_spill] sm:$0xff] %v6827_v22  ;;  %v6895_v29 = vrot.slane %v6879_v46, 6 }
 0x2b7   : > { %3573 = vst [vmem:[#allocation1 + $0x1] ss:$4 sm:$0xff] %v6823_v28 }
 0x2b8   : > { %v3571_v34 = vld.sshfl [vmem:[#allocation1 + $0x20] sm:$0xff pattern:$0x73625140]  ;;  %7843 = vst [vmem:[#allocation90_spill] sm:$0xff] %v6831_v36 }
 0x2b9   : > { %3576 = vst [vmem:[#allocation1 + $0x20] ss:$4 sm:$0xff] %v6818_v62  ;;  %v3667_v7 = vpack.c.bf16 %v3571_v34, %v3571_v34  ;;  %v6855_v62 = vrot.slane %v6848_v2, 2 }
 0x2ba   : > { %7844 = vst [vmem:[#allocation91_spill] sm:$0xff] %v6835_v0 }
 0x2bb   : > { %7845 = vst [vmem:[#allocation92_spill] sm:$0xff] %v6838_v21 }
 0x2bc   : > { %3577 = vst [vmem:[#allocation1 + $0x21] ss:$4 sm:$0xff] %v6827_v22  ;;  %v3210_v22 = vadd.f32 %v3163_v12, %v6636_v26 }
 0x2bd   : > { %3578 = vst [vmem:[#allocation1 + $0x22] ss:$4 sm:$0xff] %v6831_v36  ;;  %v6858_v36 = vrot.slane %v6848_v2, 4 }
 0x2be   : > { %3579 = vst [vmem:[#allocation1 + $0x23] ss:$4 sm:$0xff] %v6838_v21  ;;  %v6861_v21 = vrot.slane %v6848_v2, 6  ;;  %v6868_v26 = vrot.slane %v3210_v22, 2  ;;  %v6871_v12 = vrot.slane %v3210_v22, 4  ;;  %v6874_v41 = vrot.slane %v3210_v22, 6 }
 0x2bf   : > { %3574 = vst [vmem:[#allocation1 + $0x2] ss:$4 sm:$0xff] %v6835_v0  ;;  %v6890_v22 = vrot.slane %v6879_v46, 4 }
 0x2c0   : > { %3575 = vst [vmem:[#allocation1 + $0x3] ss:$4 sm:$0xff] %v6842_v33 }
 0x2c1   : > { %3699 = vst.msk [vmem:[%s6267_s26 + $0x5c] sm:$0xf] %vm437_vm0, %v3667_v7  ;;  %v3173_v7 = vpop.f32.mrf.mxu3 }
 0x2c2   : > { %7846 = vst [vmem:[#allocation93_spill] sm:$0xff] %v6855_v62 }
 0x2c3   : > { %7847 = vst [vmem:[#allocation94_spill] sm:$0xff] %v6858_v36 }
 0x2c4   : > { %7848 = vst [vmem:[#allocation95_spill] sm:$0xff] %v6861_v21 }
 0x2c5   : > { %v3581_v34 = vld.sshfl [vmem:[#allocation1 + $0x20] sm:$0xff pattern:$0x73625140]  ;;  %7849 = vst [vmem:[#allocation96_spill] sm:$0xff] %v6868_v26 }
 0x2c6   : > { %3586 = vst [vmem:[#allocation1 + $0x20] ss:$4 sm:$0xff] %v6855_v62  ;;  %v3669_v52 = vpack.c.bf16 %v3581_v34, %v3581_v34 }
 0x2c7   : > { %3587 = vst [vmem:[#allocation1 + $0x21] ss:$4 sm:$0xff] %v6858_v36  ;;  %v3580_v58 = vld.sshfl [vmem:[#allocation1] sm:$0xff pattern:$0x73625140] }
 0x2c8   : > { %3588 = vst [vmem:[#allocation1 + $0x22] ss:$4 sm:$0xff] %v6861_v21  ;;  %v3668_v36 = vpack.c.bf16 %v3580_v58, %v3580_v58  ;;  %v2837_v21 = vadd.f32 %v6709_v63, %v6566_v51  ;;  %v6903_v63 = vrot.slane %v6866_v44, 4 }
 0x2c9   : > { %3589 = vst [vmem:[#allocation1 + $0x23] ss:$4 sm:$0xff] %v6866_v44 }
 0x2ca   : > { %7850 = vst [vmem:[#allocation97_spill] sm:$0xff] %v6874_v41  ;;  %v6885_v62 = vadd.f32 %v3173_v7, %v2837_v21  ;;  %v2840_v21 = vadd.f32 %v6722_v35, %v6587_v49 }
 0x2cb   : > { %3582 = vst [vmem:[#allocation1] ss:$4 sm:$0xff] %v6868_v26 }
 0x2cc   : > { %3583 = vst [vmem:[#allocation1 + $0x1] ss:$4 sm:$0xff] %v6871_v12  ;;  %v6900_v51 = vrot.slane %v6885_v62, 2 }
 0x2cd   : > { %3584 = vst [vmem:[#allocation1 + $0x2] ss:$4 sm:$0xff] %v6874_v41 }
 0x2ce   : > { %3585 = vst [vmem:[#allocation1 + $0x3] ss:$4 sm:$0xff] %v6848_v2 }
 0x2cf   : > { %3700 = vst.msk [vmem:[%s6267_s26 + $0x60] sm:$0xf] %vm437_vm0, %v3668_v36  ;;  %v3176_v36 = vpop.f32.mrf.mxu3 }
 0x2d0   : > { %7851 = vst [vmem:[#allocation98_spill] sm:$0xff] %v6890_v22  ;;  %v3591_v58 = vld.sshfl [vmem:[#allocation1 + $0x20] sm:$0xff pattern:$0x73625140] }
 0x2d1   : > { %3701 = vst.msk [vmem:[%s6267_s26 + $0x64] sm:$0xf] %vm437_vm0, %v3669_v52  ;;  %v3671_v52 = vpack.c.bf16 %v3591_v58, %v3591_v58 }
 0x2d2   : > { %7852 = vst [vmem:[#allocation99_spill] sm:$0xff] %v6895_v29 }
 0x2d3   : > { %3596 = vst [vmem:[#allocation1 + $0x20] ss:$4 sm:$0xff] %v6890_v22  ;;  %v6917_v22 = vadd.f32 %v3176_v36, %v2840_v21  ;;  %v6930_v36 = vrot.slane %v6885_v62, 6 }
 0x2d4   : > { %3597 = vst [vmem:[#allocation1 + $0x21] ss:$4 sm:$0xff] %v6895_v29  ;;  %v6915_v29 = vrot.slane %v6879_v46, 2 }
 0x2d5   : > { %7853 = vst [vmem:[#allocation100_spill] sm:$0xff] %v6903_v63  ;;  %v3590_v34 = vld.sshfl [vmem:[#allocation1] sm:$0xff pattern:$0x73625140]  ;;  %v6926_v49 = vrot.slane %v6917_v22, 6 }
 0x2d6   : > { %3598 = vst [vmem:[#allocation1 + $0x22] ss:$4 sm:$0xff] %v6885_v62  ;;  %v3670_v7 = vpack.c.bf16 %v3590_v34, %v3590_v34 }
 0x2d7   : > { %7854 = vst [vmem:[#allocation101_spill] sm:$0xff] %v6909_v60 }
 0x2d8   : > { %3599 = vst [vmem:[#allocation1 + $0x23] ss:$4 sm:$0xff] %v6900_v51 }
 0x2d9   : > { %3592 = vst [vmem:[#allocation1] ss:$4 sm:$0xff] %v6903_v63 }
 0x2da   : > { %3593 = vst [vmem:[#allocation1 + $0x1] ss:$4 sm:$0xff] %v6909_v60 }
 0x2db   : > { %7855 = vst [vmem:[#allocation102_spill] sm:$0xff] %v6917_v22 }
 0x2dc   : > { %3594 = vst [vmem:[#allocation1 + $0x2] ss:$4 sm:$0xff] %v6879_v46 }
 0x2dd   : > { %3595 = vst [vmem:[#allocation1 + $0x3] ss:$4 sm:$0xff] %v6915_v29 }
 0x2de   : > { %3702 = vst.msk [vmem:[%s6267_s26 + $0x68] sm:$0xf] %vm437_vm0, %v3670_v7  ;;  %v6936_v7 = vrot.slane %v6917_v22, 2 }
 0x2df   : > { %3703 = vst.msk [vmem:[%s6267_s26 + $0x6c] sm:$0xf] %vm437_vm0, %v3671_v52  ;;  %v3601_v35 = vld.sshfl [vmem:[#allocation1 + $0x20] sm:$0xff pattern:$0x73625140]  ;;  %v6942_v52 = vrot.slane %v6917_v22, 4 }
 0x2e0   : > { %7856 = vst [vmem:[#allocation103_spill] sm:$0xff] %v6926_v49  ;;  %v3673_v58 = vpack.c.bf16 %v3601_v35, %v3601_v35 }
 0x2e1   : > { %3606 = vst [vmem:[#allocation1 + $0x20] ss:$4 sm:$0xff] %v6926_v49 }
 0x2e2   : > { %7857 = vst [vmem:[#allocation104_spill] sm:$0xff] %v6930_v36 }
 0x2e3   : > { %3705 = vst.msk [vmem:[%s6267_s26 + $0x74] sm:$0xf] %vm437_vm0, %v3673_v58 }
 0x2e4   : > { %v3600_v21 = vld.sshfl [vmem:[#allocation1] sm:$0xff pattern:$0x73625140]  ;;  %7858 = vst [vmem:[#allocation105_spill] sm:$0xff] %v6936_v7 }
 0x2e5   : > { %v3672_v34 = vpack.c.bf16 %v3600_v21, %v3600_v21  ;;  %3602 = vst [vmem:[#allocation1] ss:$4 sm:$0xff] %v6930_v36  ;;  %v3178_v21 = vpop.f32.mrf.mxu3 }
 0x2e6   : > { %3603 = vst [vmem:[#allocation1 + $0x1] ss:$4 sm:$0xff] %v6917_v22 }
 0x2e7   : > { %3704 = vst.msk [vmem:[%s6267_s26 + $0x70] sm:$0xf] %vm437_vm0, %v3672_v34  ;;  %v6953_v34 = vadd.f32 %v3178_v21, %v6742_v20 }
 0x2e8   : > { %7859 = vst [vmem:[#allocation106_spill] sm:$0xff] %v6942_v52 }
 0x2e9   : > { %3604 = vst [vmem:[#allocation1 + $0x2] ss:$4 sm:$0xff] %v6936_v7  ;;  %v6956_v49 = vrot.slane %v6953_v34, 2 }
 0x2ea   : > { %3605 = vst [vmem:[#allocation1 + $0x3] ss:$4 sm:$0xff] %v6942_v52 }
 0x2eb   : > { %7860 = vst [vmem:[#allocation107_spill] sm:$0xff] %v6953_v34 }
 0x2ec   : > { %7861 = vst [vmem:[#allocation108_spill] sm:$0xff] %v6956_v49 }
 0x2ed   : > { %3607 = vst [vmem:[#allocation1 + $0x21] ss:$4 sm:$0xff] %v6953_v34 }
 0x2ee   : > { %3608 = vst [vmem:[#allocation1 + $0x22] ss:$4 sm:$0xff] %v6956_v49 }
 0x2f1   : > { %v3610_v35 = vld.sshfl [vmem:[#allocation1] sm:$0xff pattern:$0x73625140] }
 0x2f2   : > { %v3674_v58 = vpack.c.bf16 %v3610_v35, %v3610_v35  ;;  %3708 = vst [vmem:[#allocation1] ss:$4 sm:$0xff] %v6213_v37  ;;  %v6959_v35 = vrot.slane %v6953_v34, 4 }
 0x2f3   : > { %3710 = vst [vmem:[#allocation1 + $0x1] ss:$4 sm:$0xff] %v6216_v27 }
 0x2f4   : > { %3706 = vst.msk [vmem:[%s6267_s26 + $0x78] sm:$0xf] %vm437_vm0, %v3674_v58 }
 0x2f5   : > { %3712 = vst [vmem:[#allocation1 + $0x2] ss:$4 sm:$0xff] %v6219_v14 }
 0x2f6   : > { %3714 = vst [vmem:[#allocation1 + $0x3] ss:$4 sm:$0xff] %v6222_v56 }
 0x2f7   : > { %7862 = vst [vmem:[#allocation109_spill] sm:$0xff] %v6959_v35 }
 0x2f8   : > { %3609 = vst [vmem:[#allocation1 + $0x23] ss:$4 sm:$0xff] %v6959_v35 }
 0x2fd   : > { %v6964_v58 = vld.sshfl [vmem:[#allocation1] sm:$0xff pattern:$0x73625140] }
 0x2fe   : > { %3725 = vst [vmem:[#allocation1] ss:$4 sm:$0xff] %v6283_v1 }
 0x2ff   : > { %3726 = vst [vmem:[#allocation1 + $0x1] ss:$4 sm:$0xff] %v6288_v42  ;;  %v3611_v20 = vld.sshfl [vmem:[#allocation1 + $0x20] sm:$0xff pattern:$0x73625140] }
 0x300   : > { %3727 = vst [vmem:[#allocation1 + $0x2] ss:$4 sm:$0xff] %v6291_v25  ;;  %v3675_v21 = vpack.c.bf16 %v3611_v20, %v3611_v20 }
 0x301   : > { %3728 = vst [vmem:[#allocation1 + $0x3] ss:$4 sm:$0xff] %v6298_v47 }
 0x302   : > { %3716 = vst [vmem:[#allocation1 + $0x20] ss:$4 sm:$0xff] %v6235_v15 }
 0x303   : > { %3718 = vst [vmem:[#allocation1 + $0x21] ss:$4 sm:$0xff] %v6240_v8 }
 0x304   : > { %3707 = vst.msk [vmem:[%s6267_s26 + $0x7c] sm:$0xf] %vm437_vm0, %v3675_v21  ;;  %vm3907_vm0 = vcmask 64512  }
 0x305   : > { %3720 = vst [vmem:[#allocation1 + $0x22] ss:$4 sm:$0xff] %v6243_v43 }
 0x306   : > { %3722 = vst [vmem:[#allocation1 + $0x23] ss:$4 sm:$0xff] %v6246_v40 }
 0x308   : > { %v6975_v56 = vld.sshfl [vmem:[#allocation1] sm:$0xff pattern:$0x73625140] }
 0x309   : > { %3735 = vst [vmem:[#allocation1] ss:$4 sm:$0xff] %v6335_v6 }
 0x30a   : > { %3736 = vst [vmem:[#allocation1 + $0x1] ss:$4 sm:$0xff] %v6344_v39  ;;  %v7896_v39 = vld [vmem:[#allocation59_spill] sm:$0xff] }
 0x30b   : > { %3737 = vst [vmem:[#allocation1 + $0x2] ss:$4 sm:$0xff] %v6355_v31 }
 0x30c   : > { %3738 = vst [vmem:[#allocation1 + $0x3] ss:$4 sm:$0xff] %v6362_v11 }
 0x30d   : > { %v6982_v20 = vld.sshfl [vmem:[#allocation1 + $0x20] sm:$0xff pattern:$0x73625140] }
 0x30e   : > { %3729 = vst [vmem:[#allocation1 + $0x20] ss:$4 sm:$0xff] %v6304_v61 }
 0x30f   : > { %3730 = vst [vmem:[#allocation1 + $0x21] ss:$4 sm:$0xff] %v6307_v3 }
 0x310   : > { %3731 = vst [vmem:[#allocation1 + $0x22] ss:$4 sm:$0xff] %v6315_v9  ;;  %v7906_v9 = vld [vmem:[#allocation69_spill] sm:$0xff] }
 0x311   : > { %3732 = vst [vmem:[#allocation1 + $0x23] ss:$4 sm:$0xff] %v6326_v30 }
 0x313   : > { %v6987_v21 = vld.sshfl [vmem:[#allocation1] sm:$0xff pattern:$0x73625140] }
 0x314   : > { %3745 = vst [vmem:[#allocation1] ss:$4 sm:$0xff] %v6410_v23  ;;  %v7875_v23 = vld [vmem:[#allocation38_spill] sm:$0xff] }
 0x315   : > { %3746 = vst [vmem:[#allocation1 + $0x1] ss:$4 sm:$0xff] %v6428_v17  ;;  %v7868_v17 = vld [vmem:[#allocation30_spill] sm:$0xff] }
 0x316   : > { %3747 = vst [vmem:[#allocation1 + $0x2] ss:$4 sm:$0xff] %v6433_v18 }
 0x317   : > { %3748 = vst [vmem:[#allocation1 + $0x3] ss:$4 sm:$0xff] %v6439_v55 }
 0x318   : > { %v6994_v11 = vld.sshfl [vmem:[#allocation1 + $0x20] sm:$0xff pattern:$0x73625140] }
 0x319   : > { %3739 = vst [vmem:[#allocation1 + $0x20] ss:$4 sm:$0xff] %v6365_v48  ;;  %v7891_v48 = vld [vmem:[#allocation54_spill] sm:$0xff] }
 0x31a   : > { %3740 = vst [vmem:[#allocation1 + $0x21] ss:$4 sm:$0xff] %v6373_v50  ;;  %v7888_v50 = vld [vmem:[#allocation51_spill] sm:$0xff] }
 0x31b   : > { %3741 = vst [vmem:[#allocation1 + $0x22] ss:$4 sm:$0xff] %v6394_v10  ;;  %v7883_v10 = vld [vmem:[#allocation46_spill] sm:$0xff] }
 0x31c   : > { %3742 = vst [vmem:[#allocation1 + $0x23] ss:$4 sm:$0xff] %v6407_v38  ;;  %v7880_v38 = vld [vmem:[#allocation43_spill] sm:$0xff] }
 0x31e   : > { %v6999_v31 = vld.sshfl [vmem:[#allocation1] sm:$0xff pattern:$0x73625140] }
 0x31f   : > { %3755 = vst [vmem:[#allocation1] ss:$4 sm:$0xff] %v6477_v59  ;;  %v7865_v59 = vld [vmem:[#allocation27_spill] sm:$0xff] }
 0x320   : > { %3756 = vst [vmem:[#allocation1 + $0x1] ss:$4 sm:$0xff] %v6484_v45  ;;  %v7863_v45 = vld [vmem:[#allocation33_spill] sm:$0xff] }
 0x321   : > { %3757 = vst [vmem:[#allocation1 + $0x2] ss:$4 sm:$0xff] %v6487_v4  ;;  %v7864_v4 = vld [vmem:[#allocation34_spill] sm:$0xff] }
 0x322   : > { %3758 = vst [vmem:[#allocation1 + $0x3] ss:$4 sm:$0xff] %v6493_v16 }
 0x323   : > { %v7006_v55 = vld.sshfl [vmem:[#allocation1 + $0x20] sm:$0xff pattern:$0x73625140] }
 0x324   : > { %3749 = vst [vmem:[#allocation1 + $0x20] ss:$4 sm:$0xff] %v6443_v19  ;;  %v7866_v19 = vld [vmem:[#allocation28_spill] sm:$0xff] }
 0x325   : > { %3750 = vst [vmem:[#allocation1 + $0x21] ss:$4 sm:$0xff] %v6451_v53  ;;  %v7867_v53 = vld [vmem:[#allocation29_spill] sm:$0xff] }
 0x326   : > { %3751 = vst [vmem:[#allocation1 + $0x22] ss:$4 sm:$0xff] %v6456_v24 }
 0x327   : > { %3752 = vst [vmem:[#allocation1 + $0x23] ss:$4 sm:$0xff] %v6459_v57  ;;  %v7869_v57 = vld [vmem:[#allocation39_spill] sm:$0xff] }
 0x329   : > { %v7011_v18 = vld.sshfl [vmem:[#allocation1] sm:$0xff pattern:$0x73625140] }
 0x32a   : > { %3765 = vst [vmem:[#allocation1] ss:$4 sm:$0xff] %v6529_v5  ;;  %v7870_v5 = vld [vmem:[#allocation40_spill] sm:$0xff] }
 0x32b   : > { %3766 = vst [vmem:[#allocation1 + $0x1] ss:$4 sm:$0xff] %v6531_v54  ;;  %v7871_v54 = vld [vmem:[#allocation41_spill] sm:$0xff] }
 0x32c   : > { %3767 = vst [vmem:[#allocation1 + $0x2] ss:$4 sm:$0xff] %v7863_v45  ;;  %v7872_v45 = vld [vmem:[#allocation35_spill] sm:$0xff] }
 0x32d   : > { %3768 = vst [vmem:[#allocation1 + $0x3] ss:$4 sm:$0xff] %v7864_v4 }
 0x32e   : > { %v7018_v16 = vld.sshfl [vmem:[#allocation1 + $0x20] sm:$0xff pattern:$0x73625140] }
 0x32f   : > { %3759 = vst [vmem:[#allocation1 + $0x20] ss:$4 sm:$0xff] %v7865_v59  ;;  %v7873_v59 = vld [vmem:[#allocation36_spill] sm:$0xff] }
 0x330   : > { %3760 = vst [vmem:[#allocation1 + $0x21] ss:$4 sm:$0xff] %v7866_v19  ;;  %v7874_v19 = vld [vmem:[#allocation37_spill] sm:$0xff] }
 0x331   : > { %3761 = vst [vmem:[#allocation1 + $0x22] ss:$4 sm:$0xff] %v7867_v53 }
 0x332   : > { %3762 = vst [vmem:[#allocation1 + $0x23] ss:$4 sm:$0xff] %v7868_v17  ;;  %v7876_v17 = vld [vmem:[#allocation47_spill] sm:$0xff] }
 0x334   : > { %v7023_v24 = vld.sshfl [vmem:[#allocation1] sm:$0xff pattern:$0x73625140] }
 0x335   : > { %3775 = vst [vmem:[#allocation1] ss:$4 sm:$0xff] %v7869_v57  ;;  %v7877_v57 = vld [vmem:[#allocation48_spill] sm:$0xff] }
 0x336   : > { %3776 = vst [vmem:[#allocation1 + $0x1] ss:$4 sm:$0xff] %v7870_v5  ;;  %v7878_v5 = vld [vmem:[#allocation49_spill] sm:$0xff] }
 0x337   : > { %3777 = vst [vmem:[#allocation1 + $0x2] ss:$4 sm:$0xff] %v7871_v54  ;;  %v7879_v54 = vld [vmem:[#allocation50_spill] sm:$0xff] }
 0x338   : > { %3778 = vst [vmem:[#allocation1 + $0x3] ss:$4 sm:$0xff] %v6605_v32 }
 0x339   : > { %v7030_v4 = vld.sshfl [vmem:[#allocation1 + $0x20] sm:$0xff pattern:$0x73625140] }
 0x33a   : > { %3769 = vst [vmem:[#allocation1 + $0x20] ss:$4 sm:$0xff] %v7872_v45  ;;  %v7881_v45 = vld [vmem:[#allocation44_spill] sm:$0xff] }
 0x33b   : > { %3770 = vst [vmem:[#allocation1 + $0x21] ss:$4 sm:$0xff] %v7873_v59  ;;  %v7882_v59 = vld [vmem:[#allocation45_spill] sm:$0xff] }
 0x33c   : > { %3771 = vst [vmem:[#allocation1 + $0x22] ss:$4 sm:$0xff] %v7874_v19 }
 0x33d   : > { %3772 = vst [vmem:[#allocation1 + $0x23] ss:$4 sm:$0xff] %v7875_v23  ;;  %v7884_v23 = vld [vmem:[#allocation55_spill] sm:$0xff] }
 0x33f   : > { %v7035_v53 = vld.sshfl [vmem:[#allocation1] sm:$0xff pattern:$0x73625140] }
 0x340   : > { %3785 = vst [vmem:[#allocation1] ss:$4 sm:$0xff] %v7876_v17  ;;  %v7885_v17 = vld [vmem:[#allocation56_spill] sm:$0xff] }
 0x341   : > { %3786 = vst [vmem:[#allocation1 + $0x1] ss:$4 sm:$0xff] %v7877_v57  ;;  %v7886_v57 = vld [vmem:[#allocation57_spill] sm:$0xff] }
 0x342   : > { %3787 = vst [vmem:[#allocation1 + $0x2] ss:$4 sm:$0xff] %v7878_v5  ;;  %v7887_v5 = vld [vmem:[#allocation58_spill] sm:$0xff] }
 0x343   : > { %3788 = vst [vmem:[#allocation1 + $0x3] ss:$4 sm:$0xff] %v7879_v54 }
 0x344   : > { %v7042_v32 = vld.sshfl [vmem:[#allocation1 + $0x20] sm:$0xff pattern:$0x73625140] }
 0x345   : > { %3779 = vst [vmem:[#allocation1 + $0x20] ss:$4 sm:$0xff] %v7880_v38  ;;  %v7889_v38 = vld [vmem:[#allocation52_spill] sm:$0xff] }
 0x346   : > { %3780 = vst [vmem:[#allocation1 + $0x21] ss:$4 sm:$0xff] %v7881_v45  ;;  %v7890_v45 = vld [vmem:[#allocation53_spill] sm:$0xff] }
 0x347   : > { %3781 = vst [vmem:[#allocation1 + $0x22] ss:$4 sm:$0xff] %v7882_v59 }
 0x348   : > { %3782 = vst [vmem:[#allocation1 + $0x23] ss:$4 sm:$0xff] %v7883_v10  ;;  %v7892_v10 = vld [vmem:[#allocation63_spill] sm:$0xff] }
 0x34a   : > { %v7047_v19 = vld.sshfl [vmem:[#allocation1] sm:$0xff pattern:$0x73625140] }
 0x34b   : > { %3795 = vst [vmem:[#allocation1] ss:$4 sm:$0xff] %v7884_v23  ;;  %v7893_v23 = vld [vmem:[#allocation64_spill] sm:$0xff] }
 0x34c   : > { %3796 = vst [vmem:[#allocation1 + $0x1] ss:$4 sm:$0xff] %v7885_v17  ;;  %v7894_v17 = vld [vmem:[#allocation65_spill] sm:$0xff] }
 0x34d   : > { %3797 = vst [vmem:[#allocation1 + $0x2] ss:$4 sm:$0xff] %v7886_v57  ;;  %v7895_v57 = vld [vmem:[#allocation66_spill] sm:$0xff] }
 0x34e   : > { %3798 = vst [vmem:[#allocation1 + $0x3] ss:$4 sm:$0xff] %v7887_v5 }
 0x34f   : > { %v7054_v54 = vld.sshfl [vmem:[#allocation1 + $0x20] sm:$0xff pattern:$0x73625140] }
 0x350   : > { %3789 = vst [vmem:[#allocation1 + $0x20] ss:$4 sm:$0xff] %v7888_v50  ;;  %v7897_v50 = vld [vmem:[#allocation60_spill] sm:$0xff] }
 0x351   : > { %3790 = vst [vmem:[#allocation1 + $0x21] ss:$4 sm:$0xff] %v7889_v38  ;;  %v7898_v38 = vld [vmem:[#allocation61_spill] sm:$0xff] }
 0x352   : > { %3791 = vst [vmem:[#allocation1 + $0x22] ss:$4 sm:$0xff] %v7890_v45 }
 0x353   : > { %3792 = vst [vmem:[#allocation1 + $0x23] ss:$4 sm:$0xff] %v7891_v48  ;;  %v7899_v48 = vld [vmem:[#allocation62_spill] sm:$0xff] }
 0x355   : > { %v7059_v59 = vld.sshfl [vmem:[#allocation1] sm:$0xff pattern:$0x73625140] }
 0x356   : > { %3805 = vst [vmem:[#allocation1] ss:$4 sm:$0xff] %v7892_v10  ;;  %v7900_v10 = vld [vmem:[#allocation71_spill] sm:$0xff] }
 0x357   : > { %3806 = vst [vmem:[#allocation1 + $0x1] ss:$4 sm:$0xff] %v7893_v23  ;;  %v7901_v23 = vld [vmem:[#allocation72_spill] sm:$0xff] }
 0x358   : > { %3807 = vst [vmem:[#allocation1 + $0x2] ss:$4 sm:$0xff] %v7894_v17  ;;  %v3909_v17 = vsel %vm3907_vm0, %v6982_v20, 0.0  ;;  %v3915_v20 = vsel %vm3907_vm0, %v6987_v21, 0.0  ;;  %v3919_v21 = vsel %vm3907_vm0, %v6999_v31, 0.0  ;;  %v3923_v31 = vsel %vm3907_vm0, %v7011_v18, 0.0 }
 0x359   : > { %3808 = vst [vmem:[#allocation1 + $0x3] ss:$4 sm:$0xff] %v7895_v57  ;;  %v3908_v57 = vsel %vm3907_vm0, %v6964_v58, 0.0  ;;  %v3913_v58 = vsel %vm3907_vm0, %v6994_v11, 0.0  ;;  %v3917_v11 = vsel %vm3907_vm0, %v7006_v55, 0.0  ;;  %v7917_v18 = vld [vmem:[#allocation84_spill] sm:$0xff] }
 0x35a   : > { %v7066_v5 = vld.sshfl [vmem:[#allocation1 + $0x20] sm:$0xff pattern:$0x73625140]  ;;  %v3910_v6 = vadd.f32 %v3909_v17, %v3908_v57  ;;  %v7908_v17 = vld [vmem:[#allocation79_spill] sm:$0xff]  ;;  %v7910_v57 = vld [vmem:[#allocation81_spill] sm:$0xff] }
 0x35b   : > { %3799 = vst [vmem:[#allocation1 + $0x20] ss:$4 sm:$0xff] %v7896_v39  ;;  %v7902_v39 = vld [vmem:[#allocation73_spill] sm:$0xff] }
 0x35c   : > { %3800 = vst [vmem:[#allocation1 + $0x21] ss:$4 sm:$0xff] %v7897_v50  ;;  %v7903_v50 = vld [vmem:[#allocation74_spill] sm:$0xff] }
 0x35d   : > { %3801 = vst [vmem:[#allocation1 + $0x22] ss:$4 sm:$0xff] %v7898_v38  ;;  %v3911_v38 = vsel %vm3907_vm0, %v6975_v56, 0.0 }
 0x35e   : > { %3802 = vst [vmem:[#allocation1 + $0x23] ss:$4 sm:$0xff] %v7899_v48  ;;  %v3912_v48 = vadd.f32 %v3911_v38, %v3910_v6  ;;  %v7909_v6 = vld [vmem:[#allocation80_spill] sm:$0xff] }
 0x360   : > { %v7071_v45 = vld.sshfl [vmem:[#allocation1] sm:$0xff pattern:$0x73625140]  ;;  %v3914_v56 = vadd.f32 %v3913_v58, %v3912_v48  ;;  %v7913_v58 = vld [vmem:[#allocation76_spill] sm:$0xff] }
 0x361   : > { %3815 = vst [vmem:[#allocation1] ss:$4 sm:$0xff] %v7900_v10  ;;  %v7904_v10 = vld [vmem:[#allocation67_spill] sm:$0xff] }
 0x362   : > { %3816 = vst [vmem:[#allocation1 + $0x1] ss:$4 sm:$0xff] %v7901_v23  ;;  %v7905_v23 = vld [vmem:[#allocation68_spill] sm:$0xff]  ;;  %v3916_v38 = vadd.f32 %v3915_v20, %v3914_v56  ;;  %v3921_v20 = vsel %vm3907_vm0, %v7018_v16, 0.0  ;;  %v3925_v16 = vsel %vm3907_vm0, %v7030_v4, 0.0  ;;  %v3929_v4 = vsel %vm3907_vm0, %v7042_v32, 0.0 }
 0x363   : > { %3817 = vst [vmem:[#allocation1 + $0x2] ss:$4 sm:$0xff] %v7902_v39  ;;  %v7907_v39 = vld [vmem:[#allocation70_spill] sm:$0xff] }
 0x364   : > { %3818 = vst [vmem:[#allocation1 + $0x3] ss:$4 sm:$0xff] %v7903_v50 }
 0x365   : > { %v7084_v30 = vld.sshfl [vmem:[#allocation1 + $0x20] sm:$0xff pattern:$0x73625140] }
 0x366   : > { %3809 = vst [vmem:[#allocation1 + $0x20] ss:$4 sm:$0xff] %v7904_v10 }
 0x367   : > { %3810 = vst [vmem:[#allocation1 + $0x21] ss:$4 sm:$0xff] %v7905_v23  ;;  %v7911_v23 = vld [vmem:[#allocation82_spill] sm:$0xff] }
 0x368   : > { %3811 = vst [vmem:[#allocation1 + $0x22] ss:$4 sm:$0xff] %v7906_v9  ;;  %v3918_v9 = vadd.f32 %v3917_v11, %v3916_v38  ;;  %v3927_v38 = vsel %vm3907_vm0, %v7023_v24, 0.0  ;;  %v3931_v24 = vsel %vm3907_vm0, %v7035_v53, 0.0  ;;  %v7922_v53 = vld [vmem:[#allocation90_spill] sm:$0xff] }
 0x369   : > { %3812 = vst [vmem:[#allocation1 + $0x23] ss:$4 sm:$0xff] %v7907_v39  ;;  %v7912_v39 = vld [vmem:[#allocation75_spill] sm:$0xff] }
 0x36a   : > { %v3920_v48 = vadd.f32 %v3919_v21, %v3918_v9 }
 0x36b   : > { %v7093_v50 = vld.sshfl [vmem:[#allocation1] sm:$0xff pattern:$0x73625140] }
 0x36c   : > { %3825 = vst [vmem:[#allocation1] ss:$4 sm:$0xff] %v7908_v17  ;;  %v3922_v55 = vadd.f32 %v3921_v20, %v3920_v48  ;;  %v7918_v20 = vld [vmem:[#allocation85_spill] sm:$0xff] }
 0x36d   : > { %3826 = vst [vmem:[#allocation1 + $0x1] ss:$4 sm:$0xff] %v7909_v6  ;;  %v7914_v6 = vld [vmem:[#allocation77_spill] sm:$0xff] }
 0x36e   : > { %3827 = vst [vmem:[#allocation1 + $0x2] ss:$4 sm:$0xff] %v7910_v57  ;;  %v3924_v9 = vadd.f32 %v3923_v31, %v3922_v55  ;;  %v7916_v57 = vld [vmem:[#allocation83_spill] sm:$0xff] }
 0x36f   : > { %3828 = vst [vmem:[#allocation1 + $0x3] ss:$4 sm:$0xff] %v7911_v23  ;;  %v7915_v23 = vld [vmem:[#allocation78_spill] sm:$0xff] }
 0x370   : > { %v7104_v10 = vld.sshfl [vmem:[#allocation1 + $0x20] sm:$0xff pattern:$0x73625140]  ;;  %v3926_v21 = vadd.f32 %v3925_v16, %v3924_v9  ;;  %v3933_v16 = vsel %vm3907_vm0, %v7054_v54, 0.0  ;;  %v3937_v54 = vsel %vm3907_vm0, %v7066_v5, 0.0 }
 0x371   : > { %3819 = vst [vmem:[#allocation1 + $0x20] ss:$4 sm:$0xff] %v7912_v39 }
 0x372   : > { %3820 = vst [vmem:[#allocation1 + $0x21] ss:$4 sm:$0xff] %v7913_v58  ;;  %v3928_v48 = vadd.f32 %v3927_v38, %v3926_v21  ;;  %v3935_v38 = vsel %vm3907_vm0, %v7047_v19, 0.0  ;;  %v7920_v21 = vld [vmem:[#allocation87_spill] sm:$0xff]  ;;  %v3939_v19 = vsel %vm3907_vm0, %v7059_v59, 0.0 }
 0x373   : > { %3821 = vst [vmem:[#allocation1 + $0x22] ss:$4 sm:$0xff] %v7914_v6 }
 0x374   : > { %3822 = vst [vmem:[#allocation1 + $0x23] ss:$4 sm:$0xff] %v7915_v23  ;;  %v3930_v31 = vadd.f32 %v3929_v4, %v3928_v48 }
 0x376   : > { %v7111_v56 = vld.sshfl [vmem:[#allocation1] sm:$0xff pattern:$0x73625140]  ;;  %v3932_v55 = vadd.f32 %v3931_v24, %v3930_v31 }
 0x377   : > { %3835 = vst [vmem:[#allocation1] ss:$4 sm:$0xff] %v6820_v13 }
 0x378   : > { %3836 = vst [vmem:[#allocation1 + $0x1] ss:$4 sm:$0xff] %v6823_v28  ;;  %v3934_v32 = vadd.f32 %v3933_v16, %v3932_v55  ;;  %v7924_v16 = vld [vmem:[#allocation93_spill] sm:$0xff] }
 0x379   : > { %3837 = vst [vmem:[#allocation1 + $0x2] ss:$4 sm:$0xff] %v6835_v0  ;;  %v7919_v0 = vld [vmem:[#allocation86_spill] sm:$0xff] }
 0x37a   : > { %3838 = vst [vmem:[#allocation1 + $0x3] ss:$4 sm:$0xff] %v6842_v33  ;;  %v3936_v48 = vadd.f32 %v3935_v38, %v3934_v32  ;;  %v3941_v38 = vsel %vm3907_vm0, %v7084_v30, 0.0  ;;  %v3943_v32 = vsel %vm3907_vm0, %v7071_v45, 0.0  ;;  %v3945_v30 = vsel %vm3907_vm0, %v7104_v10, 0.0 }
 0x37b   : > { %v3824_v11 = vld.sshfl [vmem:[#allocation1 + $0x20] sm:$0xff pattern:$0x73625140]  ;;  %v3947_v45 = vsel %vm3907_vm0, %v7093_v50, 0.0 }
 0x37c   : > { %3829 = vst [vmem:[#allocation1 + $0x20] ss:$4 sm:$0xff] %v7916_v57  ;;  %v3938_v24 = vadd.f32 %v3937_v54, %v3936_v48 }
 0x37d   : > { %3830 = vst [vmem:[#allocation1 + $0x21] ss:$4 sm:$0xff] %v7917_v18 }
 0x37e   : > { %3831 = vst [vmem:[#allocation1 + $0x22] ss:$4 sm:$0xff] %v7918_v20  ;;  %v3940_v31 = vadd.f32 %v3939_v19, %v3938_v24 }
 0x37f   : > { %3832 = vst [vmem:[#allocation1 + $0x23] ss:$4 sm:$0xff] %v7919_v0 }
 0x380   : > { %v3942_v5 = vadd.f32 %v3941_v38, %v3940_v31  ;;  %v7927_v31 = vld [vmem:[#allocation98_spill] sm:$0xff]  ;;  %v7928_v38 = vld [vmem:[#allocation99_spill] sm:$0xff] }
 0x381   : > { %v3843_v28 = vld.sshfl [vmem:[#allocation1] sm:$0xff pattern:$0x73625140] }
 0x382   : > { %3845 = vst [vmem:[#allocation1] ss:$4 sm:$0xff] %v6868_v26  ;;  %v7921_v26 = vld [vmem:[#allocation89_spill] sm:$0xff]  ;;  %v3944_v48 = vadd.f32 %v3943_v32, %v3942_v5  ;;  %v3949_v32 = vsel %vm3907_vm0, %v3824_v11, 0.0  ;;  %v3951_v5 = vsel %vm3907_vm0, %v7111_v56, 0.0 }
 0x383   : > { %3846 = vst [vmem:[#allocation1 + $0x1] ss:$4 sm:$0xff] %v6871_v12 }
 0x384   : > { %3847 = vst [vmem:[#allocation1 + $0x2] ss:$4 sm:$0xff] %v6874_v41  ;;  %v7923_v41 = vld [vmem:[#allocation92_spill] sm:$0xff]  ;;  %v3946_v54 = vadd.f32 %v3945_v30, %v3944_v48  ;;  %v3955_v48 = vsel %vm3907_vm0, %v3843_v28, 0.0 }
 0x385   : > { %3848 = vst [vmem:[#allocation1 + $0x3] ss:$4 sm:$0xff] %v6848_v2 }
 0x386   : > { %v3834_v9 = vld.sshfl [vmem:[#allocation1 + $0x20] sm:$0xff pattern:$0x73625140]  ;;  %v3948_v19 = vadd.f32 %v3947_v45, %v3946_v54 }
 0x387   : > { %3839 = vst [vmem:[#allocation1 + $0x20] ss:$4 sm:$0xff] %v7920_v21 }
 0x388   : > { %3840 = vst [vmem:[#allocation1 + $0x21] ss:$4 sm:$0xff] %v7921_v26  ;;  %v3950_v10 = vadd.f32 %v3949_v32, %v3948_v19 }
 0x389   : > { %3841 = vst [vmem:[#allocation1 + $0x22] ss:$4 sm:$0xff] %v7922_v53 }
 0x38a   : > { %3842 = vst [vmem:[#allocation1 + $0x23] ss:$4 sm:$0xff] %v7923_v41  ;;  %v3952_v50 = vadd.f32 %v3951_v5, %v3950_v10 }
 0x38c   : > { %v3853_v4 = vld.sshfl [vmem:[#allocation1] sm:$0xff pattern:$0x73625140] }
 0x38d   : > { %3855 = vst [vmem:[#allocation1] ss:$4 sm:$0xff] %v6903_v63  ;;  %v7926_v63 = vld [vmem:[#allocation95_spill] sm:$0xff]  ;;  %v3959_v11 = vsel %vm3907_vm0, %v3853_v4, 0.0 }
 0x38e   : > { %3856 = vst [vmem:[#allocation1 + $0x1] ss:$4 sm:$0xff] %v6909_v60  ;;  %v7925_v60 = vld [vmem:[#allocation94_spill] sm:$0xff] }
 0x38f   : > { %3857 = vst [vmem:[#allocation1 + $0x2] ss:$4 sm:$0xff] %v6879_v46 }
 0x390   : > { %3858 = vst [vmem:[#allocation1 + $0x3] ss:$4 sm:$0xff] %v6915_v29 }
 0x391   : > { %v3844_v55 = vld.sshfl [vmem:[#allocation1 + $0x20] sm:$0xff pattern:$0x73625140] }
 0x392   : > { %3849 = vst [vmem:[#allocation1 + $0x20] ss:$4 sm:$0xff] %v7924_v16  ;;  %v3957_v56 = vsel %vm3907_vm0, %v3844_v55, 0.0 }
 0x393   : > { %3850 = vst [vmem:[#allocation1 + $0x21] ss:$4 sm:$0xff] %v7925_v60 }
 0x394   : > { %3851 = vst [vmem:[#allocation1 + $0x22] ss:$4 sm:$0xff] %v7926_v63 }
 0x395   : > { %3852 = vst [vmem:[#allocation1 + $0x23] ss:$4 sm:$0xff] %v6866_v44 }
 0x397   : > { %v3863_v59 = vld.sshfl [vmem:[#allocation1] sm:$0xff pattern:$0x73625140] }
 0x398   : > { %3865 = vst [vmem:[#allocation1] ss:$4 sm:$0xff] %v6930_v36  ;;  %v3963_v28 = vsel %vm3907_vm0, %v3863_v59, 0.0 }
 0x399   : > { %3866 = vst [vmem:[#allocation1 + $0x1] ss:$4 sm:$0xff] %v6917_v22 }
 0x39a   : > { %3867 = vst [vmem:[#allocation1 + $0x2] ss:$4 sm:$0xff] %v6936_v7  ;;  %v7929_v7 = vld [vmem:[#allocation103_spill] sm:$0xff] }
 0x39b   : > { %3868 = vst [vmem:[#allocation1 + $0x3] ss:$4 sm:$0xff] %v6942_v52  ;;  %v3953_v52 = vsel %vm3907_vm0, %v3834_v9, 0.0 }
 0x39c   : > { %v3854_v24 = vld.sshfl [vmem:[#allocation1 + $0x20] sm:$0xff pattern:$0x73625140]  ;;  %v3954_v30 = vadd.f32 %v3953_v52, %v3952_v50 }
 0x39d   : > { %3859 = vst [vmem:[#allocation1 + $0x20] ss:$4 sm:$0xff] %v7927_v31  ;;  %v3961_v9 = vsel %vm3907_vm0, %v3854_v24, 0.0 }
 0x39e   : > { %3860 = vst [vmem:[#allocation1 + $0x21] ss:$4 sm:$0xff] %v7928_v38  ;;  %v3956_v54 = vadd.f32 %v3955_v48, %v3954_v30 }
 0x39f   : > { %3861 = vst [vmem:[#allocation1 + $0x22] ss:$4 sm:$0xff] %v6885_v62 }
 0x3a0   : > { %3862 = vst [vmem:[#allocation1 + $0x23] ss:$4 sm:$0xff] %v6900_v51  ;;  %v3958_v19 = vadd.f32 %v3957_v56, %v3956_v54 }
 0x3a2   : > { %v3960_v32 = vadd.f32 %v3959_v11, %v3958_v19  ;;  %v3873_v5 = vld.sshfl [vmem:[#allocation1] sm:$0xff pattern:$0x73625140] }
 0x3a3   : > { %v3967_v48 = vsel %vm3907_vm0, %v3873_v5, 0.0 }
 0x3a4   : > { %v3962_v52 = vadd.f32 %v3961_v9, %v3960_v32 }
 0x3a6   : > { %v3964_v10 = vadd.f32 %v3963_v28, %v3962_v52  ;;  %v7931_v28 = vld [vmem:[#allocation4_spill] sm:$0xff] }
 0x3a7   : > { %v3864_v45 = vld.sshfl [vmem:[#allocation1 + $0x20] sm:$0xff pattern:$0x73625140] }
 0x3a8   : > { %3869 = vst [vmem:[#allocation1 + $0x20] ss:$4 sm:$0xff] %v7929_v7  ;;  %v3965_v50 = vsel %vm3907_vm0, %v3864_v45, 0.0 }
 0x3a9   : > { %3870 = vst [vmem:[#allocation1 + $0x21] ss:$4 sm:$0xff] %v6953_v34  ;;  %v3966_v30 = vadd.f32 %v3965_v50, %v3964_v10 }
 0x3aa   : > { %3871 = vst [vmem:[#allocation1 + $0x22] ss:$4 sm:$0xff] %v6956_v49 }
 0x3ab   : > { %3872 = vst [vmem:[#allocation1 + $0x23] ss:$4 sm:$0xff] %v6959_v35  ;;  %v3968_v55 = vadd.f32 %v3967_v48, %v3966_v30 }
 0x3b2   : > { %v3874_v49 = vld.sshfl [vmem:[#allocation1 + $0x20] sm:$0xff pattern:$0x73625140] }
 0x3b3   : > { %v3969_v4 = vsel %vm3907_vm0, %v3874_v49, 0.0 }
 0x3b4   : > { %v3970_v34 = vadd.f32 %v3969_v4, %v3968_v55 }
 0x3b6   : > { %v3971_v35 = vrot.slane %v3970_v34, 4 }
 0x3b8   : > { %v3972_v54 = vadd.f32 %v3971_v35, %v3970_v34 }
 0x3ba   : > { %v3973_v56 = vrot.slane %v3972_v54, 2 }
 0x3bc   : > { %v3974_v11 = vadd.f32 %v3973_v56, %v3972_v54 }
 0x3be   : > { %v3975_v24 = vrot.slane %v3974_v11, 1 }
 0x3c0   : > { %v7188_v19 = vadd.f32 %v3975_v24, %v3974_v11 }
 0x3c2   : > { %7930 = vst [vmem:[#allocation79_spill] sm:$0xff] %v7188_v19  ;;  %v7191_v59 = vmul.f32 0.00390625, %v7188_v19 }
 0x3c4   : > { %v7194_v45 = vrot.slane %v7191_v59, 2  ;;  %v7197_v32 = vrot.slane %v7191_v59, 4  ;;  %v7200_v9 = vrot.slane %v7191_v59, 6  ;;  %v3985_v49 = vsub.f32 %v6213_v37, %v7191_v59 }
 0x3c5   : > { %v3989_v5 = vsub.f32 %v6235_v15, %v7191_v59  ;;  %v3997_v11 = vsub.f32 %v6304_v61, %v7191_v59 }
 0x3c6   : > { %v3986_v34 = vsub.f32 %v6216_v27, %v7194_v45  ;;  %v3987_v35 = vsub.f32 %v6219_v14, %v7197_v32  ;;  %v3988_v52 = vsub.f32 %v7931_v28, %v7200_v9  ;;  %v3990_v10 = vsub.f32 %v6240_v8, %v7194_v45 }
 0x3c7   : > { %v3991_v50 = vsub.f32 %v6243_v43, %v7197_v32  ;;  %v4113_v48 = vmul.f32 %v3985_v49, %v3985_v49  ;;  %v3992_v37 = vsub.f32 %v6246_v40, %v7200_v9  ;;  %v4117_v14 = vmul.f32 %v3989_v5, %v3989_v5 }
 0x3c8   : > { %v4114_v27 = vmul.f32 %v3986_v34, %v3986_v34  ;;  %v4115_v30 = vmul.f32 %v3987_v35, %v3987_v35  ;;  %v4116_v55 = vmul.f32 %v3988_v52, %v3988_v52  ;;  %v4118_v4 = vmul.f32 %v3990_v10, %v3990_v10 }
 0x3c9   : > { %4369 = vst [vmem:[#allocation1] ss:$4 sm:$0xff] %v4113_v48  ;;  %v4119_v54 = vmul.f32 %v3991_v50, %v3991_v50  ;;  %v4120_v15 = vmul.f32 %v3992_v37, %v3992_v37  ;;  %v3993_v8 = vsub.f32 %v6283_v1, %v7191_v59  ;;  %v3994_v43 = vsub.f32 %v6288_v42, %v7194_v45  ;;  %v7932_v42 = vld [vmem:[#allocation5_spill] sm:$0xff]  ;;  %v7934_v50 = vld [vmem:[#allocation7_spill] sm:$0xff] }
 0x3ca   : > { %4371 = vst [vmem:[#allocation1 + $0x1] ss:$4 sm:$0xff] %v4114_v27  ;;  %v3995_v40 = vsub.f32 %v6291_v25, %v7197_v32  ;;  %v3996_v56 = vsub.f32 %v6298_v47, %v7200_v9  ;;  %v3998_v49 = vsub.f32 %v6307_v3, %v7194_v45  ;;  %v3999_v35 = vsub.f32 %v7932_v42, %v7197_v32  ;;  %v7933_v25 = vld [vmem:[#allocation6_spill] sm:$0xff]  ;;  %v7935_v27 = vld [vmem:[#allocation8_spill] sm:$0xff] }
 0x3cb   : > { %4373 = vst [vmem:[#allocation1 + $0x2] ss:$4 sm:$0xff] %v4115_v30  ;;  %v4121_v24 = vmul.f32 %v3993_v8, %v3993_v8  ;;  %v4122_v1 = vmul.f32 %v3994_v43, %v3994_v43  ;;  %v4000_v52 = vsub.f32 %v7933_v25, %v7200_v9  ;;  %v4125_v47 = vmul.f32 %v3997_v11, %v3997_v11 }
 0x3cc   : > { %4375 = vst [vmem:[#allocation1 + $0x3] ss:$4 sm:$0xff] %v4116_v55  ;;  %v4123_v28 = vmul.f32 %v3995_v40, %v3995_v40  ;;  %v4124_v5 = vmul.f32 %v3996_v56, %v3996_v56  ;;  %v4126_v61 = vmul.f32 %v3998_v49, %v3998_v49  ;;  %v4127_v3 = vmul.f32 %v3999_v35, %v3999_v35  ;;  %v7936_v55 = vld [vmem:[#allocation9_spill] sm:$0xff]  ;;  %v7939_v40 = vld [vmem:[#allocation12_spill] sm:$0xff]  ;;  %v7941_v35 = vld [vmem:[#allocation14_spill] sm:$0xff] }
 0x3cd   : > { %4377 = vst [vmem:[#allocation1 + $0x20] ss:$4 sm:$0xff] %v4117_v14  ;;  %v4001_v48 = vsub.f32 %v7934_v50, %v7191_v59  ;;  %v4128_v37 = vmul.f32 %v4000_v52, %v4000_v52  ;;  %v4002_v30 = vsub.f32 %v7935_v27, %v7194_v45  ;;  %v4003_v14 = vsub.f32 %v7936_v55, %v7197_v32  ;;  %v7940_v49 = vld [vmem:[#allocation13_spill] sm:$0xff] }
 0x3ce   : > { %4379 = vst [vmem:[#allocation1 + $0x21] ss:$4 sm:$0xff] %v4118_v4  ;;  %v7937_v4 = vld [vmem:[#allocation10_spill] sm:$0xff]  ;;  %v4006_v56 = vsub.f32 %v7939_v40, %v7194_v45 }
 0x3cf   : > { %4381 = vst [vmem:[#allocation1 + $0x22] ss:$4 sm:$0xff] %v4119_v54  ;;  %v4004_v54 = vsub.f32 %v7937_v4, %v7200_v9  ;;  %v4129_v43 = vmul.f32 %v4001_v48, %v4001_v48  ;;  %v4130_v11 = vmul.f32 %v4002_v30, %v4002_v30  ;;  %v4131_v42 = vmul.f32 %v4003_v14, %v4003_v14  ;;  %v7944_v30 = vld [vmem:[#allocation17_spill] sm:$0xff]  ;;  %v7945_v14 = vld [vmem:[#allocation18_spill] sm:$0xff] }
 0x3d0   : > { %4383 = vst [vmem:[#allocation1 + $0x23] ss:$4 sm:$0xff] %v4120_v15  ;;  %v7938_v15 = vld [vmem:[#allocation11_spill] sm:$0xff]  ;;  %v4011_v55 = vsub.f32 %v7944_v30, %v7197_v32  ;;  %v4012_v4 = vsub.f32 %v7945_v14, %v7200_v9 }
 0x3d1   : > { %v4005_v8 = vsub.f32 %v7938_v15, %v7191_v59  ;;  %v4132_v25 = vmul.f32 %v4004_v54, %v4004_v54  ;;  %v7946_v54 = vld [vmem:[#allocation19_spill] sm:$0xff] }
 0x3d2   : > { %v4013_v15 = vsub.f32 %v7946_v54, %v7191_v59 }
 0x3d3   : > { %v7230_v34 = vld.sshfl [vmem:[#allocation1] sm:$0xff pattern:$0x73625140]  ;;  %v4133_v52 = vmul.f32 %v4005_v8, %v4005_v8 }
 0x3d4   : > { %4386 = vst [vmem:[#allocation1] ss:$4 sm:$0xff] %v4121_v24 }
 0x3d5   : > { %4387 = vst [vmem:[#allocation1 + $0x1] ss:$4 sm:$0xff] %v4122_v1  ;;  %v4007_v1 = vsub.f32 %v7940_v49, %v7197_v32  ;;  %v7948_v49 = vld [vmem:[#allocation21_spill] sm:$0xff] }
 0x3d6   : > { %4388 = vst [vmem:[#allocation1 + $0x2] ss:$4 sm:$0xff] %v4123_v28  ;;  %v4008_v28 = vsub.f32 %v7941_v35, %v7200_v9  ;;  %v7949_v35 = vld [vmem:[#allocation22_spill] sm:$0xff] }
 0x3d7   : > { %v7236_v10 = vld.sshfl [vmem:[#allocation1 + $0x20] sm:$0xff pattern:$0x73625140]  ;;  %4389 = vst [vmem:[#allocation1 + $0x3] ss:$4 sm:$0xff] %v4124_v5  ;;  %v4134_v5 = vmul.f32 %v4006_v56, %v4006_v56 }
 0x3d8   : > { %4390 = vst [vmem:[#allocation1 + $0x20] ss:$4 sm:$0xff] %v4125_v47  ;;  %v4136_v48 = vmul.f32 %v4008_v28, %v4008_v28  ;;  %v4016_v28 = vsub.f32 %v7949_v35, %v7200_v9 }
 0x3d9   : > { %4391 = vst [vmem:[#allocation1 + $0x21] ss:$4 sm:$0xff] %v4126_v61  ;;  %v4135_v61 = vmul.f32 %v4007_v1, %v4007_v1  ;;  %v4015_v1 = vsub.f32 %v7948_v49, %v7197_v32 }
 0x3da   : > { %4392 = vst [vmem:[#allocation1 + $0x22] ss:$4 sm:$0xff] %v4127_v3  ;;  %v7942_v3 = vld [vmem:[#allocation15_spill] sm:$0xff] }
 0x3db   : > { %4393 = vst [vmem:[#allocation1 + $0x23] ss:$4 sm:$0xff] %v4128_v37  ;;  %v4009_v50 = vsub.f32 %v7942_v3, %v7191_v59  ;;  %v7943_v37 = vld [vmem:[#allocation16_spill] sm:$0xff]  ;;  %v4143_v3 = vmul.f32 %v4015_v1, %v4015_v1 }
 0x3dc   : > { %v4010_v27 = vsub.f32 %v7943_v37, %v7194_v45  ;;  %v4144_v37 = vmul.f32 %v4016_v28, %v4016_v28 }
 0x3dd   : > { %v4137_v8 = vmul.f32 %v4009_v50, %v4009_v50  ;;  %v7950_v50 = vld [vmem:[#allocation23_spill] sm:$0xff] }
 0x3de   : > { %v7250_v24 = vld.sshfl [vmem:[#allocation1] sm:$0xff pattern:$0x73625140]  ;;  %v4138_v56 = vmul.f32 %v4010_v27, %v4010_v27  ;;  %v7951_v27 = vld [vmem:[#allocation24_spill] sm:$0xff] }
 0x3df   : > { %4396 = vst [vmem:[#allocation1] ss:$4 sm:$0xff] %v4129_v43  ;;  %v7947_v43 = vld [vmem:[#allocation20_spill] sm:$0xff]  ;;  %v4018_v30 = vsub.f32 %v7951_v27, %v7194_v45  ;;  %v7958_v27 = vld [vmem:[#allocation31_spill] sm:$0xff] }
 0x3e0   : > { %4397 = vst [vmem:[#allocation1 + $0x1] ss:$4 sm:$0xff] %v4130_v11  ;;  %v4014_v40 = vsub.f32 %v7947_v43, %v7194_v45 }
 0x3e1   : > { %4398 = vst [vmem:[#allocation1 + $0x2] ss:$4 sm:$0xff] %v4131_v42  ;;  %v4139_v42 = vmul.f32 %v4011_v55, %v4011_v55  ;;  %v7952_v55 = vld [vmem:[#allocation25_spill] sm:$0xff]  ;;  %v4146_v49 = vmul.f32 %v4018_v30, %v4018_v30  ;;  %v4025_v30 = vsub.f32 %v7958_v27, %v7191_v59 }
 0x3e2   : > { %v7256_v47 = vld.sshfl [vmem:[#allocation1 + $0x20] sm:$0xff pattern:$0x73625140]  ;;  %4399 = vst [vmem:[#allocation1 + $0x3] ss:$4 sm:$0xff] %v4132_v25  ;;  %v4140_v25 = vmul.f32 %v4012_v4, %v4012_v4  ;;  %v4019_v14 = vsub.f32 %v7952_v55, %v7197_v32 }
 0x3e3   : > { %4400 = vst [vmem:[#allocation1 + $0x20] ss:$4 sm:$0xff] %v4133_v52  ;;  %v4141_v52 = vmul.f32 %v4013_v15, %v4013_v15  ;;  %v7953_v4 = vld [vmem:[#allocation26_spill] sm:$0xff]  ;;  %v7954_v15 = vld [vmem:[#allocation27_spill] sm:$0xff] }
 0x3e4   : > { %4401 = vst [vmem:[#allocation1 + $0x21] ss:$4 sm:$0xff] %v4134_v5  ;;  %v4142_v5 = vmul.f32 %v4014_v40, %v4014_v40  ;;  %v4020_v54 = vsub.f32 %v7953_v4, %v7200_v9  ;;  %v7955_v40 = vld [vmem:[#allocation28_spill] sm:$0xff]  ;;  %v4147_v28 = vmul.f32 %v4019_v14, %v4019_v14 }
 0x3e5   : > { %4402 = vst [vmem:[#allocation1 + $0x22] ss:$4 sm:$0xff] %v4135_v61  ;;  %v7959_v14 = vld [vmem:[#allocation32_spill] sm:$0xff] }
 0x3e6   : > { %4403 = vst [vmem:[#allocation1 + $0x23] ss:$4 sm:$0xff] %v4136_v48  ;;  %v4017_v48 = vsub.f32 %v7950_v50, %v7191_v59  ;;  %v4026_v4 = vsub.f32 %v7959_v14, %v7194_v45 }
 0x3e8   : > { %v4145_v43 = vmul.f32 %v4017_v48, %v4017_v48 }
 0x3e9   : > { %v7270_v11 = vld.sshfl [vmem:[#allocation1] sm:$0xff pattern:$0x73625140] }
 0x3ea   : > { %4406 = vst [vmem:[#allocation1] ss:$4 sm:$0xff] %v4137_v8  ;;  %v4021_v8 = vsub.f32 %v7954_v15, %v7191_v59 }
 0x3eb   : > { %4407 = vst [vmem:[#allocation1 + $0x1] ss:$4 sm:$0xff] %v4138_v56  ;;  %v4022_v56 = vsub.f32 %v7955_v40, %v7194_v45  ;;  %v7962_v40 = vld [vmem:[#allocation35_spill] sm:$0xff] }
 0x3ec   : > { %4408 = vst [vmem:[#allocation1 + $0x2] ss:$4 sm:$0xff] %v4139_v42  ;;  %v7956_v42 = vld [vmem:[#allocation29_spill] sm:$0xff] }
 0x3ed   : > { %v7276_v61 = vld.sshfl [vmem:[#allocation1 + $0x20] sm:$0xff pattern:$0x73625140]  ;;  %4409 = vst [vmem:[#allocation1 + $0x3] ss:$4 sm:$0xff] %v4140_v25  ;;  %v4023_v35 = vsub.f32 %v7956_v42, %v7197_v32  ;;  %v4150_v50 = vmul.f32 %v4022_v56, %v4022_v56  ;;  %v4029_v56 = vsub.f32 %v7962_v40, %v7191_v59  ;;  %v7963_v42 = vld [vmem:[#allocation36_spill] sm:$0xff] }
 0x3ee   : > { %4410 = vst [vmem:[#allocation1 + $0x20] ss:$4 sm:$0xff] %v4141_v52  ;;  %v7957_v25 = vld [vmem:[#allocation30_spill] sm:$0xff] }
 0x3ef   : > { %4411 = vst [vmem:[#allocation1 + $0x21] ss:$4 sm:$0xff] %v4142_v5  ;;  %v4024_v52 = vsub.f32 %v7957_v25, %v7200_v9  ;;  %v4148_v5 = vmul.f32 %v4020_v54, %v4020_v54  ;;  %v7960_v54 = vld [vmem:[#allocation33_spill] sm:$0xff] }
 0x3f0   : > { %4412 = vst [vmem:[#allocation1 + $0x22] ss:$4 sm:$0xff] %v4143_v3  ;;  %v4149_v3 = vmul.f32 %v4021_v8, %v4021_v8  ;;  %v4027_v15 = vsub.f32 %v7960_v54, %v7197_v32  ;;  %v7961_v8 = vld [vmem:[#allocation34_spill] sm:$0xff] }
 0x3f1   : > { %4413 = vst [vmem:[#allocation1 + $0x23] ss:$4 sm:$0xff] %v4144_v37  ;;  %v4151_v37 = vmul.f32 %v4023_v35, %v4023_v35  ;;  %v4152_v55 = vmul.f32 %v4024_v52, %v4024_v52  ;;  %v4030_v35 = vsub.f32 %v7963_v42, %v7194_v45  ;;  %v7964_v52 = vld [vmem:[#allocation37_spill] sm:$0xff] }
 0x3f3   : > { %v4158_v14 = vmul.f32 %v4030_v35, %v4030_v35 }
 0x3f4   : > { %v7290_v1 = vld.sshfl [vmem:[#allocation1] sm:$0xff pattern:$0x73625140] }
 0x3f5   : > { %4416 = vst [vmem:[#allocation1] ss:$4 sm:$0xff] %v4145_v43  ;;  %v4028_v43 = vsub.f32 %v7961_v8, %v7200_v9 }
 0x3f6   : > { %4417 = vst [vmem:[#allocation1 + $0x1] ss:$4 sm:$0xff] %v4146_v49  ;;  %v4153_v49 = vmul.f32 %v4025_v30, %v4025_v30 }
 0x3f7   : > { %4418 = vst [vmem:[#allocation1 + $0x2] ss:$4 sm:$0xff] %v4147_v28  ;;  %v4154_v28 = vmul.f32 %v4026_v4, %v4026_v4  ;;  %v4156_v27 = vmul.f32 %v4028_v43, %v4028_v43  ;;  %v7966_v4 = vld [vmem:[#allocation39_spill] sm:$0xff]  ;;  %v7968_v43 = vld [vmem:[#allocation41_spill] sm:$0xff] }
 0x3f8   : > { %v7296_v48 = vld.sshfl [vmem:[#allocation1 + $0x20] sm:$0xff pattern:$0x73625140]  ;;  %4419 = vst [vmem:[#allocation1 + $0x3] ss:$4 sm:$0xff] %v4148_v5  ;;  %v4031_v5 = vsub.f32 %v7964_v52, %v7197_v32  ;;  %v4033_v8 = vsub.f32 %v7966_v4, %v7191_v59  ;;  %v4035_v42 = vsub.f32 %v7968_v43, %v7197_v32 }
 0x3f9   : > { %4420 = vst [vmem:[#allocation1 + $0x20] ss:$4 sm:$0xff] %v4149_v3  ;;  %v4155_v3 = vmul.f32 %v4027_v15, %v4027_v15  ;;  %v7967_v15 = vld [vmem:[#allocation40_spill] sm:$0xff]  ;;  %v7973_v4 = vld [vmem:[#allocation46_spill] sm:$0xff] }
 0x3fa   : > { %4421 = vst [vmem:[#allocation1 + $0x21] ss:$4 sm:$0xff] %v4150_v50  ;;  %v7965_v50 = vld [vmem:[#allocation38_spill] sm:$0xff]  ;;  %v4159_v54 = vmul.f32 %v4031_v5, %v4031_v5  ;;  %v4161_v5 = vmul.f32 %v4033_v8, %v4033_v8 }
 0x3fb   : > { %4422 = vst [vmem:[#allocation1 + $0x22] ss:$4 sm:$0xff] %v4151_v37  ;;  %v4032_v37 = vsub.f32 %v7965_v50, %v7200_v9 }
 0x3fc   : > { %4423 = vst [vmem:[#allocation1 + $0x23] ss:$4 sm:$0xff] %v4152_v55  ;;  %v4157_v55 = vmul.f32 %v4029_v56, %v4029_v56  ;;  %v7969_v56 = vld [vmem:[#allocation42_spill] sm:$0xff] }
 0x3fd   : > { %v4160_v40 = vmul.f32 %v4032_v37, %v4032_v37  ;;  %v4036_v35 = vsub.f32 %v7969_v56, %v7200_v9 }
 0x3ff   : > { %v7310_v25 = vld.sshfl [vmem:[#allocation1] sm:$0xff pattern:$0x73625140] }
 0x400   : > { %4426 = vst [vmem:[#allocation1] ss:$4 sm:$0xff] %v4153_v49  ;;  %v4034_v49 = vsub.f32 %v7967_v15, %v7194_v45  ;;  %v4164_v15 = vmul.f32 %v4036_v35, %v4036_v35  ;;  %v7976_v35 = vld [vmem:[#allocation49_spill] sm:$0xff] }
 0x401   : > { %4427 = vst [vmem:[#allocation1 + $0x1] ss:$4 sm:$0xff] %v4154_v28  ;;  %v7970_v28 = vld [vmem:[#allocation43_spill] sm:$0xff] }
 0x402   : > { %4428 = vst [vmem:[#allocation1 + $0x2] ss:$4 sm:$0xff] %v4155_v3  ;;  %v4037_v52 = vsub.f32 %v7970_v28, %v7191_v59  ;;  %v7971_v3 = vld [vmem:[#allocation44_spill] sm:$0xff]  ;;  %v4162_v37 = vmul.f32 %v4034_v49, %v4034_v49  ;;  %v7974_v49 = vld [vmem:[#allocation47_spill] sm:$0xff] }
 0x403   : > { %v7316_v30 = vld.sshfl [vmem:[#allocation1 + $0x20] sm:$0xff pattern:$0x73625140]  ;;  %4429 = vst [vmem:[#allocation1 + $0x3] ss:$4 sm:$0xff] %v4156_v27  ;;  %v4038_v50 = vsub.f32 %v7971_v3, %v7194_v45  ;;  %v4041_v3 = vsub.f32 %v7974_v49, %v7191_v59 }
 0x404   : > { %4430 = vst [vmem:[#allocation1 + $0x20] ss:$4 sm:$0xff] %v4157_v55  ;;  %v7972_v55 = vld [vmem:[#allocation45_spill] sm:$0xff]  ;;  %v4165_v43 = vmul.f32 %v4037_v52, %v4037_v52  ;;  %v7977_v52 = vld [vmem:[#allocation50_spill] sm:$0xff] }
 0x405   : > { %4431 = vst [vmem:[#allocation1 + $0x21] ss:$4 sm:$0xff] %v4158_v14  ;;  %v4039_v14 = vsub.f32 %v7972_v55, %v7197_v32  ;;  %v4166_v56 = vmul.f32 %v4038_v50, %v4038_v50  ;;  %v4044_v50 = vsub.f32 %v7977_v52, %v7200_v9  ;;  %v7978_v55 = vld [vmem:[#allocation51_spill] sm:$0xff] }
 0x406   : > { %4432 = vst [vmem:[#allocation1 + $0x22] ss:$4 sm:$0xff] %v4159_v54  ;;  %v4163_v54 = vmul.f32 %v4035_v42, %v4035_v42  ;;  %v7975_v42 = vld [vmem:[#allocation48_spill] sm:$0xff] }
 0x407   : > { %4433 = vst [vmem:[#allocation1 + $0x23] ss:$4 sm:$0xff] %v4160_v40  ;;  %v4040_v40 = vsub.f32 %v7973_v4, %v7200_v9  ;;  %v4167_v28 = vmul.f32 %v4039_v14, %v4039_v14  ;;  %v4045_v14 = vsub.f32 %v7978_v55, %v7191_v59  ;;  %v7979_v4 = vld [vmem:[#allocation52_spill] sm:$0xff] }
 0x409   : > { %v4168_v19 = vmul.f32 %v4040_v40, %v4040_v40  ;;  %v4173_v52 = vmul.f32 %v4045_v14, %v4045_v14  ;;  %v7985_v14 = vld [vmem:[#allocation58_spill] sm:$0xff] }
 0x40a   : > { %v7330_v27 = vld.sshfl [vmem:[#allocation1] sm:$0xff pattern:$0x73625140] }
 0x40b   : > { %4436 = vst [vmem:[#allocation1] ss:$4 sm:$0xff] %v4161_v5  ;;  %v4042_v5 = vsub.f32 %v7975_v42, %v7194_v45 }
 0x40c   : > { %4437 = vst [vmem:[#allocation1 + $0x1] ss:$4 sm:$0xff] %v4162_v37  ;;  %v4043_v37 = vsub.f32 %v7976_v35, %v7197_v32  ;;  %v4172_v35 = vmul.f32 %v4044_v50, %v4044_v50  ;;  %v7984_v50 = vld [vmem:[#allocation57_spill] sm:$0xff] }
 0x40d   : > { %4438 = vst [vmem:[#allocation1 + $0x2] ss:$4 sm:$0xff] %v4163_v54  ;;  %v4169_v54 = vmul.f32 %v4041_v3, %v4041_v3  ;;  %v4170_v40 = vmul.f32 %v4042_v5, %v4042_v5  ;;  %v7982_v5 = vld [vmem:[#allocation55_spill] sm:$0xff] }
 0x40e   : > { %v7336_v8 = vld.sshfl [vmem:[#allocation1 + $0x20] sm:$0xff pattern:$0x73625140]  ;;  %4439 = vst [vmem:[#allocation1 + $0x3] ss:$4 sm:$0xff] %v4164_v15  ;;  %v4046_v15 = vsub.f32 %v7979_v4, %v7194_v45  ;;  %v4171_v49 = vmul.f32 %v4043_v37, %v4043_v37  ;;  %v4049_v7 = vsub.f32 %v7982_v5, %v7191_v59  ;;  %v7983_v37 = vld [vmem:[#allocation56_spill] sm:$0xff] }
 0x40f   : > { %4440 = vst [vmem:[#allocation1 + $0x20] ss:$4 sm:$0xff] %v4165_v43 }
 0x410   : > { %4441 = vst [vmem:[#allocation1 + $0x21] ss:$4 sm:$0xff] %v4166_v56  ;;  %v7980_v56 = vld [vmem:[#allocation53_spill] sm:$0xff]  ;;  %v4174_v55 = vmul.f32 %v4046_v15, %v4046_v15  ;;  %v4052_v15 = vsub.f32 %v7985_v14, %v7200_v9 }
 0x411   : > { %4442 = vst [vmem:[#allocation1 + $0x22] ss:$4 sm:$0xff] %v4167_v28  ;;  %v4047_v28 = vsub.f32 %v7980_v56, %v7197_v32  ;;  %v7986_v56 = vld [vmem:[#allocation59_spill] sm:$0xff] }
 0x412   : > { %4443 = vst [vmem:[#allocation1 + $0x23] ss:$4 sm:$0xff] %v4168_v19  ;;  %v7981_v19 = vld [vmem:[#allocation54_spill] sm:$0xff]  ;;  %v4180_v14 = vmul.f32 %v4052_v15, %v4052_v15  ;;  %v7991_v15 = vld [vmem:[#allocation64_spill] sm:$0xff] }
 0x413   : > { %v4048_v42 = vsub.f32 %v7981_v19, %v7200_v9  ;;  %v4175_v4 = vmul.f32 %v4047_v28, %v4047_v28  ;;  %v4053_v28 = vsub.f32 %v7986_v56, %v7191_v59  ;;  %v7987_v19 = vld [vmem:[#allocation60_spill] sm:$0xff] }
 0x415   : > { %v7350_v43 = vld.sshfl [vmem:[#allocation1] sm:$0xff pattern:$0x73625140]  ;;  %v4176_v22 = vmul.f32 %v4048_v42, %v4048_v42  ;;  %v4181_v56 = vmul.f32 %v4053_v28, %v4053_v28  ;;  %v4058_v28 = vsub.f32 %v7991_v15, %v7194_v45 }
 0x416   : > { %4446 = vst [vmem:[#allocation1] ss:$4 sm:$0xff] %v4169_v54  ;;  %v4050_v54 = vsub.f32 %v7983_v37, %v7194_v45  ;;  %v4569_v37 = vsel %vm3907_vm0, %v7236_v10, 0.0 }
 0x417   : > { %4447 = vst [vmem:[#allocation1 + $0x1] ss:$4 sm:$0xff] %v4170_v40  ;;  %v4051_v40 = vsub.f32 %v7984_v50, %v7197_v32  ;;  %v7989_v50 = vld [vmem:[#allocation62_spill] sm:$0xff] }
 0x418   : > { %4448 = vst [vmem:[#allocation1 + $0x2] ss:$4 sm:$0xff] %v4171_v49  ;;  %v4177_v49 = vmul.f32 %v4049_v7, %v4049_v7  ;;  %v4178_v42 = vmul.f32 %v4050_v54, %v4050_v54  ;;  %v4056_v7 = vsub.f32 %v7989_v50, %v7200_v9  ;;  %v4571_v54 = vsel %vm3907_vm0, %v7250_v24, 0.0 }
 0x419   : > { %v7356_v3 = vld.sshfl [vmem:[#allocation1 + $0x20] sm:$0xff pattern:$0x73625140]  ;;  %4449 = vst [vmem:[#allocation1 + $0x3] ss:$4 sm:$0xff] %v4172_v35  ;;  %v4054_v35 = vsub.f32 %v7987_v19, %v7194_v45  ;;  %v4179_v5 = vmul.f32 %v4051_v40, %v4051_v40 }
 0x41a   : > { %4450 = vst [vmem:[#allocation1 + $0x20] ss:$4 sm:$0xff] %v4173_v52  ;;  %v4184_v36 = vmul.f32 %v4056_v7, %v4056_v7 }
 0x41b   : > { %4451 = vst [vmem:[#allocation1 + $0x21] ss:$4 sm:$0xff] %v4174_v55  ;;  %v7988_v55 = vld [vmem:[#allocation61_spill] sm:$0xff]  ;;  %v4182_v19 = vmul.f32 %v4054_v35, %v4054_v35  ;;  %v7993_v35 = vld [vmem:[#allocation66_spill] sm:$0xff] }
 0x41c   : > { %4452 = vst [vmem:[#allocation1 + $0x22] ss:$4 sm:$0xff] %v4175_v4  ;;  %v4055_v4 = vsub.f32 %v7988_v55, %v7197_v32 }
 0x41d   : > { %4453 = vst [vmem:[#allocation1 + $0x23] ss:$4 sm:$0xff] %v4176_v22  ;;  %v4568_v22 = vsel %vm3907_vm0, %v7230_v34, 0.0  ;;  %v7990_v34 = vld [vmem:[#allocation63_spill] sm:$0xff] }
 0x41e   : > { %v4570_v40 = vadd.f32 %v4569_v37, %v4568_v22  ;;  %v4057_v10 = vsub.f32 %v7990_v34, %v7191_v59  ;;  %v4575_v22 = vsel %vm3907_vm0, %v7270_v11, 0.0  ;;  %v7994_v37 = vld [vmem:[#allocation67_spill] sm:$0xff] }
 0x41f   : > { %v4061_v7 = vsub.f32 %v7994_v37, %v7191_v59 }
 0x420   : > { %v7370_v52 = vld.sshfl [vmem:[#allocation1] sm:$0xff pattern:$0x73625140]  ;;  %v4572_v50 = vadd.f32 %v4571_v54, %v4570_v40  ;;  %v7995_v54 = vld [vmem:[#allocation68_spill] sm:$0xff]  ;;  %v4186_v40 = vmul.f32 %v4058_v28, %v4058_v28 }
 0x421   : > { %4456 = vst [vmem:[#allocation1] ss:$4 sm:$0xff] %v4177_v49  ;;  %v4183_v49 = vmul.f32 %v4055_v4, %v4055_v4  ;;  %v4573_v4 = vsel %vm3907_vm0, %v7256_v47, 0.0  ;;  %v4189_v37 = vmul.f32 %v4061_v7, %v4061_v7  ;;  %v7999_v7 = vld [vmem:[#allocation72_spill] sm:$0xff] }
 0x422   : > { %4457 = vst [vmem:[#allocation1 + $0x1] ss:$4 sm:$0xff] %v4178_v42  ;;  %v7992_v42 = vld [vmem:[#allocation65_spill] sm:$0xff] }
 0x423   : > { %4458 = vst [vmem:[#allocation1 + $0x2] ss:$4 sm:$0xff] %v4179_v5  ;;  %v4059_v24 = vsub.f32 %v7992_v42, %v7197_v32  ;;  %v4060_v5 = vsub.f32 %v7993_v35, %v7200_v9  ;;  %v7997_v42 = vld [vmem:[#allocation70_spill] sm:$0xff] }
 0x424   : > { %v7382_v55 = vld.sshfl [vmem:[#allocation1 + $0x20] sm:$0xff pattern:$0x73625140]  ;;  %4459 = vst [vmem:[#allocation1 + $0x3] ss:$4 sm:$0xff] %v4180_v14  ;;  %v4185_v14 = vmul.f32 %v4057_v10, %v4057_v10  ;;  %v4064_v11 = vsub.f32 %v7997_v42, %v7200_v9  ;;  %v4577_v10 = vsel %vm3907_vm0, %v7276_v61, 0.0 }
 0x425   : > { %4460 = vst [vmem:[#allocation1 + $0x20] ss:$4 sm:$0xff] %v4181_v56  ;;  %v4574_v56 = vadd.f32 %v4573_v4, %v4572_v50  ;;  %v4187_v15 = vmul.f32 %v4059_v24, %v4059_v24  ;;  %v4188_v35 = vmul.f32 %v4060_v5, %v4060_v5  ;;  %v4579_v4 = vsel %vm3907_vm0, %v7290_v1, 0.0 }
 0x426   : > { %4461 = vst [vmem:[#allocation1 + $0x21] ss:$4 sm:$0xff] %v4182_v19  ;;  %v4062_v19 = vsub.f32 %v7995_v54, %v7194_v45  ;;  %v4192_v5 = vmul.f32 %v4064_v11, %v4064_v11  ;;  %v4066_v54 = vsub.f32 %v7999_v7, %v7194_v45  ;;  %v4583_v42 = vsel %vm3907_vm0, %v7310_v25, 0.0 }
 0x427   : > { %4462 = vst [vmem:[#allocation1 + $0x22] ss:$4 sm:$0xff] %v4183_v49  ;;  %v4576_v47 = vadd.f32 %v4575_v22, %v4574_v56  ;;  %v4070_v11 = vsub.f32 %v7913_v58, %v7194_v45 }
 0x428   : > { %4463 = vst [vmem:[#allocation1 + $0x23] ss:$4 sm:$0xff] %v4184_v36  ;;  %v7996_v36 = vld [vmem:[#allocation69_spill] sm:$0xff]  ;;  %v4190_v50 = vmul.f32 %v4062_v19, %v4062_v19 }
 0x429   : > { %v4063_v34 = vsub.f32 %v7996_v36, %v7197_v32  ;;  %v4578_v22 = vadd.f32 %v4577_v10, %v4576_v47  ;;  %v8000_v19 = vld [vmem:[#allocation73_spill] sm:$0xff]  ;;  %v8001_v36 = vld [vmem:[#allocation74_spill] sm:$0xff]  ;;  %v4581_v47 = vsel %vm3907_vm0, %v7296_v48, 0.0  ;;  %v4198_v25 = vmul.f32 %v4070_v11, %v4070_v11 }
 0x42a   : > { %v4068_v1 = vsub.f32 %v8001_v36, %v7200_v9  ;;  %v4591_v11 = vsel %vm3907_vm0, %v7350_v43, 0.0 }
 0x42b   : > { %v7400_v49 = vld.sshfl [vmem:[#allocation1] sm:$0xff pattern:$0x73625140]  ;;  %v4191_v24 = vmul.f32 %v4063_v34, %v4063_v34  ;;  %v4580_v61 = vadd.f32 %v4579_v4, %v4578_v22  ;;  %v4069_v34 = vsub.f32 %v7912_v39, %v7191_v59  ;;  %v4072_v39 = vsub.f32 %v7915_v23, %v7200_v9 }
 0x42c   : > { %4466 = vst [vmem:[#allocation1] ss:$4 sm:$0xff] %v4185_v14  ;;  %v7998_v14 = vld [vmem:[#allocation71_spill] sm:$0xff]  ;;  %v4073_v23 = vsub.f32 %v7908_v17, %v7191_v59  ;;  %v4078_v17 = vsub.f32 %v7917_v18, %v7194_v45 }
 0x42d   : > { %4467 = vst [vmem:[#allocation1 + $0x1] ss:$4 sm:$0xff] %v4186_v40  ;;  %v4065_v56 = vsub.f32 %v7998_v14, %v7191_v59  ;;  %v4067_v40 = vsub.f32 %v8000_v19, %v7197_v32  ;;  %v4582_v10 = vadd.f32 %v4581_v47, %v4580_v61  ;;  %v4197_v22 = vmul.f32 %v4069_v34, %v4069_v34  ;;  %v8003_v19 = vld [vmem:[#allocation81_spill] sm:$0xff] }
 0x42e   : > { %4468 = vst [vmem:[#allocation1 + $0x2] ss:$4 sm:$0xff] %v4187_v15  ;;  %v4201_v34 = vmul.f32 %v4073_v23, %v4073_v23 }
 0x42f   : > { %v7408_v28 = vld.sshfl [vmem:[#allocation1 + $0x20] sm:$0xff pattern:$0x73625140]  ;;  %4469 = vst [vmem:[#allocation1 + $0x3] ss:$4 sm:$0xff] %v4188_v35  ;;  %v4193_v15 = vmul.f32 %v4065_v56, %v4065_v56  ;;  %v4194_v35 = vmul.f32 %v4066_v54, %v4066_v54  ;;  %v4195_v4 = vmul.f32 %v4067_v40, %v4067_v40  ;;  %v4584_v48 = vadd.f32 %v4583_v42, %v4582_v10  ;;  %v8002_v54 = vld [vmem:[#allocation80_spill] sm:$0xff] }
 0x430   : > { %4470 = vst [vmem:[#allocation1 + $0x20] ss:$4 sm:$0xff] %v4189_v37  ;;  %v4585_v56 = vsel %vm3907_vm0, %v7316_v30, 0.0  ;;  %v4074_v61 = vsub.f32 %v8002_v54, %v7194_v45  ;;  %v4075_v40 = vsub.f32 %v8003_v19, %v7197_v32  ;;  %v8004_v30 = vld [vmem:[#allocation82_spill] sm:$0xff]  ;;  %v4589_v42 = vsel %vm3907_vm0, %v7336_v8, 0.0 }
 0x431   : > { %4471 = vst [vmem:[#allocation1 + $0x21] ss:$4 sm:$0xff] %v4190_v50  ;;  %v4071_v50 = vsub.f32 %v7914_v6, %v7197_v32  ;;  %v4587_v6 = vsel %vm3907_vm0, %v7330_v27, 0.0  ;;  %v4586_v7 = vadd.f32 %v4585_v56, %v4584_v48  ;;  %v4077_v27 = vsub.f32 %v7916_v57, %v7191_v59 }
 0x432   : > { %4472 = vst [vmem:[#allocation1 + $0x22] ss:$4 sm:$0xff] %v4191_v24  ;;  %v4196_v24 = vmul.f32 %v4068_v1, %v4068_v1  ;;  %v4076_v1 = vsub.f32 %v8004_v30, %v7200_v9  ;;  %v4203_v10 = vmul.f32 %v4075_v40, %v4075_v40  ;;  %v4080_v57 = vsub.f32 %v7919_v0, %v7200_v9 }
 0x433   : > { %4473 = vst [vmem:[#allocation1 + $0x23] ss:$4 sm:$0xff] %v4192_v5  ;;  %v4199_v58 = vmul.f32 %v4071_v50, %v4071_v50  ;;  %v4200_v5 = vmul.f32 %v4072_v39, %v4072_v39  ;;  %v4588_v36 = vadd.f32 %v4587_v6, %v4586_v7  ;;  %v4205_v18 = vmul.f32 %v4077_v27, %v4077_v27  ;;  %v8006_v6 = vld [vmem:[#allocation91_spill] sm:$0xff] }
 0x434   : > { %v4208_v43 = vmul.f32 %v4080_v57, %v4080_v57  ;;  %v4595_v0 = vsel %vm3907_vm0, %v7370_v52, 0.0  ;;  %v4083_v23 = vsub.f32 %v8006_v6, %v7197_v32  ;;  %v4085_v7 = vsub.f32 %v7920_v21, %v7191_v59 }
 0x435   : > { %v4590_v50 = vadd.f32 %v4589_v42, %v4588_v36  ;;  %v4086_v52 = vsub.f32 %v7921_v26, %v7194_v45  ;;  %v4087_v19 = vsub.f32 %v7922_v53, %v7197_v32  ;;  %v4597_v36 = vsel %vm3907_vm0, %v7382_v55, 0.0  ;;  %v8007_v55 = vld [vmem:[#allocation96_spill] sm:$0xff] }
 0x436   : > { %v7428_v37 = vld.sshfl [vmem:[#allocation1] sm:$0xff pattern:$0x73625140]  ;;  %v4211_v40 = vmul.f32 %v4083_v23, %v4083_v23  ;;  %v4088_v21 = vsub.f32 %v7923_v41, %v7200_v9  ;;  %v4213_v26 = vmul.f32 %v4085_v7, %v4085_v7  ;;  %v4090_v41 = vsub.f32 %v6871_v12, %v7194_v45  ;;  %v8010_v23 = vld [vmem:[#allocation101_spill] sm:$0xff] }
 0x437   : > { %4476 = vst [vmem:[#allocation1] ss:$4 sm:$0xff] %v4193_v15  ;;  %v4202_v15 = vmul.f32 %v4074_v61, %v4074_v61  ;;  %v4592_v39 = vadd.f32 %v4591_v11, %v4590_v50  ;;  %v4214_v27 = vmul.f32 %v4086_v52, %v4086_v52  ;;  %v4603_v11 = vsel %vm3907_vm0, %v7428_v37, 0.0 }
 0x438   : > { %4477 = vst [vmem:[#allocation1 + $0x1] ss:$4 sm:$0xff] %v4194_v35  ;;  %v4079_v35 = vsub.f32 %v7918_v20, %v7197_v32  ;;  %v4081_v20 = vsub.f32 %v6820_v13, %v7191_v59  ;;  %v4084_v13 = vsub.f32 %v6842_v33, %v7200_v9  ;;  %v4599_v33 = vsel %vm3907_vm0, %v7400_v49, 0.0 }
 0x439   : > { %4478 = vst [vmem:[#allocation1 + $0x2] ss:$4 sm:$0xff] %v4195_v4  ;;  %v4204_v4 = vmul.f32 %v4076_v1, %v4076_v1  ;;  %v4216_v42 = vmul.f32 %v4088_v21, %v4088_v21  ;;  %v4601_v49 = vsel %vm3907_vm0, %v7408_v28, 0.0  ;;  %v4092_v57 = vsub.f32 %v6848_v2, %v7200_v9 }
 0x43a   : > { %v7434_v14 = vld.sshfl [vmem:[#allocation1 + $0x20] sm:$0xff pattern:$0x73625140]  ;;  %4479 = vst [vmem:[#allocation1 + $0x3] ss:$4 sm:$0xff] %v4196_v24  ;;  %v4206_v24 = vmul.f32 %v4078_v17, %v4078_v17  ;;  %v4207_v8 = vmul.f32 %v4079_v35, %v4079_v35  ;;  %v4212_v30 = vmul.f32 %v4084_v13, %v4084_v13  ;;  %v4215_v17 = vmul.f32 %v4087_v19, %v4087_v19  ;;  %v8008_v35 = vld [vmem:[#allocation97_spill] sm:$0xff] }
 0x43b   : > { %4480 = vst [vmem:[#allocation1 + $0x20] ss:$4 sm:$0xff] %v4197_v22  ;;  %v4593_v22 = vsel %vm3907_vm0, %v7356_v3, 0.0  ;;  %v4209_v3 = vmul.f32 %v4081_v20, %v4081_v20  ;;  %v4218_v28 = vmul.f32 %v4090_v41, %v4090_v41  ;;  %v4095_v37 = vsub.f32 %v7926_v63, %v7197_v32  ;;  %v8014_v41 = vld [vmem:[#allocation106_spill] sm:$0xff] }
 0x43c   : > { %4481 = vst [vmem:[#allocation1 + $0x21] ss:$4 sm:$0xff] %v4198_v25  ;;  %v8005_v25 = vld [vmem:[#allocation88_spill] sm:$0xff]  ;;  %v4594_v56 = vadd.f32 %v4593_v22, %v4592_v39  ;;  %v4094_v39 = vsub.f32 %v7925_v60, %v7194_v45  ;;  %v4096_v20 = vsub.f32 %v6866_v44, %v7200_v9  ;;  %v4605_v2 = vsel %vm3907_vm0, %v7434_v14, 0.0 }
 0x43d   : > { %4482 = vst [vmem:[#allocation1 + $0x22] ss:$4 sm:$0xff] %v4199_v58  ;;  %v4082_v58 = vsub.f32 %v8005_v25, %v7194_v45  ;;  %v4223_v63 = vmul.f32 %v4095_v37, %v4095_v37  ;;  %v4098_v14 = vsub.f32 %v8010_v23, %v7194_v45  ;;  %v4100_v7 = vsub.f32 %v6915_v29, %v7200_v9 }
 0x43e   : > { %4483 = vst [vmem:[#allocation1 + $0x23] ss:$4 sm:$0xff] %v4200_v5  ;;  %v4596_v5 = vadd.f32 %v4595_v0, %v4594_v56  ;;  %v4222_v0 = vmul.f32 %v4094_v39, %v4094_v39  ;;  %v8009_v56 = vld [vmem:[#allocation100_spill] sm:$0xff]  ;;  %v4224_v6 = vmul.f32 %v4096_v20, %v4096_v20  ;;  %v4101_v52 = vsub.f32 %v7927_v31, %v7191_v59 }
 0x43f   : > { %v4210_v54 = vmul.f32 %v4082_v58, %v4082_v58  ;;  %v4097_v44 = vsub.f32 %v8009_v56, %v7191_v59  ;;  %v4102_v19 = vsub.f32 %v7928_v38, %v7194_v45  ;;  %v4228_v29 = vmul.f32 %v4100_v7, %v4100_v7 }
 0x440   : > { %v4598_v1 = vadd.f32 %v4597_v36, %v4596_v5  ;;  %v4229_v21 = vmul.f32 %v4101_v52, %v4101_v52 }
 0x441   : > { %v7452_v47 = vld.sshfl [vmem:[#allocation1] sm:$0xff pattern:$0x73625140] }
 0x442   : > { %4486 = vst [vmem:[#allocation1] ss:$4 sm:$0xff] %v4201_v34  ;;  %v4600_v53 = vadd.f32 %v4599_v33, %v4598_v1  ;;  %v4103_v33 = vsub.f32 %v6885_v62, %v7197_v32  ;;  %v8011_v62 = vld [vmem:[#allocation104_spill] sm:$0xff] }
 0x443   : > { %4487 = vst [vmem:[#allocation1 + $0x1] ss:$4 sm:$0xff] %v4202_v15  ;;  %v4089_v15 = vsub.f32 %v8007_v55, %v7191_v59  ;;  %v8012_v55 = vld [vmem:[#allocation102_spill] sm:$0xff] }
 0x444   : > { %4488 = vst [vmem:[#allocation1 + $0x2] ss:$4 sm:$0xff] %v4203_v10  ;;  %v4091_v10 = vsub.f32 %v8008_v35, %v7197_v32  ;;  %v4602_v50 = vadd.f32 %v4601_v49, %v4600_v53  ;;  %v4105_v53 = vsub.f32 %v8011_v62, %v7191_v59  ;;  %v4108_v49 = vsub.f32 %v8014_v41, %v7200_v9 }
 0x445   : > { %v7462_v48 = vld.sshfl [vmem:[#allocation1 + $0x20] sm:$0xff pattern:$0x73625140]  ;;  %4489 = vst [vmem:[#allocation1 + $0x3] ss:$4 sm:$0xff] %v4204_v4  ;;  %v4093_v4 = vsub.f32 %v7924_v16, %v7191_v59  ;;  %v4607_v16 = vsel %vm3907_vm0, %v7452_v47, 0.0  ;;  %v4099_v47 = vsub.f32 %v6879_v46, %v7197_v32 }
 0x446   : > { %4490 = vst [vmem:[#allocation1 + $0x20] ss:$4 sm:$0xff] %v4205_v18  ;;  %v4217_v18 = vmul.f32 %v4089_v15, %v4089_v15  ;;  %v4604_v12 = vadd.f32 %v4603_v11, %v4602_v50  ;;  %v4609_v13 = vsel %vm3907_vm0, %v7462_v48, 0.0  ;;  %v4106_v15 = vsub.f32 %v8012_v55, %v7194_v45 }
 0x447   : > { %4491 = vst [vmem:[#allocation1 + $0x21] ss:$4 sm:$0xff] %v4206_v24  ;;  %v4221_v22 = vmul.f32 %v4093_v4, %v4093_v4  ;;  %v4227_v48 = vmul.f32 %v4099_v47, %v4099_v47 }
 0x448   : > { %4492 = vst [vmem:[#allocation1 + $0x22] ss:$4 sm:$0xff] %v4207_v8  ;;  %v4219_v8 = vmul.f32 %v4091_v10, %v4091_v10  ;;  %v4606_v60 = vadd.f32 %v4605_v2, %v4604_v12  ;;  %v8015_v10 = vld [vmem:[#allocation103_spill] sm:$0xff]  ;;  %v4234_v39 = vmul.f32 %v4106_v15, %v4106_v15 }
 0x449   : > { %4493 = vst [vmem:[#allocation1 + $0x23] ss:$4 sm:$0xff] %v4208_v43  ;;  %v4220_v43 = vmul.f32 %v4092_v57, %v4092_v57  ;;  %v4109_v50 = vsub.f32 %v8015_v10, %v7191_v59  ;;  %v4233_v57 = vmul.f32 %v4105_v53, %v4105_v53 }
 0x44a   : > { %v4608_v58 = vadd.f32 %v4607_v16, %v4606_v60  ;;  %v4236_v16 = vmul.f32 %v4108_v49, %v4108_v49 }
 0x44c   : > { %v4494_v61 = vld.sshfl [vmem:[#allocation1] sm:$0xff pattern:$0x73625140] }
 0x44d   : > { %4496 = vst [vmem:[#allocation1] ss:$4 sm:$0xff] %v4209_v3  ;;  %v4611_v5 = vsel %vm3907_vm0, %v4494_v61, 0.0  ;;  %v4610_v3 = vadd.f32 %v4609_v13, %v4608_v58  ;;  %v4104_v61 = vsub.f32 %v6900_v51, %v7200_v9 }
 0x44e   : > { %4497 = vst [vmem:[#allocation1 + $0x1] ss:$4 sm:$0xff] %v4210_v54  ;;  %v4225_v54 = vmul.f32 %v4097_v44, %v4097_v44 }
 0x44f   : > { %4498 = vst [vmem:[#allocation1 + $0x2] ss:$4 sm:$0xff] %v4211_v40  ;;  %v4226_v40 = vmul.f32 %v4098_v14, %v4098_v14  ;;  %v4612_v46 = vadd.f32 %v4611_v5, %v4610_v3 }
 0x450   : > { %v7488_v34 = vld.sshfl [vmem:[#allocation1 + $0x20] sm:$0xff pattern:$0x73625140]  ;;  %4499 = vst [vmem:[#allocation1 + $0x3] ss:$4 sm:$0xff] %v4212_v30  ;;  %v4230_v30 = vmul.f32 %v4102_v19, %v4102_v19 }
 0x451   : > { %4500 = vst [vmem:[#allocation1 + $0x20] ss:$4 sm:$0xff] %v4213_v26  ;;  %v4613_v31 = vsel %vm3907_vm0, %v7488_v34, 0.0  ;;  %v8013_v34 = vld [vmem:[#allocation105_spill] sm:$0xff] }
 0x452   : > { %4501 = vst [vmem:[#allocation1 + $0x21] ss:$4 sm:$0xff] %v4214_v27  ;;  %v4614_v26 = vadd.f32 %v4613_v31, %v4612_v46  ;;  %v4231_v27 = vmul.f32 %v4103_v33, %v4103_v33 }
 0x453   : > { %4502 = vst [vmem:[#allocation1 + $0x22] ss:$4 sm:$0xff] %v4215_v17  ;;  %v4232_v17 = vmul.f32 %v4104_v61, %v4104_v61 }
 0x454   : > { %4503 = vst [vmem:[#allocation1 + $0x23] ss:$4 sm:$0xff] %v4216_v42  ;;  %v4107_v42 = vsub.f32 %v8013_v34, %v7197_v32 }
 0x457   : > { %v4504_v24 = vld.sshfl [vmem:[#allocation1] sm:$0xff pattern:$0x73625140] }
 0x458   : > { %4506 = vst [vmem:[#allocation1] ss:$4 sm:$0xff] %v4217_v18  ;;  %v4615_v38 = vsel %vm3907_vm0, %v4504_v24, 0.0  ;;  %v8016_v18 = vld [vmem:[#allocation107_spill] sm:$0xff]  ;;  %v8017_v24 = vld [vmem:[#allocation108_spill] sm:$0xff] }
 0x459   : > { %4507 = vst [vmem:[#allocation1 + $0x1] ss:$4 sm:$0xff] %v4218_v28  ;;  %v4616_v51 = vadd.f32 %v4615_v38, %v4614_v26  ;;  %v4110_v12 = vsub.f32 %v8016_v18, %v7194_v45  ;;  %v4111_v37 = vsub.f32 %v8017_v24, %v7197_v32 }
 0x45a   : > { %4508 = vst [vmem:[#allocation1 + $0x2] ss:$4 sm:$0xff] %v4219_v8  ;;  %v4235_v8 = vmul.f32 %v4107_v42, %v4107_v42 }
 0x45b   : > { %v4505_v25 = vld.sshfl [vmem:[#allocation1 + $0x20] sm:$0xff pattern:$0x73625140]  ;;  %4509 = vst [vmem:[#allocation1 + $0x3] ss:$4 sm:$0xff] %v4220_v43  ;;  %v8018_v43 = vld [vmem:[#allocation109_spill] sm:$0xff]  ;;  %v4238_v60 = vmul.f32 %v4110_v12, %v4110_v12 }
 0x45c   : > { %4510 = vst [vmem:[#allocation1 + $0x20] ss:$4 sm:$0xff] %v4221_v22  ;;  %v4617_v11 = vsel %vm3907_vm0, %v4505_v25, 0.0  ;;  %v4112_v2 = vsub.f32 %v8018_v43, %v7200_v9  ;;  %v4237_v22 = vmul.f32 %v4109_v50, %v4109_v50  ;;  %v4239_v25 = vmul.f32 %v4111_v37, %v4111_v37 }
 0x45d   : > { %4511 = vst [vmem:[#allocation1 + $0x21] ss:$4 sm:$0xff] %v4222_v0  ;;  %v4618_v4 = vadd.f32 %v4617_v11, %v4616_v51 }
 0x45e   : > { %4512 = vst [vmem:[#allocation1 + $0x22] ss:$4 sm:$0xff] %v4223_v63  ;;  %v4240_v63 = vmul.f32 %v4112_v2, %v4112_v2 }
 0x45f   : > { %4513 = vst [vmem:[#allocation1 + $0x23] ss:$4 sm:$0xff] %v4224_v6 }
 0x462   : > { %v4514_v36 = vld.sshfl [vmem:[#allocation1] sm:$0xff pattern:$0x73625140] }
 0x463   : > { %4516 = vst [vmem:[#allocation1] ss:$4 sm:$0xff] %v4225_v54  ;;  %v4619_v35 = vsel %vm3907_vm0, %v4514_v36, 0.0 }
 0x464   : > { %4517 = vst [vmem:[#allocation1 + $0x1] ss:$4 sm:$0xff] %v4226_v40  ;;  %v4620_v20 = vadd.f32 %v4619_v35, %v4618_v4  ;;  %v8019_v40 = vld [vmem:[#allocation79_spill] sm:$0xff] }
 0x465   : > { %4518 = vst [vmem:[#allocation1 + $0x2] ss:$4 sm:$0xff] %v4227_v48 }
 0x466   : > { %v4515_v1 = vld.sshfl [vmem:[#allocation1 + $0x20] sm:$0xff pattern:$0x73625140]  ;;  %4519 = vst [vmem:[#allocation1 + $0x3] ss:$4 sm:$0xff] %v4228_v29 }
 0x467   : > { %4520 = vst [vmem:[#allocation1 + $0x20] ss:$4 sm:$0xff] %v4229_v21  ;;  %v4621_v59 = vsel %vm3907_vm0, %v4515_v1, 0.0 }
 0x468   : > { %4521 = vst [vmem:[#allocation1 + $0x21] ss:$4 sm:$0xff] %v4230_v30  ;;  %v4622_v32 = vadd.f32 %v4621_v59, %v4620_v20 }
 0x469   : > { %4522 = vst [vmem:[#allocation1 + $0x22] ss:$4 sm:$0xff] %v4231_v27 }
 0x46a   : > { %4523 = vst [vmem:[#allocation1 + $0x23] ss:$4 sm:$0xff] %v4232_v17 }
 0x46d   : > { %v4524_v28 = vld.sshfl [vmem:[#allocation1] sm:$0xff pattern:$0x73625140] }
 0x46e   : > { %4526 = vst [vmem:[#allocation1] ss:$4 sm:$0xff] %v4233_v57  ;;  %v4623_v45 = vsel %vm3907_vm0, %v4524_v28, 0.0 }
 0x46f   : > { %4527 = vst [vmem:[#allocation1 + $0x1] ss:$4 sm:$0xff] %v4234_v39  ;;  %v4624_v58 = vadd.f32 %v4623_v45, %v4622_v32 }
 0x470   : > { %4528 = vst [vmem:[#allocation1 + $0x2] ss:$4 sm:$0xff] %v4235_v8 }
 0x471   : > { %v4525_v0 = vld.sshfl [vmem:[#allocation1 + $0x20] sm:$0xff pattern:$0x73625140]  ;;  %4529 = vst [vmem:[#allocation1 + $0x3] ss:$4 sm:$0xff] %v4236_v16 }
 0x472   : > { %4530 = vst [vmem:[#allocation1 + $0x20] ss:$4 sm:$0xff] %v4237_v22  ;;  %v4625_v9 = vsel %vm3907_vm0, %v4525_v0, 0.0 }
 0x473   : > { %4531 = vst [vmem:[#allocation1 + $0x21] ss:$4 sm:$0xff] %v4238_v60  ;;  %v4626_v44 = vadd.f32 %v4625_v9, %v4624_v58 }
 0x474   : > { %4532 = vst [vmem:[#allocation1 + $0x22] ss:$4 sm:$0xff] %v4239_v25 }
 0x475   : > { %4533 = vst [vmem:[#allocation1 + $0x23] ss:$4 sm:$0xff] %v4240_v63 }
 0x478   : > { %v4534_v56 = vld.sshfl [vmem:[#allocation1] sm:$0xff pattern:$0x73625140] }
 0x479   : > { %v4627_v6 = vsel %vm3907_vm0, %v4534_v56, 0.0 }
 0x47a   : > { %v4628_v23 = vadd.f32 %v4627_v6, %v4626_v44 }
 0x47c   : > { %v4535_v14 = vld.sshfl [vmem:[#allocation1 + $0x20] sm:$0xff pattern:$0x73625140] }
 0x47d   : > { %v4629_v47 = vsel %vm3907_vm0, %v4535_v14, 0.0 }
 0x47e   : > { %v4630_v13 = vadd.f32 %v4629_v47, %v4628_v23 }
 0x480   : > { %v4631_v5 = vrot.slane %v4630_v13, 4 }
 0x482   : > { %v4632_v7 = vadd.f32 %v4631_v5, %v4630_v13 }
 0x484   : > { %v4633_v3 = vrot.slane %v4632_v7, 2 }
 0x486   : > { %v4634_v52 = vadd.f32 %v4633_v3, %v4632_v7 }
 0x488   : > { %v4635_v54 = vrot.slane %v4634_v52, 1 }
 0x48a   : > { %v4636_v19 = vadd.f32 %v4635_v54, %v4634_v52 }
 0x48c   : > { %v4638_v36 = vsel %vm671_vm6, %v8019_v40, %v4636_v19 }
 0x48d   : > { %4639 = vst.msk [vmem:[%s235_s29] sm:$0x3] %vm445_vm1, %v4638_v36 }
 0x48e PF: > { %s16_s18 = sadd.s32 1, %s5110_s18  }
 0x48f   : > { %p13_p4 = scmp.ge.s32.totalorder %s16_s18, 4  }
 0x491   :  { %15 = sbr.rel (!%p13_p4) target bundleno = 1 (0x1), region = 108 }

// kernel: double_conv.3
= control target key start
LH: loop header
LB: loop body
LE: loop exit
PB: predicated region body
PF: predicated region fallthrough
CT: control target
= control target key end

     0   :  { %s4892_s12 = smov 0   ;;  %s7189_s0 = inlined_call_operand.vmem [shape: bf16[2,16,16,4], index: 0, kind: input, shape index: {}]   ;;  %s7190_s1 = inlined_call_operand.vmem [shape: bf16[3,12,8], index: 1, kind: input, shape index: {}]   ;;  %s7191_s2 = inlined_call_operand.vmem [shape: bf16[2,16,16,8], index: 2, kind: output, shape index: {0}]   ;;  %s7192_s3 = inlined_call_operand.vmem [shape: f32[2,2,8], index: 3, kind: output, shape index: {1}]  }
   0x1 LB: > { %s4491_s13 = sadd.s32 4294967295, %s4867_s12   ;;  %p4495_p0 = scmp.ge.s32.totalorder %s4867_s12, 1  ;;  %s4867_s12 = sphi %s4892_s12, %s14_s12  }
   0x2   : > { %p140_p1 = scmp.lt.s32.totalorder %s4867_s12, 3 }
   0x4   : > { %p141_p2 = pnand %p4495_p0, %p140_p1 }
   0x6   : > { %144 = sbr.rel (%p141_p2) target bundleno = 1153 (0x481), region = 28 }
   0xb   : > { %vm215_vm0 = vcmask 27648   ;;  %v4869_v0 = vmov 0   ;;  %p168_p3 = scmp.lt.s32.totalorder %s4491_s13, 1  ;;  %vm218_vm1 = vcmask 24576   ;;  %vm220_vm2 = vcmask 27649   ;;  %s4870_s18 = smov 4  }
   0xc   : > { %216 = vst.msk [vmem:[#allocation2] sm:$0xf] %vm215_vm0, %v4869_v0  ;;  %vm449_vm3 = vcmask 1040384   ;;  %vm450_vm4 = vsmask.f32 256  ;;  %vm1811_vm9 = vcmask 1042432  }
   0xd   : > { %217 = vst.msk [vmem:[#allocation2 + $0x4] sm:$0xf] %vm215_vm0, %v4869_v0  ;;  %s7639_s13 = smov (!%p168_p3, %s4491_s13), 1  ;;  %vm1141_vm5 = vsmask.f32 3328  ;;  %vm4929_vm7 = vmand %vm449_vm3, %vm450_vm4  ;;  %vm1812_vm10 = vcmask 1046532  }
   0xe   : > { %222 = vst.msk [vmem:[#allocation2 + $0x9c] sm:$0xf] %vm215_vm0, %v4869_v0  ;;  %s4782_s14 = sshll.u32 %s7639_s13, 7  ;;  %vm1142_vm6 = vsmask.f32 7440  ;;  %vm4957_vm11 = vmor %vm1811_vm9, %vm1812_vm10  ;;  %s4871_s19 = smov 8  }
   0xf   : > { %219 = vst.msk [vmem:[#allocation2 + $0x8] sm:$0x1] %vm218_vm1, %v4869_v0  ;;  %s4918_s17 = scalar_lea.vmem %s7189_s0, %s4782_s14  ;;  %vm4933_vm8 = vmor %vm1141_vm5, %vm1142_vm6  ;;  %vm1676_vm12 = vcmask 60448   ;;  %vm2059_vm13 = vcmask 93248   ;;  %vm2340_vm14 = vcmask 1045504   ;;  %vm2285_vm15 = vcmask 97280   ;;  %s5888_s7 = scalar_lea.vmem %s7191_s2, %s4782_s14 }
  0x10   : > { %221 = vst.msk [vmem:[#allocation2 + $0x98] sm:$0xe] %vm220_vm2, %v4869_v0  ;;  %v4503_v1 = vld [vmem:[%s4918_s17] sm:$0xf]  ;;  %v4784_v2 = vld [vmem:[%s4918_s17] sm:$0xf0] }
  0x11   : > { %v4504_v4 = vor.u32 %v4784_v2, %v4503_v1  ;;  %v4785_v11 = vld [vmem:[%s4918_s17 + $0x8] sm:$0xff]  ;;  %v4786_v33 = vld [vmem:[%s4918_s17 + $0x10] sm:$0xff]  ;;  %vm3439_vm4 = vcmask 60416   ;;  %vm1717_vm5 = vcmask 58400   ;;  %vm1718_vm6 = vsmask.f32 1280 }
  0x12   : > { %v313_v20 = vshrl.u32 %v4785_v11, 16  ;;  %v316_v29 = vshll.u32 %v4785_v11, 16  ;;  %v320_v39 = vshrl.u32 %v4786_v33, 16  ;;  %v323_v52 = vshll.u32 %v4786_v33, 16  ;;  %s4500_s8 = sshll.u32 %s7639_s13, 1 }
  0x13   : > { %v1100_v3 = vld [vmem:[#allocation2] sm:$0xf]  ;;  %v306_v9 = vshrl.u32 %v4504_v4, 16  ;;  %v309_v10 = vshll.u32 %v4504_v4, 16  ;;  %vm2102_vm10 = vcmask 91201   ;;  %s181_s11 = scalar_lea.vmem %s7192_s3, %s4500_s8 }
  0x14   : > { %v4922_v5 = vld [vmem:[#allocation2 + $0x4] sm:$0xf]  ;;  %v1145_v6 = vshrl.u32 %v1100_v3, 16  ;;  %v1148_v7 = vshll.u32 %v1100_v3, 16  ;;  %v4943_v28 = vrot.slane %v313_v20, 7  ;;  %v4967_v51 = vrot.slane %v320_v39, 7 }
  0x15   : > { %v1154_v8 = vshll.u32 %v4922_v5, 16  ;;  %v308_v14 = vrot.slane %v306_v9, 7  ;;  %v1730_v37 = vld [vmem:[#allocation2 + $0x4] sm:$0xf]  ;;  %v1729_v41 = vld [vmem:[#allocation2] sm:$0xe] }
  0x16   : > { %v1147_v12 = vrot.slane %v1145_v6, 4  ;;  %v1150_v13 = vrot.slane %v1148_v7, 5  ;;  %v318_v32 = vor.u32 %v316_v29, %v4943_v28  ;;  %v1158_v42 = vshrl.u32 %v4922_v5, 16  ;;  %v4787_v3 = vld [vmem:[%s4918_s17 + $0x18] sm:$0xff] }
  0x17   : > { %v4926_v16 = vrot.slane %v1154_v8, 5  ;;  %v311_v19 = vor.u32 %v309_v10, %v308_v14  ;;  %v468_v38 = vsel %vm4929_vm7, %v308_v14, 0  ;;  %v1816_v43 = vrot.slane %v1730_v37, 5 }
  0x18   : > { %v1151_v15 = vor.u32 %v1150_v13, %v1147_v12  ;;  %v4949_v35 = vsel %vm4929_vm7, 0, %v318_v32  ;;  %v4565_v45 = vrot.slane %v1729_v41, 9  ;;  %v1160_v54 = vrot.slane %v1158_v42, 4 }
  0x19   : > { %v452_v22 = vsel %vm4929_vm7, 0, %v311_v19  ;;  %v507_v40 = vrot.slane %v4949_v35, 1  ;;  %v508_v44 = vrot.slane %v4949_v35, 2  ;;  %v509_v48 = vrot.slane %v4949_v35, 3 }
  0x1a   : > { %v1152_v21 = vrot.slane %v1151_v15, 4  ;;  %v500_v24 = vrot.slane %v452_v22, 1  ;;  %v501_v25 = vrot.slane %v452_v22, 2  ;;  %v502_v26 = vrot.slane %v452_v22, 3  ;;  %614 = vst [vmem:[#allocation1 + $0x1] ss:$4 sm:$0xff] %v452_v22 }
  0x1b   : > { %v503_v27 = vrot.slane %v452_v22, 4  ;;  %v504_v30 = vrot.slane %v452_v22, 5  ;;  %v505_v31 = vrot.slane %v452_v22, 6  ;;  %v506_v34 = vrot.slane %v452_v22, 7 }
  0x1c   : > { %v1157_v23 = vsel %vm4933_vm8, %v1152_v21, %v4926_v16  ;;  %617 = vst [vmem:[#allocation1 + $0x2] ss:$4 sm:$0xff] %v500_v24  ;;  %v510_v49 = vrot.slane %v4949_v35, 4  ;;  %v1817_v50 = vsel %vm4957_vm11, %v4565_v45, %v1816_v43  ;;  %v511_v53 = vrot.slane %v4949_v35, 5 }
  0x1d   : > { %1553 = vrot.lane.b32.xlu0 %v1157_v23, %s4870_s18  ;;  %620 = vst [vmem:[#allocation1 + $0x3] ss:$4 sm:$0xff] %v501_v25  ;;  %1936 = vrot.lane.b32.xlu2 %v1817_v50, %s4871_s19  ;;  %v1818_v55 = vrot.slane %v1816_v43, 4  ;;  %v325_v61 = vor.u32 %v323_v52, %v4967_v51  ;;  %v512_v1 = vrot.slane %v4949_v35, 6  ;;  %v513_v2 = vrot.slane %v4949_v35, 7  ;;  %v4788_v50 = vld [vmem:[%s4918_s17 + $0x20] sm:$0xff] }
  0x1e   : > { %623 = vst [vmem:[#allocation1 + $0x20] ss:$4 sm:$0xff] %v502_v26  ;;  %v1161_v5 = vor.u32 %v1160_v54, %v4926_v16  ;;  %v469_v14 = vsel %vm4929_vm7, %v4943_v28, 0  ;;  %v327_v21 = vshrl.u32 %v4787_v3, 16  ;;  %v330_v32 = vshll.u32 %v4787_v3, 16 }
  0x1f   : > { %626 = vst [vmem:[#allocation1 + $0x21] ss:$4 sm:$0xff] %v503_v27  ;;  %v4981_v13 = vsel %vm4929_vm7, 0, %v325_v61 }
  0x20   : > { %629 = vst [vmem:[#allocation1 + $0x22] ss:$4 sm:$0xff] %v504_v30  ;;  %v514_v22 = vrot.slane %v4981_v13, 1  ;;  %v1162_v24 = vrot.slane %v1161_v5, 4  ;;  %v515_v26 = vrot.slane %v4981_v13, 2  ;;  %v516_v28 = vrot.slane %v4981_v13, 3 }
  0x21   : > { %632 = vst [vmem:[#allocation1 + $0x23] ss:$4 sm:$0xff] %v505_v31  ;;  %v517_v30 = vrot.slane %v4981_v13, 4  ;;  %v4999_v31 = vrot.slane %v327_v21, 7 }
  0x23   : > { %v332_v41 = vor.u32 %v330_v32, %v4999_v31 }
  0x24   : > { %v633_v36 = vld [vmem:[#allocation1] sm:$0xff] }
  0x25   : > { %981 = vst.msk [vmem:[#allocation2 + $0x8] sm:$0xe] %vm220_vm2, %v633_v36  ;;  %vm2242_vm2 = vcmask 1046528  }
  0x26   : > { %636 = vst [vmem:[#allocation1] ss:$4 sm:$0xff] %v506_v34 }
  0x27   : > { %638 = vst [vmem:[#allocation1 + $0x1] ss:$4 sm:$0xff] %v468_v38 }
  0x28   : > { %v634_v46 = vld [vmem:[#allocation1 + $0x20] sm:$0xff]  ;;  %640 = vst [vmem:[#allocation1 + $0x2] ss:$4 sm:$0xff] %v4949_v35 }
  0x29   : > { %982 = vst.msk [vmem:[#allocation2 + $0xc] sm:$0xf] %vm215_vm0, %v634_v46 }
  0x2a   : > { %642 = vst [vmem:[#allocation1 + $0x3] ss:$4 sm:$0xff] %v507_v40 }
  0x2b   : > { %644 = vst [vmem:[#allocation1 + $0x20] ss:$4 sm:$0xff] %v508_v44  ;;  %v518_v44 = vrot.slane %v4981_v13, 5 }
  0x2c   : > { %v1731_v56 = vld [vmem:[#allocation2 + $0x8] sm:$0xf]  ;;  %646 = vst [vmem:[#allocation1 + $0x21] ss:$4 sm:$0xff] %v509_v48  ;;  %v519_v48 = vrot.slane %v4981_v13, 6 }
  0x2d   : > { %v1102_v57 = vld [vmem:[#allocation2 + $0x8] sm:$0xf]  ;;  %v1819_v58 = vrot.slane %v1731_v56, 5  ;;  %648 = vst [vmem:[#allocation1 + $0x22] ss:$4 sm:$0xff] %v510_v49  ;;  %v520_v49 = vrot.slane %v4981_v13, 7 }
  0x2e   : > { %v1164_v59 = vshll.u32 %v1102_v57, 16  ;;  %v1168_v60 = vshrl.u32 %v1102_v57, 16  ;;  %650 = vst [vmem:[#allocation1 + $0x23] ss:$4 sm:$0xff] %v511_v53  ;;  %v5018_v57 = vsel %vm4929_vm7, 0, %v332_v41 }
  0x2f   : > { %v1821_v62 = vrot.slane %v1819_v58, 4  ;;  %v1820_v63 = vsel %vm4957_vm11, %v1818_v55, %v1819_v58  ;;  %v522_v5 = vrot.slane %v5018_v57, 2  ;;  %v524_v21 = vrot.slane %v5018_v57, 4 }
  0x30   : > { %v1732_v4 = vld [vmem:[#allocation2 + $0xc] sm:$0xf]  ;;  %1938 = vrot.lane.b32.xlu0 %v1820_v63, %s4871_s19  ;;  %v1166_v6 = vrot.slane %v1164_v59, 5  ;;  %v1170_v8 = vrot.slane %v1168_v60, 4  ;;  %v526_v32 = vrot.slane %v5018_v57, 6 }
  0x31   : > { %v1103_v7 = vld [vmem:[#allocation2 + $0xc] sm:$0xf]  ;;  %v1822_v9 = vrot.slane %v1732_v4, 5  ;;  %v651_v10 = vld [vmem:[#allocation1] sm:$0xff]  ;;  %v521_v4 = vrot.slane %v5018_v57, 1 }
  0x32   : > { %v1174_v11 = vshll.u32 %v1103_v7, 16  ;;  %v1178_v12 = vshrl.u32 %v1103_v7, 16  ;;  %983 = vst.msk [vmem:[#allocation2 + $0x10] sm:$0xf] %vm215_vm0, %v651_v10  ;;  %v1171_v15 = vor.u32 %v1170_v8, %v1166_v6  ;;  %v1167_v34 = vsel %vm4933_vm8, %v1162_v24, %v1166_v6 }
  0x33   : > { %v1823_v16 = vsel %vm4957_vm11, %v1821_v62, %v1822_v9  ;;  %654 = vst [vmem:[#allocation1] ss:$4 sm:$0xff] %v512_v1  ;;  %v1824_v33 = vrot.slane %v1822_v9, 4  ;;  %v470_v62 = vsel %vm4929_vm7, %v4967_v51, 0  ;;  %v334_v1 = vshrl.u32 %v4788_v50, 16 }
  0x34   : > { %v1176_v19 = vrot.slane %v1174_v11, 5  ;;  %v1180_v20 = vrot.slane %v1178_v12, 4  ;;  %1940 = vrot.lane.b32.xlu1 %v1823_v16, %s4871_s19  ;;  %656 = vst [vmem:[#allocation1 + $0x1] ss:$4 sm:$0xff] %v513_v2  ;;  %v1172_v23 = vrot.slane %v1171_v15, 4  ;;  %v523_v8 = vrot.slane %v5018_v57, 3 }
  0x35   : > { %v652_v25 = vld [vmem:[#allocation1 + $0x20] sm:$0xff]  ;;  %658 = vst [vmem:[#allocation1 + $0x2] ss:$4 sm:$0xff] %v469_v14  ;;  %v5032_v9 = vrot.slane %v334_v1, 7  ;;  %v337_v10 = vshll.u32 %v4788_v50, 16 }
  0x36   : > { %v1181_v27 = vor.u32 %v1180_v20, %v1176_v19  ;;  %984 = vst.msk [vmem:[#allocation2 + $0x14] sm:$0xf] %vm215_vm0, %v652_v25  ;;  %v1177_v29 = vsel %vm4933_vm8, %v1172_v23, %v1176_v19  ;;  %v525_v25 = vrot.slane %v5018_v57, 5 }
  0x37   : > { %660 = vst [vmem:[#allocation1 + $0x3] ss:$4 sm:$0xff] %v4981_v13  ;;  %1557 = vrot.lane.b32.xlu2 %v1177_v29, %s4870_s18 }
  0x38   : > { %662 = vst [vmem:[#allocation1 + $0x20] ss:$4 sm:$0xff] %v514_v22  ;;  %v1182_v37 = vrot.slane %v1181_v27, 4  ;;  %v339_v22 = vor.u32 %v337_v10, %v5032_v9 }
  0x39   : > { %v1104_v35 = vld [vmem:[#allocation2 + $0x10] sm:$0xf]  ;;  %664 = vst [vmem:[#allocation1 + $0x21] ss:$4 sm:$0xff] %v515_v26  ;;  %v4789_v26 = vld [vmem:[%s4918_s17 + $0x28] sm:$0xff] }
  0x3a   : > { %v1733_v36 = vld [vmem:[#allocation2 + $0x10] sm:$0xf]  ;;  %v1184_v38 = vshll.u32 %v1104_v35, 16  ;;  %v1188_v39 = vshrl.u32 %v1104_v35, 16  ;;  %666 = vst [vmem:[#allocation1 + $0x22] ss:$4 sm:$0xff] %v516_v28 }
  0x3b   : > { %v1825_v40 = vrot.slane %v1733_v36, 5  ;;  %668 = vst [vmem:[#allocation1 + $0x23] ss:$4 sm:$0xff] %v517_v30  ;;  %v527_v35 = vrot.slane %v5018_v57, 7  ;;  %v341_v41 = vshrl.u32 %v4789_v26, 16 }
  0x3c   : > { %1555 = vrot.lane.b32.xlu1 %v1167_v34, %s4870_s18  ;;  %v1186_v42 = vrot.slane %v1184_v38, 5  ;;  %v1190_v43 = vrot.slane %v1188_v39, 4  ;;  %v5049_v39 = vsel %vm4929_vm7, 0, %v339_v22 }
  0x3d   : > { %v1826_v45 = vsel %vm4957_vm11, %v1824_v33, %v1825_v40  ;;  %v1105_v46 = vld [vmem:[#allocation2 + $0x14] sm:$0xf]  ;;  %v1827_v61 = vrot.slane %v1825_v40, 4  ;;  %v531_v1 = vrot.slane %v5049_v39, 4 }
  0x3e   : > { %v1187_v52 = vsel %vm4933_vm8, %v1182_v37, %v1186_v42  ;;  %v1191_v53 = vor.u32 %v1190_v43, %v1186_v42  ;;  %v1194_v54 = vshll.u32 %v1105_v46, 16  ;;  %v1198_v55 = vshrl.u32 %v1105_v46, 16  ;;  %v669_v56 = vld [vmem:[#allocation1] sm:$0xff]  ;;  %v1734_v63 = vld [vmem:[#allocation2 + $0x14] sm:$0xf] }
  0x3f   : > { %1559 = vrot.lane.b32.xlu0 %v1187_v52, %s4870_s18  ;;  %985 = vst.msk [vmem:[#allocation2 + $0x18] sm:$0xf] %vm215_vm0, %v669_v56  ;;  %1942 = vrot.lane.b32.xlu2 %v1826_v45, %s4871_s19  ;;  %v1828_v3 = vrot.slane %v1734_v63, 5  ;;  %v528_v46 = vrot.slane %v5049_v39, 1  ;;  %v5062_v52 = vrot.slane %v341_v41, 7 }
  0x40   : > { %v1192_v58 = vrot.slane %v1191_v53, 4  ;;  %v1196_v59 = vrot.slane %v1194_v54, 5  ;;  %v1200_v60 = vrot.slane %v1198_v55, 4  ;;  %672 = vst [vmem:[#allocation1] ss:$4 sm:$0xff] %v518_v44  ;;  %v471_v44 = vsel %vm4929_vm7, %v4999_v31, 0 }
  0x41   : > { %674 = vst [vmem:[#allocation1 + $0x1] ss:$4 sm:$0xff] %v519_v48  ;;  %v1829_v51 = vsel %vm4957_vm11, %v1827_v61, %v1828_v3  ;;  %v1830_v16 = vrot.slane %v1828_v3, 4  ;;  %v344_v53 = vshll.u32 %v4789_v26, 16  ;;  %v530_v61 = vrot.slane %v5049_v39, 3 }
  0x42   : > { %v670_v2 = vld [vmem:[#allocation1 + $0x20] sm:$0xff]  ;;  %676 = vst [vmem:[#allocation1 + $0x2] ss:$4 sm:$0xff] %v520_v49  ;;  %v1197_v6 = vsel %vm4933_vm8, %v1192_v58, %v1196_v59  ;;  %v1201_v7 = vor.u32 %v1200_v60, %v1196_v59  ;;  %v529_v49 = vrot.slane %v5049_v39, 2 }
  0x43   : > { %986 = vst.msk [vmem:[#allocation2 + $0x1c] sm:$0xf] %vm215_vm0, %v670_v2  ;;  %v346_v2 = vor.u32 %v344_v53, %v5062_v52 }
  0x44   : > { %678 = vst [vmem:[#allocation1 + $0x3] ss:$4 sm:$0xff] %v470_v62  ;;  %v1202_v15 = vrot.slane %v1201_v7, 4  ;;  %v532_v7 = vrot.slane %v5049_v39, 5 }
  0x45   : > { %680 = vst [vmem:[#allocation1 + $0x20] ss:$4 sm:$0xff] %v5018_v57 }
  0x46   : > { %v1106_v11 = vld [vmem:[#allocation2 + $0x18] sm:$0xf]  ;;  %682 = vst [vmem:[#allocation1 + $0x21] ss:$4 sm:$0xff] %v521_v4 }
  0x47   : > { %1561 = vrot.lane.b32.xlu0 %v1197_v6, %s4870_s18  ;;  %v1204_v12 = vshll.u32 %v1106_v11, 16  ;;  %v1208_v13 = vshrl.u32 %v1106_v11, 16  ;;  %v1735_v14 = vld [vmem:[#allocation2 + $0x18] sm:$0xf]  ;;  %1944 = vrot.lane.b32.xlu2 %v1829_v51, %s4871_s19  ;;  %684 = vst [vmem:[#allocation1 + $0x22] ss:$4 sm:$0xff] %v522_v5 }
  0x48   : > { %686 = vst [vmem:[#allocation1 + $0x23] ss:$4 sm:$0xff] %v523_v8  ;;  %v1831_v24 = vrot.slane %v1735_v14, 5  ;;  %v533_v11 = vrot.slane %v5049_v39, 6 }
  0x49   : > { %v1206_v19 = vrot.slane %v1204_v12, 5  ;;  %v1210_v20 = vrot.slane %v1208_v13, 4 }
  0x4a   : > { %v1107_v23 = vld [vmem:[#allocation2 + $0x1c] sm:$0xf]  ;;  %v1832_v34 = vsel %vm4957_vm11, %v1830_v16, %v1831_v24  ;;  %v1833_v45 = vrot.slane %v1831_v24, 4  ;;  %v534_v16 = vrot.slane %v5049_v39, 7 }
  0x4b   : > { %v1211_v27 = vor.u32 %v1210_v20, %v1206_v19  ;;  %v1214_v28 = vshll.u32 %v1107_v23, 16  ;;  %v687_v29 = vld [vmem:[#allocation1] sm:$0xff]  ;;  %v1207_v33 = vsel %vm4933_vm8, %v1202_v15, %v1206_v19  ;;  %v1218_v38 = vshrl.u32 %v1107_v23, 16  ;;  %v4790_v19 = vld [vmem:[%s4918_s17 + $0x30] sm:$0xff] }
  0x4c   : > { %v1736_v30 = vld [vmem:[#allocation2 + $0x1c] sm:$0xf]  ;;  %987 = vst.msk [vmem:[#allocation2 + $0x20] sm:$0xf] %vm215_vm0, %v687_v29  ;;  %v5082_v15 = vsel %vm4929_vm7, 0, %v346_v2 }
  0x4d   : > { %v1212_v36 = vrot.slane %v1211_v27, 4  ;;  %v1216_v37 = vrot.slane %v1214_v28, 5  ;;  %690 = vst [vmem:[#allocation1] ss:$4 sm:$0xff] %v524_v21  ;;  %v1834_v40 = vrot.slane %v1736_v30, 5  ;;  %v1220_v48 = vrot.slane %v1218_v38, 4 }
  0x4e   : > { %692 = vst [vmem:[#allocation1 + $0x1] ss:$4 sm:$0xff] %v525_v25  ;;  %v472_v25 = vsel %vm4929_vm7, %v5032_v9, 0  ;;  %v535_v26 = vrot.slane %v5082_v15, 1  ;;  %v348_v27 = vshrl.u32 %v4790_v19, 16  ;;  %v536_v9 = vrot.slane %v5082_v15, 2 }
  0x4f   : > { %v1217_v42 = vsel %vm4933_vm8, %v1212_v36, %v1216_v37  ;;  %1563 = vrot.lane.b32.xlu0 %v1207_v33, %s4870_s18  ;;  %v688_v43 = vld [vmem:[#allocation1 + $0x20] sm:$0xff]  ;;  %1946 = vrot.lane.b32.xlu2 %v1832_v34, %s4871_s19  ;;  %694 = vst [vmem:[#allocation1 + $0x2] ss:$4 sm:$0xff] %v526_v32  ;;  %v1836_v50 = vrot.slane %v1834_v40, 4  ;;  %v1835_v56 = vsel %vm4957_vm11, %v1833_v45, %v1834_v40  ;;  %v537_v34 = vrot.slane %v5082_v15, 3 }
  0x50   : > { %1565 = vrot.lane.b32.xlu1 %v1217_v42, %s4870_s18  ;;  %988 = vst.msk [vmem:[#allocation2 + $0x24] sm:$0xf] %vm215_vm0, %v688_v43  ;;  %v1221_v57 = vor.u32 %v1220_v48, %v1216_v37  ;;  %v5100_v37 = vrot.slane %v348_v27, 7  ;;  %v351_v38 = vshll.u32 %v4790_v19, 16  ;;  %v538_v40 = vrot.slane %v5082_v15, 4 }
  0x51   : > { %696 = vst [vmem:[#allocation1 + $0x3] ss:$4 sm:$0xff] %v527_v35  ;;  %v539_v41 = vrot.slane %v5082_v15, 5 }
  0x52   : > { %698 = vst [vmem:[#allocation1 + $0x20] ss:$4 sm:$0xff] %v471_v44  ;;  %v1222_v51 = vrot.slane %v1221_v57, 4  ;;  %v353_v53 = vor.u32 %v351_v38, %v5100_v37 }
  0x53   : > { %v1737_v54 = vld [vmem:[#allocation2 + $0x20] sm:$0xf]  ;;  %700 = vst [vmem:[#allocation1 + $0x21] ss:$4 sm:$0xff] %v5049_v39 }
  0x54   : > { %v1108_v55 = vld [vmem:[#allocation2 + $0x20] sm:$0xf]  ;;  %v1837_v31 = vrot.slane %v1737_v54, 5  ;;  %702 = vst [vmem:[#allocation1 + $0x22] ss:$4 sm:$0xff] %v528_v46  ;;  %v540_v54 = vrot.slane %v5082_v15, 6 }
  0x55   : > { %v1224_v58 = vshll.u32 %v1108_v55, 16  ;;  %v1228_v59 = vshrl.u32 %v1108_v55, 16  ;;  %704 = vst [vmem:[#allocation1 + $0x23] ss:$4 sm:$0xff] %v529_v49  ;;  %v4791_v55 = vld [vmem:[%s4918_s17 + $0x38] sm:$0xff] }
  0x56   : > { %v1838_v60 = vsel %vm4957_vm11, %v1836_v50, %v1837_v31  ;;  %v1839_v5 = vrot.slane %v1837_v31, 4 }
  0x57   : > { %1948 = vrot.lane.b32.xlu0 %v1835_v56, %s4871_s19  ;;  %v1109_v62 = vld [vmem:[#allocation2 + $0x24] sm:$0xf]  ;;  %v1226_v8 = vrot.slane %v1224_v58, 5  ;;  %v1230_v10 = vrot.slane %v1228_v59, 4 }
  0x58   : > { %v5071_v63 = vld [vmem:[#allocation2 + $0x24] sm:$0xf]  ;;  %1950 = vrot.lane.b32.xlu1 %v1838_v60, %s4871_s19  ;;  %v1234_v3 = vshll.u32 %v1109_v62, 16  ;;  %v1238_v4 = vshrl.u32 %v1109_v62, 16  ;;  %v705_v6 = vld [vmem:[#allocation1] sm:$0xff]  ;;  %v541_v60 = vrot.slane %v5082_v15, 7 }
  0x59   : > { %989 = vst.msk [vmem:[#allocation2 + $0x28] sm:$0xf] %vm215_vm0, %v705_v6  ;;  %v1840_v12 = vrot.slane %v5071_v63, 5  ;;  %v1227_v22 = vsel %vm4933_vm8, %v1222_v51, %v1226_v8  ;;  %v1231_v23 = vor.u32 %v1230_v10, %v1226_v8  ;;  %v355_v6 = vshrl.u32 %v4791_v55, 16 }
  0x5a   : > { %708 = vst [vmem:[#allocation1] ss:$4 sm:$0xff] %v530_v61  ;;  %v1240_v13 = vrot.slane %v1238_v4, 4  ;;  %v1236_v14 = vrot.slane %v1234_v3, 5 }
  0x5b   : > { %710 = vst [vmem:[#allocation1 + $0x1] ss:$4 sm:$0xff] %v531_v1  ;;  %v1841_v20 = vsel %vm4957_vm11, %v1839_v5, %v1840_v12  ;;  %v1232_v29 = vrot.slane %v1231_v23, 4  ;;  %v1842_v31 = vrot.slane %v1840_v12, 4  ;;  %v473_v1 = vsel %vm4929_vm7, %v5062_v52, 0 }
  0x5c   : > { %v706_v21 = vld [vmem:[#allocation1 + $0x20] sm:$0xff]  ;;  %712 = vst [vmem:[#allocation1 + $0x2] ss:$4 sm:$0xff] %v532_v7  ;;  %v1241_v24 = vor.u32 %v1240_v13, %v1236_v14  ;;  %v5125_v5 = vsel %vm4929_vm7, 0, %v353_v53 }
  0x5d   : > { %714 = vst [vmem:[#allocation1 + $0x3] ss:$4 sm:$0xff] %v533_v11  ;;  %v1237_v42 = vsel %vm4933_vm8, %v1232_v29, %v1236_v14  ;;  %v542_v52 = vrot.slane %v5125_v5, 1  ;;  %v543_v11 = vrot.slane %v5125_v5, 2  ;;  %v544_v19 = vrot.slane %v5125_v5, 3 }
  0x5e   : > { %990 = vst.msk [vmem:[#allocation2 + $0x2c] sm:$0xf] %vm215_vm0, %v706_v21  ;;  %v1242_v30 = vrot.slane %v1241_v24, 4  ;;  %v358_v21 = vshll.u32 %v4791_v55, 16  ;;  %v546_v38 = vrot.slane %v5125_v5, 5 }
  0x5f   : > { %1952 = vrot.lane.b32.xlu0 %v1841_v20, %s4871_s19  ;;  %716 = vst [vmem:[#allocation1 + $0x20] ss:$4 sm:$0xff] %v534_v16  ;;  %v5133_v20 = vrot.slane %v355_v6, 7 }
  0x60   : > { %1567 = vrot.lane.b32.xlu1 %v1227_v22, %s4870_s18  ;;  %v1110_v28 = vld [vmem:[#allocation2 + $0x28] sm:$0xf]  ;;  %718 = vst [vmem:[#allocation1 + $0x21] ss:$4 sm:$0xff] %v472_v25 }
  0x61   : > { %v1244_v32 = vshll.u32 %v1110_v28, 16  ;;  %v1248_v33 = vshrl.u32 %v1110_v28, 16  ;;  %720 = vst [vmem:[#allocation1 + $0x22] ss:$4 sm:$0xff] %v5082_v15  ;;  %v1739_v43 = vld [vmem:[#allocation2 + $0x28] sm:$0xf] }
  0x62   : > { %722 = vst [vmem:[#allocation1 + $0x23] ss:$4 sm:$0xff] %v535_v26  ;;  %v1843_v56 = vrot.slane %v1739_v43, 5  ;;  %v545_v26 = vrot.slane %v5125_v5, 4  ;;  %v547_v43 = vrot.slane %v5125_v5, 6 }
  0x63   : > { %v1246_v35 = vrot.slane %v1244_v32, 5  ;;  %v1250_v36 = vrot.slane %v1248_v33, 4  ;;  %v1018_v33 = vld [vmem:[#allocation2] sm:$0xf] }
  0x64   : > { %v723_v39 = vld [vmem:[#allocation1] sm:$0xff]  ;;  %v1844_v2 = vsel %vm4957_vm11, %v1842_v31, %v1843_v56  ;;  %v1845_v23 = vrot.slane %v1843_v56, 4  ;;  %1059 = vst.msk [vmem:[#allocation3] sm:$0xf] %vm215_vm0, %v1018_v33 }
  0x65   : > { %991 = vst.msk [vmem:[#allocation2 + $0x30] sm:$0xf] %vm215_vm0, %v723_v39  ;;  %v1111_v44 = vld [vmem:[#allocation2 + $0x2c] sm:$0xf]  ;;  %v1247_v45 = vsel %vm4933_vm8, %v1242_v30, %v1246_v35  ;;  %v1251_v46 = vor.u32 %v1250_v36, %v1246_v35  ;;  %v360_v35 = vor.u32 %v358_v21, %v5133_v20  ;;  %v4792_v39 = vld [vmem:[%s4918_s17 + $0x40] sm:$0xff] }
  0x66   : > { %v1254_v48 = vshll.u32 %v1111_v44, 16  ;;  %v1258_v49 = vshrl.u32 %v1111_v44, 16  ;;  %1571 = vrot.lane.b32.xlu2 %v1247_v45, %s4870_s18  ;;  %726 = vst [vmem:[#allocation1] ss:$4 sm:$0xff] %v536_v9  ;;  %v1740_v62 = vld [vmem:[#allocation2 + $0x2c] sm:$0xf] }
  0x67   : > { %v1252_v50 = vrot.slane %v1251_v46, 4  ;;  %728 = vst [vmem:[#allocation1 + $0x1] ss:$4 sm:$0xff] %v537_v34  ;;  %v1846_v10 = vrot.slane %v1740_v62, 5  ;;  %v548_v46 = vrot.slane %v5125_v5, 7  ;;  %v5160_v53 = vsel %vm4929_vm7, 0, %v360_v35 }
  0x68   : > { %1569 = vrot.lane.b32.xlu1 %v1237_v42, %s4870_s18  ;;  %v1256_v57 = vrot.slane %v1254_v48, 5  ;;  %v1260_v58 = vrot.slane %v1258_v49, 4  ;;  %730 = vst [vmem:[#allocation1 + $0x2] ss:$4 sm:$0xff] %v538_v40  ;;  %v362_v56 = vshrl.u32 %v4792_v39, 16 }
  0x69   : > { %v724_v59 = vld [vmem:[#allocation1 + $0x20] sm:$0xff]  ;;  %732 = vst [vmem:[#allocation1 + $0x3] ss:$4 sm:$0xff] %v539_v41  ;;  %v1848_v14 = vrot.slane %v1846_v10, 4  ;;  %v1847_v36 = vsel %vm4957_vm11, %v1845_v23, %v1846_v10 }
  0x6a   : > { %v1261_v61 = vor.u32 %v1260_v58, %v1256_v57  ;;  %992 = vst.msk [vmem:[#allocation2 + $0x34] sm:$0xf] %vm215_vm0, %v724_v59  ;;  %v1257_v63 = vsel %vm4933_vm8, %v1252_v50, %v1256_v57  ;;  %v474_v50 = vsel %vm4929_vm7, %v5100_v37, 0  ;;  %v549_v37 = vrot.slane %v5160_v53, 1 }
  0x6b   : > { %734 = vst [vmem:[#allocation1 + $0x20] ss:$4 sm:$0xff] %v540_v54 }
  0x6c   : > { %v1112_v3 = vld [vmem:[#allocation2 + $0x30] sm:$0xf]  ;;  %v1262_v7 = vrot.slane %v1261_v61, 4  ;;  %736 = vst [vmem:[#allocation1 + $0x21] ss:$4 sm:$0xff] %v541_v60 }
  0x6d   : > { %v1741_v4 = vld [vmem:[#allocation2 + $0x30] sm:$0xf]  ;;  %v1264_v51 = vshll.u32 %v1112_v3, 16  ;;  %v1268_v8 = vshrl.u32 %v1112_v3, 16  ;;  %738 = vst [vmem:[#allocation1 + $0x22] ss:$4 sm:$0xff] %v473_v1 }
  0x6e   : > { %1573 = vrot.lane.b32.xlu2 %v1257_v63, %s4870_s18  ;;  %v1849_v15 = vrot.slane %v1741_v4, 5  ;;  %740 = vst [vmem:[#allocation1 + $0x23] ss:$4 sm:$0xff] %v5125_v5  ;;  %v550_v63 = vrot.slane %v5160_v53, 2  ;;  %v5171_v3 = vrot.slane %v362_v56, 7  ;;  %v365_v4 = vshll.u32 %v4792_v39, 16 }
  0x6f   : > { %v1266_v12 = vrot.slane %v1264_v51, 5  ;;  %v1270_v13 = vrot.slane %v1268_v8, 4 }
  0x70   : > { %1954 = vrot.lane.b32.xlu1 %v1844_v2, %s4871_s19  ;;  %v741_v16 = vld [vmem:[#allocation1] sm:$0xff]  ;;  %v1850_v32 = vsel %vm4957_vm11, %v1848_v14, %v1849_v15  ;;  %v1851_v45 = vrot.slane %v1849_v15, 4  ;;  %v551_v2 = vrot.slane %v5160_v53, 3  ;;  %v552_v14 = vrot.slane %v5160_v53, 4 }
  0x71   : > { %v1267_v22 = vsel %vm4933_vm8, %v1262_v7, %v1266_v12  ;;  %v1113_v24 = vld [vmem:[#allocation2 + $0x34] sm:$0xf]  ;;  %v1271_v25 = vor.u32 %v1270_v13, %v1266_v12  ;;  %993 = vst.msk [vmem:[#allocation2 + $0x38] sm:$0xf] %vm215_vm0, %v741_v16  ;;  %v367_v15 = vor.u32 %v365_v4, %v5171_v3  ;;  %v553_v16 = vrot.slane %v5160_v53, 5 }
  0x72   : > { %1575 = vrot.lane.b32.xlu0 %v1267_v22, %s4870_s18  ;;  %v1274_v27 = vshll.u32 %v1113_v24, 16  ;;  %v1278_v28 = vshrl.u32 %v1113_v24, 16  ;;  %v1742_v29 = vld [vmem:[#allocation2 + $0x34] sm:$0xf]  ;;  %744 = vst [vmem:[#allocation1] ss:$4 sm:$0xff] %v542_v52 }
  0x73   : > { %v1272_v30 = vrot.slane %v1271_v25, 4  ;;  %746 = vst [vmem:[#allocation1 + $0x1] ss:$4 sm:$0xff] %v543_v11  ;;  %v1852_v40 = vrot.slane %v1742_v29, 5  ;;  %v554_v24 = vrot.slane %v5160_v53, 6  ;;  %v5193_v35 = vsel %vm4929_vm7, 0, %v367_v15 }
  0x74   : > { %v1276_v9 = vrot.slane %v1274_v27, 5  ;;  %v1280_v34 = vrot.slane %v1278_v28, 4  ;;  %748 = vst [vmem:[#allocation1 + $0x2] ss:$4 sm:$0xff] %v544_v19  ;;  %v557_v56 = vrot.slane %v5193_v35, 2  ;;  %v560_v4 = vrot.slane %v5193_v35, 5 }
  0x75   : > { %750 = vst [vmem:[#allocation1 + $0x3] ss:$4 sm:$0xff] %v545_v26  ;;  %v742_v42 = vld [vmem:[#allocation1 + $0x20] sm:$0xff]  ;;  %v1854_v57 = vrot.slane %v1852_v40, 4  ;;  %v1853_v61 = vsel %vm4957_vm11, %v1851_v45, %v1852_v40  ;;  %v4793_v26 = vld [vmem:[%s4918_s17 + $0x48] sm:$0xff]  ;;  %v476_v15 = vsel %vm4929_vm7, %v5171_v3, 0 }
  0x76   : > { %1958 = vrot.lane.b32.xlu2 %v1850_v32, %s4871_s19  ;;  %v1281_v41 = vor.u32 %v1280_v34, %v1276_v9  ;;  %v1277_v44 = vsel %vm4933_vm8, %v1272_v30, %v1276_v9  ;;  %994 = vst.msk [vmem:[#allocation2 + $0x3c] sm:$0xf] %vm215_vm0, %v742_v42  ;;  %v555_v32 = vrot.slane %v5160_v53, 7  ;;  %v475_v42 = vsel %vm4929_vm7, %v5133_v20, 0 }
  0x77   : > { %752 = vst [vmem:[#allocation1 + $0x20] ss:$4 sm:$0xff] %v546_v38  ;;  %v369_v38 = vshrl.u32 %v4793_v26, 16 }
  0x78   : > { %1956 = vrot.lane.b32.xlu1 %v1847_v36, %s4871_s19  ;;  %v1743_v48 = vld [vmem:[#allocation2 + $0x38] sm:$0xf]  ;;  %v1282_v54 = vrot.slane %v1281_v41, 4  ;;  %754 = vst [vmem:[#allocation1 + $0x21] ss:$4 sm:$0xff] %v547_v43  ;;  %v556_v43 = vrot.slane %v5193_v35, 1 }
  0x79   : > { %v1114_v49 = vld [vmem:[#allocation2 + $0x38] sm:$0xf]  ;;  %v1855_v58 = vrot.slane %v1743_v48, 5  ;;  %756 = vst [vmem:[#allocation1 + $0x22] ss:$4 sm:$0xff] %v548_v46 }
  0x7a   : > { %v1284_v55 = vshll.u32 %v1114_v49, 16  ;;  %v1288_v31 = vshrl.u32 %v1114_v49, 16  ;;  %1577 = vrot.lane.b32.xlu0 %v1277_v44, %s4870_s18  ;;  %758 = vst [vmem:[#allocation1 + $0x23] ss:$4 sm:$0xff] %v474_v50 }
  0x7b   : > { %v1856_v5 = vsel %vm4957_vm11, %v1854_v57, %v1855_v58  ;;  %v1857_v52 = vrot.slane %v1855_v58, 4  ;;  %v1937_v58 = vpop.permute.xlu2 %1936 }
  0x7c   : > { %v1286_v59 = vrot.slane %v1284_v55, 5  ;;  %v1290_v60 = vrot.slane %v1288_v31, 4  ;;  %v759_v62 = vld [vmem:[#allocation1] sm:$0xff]  ;;  %v5207_v55 = vrot.slane %v369_v38, 7  ;;  %v372_v31 = vshll.u32 %v4793_v26, 16 }
  0x7d   : > { %995 = vst.msk [vmem:[#allocation2 + $0x40] sm:$0xf] %vm215_vm0, %v759_v62  ;;  %v1115_v6 = vld [vmem:[#allocation2 + $0x3c] sm:$0xf]  ;;  %v559_v62 = vrot.slane %v5193_v35, 4 }
  0x7e   : > { %v1287_v1 = vsel %vm4933_vm8, %v1282_v54, %v1286_v59  ;;  %1960 = vrot.lane.b32.xlu2 %v1853_v61, %s4871_s19  ;;  %v1744_v7 = vld [vmem:[#allocation2 + $0x3c] sm:$0xf]  ;;  %762 = vst [vmem:[#allocation1] ss:$4 sm:$0xff] %v5160_v53  ;;  %v1291_v51 = vor.u32 %v1290_v60, %v1286_v59  ;;  %v1294_v8 = vshll.u32 %v1115_v6, 16  ;;  %v1298_v10 = vshrl.u32 %v1115_v6, 16 }
  0x7f   : > { %764 = vst [vmem:[#allocation1 + $0x1] ss:$4 sm:$0xff] %v549_v37  ;;  %v1858_v13 = vrot.slane %v1744_v7, 5  ;;  %v558_v60 = vrot.slane %v5193_v35, 3  ;;  %v4794_v6 = vld [vmem:[%s4918_s17 + $0x50] sm:$0xff]  ;;  %v374_v7 = vor.u32 %v372_v31, %v5207_v55 }
  0x80   : > { %1579 = vrot.lane.b32.xlu1 %v1287_v1, %s4870_s18  ;;  %766 = vst [vmem:[#allocation1 + $0x2] ss:$4 sm:$0xff] %v550_v63  ;;  %v1296_v11 = vrot.slane %v1294_v8, 5  ;;  %v1300_v12 = vrot.slane %v1298_v10, 4  ;;  %v1292_v19 = vrot.slane %v1291_v51, 4  ;;  %v561_v51 = vrot.slane %v5193_v35, 6 }
  0x81   : > { %768 = vst [vmem:[#allocation1 + $0x3] ss:$4 sm:$0xff] %v551_v2  ;;  %v1859_v22 = vsel %vm4957_vm11, %v1857_v52, %v1858_v13  ;;  %v760_v23 = vld [vmem:[#allocation1 + $0x20] sm:$0xff]  ;;  %v1860_v44 = vrot.slane %v1858_v13, 4  ;;  %v562_v13 = vrot.slane %v5193_v35, 7 }
  0x82   : > { %1962 = vrot.lane.b32.xlu0 %v1856_v5, %s4871_s19  ;;  %v1301_v21 = vor.u32 %v1300_v12, %v1296_v11  ;;  %996 = vst.msk [vmem:[#allocation2 + $0x44] sm:$0xf] %vm215_vm0, %v760_v23  ;;  %v1297_v33 = vsel %vm4933_vm8, %v1292_v19, %v1296_v11  ;;  %v376_v11 = vshrl.u32 %v4794_v6, 16  ;;  %v461_v12 = vsel %vm4929_vm7, 0, %v374_v7 }
  0x83   : > { %770 = vst [vmem:[#allocation1 + $0x20] ss:$4 sm:$0xff] %v552_v14  ;;  %v564_v23 = vrot.slane %v461_v12, 2  ;;  %v567_v26 = vrot.slane %v461_v12, 5  ;;  %v568_v3 = vrot.slane %v461_v12, 6 }
  0x84   : > { %v1116_v25 = vld [vmem:[#allocation2 + $0x40] sm:$0xf]  ;;  %v1302_v27 = vrot.slane %v1301_v21, 4  ;;  %772 = vst [vmem:[#allocation1 + $0x21] ss:$4 sm:$0xff] %v553_v16  ;;  %v563_v16 = vrot.slane %v461_v12, 1 }
  0x85   : > { %v1304_v28 = vshll.u32 %v1116_v25, 16  ;;  %v1308_v29 = vshrl.u32 %v1116_v25, 16  ;;  %v1745_v30 = vld [vmem:[#allocation2 + $0x40] sm:$0xf]  ;;  %774 = vst [vmem:[#allocation1 + $0x22] ss:$4 sm:$0xff] %v554_v24 }
  0x86   : > { %1964 = vrot.lane.b32.xlu2 %v1859_v22, %s4871_s19  ;;  %v1861_v40 = vrot.slane %v1745_v30, 5  ;;  %776 = vst [vmem:[#allocation1 + $0x23] ss:$4 sm:$0xff] %v555_v32  ;;  %v378_v21 = vrot.slane %v376_v11, 7  ;;  %v379_v22 = vshll.u32 %v4794_v6, 16  ;;  %v565_v24 = vrot.slane %v461_v12, 3 }
  0x87   : > { %v1306_v9 = vrot.slane %v1304_v28, 5  ;;  %v1310_v34 = vrot.slane %v1308_v29, 4  ;;  %v566_v25 = vrot.slane %v461_v12, 4  ;;  %v4795_v28 = vld [vmem:[%s4918_s17 + $0x58] sm:$0xff] }
  0x88   : > { %v777_v36 = vld [vmem:[#allocation1] sm:$0xff]  ;;  %v1863_v48 = vrot.slane %v1861_v40, 4  ;;  %v1862_v61 = vsel %vm4957_vm11, %v1860_v44, %v1861_v40  ;;  %v381_v29 = vor.u32 %v379_v22, %v378_v21  ;;  %v383_v30 = vshrl.u32 %v4795_v28, 16 }
  0x89   : > { %v1307_v39 = vsel %vm4933_vm8, %v1302_v27, %v1306_v9  ;;  %v1311_v41 = vor.u32 %v1310_v34, %v1306_v9  ;;  %997 = vst.msk [vmem:[#allocation2 + $0x48] sm:$0xf] %vm215_vm0, %v777_v36  ;;  %v1117_v45 = vld [vmem:[#allocation2 + $0x44] sm:$0xf]  ;;  %v477_v9 = vsel %vm4929_vm7, %v5207_v55, 0  ;;  %v386_v38 = vshll.u32 %v4795_v28, 16 }
  0x8a   : > { %1581 = vrot.lane.b32.xlu0 %v1297_v33, %s4870_s18  ;;  %1583 = vrot.lane.b32.xlu1 %v1307_v39, %s4870_s18  ;;  %v5204_v46 = vld [vmem:[#allocation2 + $0x44] sm:$0xf]  ;;  %v1314_v50 = vshll.u32 %v1117_v45, 16  ;;  %v1318_v53 = vshrl.u32 %v1117_v45, 16  ;;  %780 = vst [vmem:[#allocation1] ss:$4 sm:$0xff] %v475_v42 }
  0x8b   : > { %v1312_v49 = vrot.slane %v1311_v41, 4  ;;  %v1864_v54 = vrot.slane %v5204_v46, 5  ;;  %782 = vst [vmem:[#allocation1 + $0x1] ss:$4 sm:$0xff] %v5193_v35  ;;  %v462_v32 = vsel %vm4929_vm7, 0, %v381_v29  ;;  %v569_v33 = vrot.slane %v461_v12, 7 }
  0x8c   : > { %v1316_v57 = vrot.slane %v1314_v50, 5  ;;  %v1320_v59 = vrot.slane %v1318_v53, 4  ;;  %784 = vst [vmem:[#allocation1 + $0x2] ss:$4 sm:$0xff] %v556_v43  ;;  %v570_v35 = vrot.slane %v462_v32, 1  ;;  %v385_v36 = vrot.slane %v383_v30, 7 }
  0x8d   : > { %v1865_v37 = vsel %vm4957_vm11, %v1863_v48, %v1864_v54  ;;  %v778_v8 = vld [vmem:[#allocation1 + $0x20] sm:$0xff]  ;;  %786 = vst [vmem:[#allocation1 + $0x3] ss:$4 sm:$0xff] %v557_v56  ;;  %v571_v39 = vrot.slane %v462_v32, 2  ;;  %v572_v40 = vrot.slane %v462_v32, 3  ;;  %v573_v41 = vrot.slane %v462_v32, 4 }
  0x8e   : > { %v1317_v63 = vsel %vm4933_vm8, %v1312_v49, %v1316_v57  ;;  %v1321_v2 = vor.u32 %v1320_v59, %v1316_v57  ;;  %788 = vst [vmem:[#allocation1 + $0x20] ss:$4 sm:$0xff] %v558_v60  ;;  %v4796_v43 = vld [vmem:[%s4918_s17 + $0x60] sm:$0xff]  ;;  %v388_v44 = vor.u32 %v386_v38, %v385_v36  ;;  %v574_v45 = vrot.slane %v462_v32, 5 }
  0x8f   : > { %v1554_v20 = vpop.permute.xlu0 %1553  ;;  %1585 = vrot.lane.b32.xlu2 %v1317_v63, %s4870_s18  ;;  %790 = vst [vmem:[#allocation1 + $0x21] ss:$4 sm:$0xff] %v559_v62  ;;  %v575_v48 = vrot.slane %v462_v32, 6  ;;  %v390_v49 = vshrl.u32 %v4796_v43, 16  ;;  %v576_v53 = vrot.slane %v462_v32, 7  ;;  %v478_v55 = vsel %vm4929_vm7, %v378_v21, 0 }
  0x90   : > { %1677 = vst.msk [vmem:[#allocation3] sm:$0xf] %vm1676_vm12, %v1554_v20  ;;  %v5223_v1 = vld [vmem:[#allocation2 + $0x48] sm:$0xf]  ;;  %v1322_v10 = vrot.slane %v1321_v2, 4  ;;  %v463_v50 = vsel %vm4929_vm7, 0, %v388_v44 }
  0x91   : > { %2060 = vst.msk [vmem:[#allocation3] sm:$0xf] %vm2059_vm13, %v1937_v58  ;;  %v1324_v5 = vshll.u32 %v5223_v1, 16  ;;  %v577_v31 = vrot.slane %v463_v50, 1  ;;  %v392_v56 = vrot.slane %v390_v49, 7  ;;  %v393_v57 = vshll.u32 %v4796_v43, 16  ;;  %v1558_v30 = vpop.permute.xlu2 %1557 }
  0x92   : > { %1966 = vrot.lane.b32.xlu0 %v1862_v61, %s4871_s19  ;;  %1968 = vrot.lane.b32.xlu1 %v1865_v37, %s4871_s19  ;;  %792 = vst [vmem:[#allocation1 + $0x22] ss:$4 sm:$0xff] %v560_v4  ;;  %v578_v58 = vrot.slane %v463_v50, 2  ;;  %v579_v59 = vrot.slane %v463_v50, 3  ;;  %v4797_v61 = vld [vmem:[%s4918_s17 + $0x68] sm:$0xff]  ;;  %v580_v62 = vrot.slane %v463_v50, 4 }
  0x93   : > { %v5233_v52 = vrot.slane %v1324_v5, 5  ;;  %794 = vst [vmem:[#allocation1 + $0x23] ss:$4 sm:$0xff] %v561_v51  ;;  %v395_v37 = vor.u32 %v393_v57, %v392_v56  ;;  %v581_v63 = vrot.slane %v463_v50, 5  ;;  %v582_v2 = vrot.slane %v463_v50, 6 }
  0x94   : > { %998 = vst.msk [vmem:[#allocation2 + $0x4c] sm:$0xf] %vm215_vm0, %v778_v8  ;;  %v795_v19 = vld [vmem:[#allocation1] sm:$0xff]  ;;  %v397_v4 = vshrl.u32 %v4797_v61, 16  ;;  %v583_v6 = vrot.slane %v463_v50, 7  ;;  %v479_v51 = vsel %vm4929_vm7, %v385_v36, 0 }
  0x95   : > { %v1327_v14 = vsel %vm4933_vm8, %v1322_v10, %v5233_v52  ;;  %798 = vst [vmem:[#allocation1] ss:$4 sm:$0xff] %v562_v13  ;;  %v464_v5 = vsel %vm4929_vm7, 0, %v395_v37  ;;  %v400_v11 = vshll.u32 %v4797_v61, 16 }
  0x96   : > { %800 = vst [vmem:[#allocation1 + $0x1] ss:$4 sm:$0xff] %v476_v15  ;;  %v584_v8 = vrot.slane %v464_v5, 1  ;;  %v5268_v10 = vrot.slane %v397_v4, 7  ;;  %v586_v15 = vrot.slane %v464_v5, 3  ;;  %v588_v21 = vrot.slane %v464_v5, 5 }
  0x97   : > { %802 = vst [vmem:[#allocation1 + $0x2] ss:$4 sm:$0xff] %v461_v12  ;;  %v585_v12 = vrot.slane %v464_v5, 2  ;;  %v589_v22 = vrot.slane %v464_v5, 6 }
  0x98   : > { %804 = vst [vmem:[#allocation1 + $0x3] ss:$4 sm:$0xff] %v563_v16  ;;  %v1020_v16 = vld [vmem:[#allocation2 + $0x8] sm:$0xf] }
  0x99   : > { %999 = vst.msk [vmem:[#allocation2 + $0x50] sm:$0xf] %vm215_vm0, %v795_v19  ;;  %v587_v19 = vrot.slane %v464_v5, 4  ;;  %v1943_v57 = vpop.permute.xlu2 %1942 }
  0x9a   : > { %1587 = vrot.lane.b32.xlu0 %v1327_v14, %s4870_s18  ;;  %v796_v27 = vld [vmem:[#allocation1 + $0x20] sm:$0xff]  ;;  %v402_v14 = vor.u32 %v400_v11, %v5268_v10  ;;  %1061 = vst.msk [vmem:[#allocation3 + $0x8] sm:$0xf] %vm215_vm0, %v1020_v16 }
  0x9b   : > { %806 = vst [vmem:[#allocation1 + $0x20] ss:$4 sm:$0xff] %v564_v23 }
  0x9c   : > { %808 = vst [vmem:[#allocation1 + $0x21] ss:$4 sm:$0xff] %v565_v24  ;;  %v5276_v24 = vsel %vm4929_vm7, 0, %v402_v14 }
  0x9d   : > { %810 = vst [vmem:[#allocation1 + $0x22] ss:$4 sm:$0xff] %v566_v25  ;;  %v590_v25 = vrot.slane %v464_v5, 7  ;;  %v595_v38 = vrot.slane %v5276_v24, 5 }
  0x9e   : > { %812 = vst [vmem:[#allocation1 + $0x23] ss:$4 sm:$0xff] %v567_v26  ;;  %v480_v26 = vsel %vm4929_vm7, %v392_v56, 0 }
  0x9f   : > { %1000 = vst.msk [vmem:[#allocation2 + $0x54] sm:$0xf] %vm215_vm0, %v796_v27  ;;  %v813_v34 = vld [vmem:[#allocation1] sm:$0xff]  ;;  %v591_v27 = vrot.slane %v5276_v24, 1 }
  0xa0   : > { %816 = vst [vmem:[#allocation1] ss:$4 sm:$0xff] %v568_v3  ;;  %v4798_v3 = vld [vmem:[%s4918_s17 + $0x70] sm:$0xff] }
  0xa1   : > { %818 = vst [vmem:[#allocation1 + $0x1] ss:$4 sm:$0xff] %v569_v33  ;;  %v404_v36 = vshrl.u32 %v4798_v3, 16  ;;  %v407_v44 = vshll.u32 %v4798_v3, 16  ;;  %v1022_v3 = vld [vmem:[#allocation2 + $0x10] sm:$0xf] }
  0xa2   : > { %820 = vst [vmem:[#allocation1 + $0x2] ss:$4 sm:$0xff] %v477_v9  ;;  %v1939_v9 = vpop.permute.xlu0 %1938 }
  0xa3   : > { %822 = vst [vmem:[#allocation1 + $0x3] ss:$4 sm:$0xff] %v462_v32  ;;  %v592_v32 = vrot.slane %v5276_v24, 2  ;;  %v5293_v43 = vrot.slane %v404_v36, 7 }
  0xa4   : > { %1001 = vst.msk [vmem:[#allocation2 + $0x58] sm:$0xf] %vm215_vm0, %v813_v34  ;;  %v593_v34 = vrot.slane %v5276_v24, 3 }
  0xa5   : > { %v814_v42 = vld [vmem:[#allocation1 + $0x20] sm:$0xff]  ;;  %1679 = vst.msk [vmem:[#allocation3 + $0x8] sm:$0xf] %vm1676_vm12, %v1558_v30  ;;  %v1945_v30 = vpop.permute.xlu2 %1944 }
  0xa6   : > { %824 = vst [vmem:[#allocation1 + $0x20] ss:$4 sm:$0xff] %v570_v35  ;;  %v1941_v29 = vpop.permute.xlu1 %1940  ;;  %v594_v35 = vrot.slane %v5276_v24, 4 }
  0xa7   : > { %826 = vst [vmem:[#allocation1 + $0x21] ss:$4 sm:$0xff] %v571_v39 }
  0xa8   : > { %828 = vst [vmem:[#allocation1 + $0x22] ss:$4 sm:$0xff] %v572_v40  ;;  %v1019_v40 = vld [vmem:[#allocation2 + $0x4] sm:$0xf] }
  0xa9   : > { %830 = vst [vmem:[#allocation1 + $0x23] ss:$4 sm:$0xff] %v573_v41 }
  0xaa   : > { %1002 = vst.msk [vmem:[#allocation2 + $0x5c] sm:$0xf] %vm215_vm0, %v814_v42  ;;  %v831_v20 = vld [vmem:[#allocation1] sm:$0xff]  ;;  %v1021_v42 = vld [vmem:[#allocation2 + $0xc] sm:$0xf] }
  0xab   : > { %834 = vst [vmem:[#allocation1] ss:$4 sm:$0xff] %v574_v45  ;;  %v4664_v45 = vld [vmem:[%s7190_s1] sm:$0xf] }
  0xac   : > { %836 = vst [vmem:[#allocation1 + $0x1] ss:$4 sm:$0xff] %v575_v48  ;;  %v4817_v48 = vld [vmem:[%s7190_s1] sm:$0x30] }
  0xad   : > { %838 = vst [vmem:[#allocation1 + $0x2] ss:$4 sm:$0xff] %v576_v53  ;;  %v4665_v53 = vor.u32 %v4817_v48, %v4664_v45 }
  0xae   : > { %840 = vst [vmem:[#allocation1 + $0x3] ss:$4 sm:$0xff] %v478_v55  ;;  %v1556_v41 = vpop.permute.xlu1 %1555 }
  0xaf   : > { %1003 = vst.msk [vmem:[#allocation2 + $0x60] sm:$0xf] %vm215_vm0, %v831_v20  ;;  %v5311_v61 = vsel %vm2340_vm14, %v4665_v53, 0 }
  0xb0   : > { %v832_v60 = vld [vmem:[#allocation1 + $0x20] sm:$0xff]  ;;  %2062 = vst.msk [vmem:[#allocation3 + $0x8] sm:$0xf] %vm2059_vm13, %v1941_v29  ;;  %2520 = vmatpush.bf16.msra.mxu1 %v5311_v61 }
  0xb1   : > { %842 = vst [vmem:[#allocation1 + $0x20] ss:$4 sm:$0xff] %v463_v50  ;;  %v1560_v56 = vpop.permute.xlu0 %1559 }
  0xb2   : > { %844 = vst [vmem:[#allocation1 + $0x21] ss:$4 sm:$0xff] %v577_v31 }
  0xb3   : > { %846 = vst [vmem:[#allocation1 + $0x22] ss:$4 sm:$0xff] %v578_v58  ;;  %v409_v58 = vor.u32 %v407_v44, %v5293_v43 }
  0xb4   : > { %848 = vst [vmem:[#allocation1 + $0x23] ss:$4 sm:$0xff] %v579_v59  ;;  %v596_v59 = vrot.slane %v5276_v24, 6 }
  0xb5   : > { %1004 = vst.msk [vmem:[#allocation2 + $0x64] sm:$0xf] %vm215_vm0, %v832_v60  ;;  %v849_v7 = vld [vmem:[#allocation1] sm:$0xff]  ;;  %v597_v60 = vrot.slane %v5276_v24, 7 }
  0xb6   : > { %852 = vst [vmem:[#allocation1] ss:$4 sm:$0xff] %v580_v62 }
  0xb7   : > { %854 = vst [vmem:[#allocation1 + $0x1] ss:$4 sm:$0xff] %v581_v63 }
  0xb8   : > { %856 = vst [vmem:[#allocation1 + $0x2] ss:$4 sm:$0xff] %v582_v2  ;;  %v4799_v2 = vld [vmem:[%s4918_s17 + $0x78] sm:$0xff] }
  0xb9   : > { %858 = vst [vmem:[#allocation1 + $0x3] ss:$4 sm:$0xff] %v583_v6  ;;  %v1562_v29 = vpop.permute.xlu0 %1561 }
  0xba   : > { %1005 = vst.msk [vmem:[#allocation2 + $0x68] sm:$0xf] %vm215_vm0, %v849_v7 }
  0xbb   : > { %v850_v13 = vld [vmem:[#allocation1 + $0x20] sm:$0xff]  ;;  %1060 = vst.msk [vmem:[#allocation3 + $0x4] sm:$0xf] %vm215_vm0, %v1019_v40 }
  0xbc   : > { %860 = vst [vmem:[#allocation1 + $0x20] ss:$4 sm:$0xff] %v479_v51 }
  0xbd   : > { %862 = vst [vmem:[#allocation1 + $0x21] ss:$4 sm:$0xff] %v464_v5 }
  0xbe   : > { %864 = vst [vmem:[#allocation1 + $0x22] ss:$4 sm:$0xff] %v584_v8 }
  0xbf   : > { %866 = vst [vmem:[#allocation1 + $0x23] ss:$4 sm:$0xff] %v585_v12  ;;  %v5325_v12 = vsel %vm4929_vm7, 0, %v409_v58 }
  0xc0   : > { %1006 = vst.msk [vmem:[#allocation2 + $0x6c] sm:$0xf] %vm215_vm0, %v850_v13  ;;  %v867_v23 = vld [vmem:[#allocation1] sm:$0xff]  ;;  %v481_v13 = vsel %vm4929_vm7, %v5268_v10, 0  ;;  %v602_v53 = vrot.slane %v5325_v12, 5  ;;  %v604_v58 = vrot.slane %v5325_v12, 7 }
  0xc1   : > { %870 = vst [vmem:[#allocation1] ss:$4 sm:$0xff] %v586_v15 }
  0xc2   : > { %872 = vst [vmem:[#allocation1 + $0x1] ss:$4 sm:$0xff] %v587_v19  ;;  %v598_v19 = vrot.slane %v5325_v12, 1 }
  0xc3   : > { %874 = vst [vmem:[#allocation1 + $0x2] ss:$4 sm:$0xff] %v588_v21  ;;  %v1566_v21 = vpop.permute.xlu1 %1565 }
  0xc4   : > { %876 = vst [vmem:[#allocation1 + $0x3] ss:$4 sm:$0xff] %v589_v22 }
  0xc5   : > { %1007 = vst.msk [vmem:[#allocation2 + $0x70] sm:$0xf] %vm215_vm0, %v867_v23  ;;  %v599_v23 = vrot.slane %v5325_v12, 2 }
  0xc6   : > { %v868_v28 = vld [vmem:[#allocation1 + $0x20] sm:$0xff]  ;;  %1678 = vst.msk [vmem:[#allocation3 + $0x4] sm:$0xf] %vm1676_vm12, %v1556_v41 }
  0xc7   : > { %878 = vst [vmem:[#allocation1 + $0x20] ss:$4 sm:$0xff] %v590_v25  ;;  %v600_v25 = vrot.slane %v5325_v12, 3  ;;  %v1024_v41 = vld [vmem:[#allocation2 + $0x18] sm:$0xf] }
  0xc8   : > { %880 = vst [vmem:[#allocation1 + $0x21] ss:$4 sm:$0xff] %v480_v26 }
  0xc9   : > { %882 = vst [vmem:[#allocation1 + $0x22] ss:$4 sm:$0xff] %v5276_v24  ;;  %v411_v24 = vshrl.u32 %v4799_v2, 16 }
  0xca   : > { %884 = vst [vmem:[#allocation1 + $0x23] ss:$4 sm:$0xff] %v591_v27  ;;  %v601_v27 = vrot.slane %v5325_v12, 4 }
  0xcb   : > { %1008 = vst.msk [vmem:[#allocation2 + $0x74] sm:$0xf] %vm215_vm0, %v868_v28  ;;  %v885_v33 = vld [vmem:[#allocation1] sm:$0xff] }
  0xcc   : > { %1009 = vst.msk [vmem:[#allocation2 + $0x78] sm:$0xf] %vm215_vm0, %v885_v33  ;;  %v414_v33 = vshll.u32 %v4799_v2, 16  ;;  %v1947_v2 = vpop.permute.xlu2 %1946 }
  0xcd   : > { %888 = vst [vmem:[#allocation1] ss:$4 sm:$0xff] %v592_v32  ;;  %v5343_v32 = vrot.slane %v411_v24, 7 }
  0xce   : > { %890 = vst [vmem:[#allocation1 + $0x1] ss:$4 sm:$0xff] %v593_v34 }
  0xcf   : > { %892 = vst [vmem:[#allocation1 + $0x2] ss:$4 sm:$0xff] %v594_v35 }
  0xd0   : > { %894 = vst [vmem:[#allocation1 + $0x3] ss:$4 sm:$0xff] %v595_v38 }
  0xd1   : > { %v886_v39 = vld [vmem:[#allocation1 + $0x20] sm:$0xff]  ;;  %2061 = vst.msk [vmem:[#allocation3 + $0x4] sm:$0xf] %vm2059_vm13, %v1939_v9 }
  0xd2   : > { %1010 = vst.msk [vmem:[#allocation2 + $0x7c] sm:$0xf] %vm215_vm0, %v886_v39 }
  0xd3   : > { %v5301_v49 = vld [vmem:[#allocation2 + $0x78] sm:$0xf]  ;;  %1062 = vst.msk [vmem:[#allocation3 + $0xc] sm:$0xf] %vm215_vm0, %v1021_v42  ;;  %v416_v42 = vor.u32 %v414_v33, %v5343_v32 }
  0xd4   : > { %v1130_v50 = vld [vmem:[#allocation2 + $0x78] sm:$0xf]  ;;  %v1903_v20 = vrot.slane %v5301_v49, 5  ;;  %1680 = vst.msk [vmem:[#allocation3 + $0xc] sm:$0xf] %vm1676_vm12, %v1560_v56  ;;  %v603_v56 = vrot.slane %v5325_v12, 6 }
  0xd5   : > { %v1444_v55 = vshll.u32 %v1130_v50, 16  ;;  %v1448_v31 = vshrl.u32 %v1130_v50, 16  ;;  %2063 = vst.msk [vmem:[#allocation3 + $0xc] sm:$0xf] %vm2059_vm13, %v1943_v57 }
  0xd6   : > { %v1905_v37 = vrot.slane %v1903_v20, 4  ;;  %896 = vst [vmem:[#allocation1 + $0x20] ss:$4 sm:$0xff] %v596_v59  ;;  %v5365_v59 = vsel %vm4929_vm7, 0, %v416_v42 }
  0xd7   : > { %v5315_v62 = vrot.slane %v1444_v55, 5  ;;  %v1450_v63 = vrot.slane %v1448_v31, 4  ;;  %v903_v11 = vld [vmem:[#allocation1] sm:$0xff]  ;;  %898 = vst [vmem:[#allocation1 + $0x21] ss:$4 sm:$0xff] %v597_v60  ;;  %v5352_v55 = vpop.permute.xlu1 %1950  ;;  %v611_v46 = vrot.slane %v5365_v59, 7 }
  0xd8   : > { %1011 = vst.msk [vmem:[#allocation2 + $0x80] sm:$0xf] %vm215_vm0, %v903_v11  ;;  %v4800_v26 = vld [vmem:[#allocation3] sm:$0xff] }
  0xd9   : > { %v1760_v4 = vld [vmem:[#allocation2 + $0x7c] sm:$0xf]  ;;  %v1451_v7 = vor.u32 %v1450_v63, %v5315_v62  ;;  %900 = vst [vmem:[#allocation1 + $0x22] ss:$4 sm:$0xff] %v481_v13  ;;  %4666 = vmatmul.msk.bf16.vlgmr.msra.gmra.mxu1 %vm2285_vm15, %v4800_v26  ;;  %v1564_v63 = vpop.permute.xlu0 %1563 }
  0xda   : > { %v1131_v5 = vld [vmem:[#allocation2 + $0x7c] sm:$0xf]  ;;  %v1906_v6 = vrot.slane %v1760_v4, 5  ;;  %902 = vst [vmem:[#allocation1 + $0x23] ss:$4 sm:$0xff] %v5325_v12  ;;  %v607_v12 = vrot.slane %v5365_v59, 3 }
  0xdb   : > { %v1454_v51 = vshll.u32 %v1131_v5, 16  ;;  %v1458_v8 = vshrl.u32 %v1131_v5, 16  ;;  %v1452_v15 = vrot.slane %v1451_v7, 4  ;;  %906 = vst [vmem:[#allocation1] ss:$4 sm:$0xff] %v598_v19  ;;  %v605_v7 = vrot.slane %v5365_v59, 1 }
  0xdc   : > { %v1907_v14 = vsel %vm4957_vm11, %v1905_v37, %v1906_v6  ;;  %908 = vst [vmem:[#allocation1 + $0x1] ss:$4 sm:$0xff] %v599_v23  ;;  %v1908_v9 = vrot.slane %v1906_v6, 4  ;;  %v482_v37 = vsel %vm4929_vm7, %v5293_v43, 0  ;;  %v4638_v4 = vld [vmem:[%s7190_s1 + $0x8] sm:$0xf] }
  0xdd   : > { %v1456_v16 = vrot.slane %v1454_v51, 5  ;;  %1996 = vrot.lane.b32.xlu2 %v1907_v14, %s4871_s19  ;;  %v1460_v22 = vrot.slane %v1458_v8, 4  ;;  %910 = vst [vmem:[#allocation1 + $0x2] ss:$4 sm:$0xff] %v600_v25  ;;  %v4819_v5 = vld [vmem:[%s7190_s1 + $0x8] sm:$0x30] }
  0xde   : > { %912 = vst [vmem:[#allocation1 + $0x3] ss:$4 sm:$0xff] %v601_v27  ;;  %v1023_v6 = vld [vmem:[#allocation2 + $0x14] sm:$0xf]  ;;  %v606_v51 = vrot.slane %v5365_v59, 2  ;;  %v4639_v43 = vor.u32 %v4819_v5, %v4638_v4  ;;  %v4843_v13 = vld [vmem:[#allocation3 + $0x8] sm:$0xff]  }
  0xdf   : > { %v1457_v10 = vsel %vm4933_vm8, %v1452_v15, %v1456_v16  ;;  %v1461_v28 = vor.u32 %v1460_v22, %v1456_v16  ;;  %v1761_v34 = vld [vmem:[#allocation2 + $0x80] sm:$0xf]  ;;  %1063 = vst.msk [vmem:[#allocation3 + $0x10] sm:$0xf] %vm215_vm0, %v1022_v3  ;;  %v1568_v23 = vpop.permute.xlu1 %1567  ;;  %v4844_v24 = vld [vmem:[#allocation3 + $0x8] sm:$0xf0] }
  0xe0   : > { %1613 = vrot.lane.b32.xlu1 %v1457_v10, %s4870_s18  ;;  %v1132_v35 = vld [vmem:[#allocation2 + $0x80] sm:$0xf]  ;;  %v1909_v36 = vrot.slane %v1761_v34, 5  ;;  %1681 = vst.msk [vmem:[#allocation3 + $0x10] sm:$0xf] %vm1676_vm12, %v1562_v29  ;;  %v2342_v22 = vsel %vm2340_vm14, %v4639_v43, 0 }
  0xe1   : > { %v1462_v38 = vrot.slane %v1461_v28, 4  ;;  %v1464_v39 = vshll.u32 %v1132_v35, 16  ;;  %v1468_v40 = vshrl.u32 %v1132_v35, 16  ;;  %v904_v48 = vld [vmem:[#allocation1 + $0x20] sm:$0xff]  ;;  %2064 = vst.msk [vmem:[#allocation3 + $0x10] sm:$0xf] %vm2059_vm13, %v1945_v30  ;;  %2351 = vmatpush.bf16.msra.mxu0 %v2342_v22  ;;  %4847 = vmatpush.bf16.msra.mxu3 %v2342_v22 }
  0xe2   : > { %v1910_v44 = vsel %vm4957_vm11, %v1908_v9, %v1909_v36  ;;  %1012 = vst.msk [vmem:[#allocation2 + $0x84] sm:$0xf] %vm215_vm0, %v904_v48  ;;  %v1911_v8 = vrot.slane %v1909_v36, 4  ;;  %v4845_v10 = vld [vmem:[#allocation3 + $0x8] sm:$0xe]  ;;  %v1949_v36 = vpop.permute.xlu0 %1948  ;;  %v1328_v4 = vshrl.u32 %v5223_v1, 16 }
  0xe3   : > { %v1466_v45 = vrot.slane %v1464_v39, 5  ;;  %v1470_v50 = vrot.slane %v1468_v40, 4  ;;  %1998 = vrot.lane.b32.xlu0 %v1910_v44, %s4871_s19  ;;  %1065 = vst.msk [vmem:[#allocation3 + $0x18] sm:$0xf] %vm215_vm0, %v1024_v41  ;;  %v5392_v35 = vld [vmem:[#allocation2 + $0x48] sm:$0xf]  ;;  %v4846_v41 = vor.u32 %v4845_v10, %v4844_v24 }
  0xe4   : > { %1683 = vst.msk [vmem:[#allocation3 + $0x18] sm:$0xf] %vm1676_vm12, %v1566_v21  ;;  %v1025_v40 = vld [vmem:[#allocation2 + $0x1c] sm:$0xf]  ;;  %v4838_v43 = vld [vmem:[%s7190_s1 + $0x10] sm:$0x30] }
  0xe5   : > { %v1467_v31 = vsel %vm4933_vm8, %v1462_v38, %v1466_v45  ;;  %v1471_v57 = vor.u32 %v1470_v50, %v1466_v45  ;;  %v921_v60 = vld [vmem:[#allocation1] sm:$0xff]  ;;  %914 = vst [vmem:[#allocation1 + $0x20] ss:$4 sm:$0xff] %v602_v53  ;;  %4848 = vmatpush.bf16.msrb.mxu3 %v5311_v61  ;;  %v5394_v38 = vpop.permute.xlu2 %1571  ;;  %v608_v50 = vrot.slane %v5365_v59, 4  ;;  %v609_v53 = vrot.slane %v5365_v59, 5 }
  0xe6   : > { %1615 = vrot.lane.b32.xlu2 %v1467_v31, %s4870_s18  ;;  %1013 = vst.msk [vmem:[#allocation2 + $0x88] sm:$0xf] %vm215_vm0, %v921_v60  ;;  %v1026_v22 = vld [vmem:[#allocation2 + $0x20] sm:$0xf] }
  0xe7   : > { %916 = vst [vmem:[#allocation1 + $0x21] ss:$4 sm:$0xff] %v603_v56  ;;  %v1472_v11 = vrot.slane %v1471_v57, 4  ;;  %v1866_v56 = vrot.slane %v1864_v54, 4  ;;  %v1867_v57 = vrot.slane %v5392_v35, 5  ;;  %v1570_v5 = vpop.permute.xlu1 %1569 }
  0xe8   : > { %918 = vst [vmem:[#allocation1 + $0x22] ss:$4 sm:$0xff] %v604_v58  ;;  %v610_v58 = vrot.slane %v5365_v59, 6 }
  0xe9   : > { %v1762_v14 = vld [vmem:[#allocation2 + $0x84] sm:$0xf]  ;;  %920 = vst [vmem:[#allocation1 + $0x23] ss:$4 sm:$0xff] %v482_v37  ;;  %4667 = vmatmul.msk.bf16.gmra.mxu1 %vm2285_vm15, %v4843_v13  ;;  %v1868_v1 = vsel %vm4957_vm11, %v1866_v56, %v1867_v57 }
  0xea   : > { %v1133_v15 = vld [vmem:[#allocation2 + $0x84] sm:$0xf]  ;;  %v1912_v16 = vrot.slane %v1762_v14, 5  ;;  %1064 = vst.msk [vmem:[#allocation3 + $0x14] sm:$0xf] %vm215_vm0, %v1023_v6 }
  0xeb   : > { %v1474_v19 = vshll.u32 %v1133_v15, 16  ;;  %v1478_v21 = vshrl.u32 %v1133_v15, 16  ;;  %1682 = vst.msk [vmem:[#allocation3 + $0x14] sm:$0xf] %vm1676_vm12, %v1564_v63  ;;  %v2243_v63 = vrot.slane %v4846_v41, 1 }
  0xec   : > { %v1913_v25 = vsel %vm4957_vm11, %v1911_v8, %v1912_v16  ;;  %v1914_v27 = vrot.slane %v1912_v16, 4  ;;  %2065 = vst.msk [vmem:[#allocation3 + $0x14] sm:$0xf] %vm2059_vm13, %v1947_v2  ;;  %v1119_v2 = vld [vmem:[#allocation2 + $0x4c] sm:$0xf]  ;;  %v5429_v8 = vpop.permute.xlu0 %1952 }
  0xed   : > { %v1476_v26 = vrot.slane %v1474_v19, 5  ;;  %v1480_v28 = vrot.slane %v1478_v21, 4  ;;  %2000 = vrot.lane.b32.xlu1 %v1913_v25, %s4871_s19  ;;  %v1763_v29 = vld [vmem:[#allocation2 + $0x88] sm:$0xf]  ;;  %924 = vst [vmem:[#allocation1] ss:$4 sm:$0xff] %v5365_v59  ;;  %v5427_v59 = vpop.permute.xlu2 %1573 }
  0xee   : > { %v1134_v3 = vld [vmem:[#allocation2 + $0x88] sm:$0xf]  ;;  %v1915_v33 = vrot.slane %v1763_v29, 5  ;;  %926 = vst [vmem:[#allocation1 + $0x1] ss:$4 sm:$0xff] %v605_v7  ;;  %v1338_v15 = vshrl.u32 %v1119_v2, 16 }
  0xef   : > { %v1477_v30 = vsel %vm4933_vm8, %v1472_v11, %v1476_v26  ;;  %v1481_v9 = vor.u32 %v1480_v28, %v1476_v26  ;;  %v1484_v34 = vshll.u32 %v1134_v3, 16  ;;  %v1488_v39 = vshrl.u32 %v1134_v3, 16  ;;  %928 = vst [vmem:[#allocation1 + $0x2] ss:$4 sm:$0xff] %v606_v51  ;;  %v4760_v6 = vld [vmem:[%s7190_s1 + $0x10] sm:$0xf] }
  0xf0   : > { %1617 = vrot.lane.b32.xlu0 %v1477_v30, %s4870_s18  ;;  %v1916_v61 = vsel %vm4957_vm11, %v1914_v27, %v1915_v33  ;;  %v922_v45 = vld [vmem:[#allocation1 + $0x20] sm:$0xff]  ;;  %930 = vst [vmem:[#allocation1 + $0x3] ss:$4 sm:$0xff] %v607_v12  ;;  %v1917_v7 = vrot.slane %v1915_v33, 4  ;;  %v1027_v51 = vld [vmem:[#allocation2 + $0x24] sm:$0xf]  ;;  %v4761_v16 = vor.u32 %v4838_v43, %v4760_v6 }
  0xf1   : > { %v1482_v42 = vrot.slane %v1481_v9, 4  ;;  %v1486_v44 = vrot.slane %v1484_v34, 5  ;;  %2002 = vrot.lane.b32.xlu2 %v1916_v61, %s4871_s19  ;;  %1014 = vst.msk [vmem:[#allocation2 + $0x8c] sm:$0xf] %vm215_vm0, %v922_v45  ;;  %v1490_v48 = vrot.slane %v1488_v39, 4  ;;  %v1869_v30 = vrot.slane %v1867_v57, 4 }
  0xf2   : > { %1066 = vst.msk [vmem:[#allocation3 + $0x1c] sm:$0xf] %vm215_vm0, %v1025_v40  ;;  %v5431_v12 = vld [vmem:[#allocation2 + $0x4c] sm:$0xf]  ;;  %v5440_v25 = vsel %vm2340_vm14, %v4761_v16, 0  ;;  %v1330_v9 = vrot.slane %v1328_v4, 4 }
  0xf3   : > { %v1487_v31 = vsel %vm4933_vm8, %v1482_v42, %v1486_v44  ;;  %v1491_v60 = vor.u32 %v1490_v48, %v1486_v44  ;;  %1684 = vst.msk [vmem:[#allocation3 + $0x1c] sm:$0xf] %vm1676_vm12, %v1568_v23  ;;  %v5411_v37 = vld [vmem:[#allocation3 + $0x10] sm:$0xff]  ;;  %2852 = vmatpush.bf16.msra.mxu2 %v5440_v25  ;;  %v1870_v33 = vrot.slane %v5431_v12, 5  ;;  %v483_v34 = vsel %vm4929_vm7, %v5343_v32, 0  ;;  %v1955_v48 = vpop.permute.xlu1 %1954 }
  0xf4   : > { %2067 = vst.msk [vmem:[#allocation3 + $0x1c] sm:$0xf] %vm2059_vm13, %v5352_v55  ;;  %v2244_v54 = vrot.slane %v5411_v37, 1  ;;  %v1334_v55 = vshll.u32 %v1119_v2, 16  ;;  %v4688_v26 = vld [vmem:[#allocation3 + $0x10] sm:$0xc]  ;;  %v1576_v32 = vpop.permute.xlu0 %1575 }
  0xf5   : > { %1619 = vrot.lane.b32.xlu1 %v1487_v31, %s4870_s18  ;;  %932 = vst [vmem:[#allocation1 + $0x20] ss:$4 sm:$0xff] %v608_v50  ;;  %v1492_v11 = vrot.slane %v1491_v60, 4  ;;  %v4820_v27 = vld [vmem:[#allocation3 + $0x10] sm:$0xf0]  ;;  %v1340_v42 = vrot.slane %v1338_v15, 4  ;;  %v1959_v17 = vpop.permute.xlu2 %1958 }
  0xf6   : > { %934 = vst [vmem:[#allocation1 + $0x21] ss:$4 sm:$0xff] %v609_v53  ;;  %v2245_v14 = vsel %vm2242_vm2, %v2243_v63, %v2244_v54  ;;  %v1028_v40 = vld [vmem:[#allocation2 + $0x28] sm:$0xf]  ;;  %v4689_v41 = vor.u32 %v4820_v27, %v4688_v26  ;;  %v1029_v43 = vld [vmem:[#allocation2 + $0x2c] sm:$0xf] }
  0xf7   : > { %v939_v13 = vld [vmem:[#allocation1] sm:$0xff]  ;;  %936 = vst [vmem:[#allocation1 + $0x22] ss:$4 sm:$0xff] %v610_v58  ;;  %4640 = vmatmul.msk.bf16.vlgmr.msra.gmra.mxu0 %vm2285_vm15, %v2245_v14  ;;  %v1871_v58 = vsel %vm4957_vm11, %v1869_v30, %v1870_v33  ;;  %vm1724_vm7 = vsmask.f32 7942 }
  0xf8   : > { %v1764_v19 = vld [vmem:[#allocation2 + $0x8c] sm:$0xf]  ;;  %1015 = vst.msk [vmem:[#allocation2 + $0x90] sm:$0xf] %vm215_vm0, %v939_v13  ;;  %v2746_v63 = vrot.slane %v4689_v41, 2 }
  0xf9   : > { %v1135_v21 = vld [vmem:[#allocation2 + $0x8c] sm:$0xf]  ;;  %v1918_v23 = vrot.slane %v1764_v19, 5  ;;  %1970 = vrot.lane.b32.xlu2 %v1868_v1, %s4871_s19  ;;  %938 = vst [vmem:[#allocation1 + $0x23] ss:$4 sm:$0xff] %v611_v46  ;;  %4668 = vmatmul.msk.bf16.gmra.mxu1 %vm2285_vm15, %v5411_v37  ;;  %v1331_v1 = vor.u32 %v1330_v9, %v5233_v52 }
  0xfa   : > { %v1494_v24 = vshll.u32 %v1135_v21, 16  ;;  %v1498_v10 = vshrl.u32 %v1135_v21, 16  ;;  %2066 = vst.msk [vmem:[#allocation3 + $0x18] sm:$0xf] %vm2059_vm13, %v1949_v36  ;;  %v5458_v36 = vrot.slane %v1334_v55, 5 }
  0xfb   : > { %v1919_v28 = vsel %vm4957_vm11, %v1917_v7, %v1918_v23  ;;  %1068 = vst.msk [vmem:[#allocation3 + $0x24] sm:$0xf] %vm215_vm0, %v1027_v51  ;;  %v1920_v61 = vrot.slane %v1918_v23, 4  ;;  %v1332_v19 = vrot.slane %v1331_v1, 4  ;;  %v1957_v21 = vpop.permute.xlu1 %1956 }
  0xfc   : > { %v1496_v29 = vrot.slane %v1494_v24, 5  ;;  %v1500_v3 = vrot.slane %v1498_v10, 4  ;;  %2004 = vrot.lane.b32.xlu0 %v1919_v28, %s4871_s19  ;;  %1686 = vst.msk [vmem:[#allocation3 + $0x24] sm:$0xf] %vm1676_vm12, %v5394_v38  ;;  %v5463_v38 = vld [vmem:[#allocation2 + $0x50] sm:$0xf] }
  0xfd   : > { %1067 = vst.msk [vmem:[#allocation3 + $0x20] sm:$0xf] %vm215_vm0, %v1026_v22  ;;  %v1344_v6 = vshll.u32 %v5463_v38, 16  ;;  %v1961_v16 = vpop.permute.xlu2 %1960  ;;  %v1578_v22 = vpop.permute.xlu0 %1577  ;;  %v1030_v28 = vld [vmem:[#allocation2 + $0x30] sm:$0xf] }
  0xfe   : > { %v1497_v35 = vsel %vm4933_vm8, %v1492_v11, %v1496_v29  ;;  %v1501_v39 = vor.u32 %v1500_v3, %v1496_v29  ;;  %1685 = vst.msk [vmem:[#allocation3 + $0x20] sm:$0xf] %vm1676_vm12, %v1570_v5  ;;  %v1341_v5 = vor.u32 %v1340_v42, %v5458_v36  ;;  %v1337_v3 = vsel %vm4933_vm8, %v1332_v19, %v5458_v36 }
  0xff   : > { %1621 = vrot.lane.b32.xlu1 %v1497_v35, %s4870_s18  ;;  %v5465_v44 = vld [vmem:[#allocation2 + $0x90] sm:$0xf]  ;;  %942 = vst [vmem:[#allocation1] ss:$4 sm:$0xff] %v483_v34  ;;  %v5504_v15 = vrot.slane %v1344_v6, 5 }
 0x100   : > { %v1136_v45 = vld [vmem:[#allocation2 + $0x90] sm:$0xf]  ;;  %v1921_v50 = vrot.slane %v5465_v44, 5  ;;  %v940_v53 = vld [vmem:[#allocation1 + $0x20] sm:$0xff]  ;;  %v1502_v57 = vrot.slane %v1501_v39, 4 }
 0x101   : > { %v1504_v31 = vshll.u32 %v1136_v45, 16  ;;  %v1508_v56 = vshrl.u32 %v1136_v45, 16  ;;  %1016 = vst.msk [vmem:[#allocation2 + $0x94] sm:$0xf] %vm215_vm0, %v940_v53  ;;  %v5473_v60 = vld [vmem:[#allocation3 + $0x18] sm:$0xff] }
 0x102   : > { %v5475_v2 = vld [vmem:[#allocation3 + $0x18] sm:$0xff]  ;;  %1069 = vst.msk [vmem:[#allocation3 + $0x28] sm:$0xf] %vm215_vm0, %v1028_v40  ;;  %v1922_v7 = vsel %vm4957_vm11, %v1920_v61, %v1921_v50  ;;  %v2747_v51 = vrot.slane %v5473_v60, 2  ;;  %v1923_v40 = vrot.slane %v1921_v50, 4 }
 0x103   : > { %v1506_v4 = vrot.slane %v1504_v31, 5  ;;  %v1510_v46 = vrot.slane %v1508_v56, 4  ;;  %1687 = vst.msk [vmem:[#allocation3 + $0x28] sm:$0xf] %vm1676_vm12, %v5427_v59  ;;  %v2246_v55 = vrot.slane %v5475_v2, 1  ;;  %v1348_v56 = vshrl.u32 %v5463_v38, 16 }
 0x104   : > { %1972 = vrot.lane.b32.xlu0 %v1871_v58, %s4871_s19  ;;  %2068 = vst.msk [vmem:[#allocation3 + $0x20] sm:$0xf] %vm2059_vm13, %v5429_v8  ;;  %v2748_v52 = vsel %vm2340_vm14, %v2746_v63, %v2747_v51  ;;  %v1342_v8 = vrot.slane %v1341_v5, 4  ;;  %v5530_v61 = vld [vmem:[#allocation2 + $0x9c] sm:$0xf] }
 0x105   : > { %v1507_v11 = vsel %vm4933_vm8, %v1502_v57, %v1506_v4  ;;  %v1511_v13 = vor.u32 %v1510_v46, %v1506_v4  ;;  %2069 = vst.msk [vmem:[#allocation3 + $0x24] sm:$0xf] %vm2059_vm13, %v1955_v48  ;;  %v2247_v59 = vsel %vm2242_vm2, %v2244_v54, %v2246_v55  ;;  %4762 = vmatmul.msk.bf16.vlgmr.msra.gmra.mxu2 %vm2285_vm15, %v2748_v52  ;;  %v5532_v42 = vpop.permute.xlu2 %1964  ;;  %v1963_v53 = vpop.permute.xlu0 %1962  ;;  %v1121_v57 = vld [vmem:[#allocation2 + $0x54] sm:$0xf]  ;;  %v1749_v63 = vld [vmem:[#allocation2 + $0x50] sm:$0xf] }
 0x106   : > { %1623 = vrot.lane.b32.xlu2 %v1507_v11, %s4870_s18  ;;  %v943_v14 = vld [vmem:[#allocation1] sm:$0xff]  ;;  %1070 = vst.msk [vmem:[#allocation3 + $0x2c] sm:$0xf] %vm215_vm0, %v1029_v43  ;;  %v1347_v27 = vsel %vm4933_vm8, %v1342_v8, %v5504_v15  ;;  %v1358_v46 = vshrl.u32 %v1121_v57, 16  ;;  %v1534_v5 = vshll.u32 %v5530_v61, 16  ;;  %v1350_v12 = vrot.slane %v1348_v56, 4 }
 0x107   : > { %2006 = vrot.lane.b32.xlu1 %v1922_v7, %s4871_s19  ;;  %1017 = vst.msk [vmem:[#allocation2 + $0x98] sm:$0x1] %vm218_vm1, %v943_v14  ;;  %4641 = vmatmul.msk.bf16.gmra.mxu0 %vm2285_vm15, %v2247_v59  ;;  %v1512_v54 = vrot.slane %v1511_v13, 4  ;;  %v1034_v6 = vld [vmem:[#allocation2 + $0x40] sm:$0xf]  ;;  %v1354_v13 = vshll.u32 %v1121_v57, 16 }
 0x108   : > { %v1137_v23 = vld [vmem:[#allocation2 + $0x94] sm:$0xf]  ;;  %1688 = vst.msk [vmem:[#allocation3 + $0x2c] sm:$0xf] %vm1676_vm12, %v1576_v32  ;;  %v5545_v43 = vld [vmem:[#allocation2 + $0x9c] sm:$0xf] }
 0x109   : > { %v1766_v37 = vld [vmem:[#allocation2 + $0x94] sm:$0xf]  ;;  %v1514_v24 = vshll.u32 %v1137_v23, 16  ;;  %v1518_v10 = vshrl.u32 %v1137_v23, 16  ;;  %2071 = vst.msk [vmem:[#allocation3 + $0x2c] sm:$0xf] %vm2059_vm13, %v1959_v17  ;;  %4669 = vmatmul.msk.bf16.gmra.mxu1 %vm2285_vm15, %v5475_v2 }
 0x10a   : > { %v1924_v26 = vrot.slane %v1766_v37, 5  ;;  %2070 = vst.msk [vmem:[#allocation3 + $0x28] sm:$0xf] %vm2059_vm13, %v1957_v21  ;;  %v1872_v59 = vrot.slane %v1870_v33, 4  ;;  %v1873_v14 = vrot.slane %v1749_v63, 5  ;;  %v1930_v8 = vrot.slane %v5545_v43, 5 }
 0x10b   : > { %v1516_v29 = vrot.slane %v1514_v24, 5  ;;  %v1520_v30 = vrot.slane %v1518_v10, 4  ;;  %1071 = vst.msk [vmem:[#allocation3 + $0x30] sm:$0xf] %vm215_vm0, %v1030_v28  ;;  %v5560_v19 = vrot.slane %v1534_v5, 5  ;;  %v1360_v60 = vrot.slane %v1358_v46, 4 }
 0x10c   : > { %v5521_v9 = vld [vmem:[#allocation3 + $0x20] sm:$0xff]  ;;  %1689 = vst.msk [vmem:[#allocation3 + $0x30] sm:$0xf] %vm1676_vm12, %v1578_v22  ;;  %v1926_v35 = vrot.slane %v1924_v26, 4  ;;  %v1925_v4 = vsel %vm4957_vm11, %v1923_v40, %v1924_v26  ;;  %v5562_v21 = vld [vmem:[#allocation2 + $0x58] sm:$0xf] }
 0x10d   : > { %v1517_v34 = vsel %vm4933_vm8, %v1512_v54, %v1516_v29  ;;  %v1521_v39 = vor.u32 %v1520_v30, %v1516_v29  ;;  %2072 = vst.msk [vmem:[#allocation3 + $0x30] sm:$0xf] %vm2059_vm13, %v1961_v16  ;;  %v5534_v48 = vld [vmem:[#allocation3 + $0x20] sm:$0xff]  ;;  %v2749_v50 = vrot.slane %v5521_v9, 2  ;;  %v1586_v22 = vpop.permute.xlu2 %1585  ;;  %v1582_v37 = vpop.permute.xlu0 %1581  ;;  %v1128_v54 = vld [vmem:[#allocation2 + $0x70] sm:$0xf] }
 0x10e   : > { %1591 = vrot.lane.b32.xlu2 %v1347_v27, %s4870_s18  ;;  %1625 = vrot.lane.b32.xlu0 %v1517_v34, %s4870_s18  ;;  %v1767_v36 = vld [vmem:[#allocation2 + $0x98] sm:$0xf]  ;;  %v2248_v38 = vrot.slane %v5534_v48, 1  ;;  %1075 = vst.msk [vmem:[#allocation3 + $0x40] sm:$0xf] %vm215_vm0, %v1034_v6  ;;  %v1356_v24 = vrot.slane %v1354_v13, 5  ;;  %v1874_v27 = vsel %vm4957_vm11, %v1872_v59, %v1873_v14 }
 0x10f   : > { %1589 = vrot.lane.b32.xlu1 %v1337_v3, %s4870_s18  ;;  %v1138_v41 = vld [vmem:[#allocation2 + $0x98] sm:$0xf]  ;;  %v1927_v17 = vrot.slane %v1767_v36, 5  ;;  %v1522_v32 = vrot.slane %v1521_v39, 4  ;;  %v2750_v52 = vsel %vm2340_vm14, %v2747_v51, %v2749_v50  ;;  %v1580_v51 = vpop.permute.xlu1 %1579  ;;  %1693 = vst.msk [vmem:[#allocation3 + $0x40] sm:$0xf] %vm1676_vm12, %v1586_v22  ;;  %v1351_v39 = vor.u32 %v1350_v12, %v5504_v15 }
 0x110   : > { %v1524_v44 = vshll.u32 %v1138_v41, 16  ;;  %v1528_v45 = vshrl.u32 %v1138_v41, 16  ;;  %v2249_v33 = vsel %vm2242_vm2, %v2246_v55, %v2248_v38  ;;  %v1129_v10 = vld [vmem:[#allocation2 + $0x74] sm:$0xf]  ;;  %v1364_v28 = vshll.u32 %v5562_v21, 16 }
 0x111   : > { %v1928_v7 = vsel %vm4957_vm11, %v1926_v35, %v1927_v17  ;;  %v1929_v23 = vrot.slane %v1927_v17, 4  ;;  %v1031_v26 = vld [vmem:[#allocation2 + $0x34] sm:$0xf]  ;;  %v1032_v29 = vld [vmem:[#allocation2 + $0x38] sm:$0xf]  ;;  %v1361_v3 = vor.u32 %v1360_v60, %v1356_v24  ;;  %v1424_v30 = vshll.u32 %v1128_v54, 16 }
 0x112   : > { %v1526_v31 = vrot.slane %v1524_v44, 5  ;;  %v1530_v58 = vrot.slane %v1528_v45, 4  ;;  %1072 = vst.msk [vmem:[#allocation3 + $0x34] sm:$0xf] %vm215_vm0, %v1031_v26  ;;  %v1750_v2 = vld [vmem:[#allocation2 + $0x54] sm:$0xf] }
 0x113   : > { %1690 = vst.msk [vmem:[#allocation3 + $0x34] sm:$0xf] %vm1676_vm12, %v1580_v51  ;;  %v1428_v34 = vshrl.u32 %v1128_v54, 16  ;;  %v1931_v35 = vsel %vm4957_vm11, %v1929_v23, %v1930_v8  ;;  %v1434_v40 = vshll.u32 %v1129_v10, 16  ;;  %v1438_v36 = vshrl.u32 %v1129_v10, 16  ;;  %v5588_v41 = vld [vmem:[#allocation3 + $0x28] sm:$0xff] }
 0x114   : > { %v1527_v1 = vsel %vm4933_vm8, %v1522_v32, %v1526_v31  ;;  %v1531_v11 = vor.u32 %v1530_v58, %v1526_v31  ;;  %2073 = vst.msk [vmem:[#allocation3 + $0x34] sm:$0xf] %vm2059_vm13, %v1963_v53  ;;  %v1875_v17 = vrot.slane %v1873_v14, 4  ;;  %v1876_v32 = vrot.slane %v1750_v2, 5  ;;  %v5599_v63 = vld [vmem:[#allocation3 + $0x28] sm:$0xff] }
 0x115   : > { %4763 = vmatmul.msk.bf16.gmra.mxu2 %vm2285_vm15, %v2750_v52  ;;  %1073 = vst.msk [vmem:[#allocation3 + $0x38] sm:$0xf] %vm215_vm0, %v1032_v29  ;;  %v1362_v15 = vrot.slane %v1361_v3, 4  ;;  %v1366_v44 = vrot.slane %v1364_v28, 5  ;;  %v5597_v45 = vrot.slane %v1424_v30, 5  ;;  %v1430_v53 = vrot.slane %v1428_v34, 4  ;;  %v1967_v46 = vpop.permute.xlu0 %1966 }
 0x116   : > { %2008 = vrot.lane.b32.xlu2 %v1925_v4, %s4871_s19  ;;  %2010 = vrot.lane.b32.xlu0 %v1928_v7, %s4871_s19  ;;  %v1532_v16 = vrot.slane %v1531_v11, 4  ;;  %1691 = vst.msk [vmem:[#allocation3 + $0x38] sm:$0xf] %vm1676_vm12, %v1582_v37  ;;  %v1352_v56 = vrot.slane %v1351_v39, 4  ;;  %v1436_v57 = vrot.slane %v1434_v40, 5  ;;  %v1440_v58 = vrot.slane %v1438_v36, 4 }
 0x117   : > { %1627 = vrot.lane.b32.xlu1 %v1527_v1, %s4870_s18  ;;  %4642 = vmatmul.msk.bf16.gmra.mxu0 %vm2285_vm15, %v2249_v33  ;;  %2074 = vst.msk [vmem:[#allocation3 + $0x38] sm:$0xf] %vm2059_vm13, %v5532_v42  ;;  %v1584_v31 = vpop.permute.xlu1 %1583  ;;  %v1033_v4 = vld [vmem:[#allocation2 + $0x3c] sm:$0xf]  ;;  %v2751_v5 = vrot.slane %v5588_v41, 2  ;;  %v1877_v42 = vsel %vm4957_vm11, %v1875_v17, %v1876_v32  ;;  %v1367_v7 = vsel %vm4933_vm8, %v1362_v15, %v1366_v44  ;;  %v1368_v59 = vshrl.u32 %v5562_v21, 16 }
 0x118   : > { %v1537_v55 = vsel %vm4933_vm8, %v1532_v16, %v5560_v19  ;;  %1074 = vst.msk [vmem:[#allocation3 + $0x3c] sm:$0xf] %vm215_vm0, %v1033_v4  ;;  %v1049_v6 = vld [vmem:[#allocation2 + $0x7c] sm:$0xf]  ;;  %v1431_v1 = vor.u32 %v1430_v53, %v5597_v45  ;;  %v1357_v11 = vsel %vm4933_vm8, %v1352_v56, %v1356_v24  ;;  %v1441_v13 = vor.u32 %v1440_v58, %v1436_v57  ;;  %v5612_v52 = vld [vmem:[#allocation2 + $0x58] sm:$0xf] }
 0x119   : > { %4670 = vmatmul.msk.bf16.gmra.mxu1 %vm2285_vm15, %v5534_v48  ;;  %1692 = vst.msk [vmem:[#allocation3 + $0x3c] sm:$0xf] %vm1676_vm12, %v1584_v31  ;;  %v2250_v14 = vrot.slane %v5599_v63, 1  ;;  %v2752_v16 = vsel %vm2340_vm14, %v2749_v50, %v2751_v5  ;;  %v1878_v60 = vrot.slane %v1876_v32, 4  ;;  %v1879_v22 = vrot.slane %v5612_v52, 5 }
 0x11a   : > { %2075 = vst.msk [vmem:[#allocation3 + $0x3c] sm:$0xf] %vm2059_vm13, %v1967_v46  ;;  %v1432_v21 = vrot.slane %v1431_v1, 4  ;;  %v1442_v51 = vrot.slane %v1441_v13, 4  ;;  %v1370_v23 = vrot.slane %v1368_v59, 4  ;;  %vm223_vm1 = vcmask 25600  }
 0x11b   : > { %1090 = vst.msk [vmem:[#allocation3 + $0x7c] sm:$0xf] %vm215_vm0, %v1049_v6  ;;  %v5626_v12 = vld [vmem:[#allocation2 + $0x70] sm:$0xf]  ;;  %v2251_v9 = vsel %vm2242_vm2, %v2248_v38, %v2250_v14  ;;  %v1123_v50 = vld [vmem:[#allocation2 + $0x5c] sm:$0xf]  ;;  %v1880_v37 = vsel %vm4957_vm11, %v1878_v60, %v1879_v22 }
 0x11c   : > { %v1758_v33 = vld [vmem:[#allocation2 + $0x74] sm:$0xf]  ;;  %v1378_v54 = vshrl.u32 %v1123_v50, 16  ;;  %v1897_v24 = vrot.slane %v5626_v12, 5  ;;  %v1437_v10 = vsel %vm4933_vm8, %v1432_v21, %v1436_v57  ;;  %v1447_v26 = vsel %vm4933_vm8, %v1442_v51, %v5315_v62  ;;  %224 = vst.msk [vmem:[#allocation2 + $0xa0] sm:$0x3] %vm223_vm1, %v4869_v0 }
 0x11d   : > { %v1371_v48 = vor.u32 %v1370_v23, %v1366_v44  ;;  %v1900_v38 = vrot.slane %v1758_v33, 5  ;;  %v5645_v28 = vld [vmem:[#allocation3 + $0x30] sm:$0xff]  ;;  %v1752_v29 = vld [vmem:[#allocation2 + $0x5c] sm:$0xf]  ;;  %v1588_v39 = vpop.permute.xlu0 %1587  ;;  %v1124_v40 = vld [vmem:[#allocation2 + $0x60] sm:$0xf] }
 0x11e   : > { %1629 = vrot.lane.b32.xlu2 %v1537_v55, %s4870_s18  ;;  %2012 = vrot.lane.b32.xlu0 %v1931_v35, %s4871_s19  ;;  %v1899_v62 = vrot.slane %v1897_v24, 4  ;;  %v1380_v2 = vrot.slane %v1378_v54, 4  ;;  %v5654_v35 = vld [vmem:[#allocation3 + $0x30] sm:$0xff]  ;;  %v2753_v36 = vrot.slane %v5645_v28, 2  ;;  %v1035_v17 = vld [vmem:[#allocation2 + $0x44] sm:$0xf] }
 0x11f   : > { %1974 = vrot.lane.b32.xlu1 %v1874_v27, %s4871_s19  ;;  %v1374_v27 = vshll.u32 %v1123_v50, 16  ;;  %v1902_v55 = vrot.slane %v1900_v38, 4  ;;  %v1969_v3 = vpop.permute.xlu1 %1968  ;;  %v1372_v30 = vrot.slane %v1371_v48, 4  ;;  %v1882_v32 = vrot.slane %v1752_v29, 5  ;;  %v1125_v15 = vld [vmem:[#allocation2 + $0x64] sm:$0xf] }
 0x120   : > { %2076 = vst.msk [vmem:[#allocation3 + $0x40] sm:$0xf] %vm2059_vm13, %v1969_v3  ;;  %v1901_v44 = vsel %vm4957_vm11, %v1899_v62, %v1900_v38  ;;  %v1753_v53 = vld [vmem:[#allocation2 + $0x60] sm:$0xf]  ;;  %v1398_v57 = vshrl.u32 %v1125_v15, 16  ;;  %v1384_v4 = vshll.u32 %v1124_v40, 16  ;;  %v2754_v49 = vsel %vm2340_vm14, %v2751_v5, %v2753_v36 }
 0x121   : > { %v1376_v34 = vrot.slane %v1374_v27, 5  ;;  %1076 = vst.msk [vmem:[#allocation3 + $0x44] sm:$0xf] %vm215_vm0, %v1035_v17  ;;  %v1904_v56 = vsel %vm4957_vm11, %v1902_v55, %v1903_v20  ;;  %v1388_v46 = vshrl.u32 %v1124_v40, 16  ;;  %v2252_v6 = vrot.slane %v5654_v35, 1  ;;  %v5698_v29 = vld [vmem:[#allocation3 + $0x38] sm:$0xff] }
 0x122   : > { %1694 = vst.msk [vmem:[#allocation3 + $0x44] sm:$0xf] %vm1676_vm12, %v1588_v39  ;;  %v1884_v20 = vrot.slane %v1882_v32, 4  ;;  %v1885_v1 = vrot.slane %v1753_v53, 5  ;;  %v1881_v13 = vrot.slane %v1879_v22, 4  ;;  %v1400_v52 = vrot.slane %v1398_v57, 4 }
 0x123   : > { %v1381_v31 = vor.u32 %v1380_v2, %v1376_v34  ;;  %v1377_v58 = vsel %vm4933_vm8, %v1372_v30, %v1376_v34  ;;  %v1386_v59 = vrot.slane %v1384_v4, 5  ;;  %v2253_v41 = vsel %vm2242_vm2, %v2250_v14, %v2252_v6  ;;  %v1126_v5 = vld [vmem:[#allocation2 + $0x68] sm:$0xf]  ;;  %v1048_v60 = vld [vmem:[#allocation2 + $0x78] sm:$0xf]  ;;  %v5701_v34 = vld [vmem:[#allocation3 + $0x38] sm:$0xff] }
 0x124   : > { %v1127_v51 = vld [vmem:[#allocation2 + $0x6c] sm:$0xf]  ;;  %1089 = vst.msk [vmem:[#allocation3 + $0x78] sm:$0xf] %vm215_vm0, %v1048_v60  ;;  %v1886_v22 = vsel %vm4957_vm11, %v1884_v20, %v1885_v1  ;;  %v1883_v23 = vsel %vm4957_vm11, %v1881_v13, %v1882_v32  ;;  %v1404_v50 = vshll.u32 %v1126_v5, 16  ;;  %v1408_v33 = vshrl.u32 %v1126_v5, 16 }
 0x125   : > { %4764 = vmatmul.msk.bf16.gmra.mxu2 %vm2285_vm15, %v2752_v16  ;;  %v1390_v16 = vrot.slane %v1388_v46, 4  ;;  %v1754_v14 = vld [vmem:[#allocation2 + $0x64] sm:$0xf]  ;;  %v1414_v54 = vshll.u32 %v1127_v51, 16  ;;  %v1050_v39 = vld [vmem:[#allocation2 + $0x80] sm:$0xf] }
 0x126   : > { %1595 = vrot.lane.b32.xlu2 %v1367_v7, %s4870_s18  ;;  %1976 = vrot.lane.b32.xlu0 %v1877_v42, %s4871_s19  ;;  %v1394_v7 = vshll.u32 %v1125_v15, 16  ;;  %v1888_v27 = vrot.slane %v1754_v14, 5  ;;  %v1406_v62 = vrot.slane %v1404_v50, 5  ;;  %v1410_v2 = vrot.slane %v1408_v33, 4  ;;  %1091 = vst.msk [vmem:[#allocation3 + $0x80] sm:$0xf] %vm215_vm0, %v1050_v39 }
 0x127   : > { %1593 = vrot.lane.b32.xlu1 %v1357_v11, %s4870_s18  ;;  %4643 = vmatmul.msk.bf16.gmra.mxu0 %vm2285_vm15, %v2251_v9  ;;  %v1382_v11 = vrot.slane %v1381_v31, 4  ;;  %v1416_v3 = vrot.slane %v1414_v54, 5  ;;  %v1538_v40 = vshrl.u32 %v5530_v61, 16  ;;  %v2755_v32 = vrot.slane %v5698_v29, 2  ;;  %v1051_v57 = vld [vmem:[#allocation2 + $0x84] sm:$0xf] }
 0x128   : > { %v1396_v21 = vrot.slane %v1394_v7, 5  ;;  %v1411_v15 = vor.u32 %v1410_v2, %v1406_v62  ;;  %1092 = vst.msk [vmem:[#allocation3 + $0x84] sm:$0xf] %vm215_vm0, %v1051_v57  ;;  %v1890_v61 = vrot.slane %v1888_v27, 4  ;;  %v1756_v13 = vld [vmem:[#allocation2 + $0x6c] sm:$0xf] }
 0x129   : > { %4671 = vmatmul.msk.bf16.gmra.mxu1 %vm2285_vm15, %v5599_v63  ;;  %v1387_v63 = vsel %vm4933_vm8, %v1382_v11, %v1386_v59  ;;  %v2756_v4 = vsel %vm2340_vm14, %v2753_v36, %v2755_v32  ;;  %v1540_v20 = vrot.slane %v1538_v40, 4  ;;  %v1140_v11 = vld [vmem:[#allocation2 + $0xa0] sm:$0x3]  ;;  %v1932_v18 = vrot.slane %v1930_v8, 4  ;;  %v1036_v29 = vld [vmem:[#allocation2 + $0x48] sm:$0xf] }
 0x12a   : > { %v1401_v9 = vor.u32 %v1400_v52, %v1396_v21  ;;  %v1412_v46 = vrot.slane %v1411_v15, 4  ;;  %v1548_v5 = vshrl.u32 %v1140_v11, 16  ;;  %1077 = vst.msk [vmem:[#allocation3 + $0x48] sm:$0xf] %vm215_vm0, %v1036_v29  ;;  %v1056_v39 = vld [vmem:[#allocation2 + $0x98] sm:$0xf] }
 0x12b   : > { %v1055_v40 = vld [vmem:[#allocation2 + $0x94] sm:$0xf]  ;;  %1097 = vst.msk [vmem:[#allocation3 + $0x98] sm:$0xf] %vm215_vm0, %v1056_v39 }
 0x12c   : > { %v1402_v38 = vrot.slane %v1401_v9, 4  ;;  %v1417_v28 = vsel %vm4933_vm8, %v1412_v46, %v1416_v3  ;;  %1096 = vst.msk [vmem:[#allocation3 + $0x94] sm:$0xf] %vm215_vm0, %v1055_v40 }
 0x12e   : > { %1609 = vrot.lane.b32.xlu2 %v1437_v10, %s4870_s18  ;;  %1611 = vrot.lane.b32.xlu0 %v1447_v26, %s4870_s18  ;;  %v1418_v10 = vshrl.u32 %v1127_v51, 16  ;;  %v1887_v26 = vrot.slane %v1885_v1, 4  ;;  %v1407_v17 = vsel %vm4933_vm8, %v1402_v38, %v1406_v62 }
 0x12f   : > { %1978 = vrot.lane.b32.xlu1 %v1880_v37, %s4871_s19  ;;  %v1391_v37 = vor.u32 %v1390_v16, %v1386_v59  ;;  %v1544_v16 = vshll.u32 %v1140_v11, 16  ;;  %v1047_v11 = vld [vmem:[#allocation2 + $0x74] sm:$0xf] }
 0x130   : > { %v1420_v30 = vrot.slane %v1418_v10, 4  ;;  %1088 = vst.msk [vmem:[#allocation3 + $0x74] sm:$0xf] %vm215_vm0, %v1047_v11 }
 0x131   : > { %v1392_v55 = vrot.slane %v1391_v37, 4 }
 0x132   : > { %v1421_v31 = vor.u32 %v1420_v30, %v1416_v3 }
 0x133   : > { %v1397_v53 = vsel %vm4933_vm8, %v1392_v55, %v1396_v21  ;;  %v1546_v21 = vrot.slane %v1544_v16, 5  ;;  %v1054_v55 = vld [vmem:[#allocation2 + $0x90] sm:$0xf]  ;;  %v1040_v16 = vld [vmem:[#allocation2 + $0x58] sm:$0xf] }
 0x134   : > { %v1422_v7 = vrot.slane %v1421_v31, 4  ;;  %1095 = vst.msk [vmem:[#allocation3 + $0x90] sm:$0xf] %vm215_vm0, %v1054_v55  ;;  %v1039_v31 = vld [vmem:[#allocation2 + $0x54] sm:$0xf] }
 0x135   : > { %4765 = vmatmul.msk.bf16.gmra.mxu2 %vm2285_vm15, %v2754_v49  ;;  %1080 = vst.msk [vmem:[#allocation3 + $0x54] sm:$0xf] %vm215_vm0, %v1039_v31 }
 0x136   : > { %1994 = vrot.lane.b32.xlu2 %v1904_v56, %s4871_s19  ;;  %1597 = vrot.lane.b32.xlu0 %v1377_v58, %s4870_s18  ;;  %v2254_v56 = vrot.slane %v5701_v34, 1  ;;  %v1755_v58 = vld [vmem:[#allocation2 + $0x68] sm:$0xf]  ;;  %v1427_v52 = vsel %vm4933_vm8, %v1422_v7, %v5597_v45  ;;  %1081 = vst.msk [vmem:[#allocation3 + $0x58] sm:$0xf] %vm215_vm0, %v1040_v16 }
 0x137   : > { %v5669_v42 = vpop.permute.xlu2 %1996  ;;  %1992 = vrot.lane.b32.xlu1 %v1901_v44, %s4871_s19  ;;  %4644 = vmatmul.msk.bf16.gmra.mxu0 %vm2285_vm15, %v2253_v41  ;;  %v1889_v44 = vsel %vm4957_vm11, %v1887_v26, %v1888_v27  ;;  %v1891_v49 = vrot.slane %v1755_v58, 5  ;;  %v1046_v58 = vld [vmem:[#allocation2 + $0x70] sm:$0xf] }
 0x138   : > { %v2255_v1 = vsel %vm2242_vm2, %v2252_v6, %v2254_v56  ;;  %v1894_v6 = vrot.slane %v1756_v13, 5  ;;  %1087 = vst.msk [vmem:[#allocation3 + $0x70] sm:$0xf] %vm215_vm0, %v1046_v58 }
 0x139   : > { %4672 = vmatmul.msk.bf16.gmra.mxu1 %vm2285_vm15, %v5654_v35  ;;  %v1892_v59 = vsel %vm4957_vm11, %v1890_v61, %v1891_v49  ;;  %v1541_v35 = vor.u32 %v1540_v20, %v5560_v19  ;;  %v1053_v19 = vld [vmem:[#allocation2 + $0x8c] sm:$0xf]  ;;  %v1893_v51 = vrot.slane %v1891_v49, 4 }
 0x13a   : > { %v1896_v45 = vrot.slane %v1894_v6, 4  ;;  %1094 = vst.msk [vmem:[#allocation3 + $0x8c] sm:$0xf] %vm215_vm0, %v1053_v19 }
 0x13b   : > { %v1542_v60 = vrot.slane %v1541_v35, 4  ;;  %v1895_v33 = vsel %vm4957_vm11, %v1893_v51, %v1894_v6 }
 0x13c   : > { %v1898_v9 = vsel %vm4957_vm11, %v1896_v45, %v1897_v24  ;;  %v1037_v24 = vld [vmem:[#allocation2 + $0x4c] sm:$0xf] }
 0x13d   : > { %1078 = vst.msk [vmem:[#allocation3 + $0x4c] sm:$0xf] %vm215_vm0, %v1037_v24 }
 0x13e   : > { %1980 = vrot.lane.b32.xlu2 %v1883_v23, %s4871_s19  ;;  %1982 = vrot.lane.b32.xlu0 %v1886_v22, %s4871_s19  ;;  %v1052_v22 = vld [vmem:[#allocation2 + $0x88] sm:$0xf]  ;;  %v1550_v23 = vrot.slane %v1548_v5, 4 }
 0x13f   : > { %1599 = vrot.lane.b32.xlu1 %v1387_v63, %s4870_s18  ;;  %1093 = vst.msk [vmem:[#allocation3 + $0x88] sm:$0xf] %vm215_vm0, %v1052_v22  ;;  %v1769_v63 = vld [vmem:[#allocation2 + $0xa0] sm:$0x3] }
 0x140   : > { %v1616_v48 = vpop.permute.xlu2 %1615  ;;  %v1551_v37 = vor.u32 %v1550_v23, %v1546_v21  ;;  %v1933_v12 = vrot.slane %v1769_v63, 5  ;;  %v1043_v23 = vld [vmem:[#allocation2 + $0x64] sm:$0xf] }
 0x141   : > { %1708 = vst.msk [vmem:[#allocation3 + $0x7c] sm:$0xf] %vm1676_vm12, %v1616_v48 }
 0x142   : > { %v1552_v54 = vrot.slane %v1551_v37, 4  ;;  %v1935_v10 = vrot.slane %v1933_v12, 4  ;;  %v1934_v26 = vsel %vm4957_vm11, %v1932_v18, %v1933_v12  ;;  %1084 = vst.msk [vmem:[#allocation3 + $0x64] sm:$0xf] %vm215_vm0, %v1043_v23  ;;  %v1041_v12 = vld [vmem:[#allocation2 + $0x5c] sm:$0xf] }
 0x143   : > { %1082 = vst.msk [vmem:[#allocation3 + $0x5c] sm:$0xf] %vm215_vm0, %v1041_v12  ;;  %vm2100_vm11 = vcmask 90176  }
 0x145   : > { %4766 = vmatmul.msk.bf16.gmra.mxu2 %vm2285_vm15, %v2756_v4 }
 0x146   : > { %1603 = vrot.lane.b32.xlu2 %v1407_v17, %s4870_s18  ;;  %1984 = vrot.lane.b32.xlu0 %v1889_v44, %s4871_s19 }
 0x147   : > { %1601 = vrot.lane.b32.xlu1 %v1397_v53, %s4870_s18  ;;  %4645 = vmatmul.msk.bf16.gmra.mxu0 %vm2285_vm15, %v2255_v1  ;;  %v1038_v1 = vld [vmem:[#allocation2 + $0x50] sm:$0xf] }
 0x148   : > { %1079 = vst.msk [vmem:[#allocation3 + $0x50] sm:$0xf] %vm215_vm0, %v1038_v1 }
 0x149   : > { %4673 = vmatmul.msk.bf16.gmra.mxu1 %vm2285_vm15, %v5701_v34 }
 0x14b   : > { %v5731_v36 = vpop.permute.xlu2 %2002 }
 0x14e   : > { %1605 = vrot.lane.b32.xlu2 %v1417_v28, %s4870_s18  ;;  %1607 = vrot.lane.b32.xlu0 %v1427_v52, %s4870_s18 }
 0x14f   : > { %1986 = vrot.lane.b32.xlu1 %v1892_v59, %s4871_s19 }
 0x152   : > { %v1614_v41 = vpop.permute.xlu1 %1613 }
 0x153   : > { %1707 = vst.msk [vmem:[#allocation3 + $0x78] sm:$0xf] %vm1676_vm12, %v1614_v41  ;;  %v1971_v50 = vpop.permute.xlu2 %1970 }
 0x154   : > { %2090 = vst.msk [vmem:[#allocation3 + $0x78] sm:$0xf] %vm2059_vm13, %v5669_v42  ;;  %v1547_v42 = vsel %vm4933_vm8, %v1542_v60, %v1546_v21  ;;  %vm1723_vm8 = vcmask 58401  }
 0x155   : > { %2077 = vst.msk [vmem:[#allocation3 + $0x44] sm:$0xf] %vm2059_vm13, %v1971_v50  ;;  %v1999_v14 = vpop.permute.xlu0 %1998  ;;  %vm1725_vm9 = vmand %vm1723_vm8, %vm1724_vm7 }
 0x156   : > { %2091 = vst.msk [vmem:[#allocation3 + $0x7c] sm:$0xf] %vm2059_vm13, %v1999_v14  ;;  %1990 = vrot.lane.b32.xlu2 %v1898_v9, %s4871_s19  ;;  %1631 = vrot.lane.b32.xlu0 %v1547_v42, %s4870_s18  ;;  %v2522_v4 = vpop.f32.mrf.mxu1 }
 0x157   : > { %1988 = vrot.lane.b32.xlu1 %v1895_v33, %s4871_s19 }
 0x15c   : > { %v5767_v48 = vld [vmem:[#allocation3 + $0x40] sm:$0xff] }
 0x15d   : > { %v5769_v27 = vld [vmem:[#allocation3 + $0x40] sm:$0xff]  ;;  %v2757_v38 = vrot.slane %v5767_v48, 2 }
 0x15e   : > { %1633 = vrot.lane.b32.xlu2 %v1552_v54, %s4870_s18  ;;  %v2256_v62 = vrot.slane %v5769_v27, 1  ;;  %4674 = vmatmul.msk.bf16.gmra.mxu1 %vm2285_vm15, %v5769_v27  ;;  %v2524_v28 = vpop.f32.mrf.mxu1 }
 0x15f   : > { %2016 = vrot.lane.b32.xlu0 %v1935_v10, %s4871_s19  ;;  %2014 = vrot.lane.b32.xlu1 %v1934_v26, %s4871_s19  ;;  %v2001_v43 = vpop.permute.xlu1 %2000  ;;  %v2758_v47 = vsel %vm2340_vm14, %v2755_v32, %v2757_v38  ;;  %v5801_v32 = vld [vmem:[#allocation3 + $0x78] sm:$0xff]  ;;  %v1044_v26 = vld [vmem:[#allocation2 + $0x68] sm:$0xf] }
 0x160   : > { %v2257_v8 = vsel %vm2242_vm2, %v2254_v56, %v2256_v62  ;;  %v1624_v2 = vpop.permute.xlu2 %1623  ;;  %4767 = vmatmul.msk.bf16.gmra.mxu2 %vm2285_vm15, %v2758_v47  ;;  %v2270_v56 = vrot.slane %v5801_v32, 1  ;;  %1085 = vst.msk [vmem:[#allocation3 + $0x68] sm:$0xf] %vm215_vm0, %v1044_v26 }
 0x161   : > { %4646 = vmatmul.msk.bf16.gmra.mxu0 %vm2285_vm15, %v2257_v8  ;;  %1712 = vst.msk [vmem:[#allocation3 + $0x8c] sm:$0xf] %vm1676_vm12, %v1624_v2 }
 0x162   : > { %v1618_v3 = vpop.permute.xlu0 %1617 }
 0x163   : > { %1709 = vst.msk [vmem:[#allocation3 + $0x80] sm:$0xf] %vm1676_vm12, %v1618_v3 }
 0x164   : > { %2092 = vst.msk [vmem:[#allocation3 + $0x80] sm:$0xf] %vm2059_vm13, %v2001_v43 }
 0x166   : > { %v2527_v21 = vpop.f32.mrf.mxu1 }
 0x167   : > { %v1620_v30 = vpop.permute.xlu1 %1619 }
 0x168   : > { %v1592_v34 = vpop.permute.xlu2 %1591  ;;  %1710 = vst.msk [vmem:[#allocation3 + $0x84] sm:$0xf] %vm1676_vm12, %v1620_v30 }
 0x169   : > { %2093 = vst.msk [vmem:[#allocation3 + $0x84] sm:$0xf] %vm2059_vm13, %v5731_v36 }
 0x16a   : > { %1696 = vst.msk [vmem:[#allocation3 + $0x4c] sm:$0xf] %vm1676_vm12, %v1592_v34 }
 0x16e   : > { %v2005_v17 = vpop.permute.xlu0 %2004  ;;  %v2529_v43 = vpop.f32.mrf.mxu1 }
 0x170   : > { %v2009_v15 = vpop.permute.xlu2 %2008  ;;  %v5803_v53 = vld [vmem:[#allocation3 + $0x80] sm:$0xff] }
 0x171   : > { %v1622_v44 = vpop.permute.xlu1 %1621  ;;  %v2272_v57 = vrot.slane %v5803_v53, 1 }
 0x172   : > { %1711 = vst.msk [vmem:[#allocation3 + $0x88] sm:$0xf] %vm1676_vm12, %v1622_v44 }
 0x173   : > { %2094 = vst.msk [vmem:[#allocation3 + $0x88] sm:$0xf] %vm2059_vm13, %v2005_v17  ;;  %v2273_v61 = vsel %vm2242_vm2, %v2270_v56, %v2272_v57  ;;  %v1042_v17 = vld [vmem:[#allocation2 + $0x60] sm:$0xf] }
 0x174   : > { %4654 = vmatmul.msk.bf16.vlgmr.msra.gmra.mxu3 %vm2285_vm15, %v2273_v61  ;;  %v2353_v46 = vpop.f32.mrf.mxu0  ;;  %1083 = vst.msk [vmem:[#allocation3 + $0x60] sm:$0xf] %vm215_vm0, %v1042_v17 }
 0x175   : > { %4849 = vmatpush.bf16.msra.mxu3 %v5440_v25  ;;  %v2523_v19 = vadd.f32 %v2522_v4, %v2353_v46 }
 0x176   : > { %v1973_v7 = vpop.permute.xlu0 %1972  ;;  %v2532_v1 = vpop.f32.mrf.mxu1 }
 0x178   : > { %v1630_v49 = vpop.permute.xlu2 %1629 }
 0x179   : > { %v2007_v20 = vpop.permute.xlu1 %2006  ;;  %1715 = vst.msk [vmem:[#allocation3 + $0x98] sm:$0xf] %vm1676_vm12, %v1630_v49 }
 0x17a   : > { %2095 = vst.msk [vmem:[#allocation3 + $0x8c] sm:$0xf] %vm2059_vm13, %v2007_v20  ;;  %v1045_v20 = vld [vmem:[#allocation2 + $0x6c] sm:$0xf] }
 0x17b   : > { %1086 = vst.msk [vmem:[#allocation3 + $0x6c] sm:$0xf] %vm215_vm0, %v1045_v20 }
 0x17c   : > { %v2355_v13 = vpop.f32.mrf.mxu0 }
 0x17d   : > { %v2525_v14 = vadd.f32 %v2524_v28, %v2355_v13 }
 0x180   : > { %v1596_v36 = vpop.permute.xlu2 %1595  ;;  %v1626_v52 = vpop.permute.xlu0 %1625 }
 0x181   : > { %v1590_v59 = vpop.permute.xlu1 %1589  ;;  %v5820_v35 = vld [vmem:[#allocation3 + $0x88] sm:$0xff]  ;;  %1698 = vst.msk [vmem:[#allocation3 + $0x54] sm:$0xf] %vm1676_vm12, %v1596_v36 }
 0x182   : > { %1713 = vst.msk [vmem:[#allocation3 + $0x90] sm:$0xf] %vm1676_vm12, %v1626_v52  ;;  %v2274_v25 = vrot.slane %v5820_v35, 1 }
 0x183   : > { %2096 = vst.msk [vmem:[#allocation3 + $0x90] sm:$0xf] %vm2059_vm13, %v2009_v15 }
 0x184   : > { %1695 = vst.msk [vmem:[#allocation3 + $0x48] sm:$0xf] %vm1676_vm12, %v1590_v59  ;;  %v2275_v6 = vsel %vm2242_vm2, %v2272_v57, %v2274_v25  ;;  %v2358_v5 = vpop.f32.mrf.mxu0 }
 0x185   : > { %2078 = vst.msk [vmem:[#allocation3 + $0x48] sm:$0xf] %vm2059_vm13, %v1973_v7  ;;  %4655 = vmatmul.msk.bf16.gmra.mxu3 %vm2285_vm15, %v2275_v6  ;;  %v2528_v44 = vadd.f32 %v2527_v21, %v2358_v5  ;;  %v2534_v21 = vpop.f32.mrf.mxu1 }
 0x188   : > { %v1610_v41 = vpop.permute.xlu2 %1609  ;;  %v2011_v45 = vpop.permute.xlu0 %2010 }
 0x189   : > { %v1628_v60 = vpop.permute.xlu1 %1627  ;;  %1705 = vst.msk [vmem:[#allocation3 + $0x70] sm:$0xf] %vm1676_vm12, %v1610_v41  ;;  %v2854_v51 = vpop.f32.mrf.mxu2 }
 0x18a   : > { %1714 = vst.msk [vmem:[#allocation3 + $0x94] sm:$0xf] %vm1676_vm12, %v1628_v60  ;;  %v5834_v22 = vadd.f32 %v2854_v51, %v2523_v19 }
 0x18b   : > { %2097 = vst.msk [vmem:[#allocation3 + $0x94] sm:$0xf] %vm2059_vm13, %v2011_v45 }
 0x18c   : > { %v5837_v9 = vrot.slane %v5834_v22, 2  ;;  %v5840_v50 = vrot.slane %v5834_v22, 4  ;;  %v5843_v42 = vrot.slane %v5834_v22, 6  ;;  %3208 = vst [vmem:[#allocation1] ss:$4 sm:$0xff] %v5834_v22  ;;  %v2360_v18 = vpop.f32.mrf.mxu0 }
 0x18d   : > { %v2530_v48 = vadd.f32 %v2529_v43, %v2360_v18 }
 0x18e   : > { %7373 = vst [vmem:[#allocation4_spill] sm:$0xff] %v5843_v42 }
 0x18f   : > { %3210 = vst [vmem:[#allocation1 + $0x1] ss:$4 sm:$0xff] %v5837_v9 }
 0x190   : > { %3212 = vst [vmem:[#allocation1 + $0x2] ss:$4 sm:$0xff] %v5840_v50  ;;  %v5849_v33 = vpop.permute.xlu2 %1994  ;;  %v2013_v63 = vpop.permute.xlu0 %2012 }
 0x191   : > { %v1975_v37 = vpop.permute.xlu1 %1974  ;;  %3214 = vst [vmem:[#allocation1 + $0x3] ss:$4 sm:$0xff] %v5843_v42  ;;  %v2856_v54 = vpop.f32.mrf.mxu2 }
 0x192   : > { %2098 = vst.msk [vmem:[#allocation3 + $0x98] sm:$0xf] %vm2059_vm13, %v2013_v63  ;;  %v5853_v24 = vld [vmem:[#allocation3 + $0x90] sm:$0xff]  ;;  %v5856_v10 = vadd.f32 %v2856_v54, %v2525_v14 }
 0x193   : > { %2079 = vst.msk [vmem:[#allocation3 + $0x4c] sm:$0xf] %vm2059_vm13, %v1975_v37  ;;  %v2276_v47 = vrot.slane %v5853_v24, 1 }
 0x194   : > { %v5861_v8 = vrot.slane %v5856_v10, 2  ;;  %v5864_v2 = vrot.slane %v5856_v10, 4  ;;  %v5867_v55 = vrot.slane %v5856_v10, 6  ;;  %3216 = vst [vmem:[#allocation1 + $0x20] ss:$4 sm:$0xff] %v5856_v10  ;;  %v2363_v7 = vpop.f32.mrf.mxu0 }
 0x195   : > { %v2277_v3 = vsel %vm2242_vm2, %v2274_v25, %v2276_v47  ;;  %v2533_v14 = vadd.f32 %v2532_v1, %v2363_v7 }
 0x196   : > { %4656 = vmatmul.msk.bf16.gmra.mxu3 %vm2285_vm15, %v2277_v3  ;;  %3218 = vst [vmem:[#allocation1 + $0x21] ss:$4 sm:$0xff] %v5861_v8 }
 0x197   : > { %3220 = vst [vmem:[#allocation1 + $0x22] ss:$4 sm:$0xff] %v5864_v2 }
 0x198   : > { %v3223_v29 = vld.sshfl [vmem:[#allocation1] sm:$0xff pattern:$0x73625140]  ;;  %v5875_v30 = vpop.permute.xlu2 %1980  ;;  %v1977_v34 = vpop.permute.xlu0 %1976  ;;  %3222 = vst [vmem:[#allocation1 + $0x23] ss:$4 sm:$0xff] %v5867_v55 }
 0x199   : > { %v1594_v39 = vpop.permute.xlu1 %1593  ;;  %v2145_v40 = vld [vmem:[#allocation3 + $0x98] sm:$0x1]  ;;  %v3407_v15 = vpack.c.bf16 %v3223_v29, %v3223_v29  ;;  %v2859_v61 = vpop.f32.mrf.mxu2 }
 0x19a   : > { %1697 = vst.msk [vmem:[#allocation3 + $0x50] sm:$0xf] %vm1676_vm12, %v1594_v39  ;;  %v5879_v31 = vld [vmem:[#allocation3 + $0x48] sm:$0xff]  ;;  %v2222_v58 = vunpack.c.l.b16 %v2145_v40  ;;  %v2946_v49 = vadd.f32 %v2859_v61, %v2528_v44  ;;  %v2537_v44 = vpop.f32.mrf.mxu1 }
 0x19b   : > { %v5881_v57 = vld [vmem:[#allocation3 + $0x48] sm:$0xff]  ;;  %2080 = vst.msk [vmem:[#allocation3 + $0x50] sm:$0xf] %vm2059_vm13, %v1977_v34  ;;  %v2258_v4 = vrot.slane %v5879_v31, 1  ;;  %4675 = vmatmul.msk.bf16.gmra.mxu1 %vm2285_vm15, %v5879_v31 }
 0x19c   : > { %v2759_v46 = vrot.slane %v5881_v57, 2  ;;  %3440 = vst.msk [vmem:[%s5888_s7] sm:$0xf] %vm3439_vm4, %v3407_v15  ;;  %v2241_v28 = vpack.c.b16 %v2222_v58, %v2222_v58  ;;  %v5904_v36 = vrot.slane %v2946_v49, 2  ;;  %v5909_v52 = vrot.slane %v2946_v49, 4  ;;  %v2365_v5 = vpop.f32.mrf.mxu0 }
 0x19d   : > { %v2259_v11 = vsel %vm2242_vm2, %v2256_v62, %v2258_v4  ;;  %v5912_v25 = vrot.slane %v2946_v49, 6  ;;  %v1058_v15 = vld [vmem:[#allocation2 + $0xa0] sm:$0x3]  ;;  %v2535_v31 = vadd.f32 %v2534_v21, %v2365_v5  ;;  %v1057_v57 = vld [vmem:[#allocation2 + $0x9c] sm:$0xf] }
 0x19e   : > { %v2760_v13 = vsel %vm2340_vm14, %v2757_v38, %v2759_v46  ;;  %4647 = vmatmul.msk.bf16.gmra.mxu0 %vm2285_vm15, %v2259_v11  ;;  %3225 = vst [vmem:[#allocation1] ss:$4 sm:$0xff] %v5904_v36  ;;  %v2278_v38 = vrot.slane %v2241_v28, 1 }
 0x19f   : > { %4768 = vmatmul.msk.bf16.gmra.mxu2 %vm2285_vm15, %v2760_v13  ;;  %3226 = vst [vmem:[#allocation1 + $0x1] ss:$4 sm:$0xff] %v5909_v52  ;;  %v5930_v60 = vld.sshfl [vmem:[#allocation1 + $0x20] sm:$0xff pattern:$0x73625140] }
 0x1a0   : > { %v1604_v27 = vpop.permute.xlu2 %1603  ;;  %v1612_v59 = vpop.permute.xlu0 %1611  ;;  %3227 = vst [vmem:[#allocation1 + $0x2] ss:$4 sm:$0xff] %v5912_v25  ;;  %v2279_v41 = vsel %vm2242_vm2, %v2276_v47, %v2278_v38 }
 0x1a1   : > { %v1979_v62 = vpop.permute.xlu1 %1978  ;;  %1706 = vst.msk [vmem:[#allocation3 + $0x74] sm:$0xf] %vm1676_vm12, %v1612_v59  ;;  %v2861_v16 = vpop.f32.mrf.mxu2 }
 0x1a2   : > { %2089 = vst.msk [vmem:[#allocation3 + $0x74] sm:$0xf] %vm2059_vm13, %v5849_v33  ;;  %v5919_v6 = vadd.f32 %v2861_v16, %v2530_v48  ;;  %v2539_v5 = vpop.f32.mrf.mxu1 }
 0x1a3   : > { %2081 = vst.msk [vmem:[#allocation3 + $0x54] sm:$0xf] %vm2059_vm13, %v1979_v62 }
 0x1a4   : > { %1702 = vst.msk [vmem:[#allocation3 + $0x64] sm:$0xf] %vm1676_vm12, %v1604_v27  ;;  %v5925_v45 = vrot.slane %v5919_v6, 2  ;;  %v5928_v19 = vrot.slane %v5919_v6, 4  ;;  %v5936_v63 = vrot.slane %v5919_v6, 6  ;;  %v2368_v34 = vpop.f32.mrf.mxu0 }
 0x1a5   : > { %3228 = vst [vmem:[#allocation1 + $0x3] ss:$4 sm:$0xff] %v5919_v6  ;;  %v2538_v27 = vadd.f32 %v2537_v44, %v2368_v34 }
 0x1a6   : > { %4657 = vmatmul.msk.bf16.gmra.mxu3 %vm2285_vm15, %v2279_v41  ;;  %3229 = vst [vmem:[#allocation1 + $0x20] ss:$4 sm:$0xff] %v5925_v45  ;;  %v3408_v41 = vpack.c.bf16 %v5930_v60, %v5930_v60 }
 0x1a7   : > { %7374 = vst [vmem:[#allocation5_spill] sm:$0xff] %v5936_v63 }
 0x1a8   : > { %v1606_v51 = vpop.permute.xlu2 %1605  ;;  %v1598_v23 = vpop.permute.xlu0 %1597  ;;  %3230 = vst [vmem:[#allocation1 + $0x21] ss:$4 sm:$0xff] %v5928_v19 }
 0x1a9   : > { %v1993_v33 = vpop.permute.xlu1 %1992  ;;  %1699 = vst.msk [vmem:[#allocation3 + $0x58] sm:$0xf] %vm1676_vm12, %v1598_v23  ;;  %v2864_v24 = vpop.f32.mrf.mxu2 }
 0x1aa   : > { %2082 = vst.msk [vmem:[#allocation3 + $0x58] sm:$0xf] %vm2059_vm13, %v5875_v30  ;;  %v5942_v37 = vld [vmem:[#allocation3 + $0x50] sm:$0xff]  ;;  %v5947_v18 = vadd.f32 %v2864_v24, %v2533_v14 }
 0x1ab   : > { %v5944_v12 = vld [vmem:[#allocation3 + $0x50] sm:$0xff]  ;;  %2088 = vst.msk [vmem:[#allocation3 + $0x70] sm:$0xf] %vm2059_vm13, %v1993_v33  ;;  %v2260_v54 = vrot.slane %v5942_v37, 1  ;;  %4676 = vmatmul.msk.bf16.gmra.mxu1 %vm2285_vm15, %v5942_v37 }
 0x1ac   : > { %7375 = vst [vmem:[#allocation6_spill] sm:$0xff] %v5947_v18  ;;  %v2761_v26 = vrot.slane %v5944_v12, 2  ;;  %v5956_v43 = vrot.slane %v5947_v18, 4  ;;  %v5962_v29 = vld.sshfl [vmem:[#allocation1] sm:$0xff pattern:$0x73625140]  ;;  %v2370_v48 = vpop.f32.mrf.mxu0 }
 0x1ad   : > { %3231 = vst [vmem:[#allocation1 + $0x22] ss:$4 sm:$0xff] %v5936_v63  ;;  %v2261_v47 = vsel %vm2242_vm2, %v2258_v4, %v2260_v54  ;;  %v5965_v30 = vrot.slane %v5947_v18, 6 }
 0x1ae   : > { %1703 = vst.msk [vmem:[#allocation3 + $0x68] sm:$0xf] %vm1676_vm12, %v1606_v51  ;;  %v2762_v3 = vsel %vm2340_vm14, %v2759_v46, %v2761_v26  ;;  %4648 = vmatmul.msk.bf16.gmra.mxu0 %vm2285_vm15, %v2261_v47 }
 0x1af   : > { %7376 = vst [vmem:[#allocation7_spill] sm:$0xff] %v5956_v43  ;;  %4769 = vmatmul.msk.bf16.gmra.mxu2 %vm2285_vm15, %v2762_v3  ;;  %v2540_v3 = vadd.f32 %v2539_v5, %v2370_v48 }
 0x1b0   : > { %7377 = vst [vmem:[#allocation8_spill] sm:$0xff] %v5965_v30  ;;  %v5971_v39 = vpop.permute.xlu2 %1990  ;;  %v1983_v40 = vpop.permute.xlu0 %1982 }
 0x1b1   : > { %3232 = vst [vmem:[#allocation1 + $0x23] ss:$4 sm:$0xff] %v5947_v18  ;;  %v1600_v17 = vpop.permute.xlu1 %1599  ;;  %v2866_v58 = vpop.f32.mrf.mxu2 }
 0x1b2   : > { %3235 = vst [vmem:[#allocation1] ss:$4 sm:$0xff] %v5956_v43  ;;  %v5976_v61 = vadd.f32 %v2866_v58, %v2535_v31  ;;  %v5979_v4 = vld [vmem:[#allocation3 + $0x70] sm:$0xff] }
 0x1b3   : > { %3236 = vst [vmem:[#allocation1 + $0x1] ss:$4 sm:$0xff] %v5965_v30 }
 0x1b4   : > { %1700 = vst.msk [vmem:[#allocation3 + $0x5c] sm:$0xf] %vm1676_vm12, %v1600_v17  ;;  %v5983_v46 = vrot.slane %v5976_v61, 2  ;;  %v5986_v7 = vrot.slane %v5976_v61, 4  ;;  %v5994_v20 = vrot.slane %v5976_v61, 6  ;;  %v2373_v44 = vpop.f32.mrf.mxu0 }
 0x1b5   : > { %2083 = vst.msk [vmem:[#allocation3 + $0x5c] sm:$0xf] %vm2059_vm13, %v1983_v40 }
 0x1b6   : > { %7378 = vst [vmem:[#allocation9_spill] sm:$0xff] %v5976_v61  ;;  %4680 = vmatmul.msk.bf16.vlgmr.msrb.gmra.mxu3 %vm2285_vm15, %v5979_v4 }
 0x1b7   : > { %1099 = vst.msk [vmem:[#allocation3 + $0xa0] sm:$0x3] %vm223_vm1, %v1058_v15 }
 0x1b8   : > { %1098 = vst.msk [vmem:[#allocation3 + $0x9c] sm:$0xf] %vm215_vm0, %v1057_v57  ;;  %v5991_v49 = vld.sshfl [vmem:[#allocation1 + $0x20] sm:$0xff pattern:$0x73625140]  ;;  %v1634_v1 = vpop.permute.xlu2 %1633  ;;  %v1985_v11 = vpop.permute.xlu0 %1984  ;;  %vm5998_vm0 = vmand %vm1717_vm5, %vm1718_vm6 }
 0x1b9   : > { %7379 = vst [vmem:[#allocation10_spill] sm:$0xff] %v5983_v46  ;;  %v1602_v13 = vpop.permute.xlu1 %1601  ;;  %v2869_v16 = vpop.f32.mrf.mxu2  ;;  %v3410_v48 = vpack.c.bf16 %v5991_v49, %v5991_v49 }
 0x1ba   : > { %7380 = vst [vmem:[#allocation11_spill] sm:$0xff] %v5986_v7  ;;  %v6015_v33 = vadd.f32 %v2869_v16, %v2538_v27 }
 0x1bb   : > { %3237 = vst [vmem:[#allocation1 + $0x2] ss:$4 sm:$0xff] %v5976_v61 }
 0x1bc   : > { %7381 = vst [vmem:[#allocation12_spill] sm:$0xff] %v5994_v20  ;;  %v6003_v59 = vld [vmem:[#allocation3 + $0x58] sm:$0xff]  ;;  %v6028_v12 = vrot.slane %v6015_v33, 2  ;;  %v6031_v24 = vrot.slane %v6015_v33, 6 }
 0x1bd   : > { %3238 = vst [vmem:[#allocation1 + $0x3] ss:$4 sm:$0xff] %v5983_v46  ;;  %v6005_v62 = vld [vmem:[#allocation3 + $0x58] sm:$0xff]  ;;  %v2262_v21 = vrot.slane %v6003_v59, 1  ;;  %4677 = vmatmul.msk.bf16.gmra.mxu1 %vm2285_vm15, %v6003_v59 }
 0x1be   : > { %3239 = vst [vmem:[#allocation1 + $0x20] ss:$4 sm:$0xff] %v5986_v7  ;;  %v1720_v38 = vld [vmem:[#allocation3 + $0xa0] sm:$0x3]  ;;  %v2763_v51 = vrot.slane %v6005_v62, 2 }
 0x1bf   : > { %1701 = vst.msk [vmem:[#allocation3 + $0x60] sm:$0xf] %vm1676_vm12, %v1602_v13  ;;  %v1721_v23 = vsel %vm5998_vm0, %v1634_v1, %v1720_v38  ;;  %v2263_v60 = vsel %vm2242_vm2, %v2260_v54, %v2262_v21 }
 0x1c0   : > { %2084 = vst.msk [vmem:[#allocation3 + $0x60] sm:$0xf] %vm2059_vm13, %v1985_v11  ;;  %v2764_v14 = vsel %vm2340_vm14, %v2761_v26, %v2763_v51  ;;  %4649 = vmatmul.msk.bf16.gmra.mxu0 %vm2285_vm15, %v2263_v60  ;;  %v1608_v37 = vpop.permute.xlu0 %1607  ;;  %v3409_v26 = vpack.c.bf16 %v5962_v29, %v5962_v29  ;;  %v2542_v29 = vpop.f32.mrf.mxu1 }
 0x1c1   : > { %3240 = vst [vmem:[#allocation1 + $0x21] ss:$4 sm:$0xff] %v5994_v20  ;;  %4770 = vmatmul.msk.bf16.gmra.mxu2 %vm2285_vm15, %v2764_v14  ;;  %v1987_v54 = vpop.permute.xlu1 %1986  ;;  %v2871_v34 = vpop.f32.mrf.mxu2  ;;  %v2543_v11 = vadd.f32 %v2542_v29, %v2373_v44 }
 0x1c2   : > { %7384 = vst [vmem:[#allocation13_spill] sm:$0xff] %v6015_v33  ;;  %v6049_v17 = vadd.f32 %v2871_v34, %v2540_v3  ;;  %v2375_v14 = vpop.f32.mrf.mxu0 }
 0x1c3   : > { %1722 = vst [vmem:[#allocation3 + $0xa0] sm:$0x3] %v1721_v23 }
 0x1c4   : > { %7385 = vst [vmem:[#allocation14_spill] sm:$0xff] %v6028_v12  ;;  %v6034_v47 = vld.sshfl [vmem:[#allocation1] sm:$0xff pattern:$0x73625140]  ;;  %v6054_v31 = vrot.slane %v6049_v17, 2  ;;  %v6064_v1 = vrot.slane %v6049_v17, 6 }
 0x1c5   : > { %7386 = vst [vmem:[#allocation15_spill] sm:$0xff] %v6031_v24  ;;  %v3411_v59 = vpack.c.bf16 %v6034_v47, %v6034_v47 }
 0x1c6   : > { %3241 = vst [vmem:[#allocation1 + $0x22] ss:$4 sm:$0xff] %v6015_v33  ;;  %4681 = vmatmul.msk.bf16.gmra.mxu3 %vm2285_vm15, %v5801_v32 }
 0x1c7   : > { %3441 = vst.msk [vmem:[%s5888_s7 + $0x4] sm:$0xf] %vm3439_vm4, %v3408_v41 }
 0x1c8   : > { %3242 = vst [vmem:[#allocation1 + $0x23] ss:$4 sm:$0xff] %v6028_v12  ;;  %v1632_v57 = vpop.permute.xlu0 %1631 }
 0x1c9   : > { %3245 = vst [vmem:[#allocation1] ss:$4 sm:$0xff] %v6031_v24  ;;  %v1989_v58 = vpop.permute.xlu1 %1988  ;;  %v2874_v27 = vpop.f32.mrf.mxu2 }
 0x1ca   : > { %1704 = vst.msk [vmem:[#allocation3 + $0x6c] sm:$0xf] %vm1676_vm12, %v1608_v37  ;;  %v1726_v40 = vld [vmem:[#allocation3 + $0xa0] sm:$0x2]  ;;  %v6072_v38 = vadd.f32 %v2874_v27, %v2543_v11  ;;  %v2544_v37 = vpop.f32.mrf.mxu1 }
 0x1cb   : > { %2087 = vst.msk [vmem:[#allocation3 + $0x6c] sm:$0xf] %vm2059_vm13, %v5971_v39  ;;  %v1727_v15 = vsel %vm1725_vm9, 0, %v1726_v40  ;;  %v6060_v39 = vrot.slane %v6049_v17, 4 }
 0x1cc   : > { %2085 = vst.msk [vmem:[#allocation3 + $0x64] sm:$0xf] %vm2059_vm13, %v1987_v54  ;;  %v6077_v5 = vrot.slane %v6072_v38, 2  ;;  %v6080_v23 = vrot.slane %v6072_v38, 4 }
 0x1cd   : > { %7387 = vst [vmem:[#allocation16_spill] sm:$0xff] %v6049_v17 }
 0x1ce   : > { %3442 = vst.msk [vmem:[%s5888_s7 + $0x8] sm:$0xf] %vm3439_vm4, %v3409_v26 }
 0x1cf   : > { %1728 = vst [vmem:[#allocation3 + $0xa0] sm:$0x2] %v1727_v15  ;;  %v3244_v13 = vld.sshfl [vmem:[#allocation1 + $0x20] sm:$0xff pattern:$0x73625140] }
 0x1d0   : > { %7388 = vst [vmem:[#allocation17_spill] sm:$0xff] %v6054_v31  ;;  %v3412_v62 = vpack.c.bf16 %v3244_v13, %v3244_v13 }
 0x1d1   : > { %2103 = vst.msk [vmem:[#allocation3 + $0xa0] sm:$0x2] %vm2102_vm10, %v4869_v0  ;;  %v2015_v54 = vpop.permute.xlu1 %2014  ;;  %v2876_v3 = vpop.f32.mrf.mxu2 }
 0x1d2   : > { %7389 = vst [vmem:[#allocation18_spill] sm:$0xff] %v6060_v39 }
 0x1d3   : > { %3246 = vst [vmem:[#allocation1 + $0x1] ss:$4 sm:$0xff] %v6049_v17  ;;  %v4811_v0 = vld [vmem:[#allocation3 + $0x60] sm:$0xff] }
 0x1d4   : > { %7390 = vst [vmem:[#allocation19_spill] sm:$0xff] %v6064_v1  ;;  %v4830_v28 = vld [vmem:[#allocation3 + $0x60] sm:$0xff]  ;;  %4678 = vmatmul.msk.bf16.gmra.mxu1 %vm2285_vm15, %v4811_v0  ;;  %v2264_v16 = vrot.slane %v4811_v0, 1 }
 0x1d5   : > { %3247 = vst [vmem:[#allocation1 + $0x2] ss:$4 sm:$0xff] %v6054_v31  ;;  %v2765_v41 = vrot.slane %v4830_v28, 2 }
 0x1d6   : > { %1716 = vst.msk [vmem:[#allocation3 + $0x9c] sm:$0xf] %vm1676_vm12, %v1632_v57  ;;  %v2265_v49 = vsel %vm2242_vm2, %v2262_v21, %v2264_v16  ;;  %v2017_v21 = vpop.permute.xlu0 %2016  ;;  %4682 = vmatmul.msk.bf16.gmra.mxu3 %vm2285_vm15, %v5803_v53  ;;  %v2378_v53 = vpop.f32.mrf.mxu0  ;;  %vm3671_vm12 = vcmask 64512  }
 0x1d7   : > { %2086 = vst.msk [vmem:[#allocation3 + $0x68] sm:$0xf] %vm2059_vm13, %v1989_v58  ;;  %v2766_v60 = vsel %vm2340_vm14, %v2763_v51, %v2765_v41  ;;  %4650 = vmatmul.msk.bf16.gmra.mxu0 %vm2285_vm15, %v2265_v49  ;;  %v2545_v51 = vadd.f32 %v2544_v37, %v2375_v14 }
 0x1d8   : > { %3248 = vst [vmem:[#allocation1 + $0x3] ss:$4 sm:$0xff] %v6060_v39  ;;  %4771 = vmatmul.msk.bf16.gmra.mxu2 %vm2285_vm15, %v2766_v60 }
 0x1d9   : > { %7391 = vst [vmem:[#allocation20_spill] sm:$0xff] %v6072_v38  ;;  %v6098_v34 = vadd.f32 %v2876_v3, %v2545_v51 }
 0x1da   : > { %3249 = vst [vmem:[#allocation1 + $0x20] ss:$4 sm:$0xff] %v6064_v1 }
 0x1db   : > { %7392 = vst [vmem:[#allocation21_spill] sm:$0xff] %v6077_v5  ;;  %v6105_v47 = vrot.slane %v6098_v34, 2  ;;  %v6108_v15 = vrot.slane %v6098_v34, 4  ;;  %v6114_v57 = vrot.slane %v6098_v34, 6 }
 0x1dc   : > { %7393 = vst [vmem:[#allocation22_spill] sm:$0xff] %v6080_v23 }
 0x1dd   : > { %3250 = vst [vmem:[#allocation1 + $0x21] ss:$4 sm:$0xff] %v6072_v38 }
 0x1de   : > { %3443 = vst.msk [vmem:[%s5888_s7 + $0xc] sm:$0xf] %vm3439_vm4, %v3410_v48  ;;  %v4812_v44 = vld [vmem:[#allocation3 + $0x68] sm:$0xff]  ;;  %v2547_v48 = vpop.f32.mrf.mxu1 }
 0x1df   : > { %3251 = vst [vmem:[#allocation1 + $0x22] ss:$4 sm:$0xff] %v6077_v5  ;;  %v3253_v26 = vld.sshfl [vmem:[#allocation1] sm:$0xff pattern:$0x73625140]  ;;  %v4831_v29 = vld [vmem:[#allocation3 + $0x68] sm:$0xff]  ;;  %v2548_v14 = vadd.f32 %v2547_v48, %v2378_v53 }
 0x1e0   : > { %3252 = vst [vmem:[#allocation1 + $0x23] ss:$4 sm:$0xff] %v6080_v23  ;;  %v3413_v40 = vpack.c.bf16 %v3253_v26, %v3253_v26  ;;  %v2266_v13 = vrot.slane %v4812_v44, 1  ;;  %v2767_v0 = vrot.slane %v4831_v29, 2 }
 0x1e1   : > { %2101 = vst.msk [vmem:[#allocation3 + $0xa0] sm:$0x1] %vm2100_vm11, %v2017_v21 }
 0x1e2   : > { %2099 = vst.msk [vmem:[#allocation3 + $0x9c] sm:$0xf] %vm2059_vm13, %v2015_v54  ;;  %v2267_v28 = vsel %vm2242_vm2, %v2264_v16, %v2266_v13  ;;  %v2768_v27 = vsel %vm2340_vm14, %v2765_v41, %v2767_v0  ;;  %v2380_v54 = vpop.f32.mrf.mxu0  ;;  %vm4403_vm13 = vcmask 58368  }
 0x1e3   : > { %7394 = vst [vmem:[#allocation23_spill] sm:$0xff] %v6098_v34  ;;  %v2879_v37 = vpop.f32.mrf.mxu2 }
 0x1e4   : > { %3444 = vst.msk [vmem:[%s5888_s7 + $0x10] sm:$0xf] %vm3439_vm4, %v3411_v59  ;;  %4679 = vmatmul.msk.bf16.gmra.mxu1 %vm2285_vm15, %v4812_v44  ;;  %v6130_v59 = vadd.f32 %v2879_v37, %v2548_v14  ;;  %v4833_v37 = vld [vmem:[#allocation3 + $0x78] sm:$0xff] }
 0x1e5   : > { %3445 = vst.msk [vmem:[%s5888_s7 + $0x14] sm:$0xf] %vm3439_vm4, %v3412_v62  ;;  %v4832_v62 = vld [vmem:[#allocation3 + $0x70] sm:$0xff] }
 0x1e6   : > { %7395 = vst [vmem:[#allocation24_spill] sm:$0xff] %v6105_v47  ;;  %4683 = vmatmul.msk.bf16.gmra.mxu3 %vm2285_vm15, %v5820_v35  ;;  %v6135_v16 = vrot.slane %v6130_v59, 2  ;;  %v6138_v41 = vrot.slane %v6130_v59, 4  ;;  %v6141_v21 = vrot.slane %v6130_v59, 6  ;;  %v2549_v51 = vpop.f32.mrf.mxu1  ;;  %v2268_v35 = vrot.slane %v5979_v4, 1  ;;  %v4834_v4 = vld [vmem:[#allocation3 + $0x80] sm:$0xff] }
 0x1e7   : > { %7396 = vst [vmem:[#allocation25_spill] sm:$0xff] %v6108_v15  ;;  %v3254_v58 = vld.sshfl [vmem:[#allocation1 + $0x20] sm:$0xff pattern:$0x73625140]  ;;  %4651 = vmatmul.msk.bf16.gmra.mxu0 %vm2285_vm15, %v2267_v28  ;;  %v2550_v26 = vadd.f32 %v2549_v51, %v2380_v54  ;;  %v2771_v54 = vrot.slane %v4833_v37, 2 }
 0x1e8   : > { %3255 = vst [vmem:[#allocation1] ss:$4 sm:$0xff] %v6098_v34  ;;  %v3414_v11 = vpack.c.bf16 %v3254_v58, %v3254_v58  ;;  %4772 = vmatmul.msk.bf16.gmra.mxu2 %vm2285_vm15, %v2768_v27  ;;  %v2269_v29 = vsel %vm2242_vm2, %v2266_v13, %v2268_v35  ;;  %v4835_v58 = vld [vmem:[#allocation3 + $0x88] sm:$0xff]  ;;  %v2271_v51 = vsel %vm2242_vm2, %v2268_v35, %v2270_v56 }
 0x1e9   : > { %7397 = vst [vmem:[#allocation26_spill] sm:$0xff] %v6114_v57  ;;  %v2775_v13 = vrot.slane %v4835_v58, 2 }
 0x1ea   : > { %3446 = vst.msk [vmem:[%s5888_s7 + $0x18] sm:$0xf] %vm3439_vm4, %v3413_v40  ;;  %v2769_v40 = vrot.slane %v4832_v62, 2  ;;  %v4836_v62 = vld [vmem:[#allocation3 + $0x90] sm:$0xff] }
 0x1eb   : > { %3256 = vst [vmem:[#allocation1 + $0x1] ss:$4 sm:$0xff] %v6105_v47  ;;  %v2881_v3 = vpop.f32.mrf.mxu2 }
 0x1ec   : > { %3257 = vst [vmem:[#allocation1 + $0x2] ss:$4 sm:$0xff] %v6108_v15  ;;  %v2955_v44 = vadd.f32 %v2881_v3, %v2550_v26  ;;  %v2772_v26 = vsel %vm2340_vm14, %v2769_v40, %v2771_v54 }
 0x1ed   : > { %3258 = vst [vmem:[#allocation1 + $0x3] ss:$4 sm:$0xff] %v6114_v57 }
 0x1ee   : > { %3447 = vst.msk [vmem:[%s5888_s7 + $0x1c] sm:$0xf] %vm3439_vm4, %v3414_v11  ;;  %v2770_v11 = vsel %vm2340_vm14, %v2767_v0, %v2769_v40  ;;  %v6150_v53 = vrot.slane %v2955_v44, 2  ;;  %v6152_v28 = vrot.slane %v2955_v44, 4  ;;  %v6154_v27 = vrot.slane %v2955_v44, 6 }
 0x1ef   : > { %7398 = vst [vmem:[#allocation27_spill] sm:$0xff] %v6130_v59  ;;  %v2777_v44 = vrot.slane %v4836_v62, 2 }
 0x1f0   : > { %7399 = vst [vmem:[#allocation28_spill] sm:$0xff] %v6135_v16 }
 0x1f1   : > { %7400 = vst [vmem:[#allocation29_spill] sm:$0xff] %v6138_v41  ;;  %v2778_v58 = vsel %vm2340_vm14, %v2775_v13, %v2777_v44 }
 0x1f2   : > { %7401 = vst [vmem:[#allocation30_spill] sm:$0xff] %v6141_v21 }
 0x1f3   : > { %3259 = vst [vmem:[#allocation1 + $0x20] ss:$4 sm:$0xff] %v6130_v59 }
 0x1f4   : > { %v3263_v49 = vld.sshfl [vmem:[#allocation1] sm:$0xff pattern:$0x73625140]  ;;  %3260 = vst [vmem:[#allocation1 + $0x21] ss:$4 sm:$0xff] %v6135_v16 }
 0x1f5   : > { %v3415_v60 = vpack.c.bf16 %v3263_v49, %v3263_v49  ;;  %3261 = vst [vmem:[#allocation1 + $0x22] ss:$4 sm:$0xff] %v6138_v41  ;;  %v2773_v49 = vrot.slane %v4834_v4, 2  ;;  %v2383_v4 = vpop.f32.mrf.mxu0 }
 0x1f6   : > { %3262 = vst [vmem:[#allocation1 + $0x23] ss:$4 sm:$0xff] %v6141_v21 }
 0x1f7   : > { %3448 = vst.msk [vmem:[%s5888_s7 + $0x20] sm:$0xf] %vm3439_vm4, %v3415_v60  ;;  %4652 = vmatmul.msk.bf16.gmra.mxu0 %vm2285_vm15, %v2269_v29  ;;  %v2776_v60 = vsel %vm2340_vm14, %v2773_v49, %v2775_v13  ;;  %v6165_v14 = vpop.f32.mrf.mxu3  ;;  %v2552_v29 = vpop.f32.mrf.mxu1  ;;  %v2774_v56 = vsel %vm2340_vm14, %v2771_v54, %v2773_v49  ;;  %v2648_v13 = vld [vmem:[#allocation3 + $0xa0] sm:$0x3] }
 0x1f8   : > { %7402 = vst [vmem:[#allocation31_spill] sm:$0xff] %v6150_v53  ;;  %4773 = vmatmul.msk.bf16.gmra.mxu2 %vm2285_vm15, %v2770_v11  ;;  %4776 = vmatmul.msk.bf16.vlgmr.msra.gmra.mxu3 %vm2285_vm15, %v2776_v60  ;;  %v2553_v21 = vadd.f32 %v2552_v29, %v2383_v4 }
 0x1f9   : > { %7403 = vst [vmem:[#allocation32_spill] sm:$0xff] %v6152_v28 }
 0x1fa   : > { %7404 = vst [vmem:[#allocation33_spill] sm:$0xff] %v6154_v27 }
 0x1fb   : > { %3265 = vst [vmem:[#allocation1] ss:$4 sm:$0xff] %v6150_v53 }
 0x1fc   : > { %3266 = vst [vmem:[#allocation1 + $0x1] ss:$4 sm:$0xff] %v6152_v28 }
 0x1fd   : > { %v3264_v48 = vld.sshfl [vmem:[#allocation1 + $0x20] sm:$0xff pattern:$0x73625140]  ;;  %3267 = vst [vmem:[#allocation1 + $0x2] ss:$4 sm:$0xff] %v6154_v27 }
 0x1fe   : > { %v3416_v0 = vpack.c.bf16 %v3264_v48, %v3264_v48  ;;  %v4837_v48 = vld [vmem:[#allocation3 + $0x98] sm:$0xff] }
 0x1ff   : > { %v6173_v3 = vpop.f32.mrf.mxu3  ;;  %v2554_v32 = vpop.f32.mrf.mxu1  ;;  %v2779_v40 = vrot.slane %v4837_v48, 2 }
 0x200   : > { %3449 = vst.msk [vmem:[%s5888_s7 + $0x24] sm:$0xf] %vm3439_vm4, %v3416_v0  ;;  %v2385_v0 = vpop.f32.mrf.mxu0 }
 0x201   : > { %v2780_v60 = vsel %vm2340_vm14, %v2777_v44, %v2779_v40 }
 0x207   : > { %4653 = vmatmul.msk.bf16.gmra.mxu0 %vm2285_vm15, %v2271_v51  ;;  %v2557_v37 = vpop.f32.mrf.mxu1  ;;  %v2725_v51 = vunpack.c.l.b16 %v2648_v13 }
 0x208   : > { %4774 = vmatmul.msk.bf16.gmra.mxu2 %vm2285_vm15, %v2772_v26  ;;  %4777 = vmatmul.msk.bf16.gmra.mxu3 %vm2285_vm15, %v2778_v58  ;;  %v6177_v11 = vpop.f32.mrf.mxu3 }
 0x209   : > { %v2744_v58 = vpack.c.b16 %v2725_v51, %v2725_v51 }
 0x20f   : > { %v2559_v41 = vpop.f32.mrf.mxu1 }
 0x210   : > { %v6181_v35 = vpop.f32.mrf.mxu3 }
 0x218   : > { %4775 = vmatmul.msk.bf16.gmra.mxu2 %vm2285_vm15, %v2774_v56  ;;  %4778 = vmatmul.msk.bf16.gmra.mxu3 %vm2285_vm15, %v2780_v60  ;;  %v2781_v56 = vrot.slane %v2744_v58, 2  ;;  %v2562_v58 = vpop.f32.mrf.mxu1 }
 0x219   : > { %v6185_v62 = vpop.f32.mrf.mxu3 }
 0x21a   : > { %v2782_v29 = vsel %vm2340_vm14, %v2779_v40, %v2781_v56 }
 0x21b   : > { %v2388_v26 = vpop.f32.mrf.mxu0 }
 0x220   : > { %v2564_v27 = vpop.f32.mrf.mxu1 }
 0x221   : > { %v6187_v54 = vpop.f32.mrf.mxu3 }
 0x222   : > { %v2884_v49 = vpop.f32.mrf.mxu2 }
 0x223   : > { %v6189_v16 = vadd.f32 %v2884_v49, %v2553_v21  ;;  %v2390_v48 = vpop.f32.mrf.mxu0  ;;  %v2555_v21 = vadd.f32 %v2554_v32, %v2385_v0  ;;  %v2558_v32 = vadd.f32 %v2557_v37, %v2388_v26 }
 0x224   : > { %v2560_v37 = vadd.f32 %v2559_v41, %v2390_v48 }
 0x225   : > { %7405 = vst [vmem:[#allocation34_spill] sm:$0xff] %v6189_v16  ;;  %v6192_v44 = vrot.slane %v6189_v16, 2  ;;  %v6195_v60 = vrot.slane %v6189_v16, 4  ;;  %v6198_v59 = vrot.slane %v6189_v16, 6 }
 0x226   : > { %3268 = vst [vmem:[#allocation1 + $0x3] ss:$4 sm:$0xff] %v6189_v16 }
 0x227   : > { %7406 = vst [vmem:[#allocation35_spill] sm:$0xff] %v6192_v44 }
 0x228   : > { %7407 = vst [vmem:[#allocation36_spill] sm:$0xff] %v6195_v60  ;;  %4779 = vmatmul.msk.bf16.gmra.mxu3 %vm2285_vm15, %v2782_v29 }
 0x229   : > { %7408 = vst [vmem:[#allocation37_spill] sm:$0xff] %v6198_v59  ;;  %v6208_v51 = vpop.f32.mrf.mxu3 }
 0x22a   : > { %3269 = vst [vmem:[#allocation1 + $0x20] ss:$4 sm:$0xff] %v6192_v44  ;;  %v2886_v4 = vpop.f32.mrf.mxu2 }
 0x22b   : > { %3270 = vst [vmem:[#allocation1 + $0x21] ss:$4 sm:$0xff] %v6195_v60  ;;  %v6206_v13 = vadd.f32 %v2886_v4, %v2555_v21  ;;  %v2393_v56 = vpop.f32.mrf.mxu0 }
 0x22c   : > { %3271 = vst [vmem:[#allocation1 + $0x22] ss:$4 sm:$0xff] %v6198_v59 }
 0x22d   : > { %7409 = vst [vmem:[#allocation38_spill] sm:$0xff] %v6206_v13  ;;  %v3273_v49 = vld.sshfl [vmem:[#allocation1] sm:$0xff pattern:$0x73625140]  ;;  %v6211_v16 = vrot.slane %v6206_v13, 4  ;;  %v6214_v40 = vrot.slane %v6206_v13, 6 }
 0x22e   : > { %3272 = vst [vmem:[#allocation1 + $0x23] ss:$4 sm:$0xff] %v6206_v13  ;;  %v3417_v29 = vpack.c.bf16 %v3273_v49, %v3273_v49 }
 0x22f   : > { %7410 = vst [vmem:[#allocation39_spill] sm:$0xff] %v6211_v16 }
 0x230   : > { %7411 = vst [vmem:[#allocation40_spill] sm:$0xff] %v6214_v40 }
 0x231   : > { %3275 = vst [vmem:[#allocation1] ss:$4 sm:$0xff] %v6211_v16  ;;  %v6221_v21 = vpop.f32.mrf.mxu3  ;;  %v2567_v16 = vpop.f32.mrf.mxu1 }
 0x232   : > { %3276 = vst [vmem:[#allocation1 + $0x1] ss:$4 sm:$0xff] %v6214_v40  ;;  %v2889_v0 = vpop.f32.mrf.mxu2 }
 0x233   : > { %3450 = vst.msk [vmem:[%s5888_s7 + $0x28] sm:$0xf] %vm3439_vm4, %v3417_v29  ;;  %v6223_v59 = vadd.f32 %v2889_v0, %v2558_v32  ;;  %v2395_v60 = vpop.f32.mrf.mxu0 }
 0x235   : > { %v3274_v4 = vld.sshfl [vmem:[#allocation1 + $0x20] sm:$0xff pattern:$0x73625140]  ;;  %7412 = vst [vmem:[#allocation41_spill] sm:$0xff] %v6223_v59  ;;  %v6226_v13 = vrot.slane %v6223_v59, 2  ;;  %v6229_v49 = vrot.slane %v6223_v59, 4 }
 0x236   : > { %v3418_v44 = vpack.c.bf16 %v3274_v4, %v3274_v4  ;;  %v6232_v40 = vrot.slane %v6223_v59, 6  ;;  %3277 = vst [vmem:[#allocation1 + $0x2] ss:$4 sm:$0xff] %v6223_v59 }
 0x237   : > { %7413 = vst [vmem:[#allocation42_spill] sm:$0xff] %v6226_v13 }
 0x238   : > { %7414 = vst [vmem:[#allocation43_spill] sm:$0xff] %v6229_v49 }
 0x239   : > { %7415 = vst [vmem:[#allocation44_spill] sm:$0xff] %v6232_v40  ;;  %v2592_v29 = vpop.f32.mrf.mxu3 }
 0x23a   : > { %3451 = vst.msk [vmem:[%s5888_s7 + $0x2c] sm:$0xf] %vm3439_vm4, %v3418_v44  ;;  %v2891_v26 = vpop.f32.mrf.mxu2  ;;  %v6243_v0 = vadd.f32 %v2592_v29, %v6165_v14 }
 0x23b   : > { %3278 = vst [vmem:[#allocation1 + $0x3] ss:$4 sm:$0xff] %v6226_v13  ;;  %v6240_v32 = vadd.f32 %v2891_v26, %v2560_v37  ;;  %v2563_v37 = vadd.f32 %v2562_v58, %v2393_v56 }
 0x23c   : > { %3279 = vst [vmem:[#allocation1 + $0x20] ss:$4 sm:$0xff] %v6229_v49 }
 0x23d   : > { %3280 = vst [vmem:[#allocation1 + $0x21] ss:$4 sm:$0xff] %v6232_v40  ;;  %v2398_v4 = vpop.f32.mrf.mxu0  ;;  %v6246_v59 = vrot.slane %v6240_v32, 2  ;;  %v6249_v44 = vrot.slane %v6240_v32, 6 }
 0x23e   : > { %7416 = vst [vmem:[#allocation45_spill] sm:$0xff] %v6240_v32 }
 0x23f   : > { %7417 = vst [vmem:[#allocation46_spill] sm:$0xff] %v6246_v59 }
 0x240   : > { %7418 = vst [vmem:[#allocation47_spill] sm:$0xff] %v6249_v44 }
 0x241   : > { %3281 = vst [vmem:[#allocation1 + $0x22] ss:$4 sm:$0xff] %v6240_v32  ;;  %v2594_v14 = vpop.f32.mrf.mxu3 }
 0x242   : > { %v3283_v41 = vld.sshfl [vmem:[#allocation1] sm:$0xff pattern:$0x73625140]  ;;  %3282 = vst [vmem:[#allocation1 + $0x23] ss:$4 sm:$0xff] %v6246_v59  ;;  %v6257_v29 = vadd.f32 %v2594_v14, %v6173_v3 }
 0x243   : > { %v3419_v48 = vpack.c.bf16 %v3283_v41, %v3283_v41  ;;  %3285 = vst [vmem:[#allocation1] ss:$4 sm:$0xff] %v6249_v44 }
 0x244   : > { %v2894_v26 = vpop.f32.mrf.mxu2 }
 0x245   : > { %3452 = vst.msk [vmem:[%s5888_s7 + $0x30] sm:$0xf] %vm3439_vm4, %v3419_v48  ;;  %v6259_v40 = vadd.f32 %v2894_v26, %v2563_v37  ;;  %v2400_v58 = vpop.f32.mrf.mxu0  ;;  %v2569_v48 = vpop.f32.mrf.mxu1  ;;  %v2565_v37 = vadd.f32 %v2564_v27, %v2395_v60 }
 0x247   : > { %7419 = vst [vmem:[#allocation48_spill] sm:$0xff] %v6259_v40  ;;  %v6262_v49 = vrot.slane %v6259_v40, 2  ;;  %v6265_v32 = vrot.slane %v6259_v40, 4  ;;  %v6268_v41 = vrot.slane %v6259_v40, 6 }
 0x248   : > { %3286 = vst [vmem:[#allocation1 + $0x1] ss:$4 sm:$0xff] %v6259_v40 }
 0x249   : > { %7420 = vst [vmem:[#allocation49_spill] sm:$0xff] %v6262_v49  ;;  %v3284_v56 = vld.sshfl [vmem:[#allocation1 + $0x20] sm:$0xff pattern:$0x73625140]  ;;  %v2597_v14 = vpop.f32.mrf.mxu3 }
 0x24a   : > { %7421 = vst [vmem:[#allocation50_spill] sm:$0xff] %v6265_v32  ;;  %v3420_v3 = vpack.c.bf16 %v3284_v56, %v3284_v56  ;;  %v6277_v59 = vadd.f32 %v2597_v14, %v6177_v11  ;;  %v2568_v11 = vadd.f32 %v2567_v16, %v2398_v4  ;;  %v2570_v4 = vadd.f32 %v2569_v48, %v2400_v58 }
 0x24b   : > { %7422 = vst [vmem:[#allocation51_spill] sm:$0xff] %v6268_v41 }
 0x24c   : > { %3287 = vst [vmem:[#allocation1 + $0x2] ss:$4 sm:$0xff] %v6262_v49  ;;  %v2896_v26 = vpop.f32.mrf.mxu2 }
 0x24d   : > { %3288 = vst [vmem:[#allocation1 + $0x3] ss:$4 sm:$0xff] %v6265_v32  ;;  %v6279_v40 = vadd.f32 %v2896_v26, %v2565_v37 }
 0x24e   : > { %3289 = vst [vmem:[#allocation1 + $0x20] ss:$4 sm:$0xff] %v6268_v41  ;;  %v2572_v41 = vpop.f32.mrf.mxu1 }
 0x24f   : > { %3453 = vst.msk [vmem:[%s5888_s7 + $0x34] sm:$0xf] %vm3439_vm4, %v3420_v3  ;;  %v6282_v44 = vrot.slane %v6279_v40, 2  ;;  %v6285_v56 = vrot.slane %v6279_v40, 4 }
 0x250   : > { %7423 = vst [vmem:[#allocation52_spill] sm:$0xff] %v6279_v40 }
 0x251   : > { %7424 = vst [vmem:[#allocation53_spill] sm:$0xff] %v6282_v44  ;;  %v2599_v14 = vpop.f32.mrf.mxu3 }
 0x252   : > { %7425 = vst [vmem:[#allocation54_spill] sm:$0xff] %v6285_v56  ;;  %v6293_v26 = vadd.f32 %v2599_v14, %v6181_v35 }
 0x253   : > { %3290 = vst [vmem:[#allocation1 + $0x21] ss:$4 sm:$0xff] %v6279_v40 }
 0x254   : > { %v3293_v27 = vld.sshfl [vmem:[#allocation1] sm:$0xff pattern:$0x73625140]  ;;  %3291 = vst [vmem:[#allocation1 + $0x22] ss:$4 sm:$0xff] %v6282_v44  ;;  %v2403_v60 = vpop.f32.mrf.mxu0 }
 0x255   : > { %3292 = vst [vmem:[#allocation1 + $0x23] ss:$4 sm:$0xff] %v6285_v56  ;;  %v3421_v3 = vpack.c.bf16 %v3293_v27, %v3293_v27 }
 0x257   : > { %3454 = vst.msk [vmem:[%s5888_s7 + $0x38] sm:$0xf] %vm3439_vm4, %v3421_v3 }
 0x25b   : > { %v2899_v37 = vpop.f32.mrf.mxu2 }
 0x25c   : > { %v6295_v32 = vadd.f32 %v2899_v37, %v2568_v11  ;;  %v3294_v16 = vld.sshfl [vmem:[#allocation1 + $0x20] sm:$0xff pattern:$0x73625140]  ;;  %v2405_v3 = vpop.f32.mrf.mxu0  ;;  %v2602_v11 = vpop.f32.mrf.mxu3 }
 0x25d   : > { %v3422_v35 = vpack.c.bf16 %v3294_v16, %v3294_v16  ;;  %v6313_v37 = vadd.f32 %v2602_v11, %v6185_v62  ;;  %v2573_v62 = vadd.f32 %v2572_v41, %v2403_v60 }
 0x25e   : > { %7426 = vst [vmem:[#allocation55_spill] sm:$0xff] %v6295_v32  ;;  %v6298_v40 = vrot.slane %v6295_v32, 2  ;;  %v6301_v44 = vrot.slane %v6295_v32, 4  ;;  %v6304_v27 = vrot.slane %v6295_v32, 6 }
 0x25f   : > { %3295 = vst [vmem:[#allocation1] ss:$4 sm:$0xff] %v6295_v32  ;;  %v2574_v32 = vpop.f32.mrf.mxu1 }
 0x260   : > { %7427 = vst [vmem:[#allocation56_spill] sm:$0xff] %v6298_v40  ;;  %v2575_v60 = vadd.f32 %v2574_v32, %v2405_v3 }
 0x261   : > { %7428 = vst [vmem:[#allocation57_spill] sm:$0xff] %v6301_v44 }
 0x262   : > { %7429 = vst [vmem:[#allocation58_spill] sm:$0xff] %v6304_v27 }
 0x263   : > { %3296 = vst [vmem:[#allocation1 + $0x1] ss:$4 sm:$0xff] %v6298_v40  ;;  %v2901_v14 = vpop.f32.mrf.mxu2 }
 0x264   : > { %3297 = vst [vmem:[#allocation1 + $0x2] ss:$4 sm:$0xff] %v6301_v44  ;;  %v6315_v56 = vadd.f32 %v2901_v14, %v2570_v4  ;;  %v6330_v4 = vpop.f32.mrf.mxu3 }
 0x265   : > { %3298 = vst [vmem:[#allocation1 + $0x3] ss:$4 sm:$0xff] %v6304_v27  ;;  %v2408_v27 = vpop.f32.mrf.mxu0 }
 0x266   : > { %3455 = vst.msk [vmem:[%s5888_s7 + $0x3c] sm:$0xf] %vm3439_vm4, %v3422_v35  ;;  %v6318_v40 = vrot.slane %v6315_v56, 2  ;;  %v6321_v16 = vrot.slane %v6315_v56, 4  ;;  %v6324_v58 = vrot.slane %v6315_v56, 6 }
 0x267   : > { %7430 = vst [vmem:[#allocation59_spill] sm:$0xff] %v6315_v56  ;;  %v2577_v49 = vpop.f32.mrf.mxu1 }
 0x268   : > { %7431 = vst [vmem:[#allocation60_spill] sm:$0xff] %v6318_v40 }
 0x269   : > { %7432 = vst [vmem:[#allocation61_spill] sm:$0xff] %v6321_v16 }
 0x26a   : > { %7433 = vst [vmem:[#allocation62_spill] sm:$0xff] %v6324_v58 }
 0x26b   : > { %3299 = vst [vmem:[#allocation1 + $0x20] ss:$4 sm:$0xff] %v6315_v56  ;;  %v2904_v11 = vpop.f32.mrf.mxu2 }
 0x26c   : > { %3300 = vst [vmem:[#allocation1 + $0x21] ss:$4 sm:$0xff] %v6318_v40  ;;  %v3303_v48 = vld.sshfl [vmem:[#allocation1] sm:$0xff pattern:$0x73625140]  ;;  %v2964_v14 = vadd.f32 %v2904_v11, %v2573_v62  ;;  %v6343_v62 = vpop.f32.mrf.mxu3 }
 0x26d   : > { %3301 = vst [vmem:[#allocation1 + $0x22] ss:$4 sm:$0xff] %v6321_v16  ;;  %v3423_v35 = vpack.c.bf16 %v3303_v48, %v3303_v48  ;;  %v2410_v32 = vpop.f32.mrf.mxu0 }
 0x26e   : > { %3302 = vst [vmem:[#allocation1 + $0x23] ss:$4 sm:$0xff] %v6324_v58  ;;  %v6334_v44 = vrot.slane %v2964_v14, 2  ;;  %v6336_v56 = vrot.slane %v2964_v14, 4  ;;  %v6338_v40 = vrot.slane %v2964_v14, 6 }
 0x26f   : > { %3456 = vst.msk [vmem:[%s5888_s7 + $0x40] sm:$0xf] %vm3439_vm4, %v3423_v35  ;;  %v2579_v3 = vpop.f32.mrf.mxu1 }
 0x270   : > { %7434 = vst [vmem:[#allocation63_spill] sm:$0xff] %v6334_v44 }
 0x271   : > { %7435 = vst [vmem:[#allocation64_spill] sm:$0xff] %v6336_v56 }
 0x272   : > { %7436 = vst [vmem:[#allocation65_spill] sm:$0xff] %v6338_v40 }
 0x273   : > { %3305 = vst [vmem:[#allocation1] ss:$4 sm:$0xff] %v6334_v44  ;;  %v2906_v35 = vpop.f32.mrf.mxu2 }
 0x274   : > { %3306 = vst [vmem:[#allocation1 + $0x1] ss:$4 sm:$0xff] %v6336_v56  ;;  %v6345_v11 = vadd.f32 %v2906_v35, %v2575_v60  ;;  %v2609_v60 = vpop.f32.mrf.mxu3 }
 0x275   : > { %v3304_v41 = vld.sshfl [vmem:[#allocation1 + $0x20] sm:$0xff pattern:$0x73625140]  ;;  %3307 = vst [vmem:[#allocation1 + $0x2] ss:$4 sm:$0xff] %v6338_v40  ;;  %v6363_v35 = vadd.f32 %v2609_v60, %v6221_v21 }
 0x276   : > { %v3424_v48 = vpack.c.bf16 %v3304_v41, %v3304_v41  ;;  %7437 = vst [vmem:[#allocation66_spill] sm:$0xff] %v6345_v11  ;;  %v6350_v14 = vrot.slane %v6345_v11, 2  ;;  %v6353_v58 = vrot.slane %v6345_v11, 4  ;;  %v6356_v16 = vrot.slane %v6345_v11, 6 }
 0x277   : > { %3308 = vst [vmem:[#allocation1 + $0x3] ss:$4 sm:$0xff] %v6345_v11  ;;  %v2578_v41 = vadd.f32 %v2577_v49, %v2408_v27  ;;  %v2413_v49 = vpop.f32.mrf.mxu0  ;;  %v2580_v27 = vadd.f32 %v2579_v3, %v2410_v32  ;;  %v2582_v21 = vpop.f32.mrf.mxu1 }
 0x278   : > { %3457 = vst.msk [vmem:[%s5888_s7 + $0x44] sm:$0xf] %vm3439_vm4, %v3424_v48 }
 0x279   : > { %7438 = vst [vmem:[#allocation67_spill] sm:$0xff] %v6350_v14 }
 0x27a   : > { %7439 = vst [vmem:[#allocation68_spill] sm:$0xff] %v6353_v58 }
 0x27b   : > { %7440 = vst [vmem:[#allocation69_spill] sm:$0xff] %v6356_v16  ;;  %v2909_v48 = vpop.f32.mrf.mxu2 }
 0x27c   : > { %3309 = vst [vmem:[#allocation1 + $0x20] ss:$4 sm:$0xff] %v6350_v14  ;;  %v6365_v40 = vadd.f32 %v2909_v48, %v2578_v41 }
 0x27d   : > { %3310 = vst [vmem:[#allocation1 + $0x21] ss:$4 sm:$0xff] %v6353_v58 }
 0x27e   : > { %3311 = vst [vmem:[#allocation1 + $0x22] ss:$4 sm:$0xff] %v6356_v16  ;;  %v3313_v56 = vld.sshfl [vmem:[#allocation1] sm:$0xff pattern:$0x73625140]  ;;  %v6368_v11 = vrot.slane %v6365_v40, 4  ;;  %v2924_v16 = vpop.f32.mrf.mxu3 }
 0x27f   : > { %7441 = vst [vmem:[#allocation70_spill] sm:$0xff] %v6365_v40  ;;  %v6371_v14 = vrot.slane %v6365_v40, 6  ;;  %v3425_v58 = vpack.c.bf16 %v3313_v56, %v3313_v56  ;;  %v2415_v3 = vpop.f32.mrf.mxu0 }
 0x280   : > { %7442 = vst [vmem:[#allocation71_spill] sm:$0xff] %v6368_v11 }
 0x281   : > { %7443 = vst [vmem:[#allocation72_spill] sm:$0xff] %v6371_v14 }
 0x282   : > { %3312 = vst [vmem:[#allocation1 + $0x23] ss:$4 sm:$0xff] %v6365_v40 }
 0x283   : > { %3315 = vst [vmem:[#allocation1] ss:$4 sm:$0xff] %v6368_v11  ;;  %v2911_v41 = vpop.f32.mrf.mxu2 }
 0x284   : > { %3316 = vst [vmem:[#allocation1 + $0x1] ss:$4 sm:$0xff] %v6371_v14  ;;  %v6378_v60 = vadd.f32 %v2911_v41, %v2580_v27  ;;  %v2584_v14 = vpop.f32.mrf.mxu1 }
 0x285   : > { %3458 = vst.msk [vmem:[%s5888_s7 + $0x48] sm:$0xf] %vm3439_vm4, %v3425_v58  ;;  %v2583_v58 = vadd.f32 %v2582_v21, %v2413_v49 }
 0x286   : > { %7444 = vst [vmem:[#allocation73_spill] sm:$0xff] %v6378_v60  ;;  %v6381_v44 = vrot.slane %v6378_v60, 2  ;;  %v6384_v56 = vrot.slane %v6378_v60, 4  ;;  %v6387_v40 = vrot.slane %v6378_v60, 6  ;;  %v2926_v49 = vpop.f32.mrf.mxu3 }
 0x287   : > { %3317 = vst [vmem:[#allocation1 + $0x2] ss:$4 sm:$0xff] %v6378_v60 }
 0x288   : > { %7445 = vst [vmem:[#allocation74_spill] sm:$0xff] %v6381_v44 }
 0x289   : > { %v3314_v48 = vld.sshfl [vmem:[#allocation1 + $0x20] sm:$0xff pattern:$0x73625140]  ;;  %7446 = vst [vmem:[#allocation75_spill] sm:$0xff] %v6384_v56 }
 0x28a   : > { %7447 = vst [vmem:[#allocation76_spill] sm:$0xff] %v6387_v40  ;;  %v3426_v32 = vpack.c.bf16 %v3314_v48, %v3314_v48 }
 0x28b   : > { %3318 = vst [vmem:[#allocation1 + $0x3] ss:$4 sm:$0xff] %v6381_v44  ;;  %v2914_v27 = vpop.f32.mrf.mxu2 }
 0x28c   : > { %3319 = vst [vmem:[#allocation1 + $0x20] ss:$4 sm:$0xff] %v6384_v56  ;;  %v6395_v41 = vadd.f32 %v2914_v27, %v2583_v58  ;;  %v2418_v27 = vpop.f32.mrf.mxu0 }
 0x28d   : > { %3320 = vst [vmem:[#allocation1 + $0x21] ss:$4 sm:$0xff] %v6387_v40  ;;  %v2585_v40 = vadd.f32 %v2584_v14, %v2415_v3 }
 0x28e   : > { %3459 = vst.msk [vmem:[%s5888_s7 + $0x4c] sm:$0xf] %vm3439_vm4, %v3426_v32  ;;  %v6398_v11 = vrot.slane %v6395_v41, 2  ;;  %v6401_v48 = vrot.slane %v6395_v41, 6 }
 0x28f   : > { %7448 = vst [vmem:[#allocation77_spill] sm:$0xff] %v6395_v41 }
 0x290   : > { %7449 = vst [vmem:[#allocation78_spill] sm:$0xff] %v6398_v11 }
 0x291   : > { %7450 = vst [vmem:[#allocation79_spill] sm:$0xff] %v6401_v48 }
 0x292   : > { %3321 = vst [vmem:[#allocation1 + $0x22] ss:$4 sm:$0xff] %v6395_v41  ;;  %v3323_v56 = vld.sshfl [vmem:[#allocation1] sm:$0xff pattern:$0x73625140] }
 0x293   : > { %3322 = vst [vmem:[#allocation1 + $0x23] ss:$4 sm:$0xff] %v6398_v11  ;;  %v3427_v21 = vpack.c.bf16 %v3323_v56, %v3323_v56  ;;  %v2916_v32 = vpop.f32.mrf.mxu2  ;;  %v2587_v56 = vpop.f32.mrf.mxu1 }
 0x294   : > { %3325 = vst [vmem:[#allocation1] ss:$4 sm:$0xff] %v6401_v48  ;;  %v6408_v58 = vadd.f32 %v2916_v32, %v2585_v40  ;;  %v2929_v40 = vpop.f32.mrf.mxu3 }
 0x295   : > { %3460 = vst.msk [vmem:[%s5888_s7 + $0x50] sm:$0xf] %vm3439_vm4, %v3427_v21  ;;  %v2588_v21 = vadd.f32 %v2587_v56, %v2418_v27 }
 0x296   : > { %7451 = vst [vmem:[#allocation80_spill] sm:$0xff] %v6408_v58  ;;  %v6411_v44 = vrot.slane %v6408_v58, 2  ;;  %v6414_v41 = vrot.slane %v6408_v58, 4  ;;  %v6417_v60 = vrot.slane %v6408_v58, 6 }
 0x297   : > { %3326 = vst [vmem:[#allocation1 + $0x1] ss:$4 sm:$0xff] %v6408_v58 }
 0x298   : > { %7452 = vst [vmem:[#allocation81_spill] sm:$0xff] %v6411_v44 }
 0x299   : > { %7453 = vst [vmem:[#allocation82_spill] sm:$0xff] %v6414_v41 }
 0x29a   : > { %7454 = vst [vmem:[#allocation83_spill] sm:$0xff] %v6417_v60  ;;  %v3324_v14 = vld.sshfl [vmem:[#allocation1 + $0x20] sm:$0xff pattern:$0x73625140] }
 0x29b   : > { %3327 = vst [vmem:[#allocation1 + $0x2] ss:$4 sm:$0xff] %v6411_v44  ;;  %v3428_v3 = vpack.c.bf16 %v3324_v14, %v3324_v14  ;;  %v2919_v32 = vpop.f32.mrf.mxu2  ;;  %v2420_v14 = vpop.f32.mrf.mxu0 }
 0x29c   : > { %3328 = vst [vmem:[#allocation1 + $0x3] ss:$4 sm:$0xff] %v6414_v41  ;;  %v6425_v11 = vadd.f32 %v2919_v32, %v2588_v21  ;;  %v2589_v27 = vpop.f32.mrf.mxu1  ;;  %v6439_v32 = vadd.f32 %v2924_v16, %v6243_v0 }
 0x29d   : > { %3329 = vst [vmem:[#allocation1 + $0x20] ss:$4 sm:$0xff] %v6417_v60  ;;  %v2590_v60 = vadd.f32 %v2589_v27, %v2420_v14 }
 0x29e   : > { %3461 = vst.msk [vmem:[%s5888_s7 + $0x54] sm:$0xf] %vm3439_vm4, %v3428_v3  ;;  %v6428_v48 = vrot.slane %v6425_v11, 2  ;;  %v6431_v58 = vrot.slane %v6425_v11, 4  ;;  %v2931_v3 = vpop.f32.mrf.mxu3  ;;  %v6452_v14 = vrot.slane %v6439_v32, 4  ;;  %v6459_v16 = vrot.slane %v6439_v32, 6 }
 0x29f   : > { %7455 = vst [vmem:[#allocation84_spill] sm:$0xff] %v6425_v11 }
 0x2a0   : > { %7456 = vst [vmem:[#allocation85_spill] sm:$0xff] %v6428_v48 }
 0x2a1   : > { %7457 = vst [vmem:[#allocation86_spill] sm:$0xff] %v6431_v58 }
 0x2a2   : > { %3330 = vst [vmem:[#allocation1 + $0x21] ss:$4 sm:$0xff] %v6425_v11 }
 0x2a3   : > { %v3333_v41 = vld.sshfl [vmem:[#allocation1] sm:$0xff pattern:$0x73625140]  ;;  %3331 = vst [vmem:[#allocation1 + $0x22] ss:$4 sm:$0xff] %v6428_v48  ;;  %v2921_v21 = vpop.f32.mrf.mxu2  ;;  %v6448_v48 = vrot.slane %v6439_v32, 2 }
 0x2a4   : > { %3332 = vst [vmem:[#allocation1 + $0x23] ss:$4 sm:$0xff] %v6431_v58  ;;  %v3429_v56 = vpack.c.bf16 %v3333_v41, %v3333_v41  ;;  %v6441_v44 = vadd.f32 %v2921_v21, %v2590_v60  ;;  %v6469_v21 = vadd.f32 %v2929_v40, %v6277_v59  ;;  %v6487_v59 = vadd.f32 %v2931_v3, %v6293_v26 }
 0x2a5   : > { %7458 = vst [vmem:[#allocation87_spill] sm:$0xff] %v6439_v32 }
 0x2a6   : > { %3462 = vst.msk [vmem:[%s5888_s7 + $0x58] sm:$0xf] %vm3439_vm4, %v3429_v56  ;;  %v6444_v11 = vrot.slane %v6441_v44, 2  ;;  %v6456_v0 = vrot.slane %v6441_v44, 4  ;;  %v6463_v60 = vrot.slane %v6441_v44, 6  ;;  %v2934_v56 = vpop.f32.mrf.mxu3 }
 0x2a7   : > { %3335 = vst [vmem:[#allocation1] ss:$4 sm:$0xff] %v6441_v44  ;;  %v6500_v26 = vadd.f32 %v2934_v56, %v6313_v37  ;;  %v6530_v56 = vrot.slane %v6487_v59, 6 }
 0x2a8   : > { %7459 = vst [vmem:[#allocation88_spill] sm:$0xff] %v6444_v11 }
 0x2a9   : > { %7460 = vst [vmem:[#allocation89_spill] sm:$0xff] %v6448_v48  ;;  %v6516_v37 = vrot.slane %v6500_v26, 6 }
 0x2aa   : > { %3336 = vst [vmem:[#allocation1 + $0x1] ss:$4 sm:$0xff] %v6444_v11 }
 0x2ab   : > { %v3334_v41 = vld.sshfl [vmem:[#allocation1 + $0x20] sm:$0xff pattern:$0x73625140]  ;;  %7461 = vst [vmem:[#allocation90_spill] sm:$0xff] %v6452_v14 }
 0x2ac   : > { %3339 = vst [vmem:[#allocation1 + $0x20] ss:$4 sm:$0xff] %v6439_v32  ;;  %v3430_v27 = vpack.c.bf16 %v3334_v41, %v3334_v41  ;;  %v6476_v32 = vrot.slane %v6469_v21, 2 }
 0x2ad   : > { %7462 = vst [vmem:[#allocation91_spill] sm:$0xff] %v6456_v0 }
 0x2ae   : > { %7463 = vst [vmem:[#allocation92_spill] sm:$0xff] %v6459_v16 }
 0x2af   : > { %3340 = vst [vmem:[#allocation1 + $0x21] ss:$4 sm:$0xff] %v6448_v48  ;;  %v2973_v48 = vadd.f32 %v2926_v49, %v6257_v29 }
 0x2b0   : > { %3341 = vst [vmem:[#allocation1 + $0x22] ss:$4 sm:$0xff] %v6452_v14  ;;  %v6479_v14 = vrot.slane %v6469_v21, 4 }
 0x2b1   : > { %3342 = vst [vmem:[#allocation1 + $0x23] ss:$4 sm:$0xff] %v6459_v16  ;;  %v6482_v16 = vrot.slane %v6469_v21, 6  ;;  %v6489_v29 = vrot.slane %v2973_v48, 2  ;;  %v6492_v49 = vrot.slane %v2973_v48, 4  ;;  %v6495_v58 = vrot.slane %v2973_v48, 6 }
 0x2b2   : > { %3337 = vst [vmem:[#allocation1 + $0x2] ss:$4 sm:$0xff] %v6456_v0  ;;  %v6511_v48 = vrot.slane %v6500_v26, 4 }
 0x2b3   : > { %3338 = vst [vmem:[#allocation1 + $0x3] ss:$4 sm:$0xff] %v6463_v60 }
 0x2b4   : > { %3463 = vst.msk [vmem:[%s5888_s7 + $0x5c] sm:$0xf] %vm3439_vm4, %v3430_v27  ;;  %v2936_v27 = vpop.f32.mrf.mxu3 }
 0x2b5   : > { %7464 = vst [vmem:[#allocation93_spill] sm:$0xff] %v6476_v32 }
 0x2b6   : > { %7465 = vst [vmem:[#allocation94_spill] sm:$0xff] %v6479_v14 }
 0x2b7   : > { %7466 = vst [vmem:[#allocation95_spill] sm:$0xff] %v6482_v16 }
 0x2b8   : > { %v3344_v41 = vld.sshfl [vmem:[#allocation1 + $0x20] sm:$0xff pattern:$0x73625140]  ;;  %7467 = vst [vmem:[#allocation96_spill] sm:$0xff] %v6489_v29 }
 0x2b9   : > { %3349 = vst [vmem:[#allocation1 + $0x20] ss:$4 sm:$0xff] %v6476_v32  ;;  %v3432_v3 = vpack.c.bf16 %v3344_v41, %v3344_v41 }
 0x2ba   : > { %3350 = vst [vmem:[#allocation1 + $0x21] ss:$4 sm:$0xff] %v6479_v14  ;;  %v3343_v40 = vld.sshfl [vmem:[#allocation1] sm:$0xff pattern:$0x73625140] }
 0x2bb   : > { %3351 = vst [vmem:[#allocation1 + $0x22] ss:$4 sm:$0xff] %v6482_v16  ;;  %v3431_v14 = vpack.c.bf16 %v3343_v40, %v3343_v40  ;;  %v2605_v16 = vadd.f32 %v6330_v4, %v6187_v54  ;;  %v6524_v4 = vrot.slane %v6487_v59, 4 }
 0x2bc   : > { %3352 = vst [vmem:[#allocation1 + $0x23] ss:$4 sm:$0xff] %v6487_v59 }
 0x2bd   : > { %7468 = vst [vmem:[#allocation97_spill] sm:$0xff] %v6495_v58  ;;  %v6506_v32 = vadd.f32 %v2936_v27, %v2605_v16  ;;  %v2608_v16 = vadd.f32 %v6343_v62, %v6208_v51 }
 0x2be   : > { %3345 = vst [vmem:[#allocation1] ss:$4 sm:$0xff] %v6489_v29 }
 0x2bf   : > { %3346 = vst [vmem:[#allocation1 + $0x1] ss:$4 sm:$0xff] %v6492_v49  ;;  %v6521_v54 = vrot.slane %v6506_v32, 2 }
 0x2c0   : > { %3347 = vst [vmem:[#allocation1 + $0x2] ss:$4 sm:$0xff] %v6495_v58 }
 0x2c1   : > { %3348 = vst [vmem:[#allocation1 + $0x3] ss:$4 sm:$0xff] %v6469_v21 }
 0x2c2   : > { %3464 = vst.msk [vmem:[%s5888_s7 + $0x60] sm:$0xf] %vm3439_vm4, %v3431_v14  ;;  %v2939_v14 = vpop.f32.mrf.mxu3 }
 0x2c3   : > { %7469 = vst [vmem:[#allocation98_spill] sm:$0xff] %v6511_v48  ;;  %v3354_v40 = vld.sshfl [vmem:[#allocation1 + $0x20] sm:$0xff pattern:$0x73625140] }
 0x2c4   : > { %3465 = vst.msk [vmem:[%s5888_s7 + $0x64] sm:$0xf] %vm3439_vm4, %v3432_v3  ;;  %v3434_v3 = vpack.c.bf16 %v3354_v40, %v3354_v40 }
 0x2c5   : > { %7470 = vst [vmem:[#allocation99_spill] sm:$0xff] %v6516_v37 }
 0x2c6   : > { %3359 = vst [vmem:[#allocation1 + $0x20] ss:$4 sm:$0xff] %v6511_v48  ;;  %v6538_v48 = vadd.f32 %v2939_v14, %v2608_v16  ;;  %v6551_v14 = vrot.slane %v6506_v32, 6 }
 0x2c7   : > { %3360 = vst [vmem:[#allocation1 + $0x21] ss:$4 sm:$0xff] %v6516_v37  ;;  %v6536_v37 = vrot.slane %v6500_v26, 2 }
 0x2c8   : > { %7471 = vst [vmem:[#allocation100_spill] sm:$0xff] %v6524_v4  ;;  %v3353_v41 = vld.sshfl [vmem:[#allocation1] sm:$0xff pattern:$0x73625140]  ;;  %v6547_v51 = vrot.slane %v6538_v48, 6 }
 0x2c9   : > { %3361 = vst [vmem:[#allocation1 + $0x22] ss:$4 sm:$0xff] %v6506_v32  ;;  %v3433_v27 = vpack.c.bf16 %v3353_v41, %v3353_v41 }
 0x2ca   : > { %7472 = vst [vmem:[#allocation101_spill] sm:$0xff] %v6530_v56 }
 0x2cb   : > { %3362 = vst [vmem:[#allocation1 + $0x23] ss:$4 sm:$0xff] %v6521_v54 }
 0x2cc   : > { %3355 = vst [vmem:[#allocation1] ss:$4 sm:$0xff] %v6524_v4 }
 0x2cd   : > { %3356 = vst [vmem:[#allocation1 + $0x1] ss:$4 sm:$0xff] %v6530_v56 }
 0x2ce   : > { %7473 = vst [vmem:[#allocation102_spill] sm:$0xff] %v6538_v48 }
 0x2cf   : > { %3357 = vst [vmem:[#allocation1 + $0x2] ss:$4 sm:$0xff] %v6500_v26 }
 0x2d0   : > { %3358 = vst [vmem:[#allocation1 + $0x3] ss:$4 sm:$0xff] %v6536_v37 }
 0x2d1   : > { %3466 = vst.msk [vmem:[%s5888_s7 + $0x68] sm:$0xf] %vm3439_vm4, %v3433_v27  ;;  %v6557_v27 = vrot.slane %v6538_v48, 2 }
 0x2d2   : > { %3467 = vst.msk [vmem:[%s5888_s7 + $0x6c] sm:$0xf] %vm3439_vm4, %v3434_v3  ;;  %v3364_v62 = vld.sshfl [vmem:[#allocation1 + $0x20] sm:$0xff pattern:$0x73625140]  ;;  %v6563_v3 = vrot.slane %v6538_v48, 4 }
 0x2d3   : > { %7474 = vst [vmem:[#allocation103_spill] sm:$0xff] %v6547_v51  ;;  %v3436_v40 = vpack.c.bf16 %v3364_v62, %v3364_v62 }
 0x2d4   : > { %3369 = vst [vmem:[#allocation1 + $0x20] ss:$4 sm:$0xff] %v6547_v51 }
 0x2d5   : > { %7475 = vst [vmem:[#allocation104_spill] sm:$0xff] %v6551_v14 }
 0x2d6   : > { %3469 = vst.msk [vmem:[%s5888_s7 + $0x74] sm:$0xf] %vm3439_vm4, %v3436_v40 }
 0x2d7   : > { %v3363_v16 = vld.sshfl [vmem:[#allocation1] sm:$0xff pattern:$0x73625140]  ;;  %7476 = vst [vmem:[#allocation105_spill] sm:$0xff] %v6557_v27 }
 0x2d8   : > { %v3435_v41 = vpack.c.bf16 %v3363_v16, %v3363_v16  ;;  %3365 = vst [vmem:[#allocation1] ss:$4 sm:$0xff] %v6551_v14  ;;  %v2941_v16 = vpop.f32.mrf.mxu3 }
 0x2d9   : > { %3366 = vst [vmem:[#allocation1 + $0x1] ss:$4 sm:$0xff] %v6538_v48 }
 0x2da   : > { %3468 = vst.msk [vmem:[%s5888_s7 + $0x70] sm:$0xf] %vm3439_vm4, %v3435_v41  ;;  %v6574_v41 = vadd.f32 %v2941_v16, %v6363_v35 }
 0x2db   : > { %7477 = vst [vmem:[#allocation106_spill] sm:$0xff] %v6563_v3 }
 0x2dc   : > { %3367 = vst [vmem:[#allocation1 + $0x2] ss:$4 sm:$0xff] %v6557_v27  ;;  %v6577_v51 = vrot.slane %v6574_v41, 2 }
 0x2dd   : > { %3368 = vst [vmem:[#allocation1 + $0x3] ss:$4 sm:$0xff] %v6563_v3 }
 0x2de   : > { %7478 = vst [vmem:[#allocation107_spill] sm:$0xff] %v6574_v41 }
 0x2df   : > { %7479 = vst [vmem:[#allocation108_spill] sm:$0xff] %v6577_v51 }
 0x2e0   : > { %3370 = vst [vmem:[#allocation1 + $0x21] ss:$4 sm:$0xff] %v6574_v41 }
 0x2e1   : > { %3371 = vst [vmem:[#allocation1 + $0x22] ss:$4 sm:$0xff] %v6577_v51 }
 0x2e4   : > { %v3373_v62 = vld.sshfl [vmem:[#allocation1] sm:$0xff pattern:$0x73625140] }
 0x2e5   : > { %v3437_v40 = vpack.c.bf16 %v3373_v62, %v3373_v62  ;;  %3472 = vst [vmem:[#allocation1] ss:$4 sm:$0xff] %v5834_v22  ;;  %v6580_v62 = vrot.slane %v6574_v41, 4 }
 0x2e6   : > { %3474 = vst [vmem:[#allocation1 + $0x1] ss:$4 sm:$0xff] %v5837_v9 }
 0x2e7   : > { %3470 = vst.msk [vmem:[%s5888_s7 + $0x78] sm:$0xf] %vm3439_vm4, %v3437_v40 }
 0x2e8   : > { %3476 = vst [vmem:[#allocation1 + $0x2] ss:$4 sm:$0xff] %v5840_v50 }
 0x2e9   : > { %3478 = vst [vmem:[#allocation1 + $0x3] ss:$4 sm:$0xff] %v5843_v42 }
 0x2ea   : > { %7480 = vst [vmem:[#allocation109_spill] sm:$0xff] %v6580_v62 }
 0x2eb   : > { %3372 = vst [vmem:[#allocation1 + $0x23] ss:$4 sm:$0xff] %v6580_v62 }
 0x2f0   : > { %v6585_v40 = vld.sshfl [vmem:[#allocation1] sm:$0xff pattern:$0x73625140] }
 0x2f1   : > { %3489 = vst [vmem:[#allocation1] ss:$4 sm:$0xff] %v5904_v36 }
 0x2f2   : > { %3490 = vst [vmem:[#allocation1 + $0x1] ss:$4 sm:$0xff] %v5909_v52  ;;  %v3374_v35 = vld.sshfl [vmem:[#allocation1 + $0x20] sm:$0xff pattern:$0x73625140] }
 0x2f3   : > { %3491 = vst [vmem:[#allocation1 + $0x2] ss:$4 sm:$0xff] %v5912_v25  ;;  %v3438_v16 = vpack.c.bf16 %v3374_v35, %v3374_v35 }
 0x2f4   : > { %3492 = vst [vmem:[#allocation1 + $0x3] ss:$4 sm:$0xff] %v5919_v6 }
 0x2f5   : > { %3480 = vst [vmem:[#allocation1 + $0x20] ss:$4 sm:$0xff] %v5856_v10 }
 0x2f6   : > { %3482 = vst [vmem:[#allocation1 + $0x21] ss:$4 sm:$0xff] %v5861_v8 }
 0x2f7   : > { %3471 = vst.msk [vmem:[%s5888_s7 + $0x7c] sm:$0xf] %vm3439_vm4, %v3438_v16 }
 0x2f8   : > { %3484 = vst [vmem:[#allocation1 + $0x22] ss:$4 sm:$0xff] %v5864_v2 }
 0x2f9   : > { %3486 = vst [vmem:[#allocation1 + $0x23] ss:$4 sm:$0xff] %v5867_v55 }
 0x2fb   : > { %v6596_v42 = vld.sshfl [vmem:[#allocation1] sm:$0xff pattern:$0x73625140] }
 0x2fc   : > { %3499 = vst [vmem:[#allocation1] ss:$4 sm:$0xff] %v5956_v43 }
 0x2fd   : > { %3500 = vst [vmem:[#allocation1 + $0x1] ss:$4 sm:$0xff] %v5965_v30  ;;  %v7514_v30 = vld [vmem:[#allocation59_spill] sm:$0xff] }
 0x2fe   : > { %3501 = vst [vmem:[#allocation1 + $0x2] ss:$4 sm:$0xff] %v5976_v61 }
 0x2ff   : > { %3502 = vst [vmem:[#allocation1 + $0x3] ss:$4 sm:$0xff] %v5983_v46 }
 0x300   : > { %v6603_v35 = vld.sshfl [vmem:[#allocation1 + $0x20] sm:$0xff pattern:$0x73625140] }
 0x301   : > { %3493 = vst [vmem:[#allocation1 + $0x20] ss:$4 sm:$0xff] %v5925_v45 }
 0x302   : > { %3494 = vst [vmem:[#allocation1 + $0x21] ss:$4 sm:$0xff] %v5928_v19 }
 0x303   : > { %3495 = vst [vmem:[#allocation1 + $0x22] ss:$4 sm:$0xff] %v5936_v63  ;;  %v7524_v63 = vld [vmem:[#allocation69_spill] sm:$0xff] }
 0x304   : > { %3496 = vst [vmem:[#allocation1 + $0x23] ss:$4 sm:$0xff] %v5947_v18 }
 0x306   : > { %v6608_v16 = vld.sshfl [vmem:[#allocation1] sm:$0xff pattern:$0x73625140] }
 0x307   : > { %3509 = vst [vmem:[#allocation1] ss:$4 sm:$0xff] %v6031_v24  ;;  %v7493_v24 = vld [vmem:[#allocation38_spill] sm:$0xff] }
 0x308   : > { %3510 = vst [vmem:[#allocation1 + $0x1] ss:$4 sm:$0xff] %v6049_v17  ;;  %v7486_v17 = vld [vmem:[#allocation30_spill] sm:$0xff] }
 0x309   : > { %3511 = vst [vmem:[#allocation1 + $0x2] ss:$4 sm:$0xff] %v6054_v31 }
 0x30a   : > { %3512 = vst [vmem:[#allocation1 + $0x3] ss:$4 sm:$0xff] %v6060_v39 }
 0x30b   : > { %v6615_v46 = vld.sshfl [vmem:[#allocation1 + $0x20] sm:$0xff pattern:$0x73625140] }
 0x30c   : > { %3503 = vst [vmem:[#allocation1 + $0x20] ss:$4 sm:$0xff] %v5986_v7  ;;  %v7509_v7 = vld [vmem:[#allocation54_spill] sm:$0xff] }
 0x30d   : > { %3504 = vst [vmem:[#allocation1 + $0x21] ss:$4 sm:$0xff] %v5994_v20  ;;  %v7506_v20 = vld [vmem:[#allocation51_spill] sm:$0xff] }
 0x30e   : > { %3505 = vst [vmem:[#allocation1 + $0x22] ss:$4 sm:$0xff] %v6015_v33  ;;  %v7501_v33 = vld [vmem:[#allocation46_spill] sm:$0xff] }
 0x30f   : > { %3506 = vst [vmem:[#allocation1 + $0x23] ss:$4 sm:$0xff] %v6028_v12  ;;  %v7498_v12 = vld [vmem:[#allocation43_spill] sm:$0xff] }
 0x311   : > { %v6620_v61 = vld.sshfl [vmem:[#allocation1] sm:$0xff pattern:$0x73625140] }
 0x312   : > { %3519 = vst [vmem:[#allocation1] ss:$4 sm:$0xff] %v6098_v34  ;;  %v7483_v34 = vld [vmem:[#allocation27_spill] sm:$0xff] }
 0x313   : > { %3520 = vst [vmem:[#allocation1 + $0x1] ss:$4 sm:$0xff] %v6105_v47  ;;  %v7481_v47 = vld [vmem:[#allocation33_spill] sm:$0xff] }
 0x314   : > { %3521 = vst [vmem:[#allocation1 + $0x2] ss:$4 sm:$0xff] %v6108_v15  ;;  %v7482_v15 = vld [vmem:[#allocation34_spill] sm:$0xff] }
 0x315   : > { %3522 = vst [vmem:[#allocation1 + $0x3] ss:$4 sm:$0xff] %v6114_v57 }
 0x316   : > { %v6627_v39 = vld.sshfl [vmem:[#allocation1 + $0x20] sm:$0xff pattern:$0x73625140] }
 0x317   : > { %3513 = vst [vmem:[#allocation1 + $0x20] ss:$4 sm:$0xff] %v6064_v1  ;;  %v7484_v1 = vld [vmem:[#allocation28_spill] sm:$0xff] }
 0x318   : > { %3514 = vst [vmem:[#allocation1 + $0x21] ss:$4 sm:$0xff] %v6072_v38  ;;  %v7485_v38 = vld [vmem:[#allocation29_spill] sm:$0xff] }
 0x319   : > { %3515 = vst [vmem:[#allocation1 + $0x22] ss:$4 sm:$0xff] %v6077_v5 }
 0x31a   : > { %3516 = vst [vmem:[#allocation1 + $0x23] ss:$4 sm:$0xff] %v6080_v23  ;;  %v7487_v23 = vld [vmem:[#allocation39_spill] sm:$0xff] }
 0x31c   : > { %v6632_v31 = vld.sshfl [vmem:[#allocation1] sm:$0xff pattern:$0x73625140] }
 0x31d   : > { %3529 = vst [vmem:[#allocation1] ss:$4 sm:$0xff] %v6150_v53  ;;  %v7488_v53 = vld [vmem:[#allocation40_spill] sm:$0xff] }
 0x31e   : > { %3530 = vst [vmem:[#allocation1 + $0x1] ss:$4 sm:$0xff] %v6152_v28  ;;  %v7489_v28 = vld [vmem:[#allocation41_spill] sm:$0xff] }
 0x31f   : > { %3531 = vst [vmem:[#allocation1 + $0x2] ss:$4 sm:$0xff] %v7481_v47  ;;  %v7490_v47 = vld [vmem:[#allocation35_spill] sm:$0xff] }
 0x320   : > { %3532 = vst [vmem:[#allocation1 + $0x3] ss:$4 sm:$0xff] %v7482_v15 }
 0x321   : > { %v6639_v57 = vld.sshfl [vmem:[#allocation1 + $0x20] sm:$0xff pattern:$0x73625140] }
 0x322   : > { %3523 = vst [vmem:[#allocation1 + $0x20] ss:$4 sm:$0xff] %v7483_v34  ;;  %v7491_v34 = vld [vmem:[#allocation36_spill] sm:$0xff] }
 0x323   : > { %3524 = vst [vmem:[#allocation1 + $0x21] ss:$4 sm:$0xff] %v7484_v1  ;;  %v7492_v1 = vld [vmem:[#allocation37_spill] sm:$0xff] }
 0x324   : > { %3525 = vst [vmem:[#allocation1 + $0x22] ss:$4 sm:$0xff] %v7485_v38 }
 0x325   : > { %3526 = vst [vmem:[#allocation1 + $0x23] ss:$4 sm:$0xff] %v7486_v17  ;;  %v7494_v17 = vld [vmem:[#allocation47_spill] sm:$0xff] }
 0x327   : > { %v6644_v5 = vld.sshfl [vmem:[#allocation1] sm:$0xff pattern:$0x73625140] }
 0x328   : > { %3539 = vst [vmem:[#allocation1] ss:$4 sm:$0xff] %v7487_v23  ;;  %v7495_v23 = vld [vmem:[#allocation48_spill] sm:$0xff] }
 0x329   : > { %3540 = vst [vmem:[#allocation1 + $0x1] ss:$4 sm:$0xff] %v7488_v53  ;;  %v7496_v53 = vld [vmem:[#allocation49_spill] sm:$0xff] }
 0x32a   : > { %3541 = vst [vmem:[#allocation1 + $0x2] ss:$4 sm:$0xff] %v7489_v28  ;;  %v7497_v28 = vld [vmem:[#allocation50_spill] sm:$0xff] }
 0x32b   : > { %3542 = vst [vmem:[#allocation1 + $0x3] ss:$4 sm:$0xff] %v6226_v13 }
 0x32c   : > { %v6651_v15 = vld.sshfl [vmem:[#allocation1 + $0x20] sm:$0xff pattern:$0x73625140] }
 0x32d   : > { %3533 = vst [vmem:[#allocation1 + $0x20] ss:$4 sm:$0xff] %v7490_v47  ;;  %v7499_v47 = vld [vmem:[#allocation44_spill] sm:$0xff] }
 0x32e   : > { %3534 = vst [vmem:[#allocation1 + $0x21] ss:$4 sm:$0xff] %v7491_v34  ;;  %v7500_v34 = vld [vmem:[#allocation45_spill] sm:$0xff] }
 0x32f   : > { %3535 = vst [vmem:[#allocation1 + $0x22] ss:$4 sm:$0xff] %v7492_v1 }
 0x330   : > { %3536 = vst [vmem:[#allocation1 + $0x23] ss:$4 sm:$0xff] %v7493_v24  ;;  %v7502_v24 = vld [vmem:[#allocation55_spill] sm:$0xff] }
 0x332   : > { %v6656_v38 = vld.sshfl [vmem:[#allocation1] sm:$0xff pattern:$0x73625140] }
 0x333   : > { %3549 = vst [vmem:[#allocation1] ss:$4 sm:$0xff] %v7494_v17  ;;  %v7503_v17 = vld [vmem:[#allocation56_spill] sm:$0xff] }
 0x334   : > { %3550 = vst [vmem:[#allocation1 + $0x1] ss:$4 sm:$0xff] %v7495_v23  ;;  %v7504_v23 = vld [vmem:[#allocation57_spill] sm:$0xff] }
 0x335   : > { %3551 = vst [vmem:[#allocation1 + $0x2] ss:$4 sm:$0xff] %v7496_v53  ;;  %v7505_v53 = vld [vmem:[#allocation58_spill] sm:$0xff] }
 0x336   : > { %3552 = vst [vmem:[#allocation1 + $0x3] ss:$4 sm:$0xff] %v7497_v28 }
 0x337   : > { %v6663_v13 = vld.sshfl [vmem:[#allocation1 + $0x20] sm:$0xff pattern:$0x73625140] }
 0x338   : > { %3543 = vst [vmem:[#allocation1 + $0x20] ss:$4 sm:$0xff] %v7498_v12  ;;  %v7507_v12 = vld [vmem:[#allocation52_spill] sm:$0xff] }
 0x339   : > { %3544 = vst [vmem:[#allocation1 + $0x21] ss:$4 sm:$0xff] %v7499_v47  ;;  %v7508_v47 = vld [vmem:[#allocation53_spill] sm:$0xff] }
 0x33a   : > { %3545 = vst [vmem:[#allocation1 + $0x22] ss:$4 sm:$0xff] %v7500_v34 }
 0x33b   : > { %3546 = vst [vmem:[#allocation1 + $0x23] ss:$4 sm:$0xff] %v7501_v33  ;;  %v7510_v33 = vld [vmem:[#allocation63_spill] sm:$0xff] }
 0x33d   : > { %v6668_v1 = vld.sshfl [vmem:[#allocation1] sm:$0xff pattern:$0x73625140] }
 0x33e   : > { %3559 = vst [vmem:[#allocation1] ss:$4 sm:$0xff] %v7502_v24  ;;  %v7511_v24 = vld [vmem:[#allocation64_spill] sm:$0xff] }
 0x33f   : > { %3560 = vst [vmem:[#allocation1 + $0x1] ss:$4 sm:$0xff] %v7503_v17  ;;  %v7512_v17 = vld [vmem:[#allocation65_spill] sm:$0xff] }
 0x340   : > { %3561 = vst [vmem:[#allocation1 + $0x2] ss:$4 sm:$0xff] %v7504_v23  ;;  %v7513_v23 = vld [vmem:[#allocation66_spill] sm:$0xff] }
 0x341   : > { %3562 = vst [vmem:[#allocation1 + $0x3] ss:$4 sm:$0xff] %v7505_v53 }
 0x342   : > { %v6675_v28 = vld.sshfl [vmem:[#allocation1 + $0x20] sm:$0xff pattern:$0x73625140] }
 0x343   : > { %3553 = vst [vmem:[#allocation1 + $0x20] ss:$4 sm:$0xff] %v7506_v20  ;;  %v7515_v20 = vld [vmem:[#allocation60_spill] sm:$0xff] }
 0x344   : > { %3554 = vst [vmem:[#allocation1 + $0x21] ss:$4 sm:$0xff] %v7507_v12  ;;  %v7516_v12 = vld [vmem:[#allocation61_spill] sm:$0xff] }
 0x345   : > { %3555 = vst [vmem:[#allocation1 + $0x22] ss:$4 sm:$0xff] %v7508_v47 }
 0x346   : > { %3556 = vst [vmem:[#allocation1 + $0x23] ss:$4 sm:$0xff] %v7509_v7  ;;  %v7517_v7 = vld [vmem:[#allocation62_spill] sm:$0xff] }
 0x348   : > { %v6680_v34 = vld.sshfl [vmem:[#allocation1] sm:$0xff pattern:$0x73625140] }
 0x349   : > { %3569 = vst [vmem:[#allocation1] ss:$4 sm:$0xff] %v7510_v33  ;;  %v7518_v33 = vld [vmem:[#allocation71_spill] sm:$0xff] }
 0x34a   : > { %3570 = vst [vmem:[#allocation1 + $0x1] ss:$4 sm:$0xff] %v7511_v24  ;;  %v7519_v24 = vld [vmem:[#allocation72_spill] sm:$0xff] }
 0x34b   : > { %3571 = vst [vmem:[#allocation1 + $0x2] ss:$4 sm:$0xff] %v7512_v17  ;;  %v3673_v17 = vsel %vm3671_vm12, %v6603_v35, 0.0  ;;  %v3679_v35 = vsel %vm3671_vm12, %v6608_v16, 0.0  ;;  %v3683_v16 = vsel %vm3671_vm12, %v6620_v61, 0.0  ;;  %v3687_v61 = vsel %vm3671_vm12, %v6632_v31, 0.0 }
 0x34c   : > { %3572 = vst [vmem:[#allocation1 + $0x3] ss:$4 sm:$0xff] %v7513_v23  ;;  %v3672_v23 = vsel %vm3671_vm12, %v6585_v40, 0.0  ;;  %v3677_v40 = vsel %vm3671_vm12, %v6615_v46, 0.0  ;;  %v3681_v46 = vsel %vm3671_vm12, %v6627_v39, 0.0  ;;  %v7535_v31 = vld [vmem:[#allocation84_spill] sm:$0xff] }
 0x34d   : > { %v6687_v53 = vld.sshfl [vmem:[#allocation1 + $0x20] sm:$0xff pattern:$0x73625140]  ;;  %v3674_v43 = vadd.f32 %v3673_v17, %v3672_v23  ;;  %v7526_v17 = vld [vmem:[#allocation79_spill] sm:$0xff]  ;;  %v7528_v23 = vld [vmem:[#allocation81_spill] sm:$0xff] }
 0x34e   : > { %3563 = vst [vmem:[#allocation1 + $0x20] ss:$4 sm:$0xff] %v7514_v30  ;;  %v7520_v30 = vld [vmem:[#allocation73_spill] sm:$0xff] }
 0x34f   : > { %3564 = vst [vmem:[#allocation1 + $0x21] ss:$4 sm:$0xff] %v7515_v20  ;;  %v7521_v20 = vld [vmem:[#allocation74_spill] sm:$0xff] }
 0x350   : > { %3565 = vst [vmem:[#allocation1 + $0x22] ss:$4 sm:$0xff] %v7516_v12  ;;  %v3675_v12 = vsel %vm3671_vm12, %v6596_v42, 0.0 }
 0x351   : > { %3566 = vst [vmem:[#allocation1 + $0x23] ss:$4 sm:$0xff] %v7517_v7  ;;  %v3676_v7 = vadd.f32 %v3675_v12, %v3674_v43  ;;  %v7527_v43 = vld [vmem:[#allocation80_spill] sm:$0xff] }
 0x353   : > { %v6692_v47 = vld.sshfl [vmem:[#allocation1] sm:$0xff pattern:$0x73625140]  ;;  %v3678_v42 = vadd.f32 %v3677_v40, %v3676_v7  ;;  %v7531_v40 = vld [vmem:[#allocation76_spill] sm:$0xff] }
 0x354   : > { %3579 = vst [vmem:[#allocation1] ss:$4 sm:$0xff] %v7518_v33  ;;  %v7522_v33 = vld [vmem:[#allocation67_spill] sm:$0xff] }
 0x355   : > { %3580 = vst [vmem:[#allocation1 + $0x1] ss:$4 sm:$0xff] %v7519_v24  ;;  %v7523_v24 = vld [vmem:[#allocation68_spill] sm:$0xff]  ;;  %v3680_v12 = vadd.f32 %v3679_v35, %v3678_v42  ;;  %v3685_v35 = vsel %vm3671_vm12, %v6639_v57, 0.0  ;;  %v3689_v57 = vsel %vm3671_vm12, %v6651_v15, 0.0  ;;  %v3693_v15 = vsel %vm3671_vm12, %v6663_v13, 0.0 }
 0x356   : > { %3581 = vst [vmem:[#allocation1 + $0x2] ss:$4 sm:$0xff] %v7520_v30  ;;  %v7525_v30 = vld [vmem:[#allocation70_spill] sm:$0xff] }
 0x357   : > { %3582 = vst [vmem:[#allocation1 + $0x3] ss:$4 sm:$0xff] %v7521_v20 }
 0x358   : > { %v6705_v18 = vld.sshfl [vmem:[#allocation1 + $0x20] sm:$0xff pattern:$0x73625140] }
 0x359   : > { %3573 = vst [vmem:[#allocation1 + $0x20] ss:$4 sm:$0xff] %v7522_v33 }
 0x35a   : > { %3574 = vst [vmem:[#allocation1 + $0x21] ss:$4 sm:$0xff] %v7523_v24  ;;  %v7529_v24 = vld [vmem:[#allocation82_spill] sm:$0xff] }
 0x35b   : > { %3575 = vst [vmem:[#allocation1 + $0x22] ss:$4 sm:$0xff] %v7524_v63  ;;  %v3682_v63 = vadd.f32 %v3681_v46, %v3680_v12  ;;  %v3691_v12 = vsel %vm3671_vm12, %v6644_v5, 0.0  ;;  %v3695_v5 = vsel %vm3671_vm12, %v6656_v38, 0.0  ;;  %v7540_v38 = vld [vmem:[#allocation90_spill] sm:$0xff] }
 0x35c   : > { %3576 = vst [vmem:[#allocation1 + $0x23] ss:$4 sm:$0xff] %v7525_v30  ;;  %v7530_v30 = vld [vmem:[#allocation75_spill] sm:$0xff] }
 0x35d   : > { %v3684_v7 = vadd.f32 %v3683_v16, %v3682_v63 }
 0x35e   : > { %v6714_v20 = vld.sshfl [vmem:[#allocation1] sm:$0xff pattern:$0x73625140] }
 0x35f   : > { %3589 = vst [vmem:[#allocation1] ss:$4 sm:$0xff] %v7526_v17  ;;  %v3686_v39 = vadd.f32 %v3685_v35, %v3684_v7  ;;  %v7536_v35 = vld [vmem:[#allocation85_spill] sm:$0xff] }
 0x360   : > { %3590 = vst [vmem:[#allocation1 + $0x1] ss:$4 sm:$0xff] %v7527_v43  ;;  %v7532_v43 = vld [vmem:[#allocation77_spill] sm:$0xff] }
 0x361   : > { %3591 = vst [vmem:[#allocation1 + $0x2] ss:$4 sm:$0xff] %v7528_v23  ;;  %v3688_v63 = vadd.f32 %v3687_v61, %v3686_v39  ;;  %v7534_v23 = vld [vmem:[#allocation83_spill] sm:$0xff] }
 0x362   : > { %3592 = vst [vmem:[#allocation1 + $0x3] ss:$4 sm:$0xff] %v7529_v24  ;;  %v7533_v24 = vld [vmem:[#allocation78_spill] sm:$0xff] }
 0x363   : > { %v6725_v33 = vld.sshfl [vmem:[#allocation1 + $0x20] sm:$0xff pattern:$0x73625140]  ;;  %v3690_v16 = vadd.f32 %v3689_v57, %v3688_v63  ;;  %v3697_v57 = vsel %vm3671_vm12, %v6675_v28, 0.0  ;;  %v3701_v28 = vsel %vm3671_vm12, %v6687_v53, 0.0 }
 0x364   : > { %3583 = vst [vmem:[#allocation1 + $0x20] ss:$4 sm:$0xff] %v7530_v30 }
 0x365   : > { %3584 = vst [vmem:[#allocation1 + $0x21] ss:$4 sm:$0xff] %v7531_v40  ;;  %v3692_v7 = vadd.f32 %v3691_v12, %v3690_v16  ;;  %v3699_v12 = vsel %vm3671_vm12, %v6668_v1, 0.0  ;;  %v7538_v16 = vld [vmem:[#allocation87_spill] sm:$0xff]  ;;  %v3703_v1 = vsel %vm3671_vm12, %v6680_v34, 0.0 }
 0x366   : > { %3585 = vst [vmem:[#allocation1 + $0x22] ss:$4 sm:$0xff] %v7532_v43 }
 0x367   : > { %3586 = vst [vmem:[#allocation1 + $0x23] ss:$4 sm:$0xff] %v7533_v24  ;;  %v3694_v61 = vadd.f32 %v3693_v15, %v3692_v7 }
 0x369   : > { %v6732_v42 = vld.sshfl [vmem:[#allocation1] sm:$0xff pattern:$0x73625140]  ;;  %v3696_v39 = vadd.f32 %v3695_v5, %v3694_v61 }
 0x36a   : > { %3599 = vst [vmem:[#allocation1] ss:$4 sm:$0xff] %v6441_v44 }
 0x36b   : > { %3600 = vst [vmem:[#allocation1 + $0x1] ss:$4 sm:$0xff] %v6444_v11  ;;  %v3698_v13 = vadd.f32 %v3697_v57, %v3696_v39  ;;  %v7542_v57 = vld [vmem:[#allocation93_spill] sm:$0xff] }
 0x36c   : > { %3601 = vst [vmem:[#allocation1 + $0x2] ss:$4 sm:$0xff] %v6456_v0  ;;  %v7537_v0 = vld [vmem:[#allocation86_spill] sm:$0xff] }
 0x36d   : > { %3602 = vst [vmem:[#allocation1 + $0x3] ss:$4 sm:$0xff] %v6463_v60  ;;  %v3700_v7 = vadd.f32 %v3699_v12, %v3698_v13  ;;  %v3705_v12 = vsel %vm3671_vm12, %v6705_v18, 0.0  ;;  %v3707_v13 = vsel %vm3671_vm12, %v6692_v47, 0.0  ;;  %v3709_v18 = vsel %vm3671_vm12, %v6725_v33, 0.0 }
 0x36e   : > { %v3588_v46 = vld.sshfl [vmem:[#allocation1 + $0x20] sm:$0xff pattern:$0x73625140]  ;;  %v3711_v47 = vsel %vm3671_vm12, %v6714_v20, 0.0 }
 0x36f   : > { %3593 = vst [vmem:[#allocation1 + $0x20] ss:$4 sm:$0xff] %v7534_v23  ;;  %v3702_v5 = vadd.f32 %v3701_v28, %v3700_v7 }
 0x370   : > { %3594 = vst [vmem:[#allocation1 + $0x21] ss:$4 sm:$0xff] %v7535_v31 }
 0x371   : > { %3595 = vst [vmem:[#allocation1 + $0x22] ss:$4 sm:$0xff] %v7536_v35  ;;  %v3704_v61 = vadd.f32 %v3703_v1, %v3702_v5 }
 0x372   : > { %3596 = vst [vmem:[#allocation1 + $0x23] ss:$4 sm:$0xff] %v7537_v0 }
 0x373   : > { %v3706_v53 = vadd.f32 %v3705_v12, %v3704_v61  ;;  %v7545_v61 = vld [vmem:[#allocation98_spill] sm:$0xff]  ;;  %v7546_v12 = vld [vmem:[#allocation99_spill] sm:$0xff] }
 0x374   : > { %v3607_v11 = vld.sshfl [vmem:[#allocation1] sm:$0xff pattern:$0x73625140] }
 0x375   : > { %3609 = vst [vmem:[#allocation1] ss:$4 sm:$0xff] %v6489_v29  ;;  %v7539_v29 = vld [vmem:[#allocation89_spill] sm:$0xff]  ;;  %v3708_v7 = vadd.f32 %v3707_v13, %v3706_v53  ;;  %v3713_v13 = vsel %vm3671_vm12, %v3588_v46, 0.0  ;;  %v3715_v53 = vsel %vm3671_vm12, %v6732_v42, 0.0 }
 0x376   : > { %3610 = vst [vmem:[#allocation1 + $0x1] ss:$4 sm:$0xff] %v6492_v49 }
 0x377   : > { %3611 = vst [vmem:[#allocation1 + $0x2] ss:$4 sm:$0xff] %v6495_v58  ;;  %v7541_v58 = vld [vmem:[#allocation92_spill] sm:$0xff]  ;;  %v3710_v28 = vadd.f32 %v3709_v18, %v3708_v7  ;;  %v3719_v7 = vsel %vm3671_vm12, %v3607_v11, 0.0 }
 0x378   : > { %3612 = vst [vmem:[#allocation1 + $0x3] ss:$4 sm:$0xff] %v6469_v21 }
 0x379   : > { %v3598_v63 = vld.sshfl [vmem:[#allocation1 + $0x20] sm:$0xff pattern:$0x73625140]  ;;  %v3712_v1 = vadd.f32 %v3711_v47, %v3710_v28 }
 0x37a   : > { %3603 = vst [vmem:[#allocation1 + $0x20] ss:$4 sm:$0xff] %v7538_v16 }
 0x37b   : > { %3604 = vst [vmem:[#allocation1 + $0x21] ss:$4 sm:$0xff] %v7539_v29  ;;  %v3714_v33 = vadd.f32 %v3713_v13, %v3712_v1 }
 0x37c   : > { %3605 = vst [vmem:[#allocation1 + $0x22] ss:$4 sm:$0xff] %v7540_v38 }
 0x37d   : > { %3606 = vst [vmem:[#allocation1 + $0x23] ss:$4 sm:$0xff] %v7541_v58  ;;  %v3716_v20 = vadd.f32 %v3715_v53, %v3714_v33 }
 0x37f   : > { %v3617_v15 = vld.sshfl [vmem:[#allocation1] sm:$0xff pattern:$0x73625140] }
 0x380   : > { %3619 = vst [vmem:[#allocation1] ss:$4 sm:$0xff] %v6524_v4  ;;  %v7544_v4 = vld [vmem:[#allocation95_spill] sm:$0xff]  ;;  %v3723_v46 = vsel %vm3671_vm12, %v3617_v15, 0.0 }
 0x381   : > { %3620 = vst [vmem:[#allocation1 + $0x1] ss:$4 sm:$0xff] %v6530_v56  ;;  %v7543_v56 = vld [vmem:[#allocation94_spill] sm:$0xff] }
 0x382   : > { %3621 = vst [vmem:[#allocation1 + $0x2] ss:$4 sm:$0xff] %v6500_v26 }
 0x383   : > { %3622 = vst [vmem:[#allocation1 + $0x3] ss:$4 sm:$0xff] %v6536_v37 }
 0x384   : > { %v3608_v39 = vld.sshfl [vmem:[#allocation1 + $0x20] sm:$0xff pattern:$0x73625140] }
 0x385   : > { %3613 = vst [vmem:[#allocation1 + $0x20] ss:$4 sm:$0xff] %v7542_v57  ;;  %v3721_v42 = vsel %vm3671_vm12, %v3608_v39, 0.0 }
 0x386   : > { %3614 = vst [vmem:[#allocation1 + $0x21] ss:$4 sm:$0xff] %v7543_v56 }
 0x387   : > { %3615 = vst [vmem:[#allocation1 + $0x22] ss:$4 sm:$0xff] %v7544_v4 }
 0x388   : > { %3616 = vst [vmem:[#allocation1 + $0x23] ss:$4 sm:$0xff] %v6487_v59 }
 0x38a   : > { %v3627_v34 = vld.sshfl [vmem:[#allocation1] sm:$0xff pattern:$0x73625140] }
 0x38b   : > { %3629 = vst [vmem:[#allocation1] ss:$4 sm:$0xff] %v6551_v14  ;;  %v3727_v11 = vsel %vm3671_vm12, %v3627_v34, 0.0 }
 0x38c   : > { %3630 = vst [vmem:[#allocation1 + $0x1] ss:$4 sm:$0xff] %v6538_v48 }
 0x38d   : > { %3631 = vst [vmem:[#allocation1 + $0x2] ss:$4 sm:$0xff] %v6557_v27  ;;  %v7547_v27 = vld [vmem:[#allocation103_spill] sm:$0xff] }
 0x38e   : > { %3632 = vst [vmem:[#allocation1 + $0x3] ss:$4 sm:$0xff] %v6563_v3  ;;  %v3717_v3 = vsel %vm3671_vm12, %v3598_v63, 0.0 }
 0x38f   : > { %v3618_v5 = vld.sshfl [vmem:[#allocation1 + $0x20] sm:$0xff pattern:$0x73625140]  ;;  %v3718_v18 = vadd.f32 %v3717_v3, %v3716_v20 }
 0x390   : > { %3623 = vst [vmem:[#allocation1 + $0x20] ss:$4 sm:$0xff] %v7545_v61  ;;  %v3725_v63 = vsel %vm3671_vm12, %v3618_v5, 0.0 }
 0x391   : > { %3624 = vst [vmem:[#allocation1 + $0x21] ss:$4 sm:$0xff] %v7546_v12  ;;  %v3720_v28 = vadd.f32 %v3719_v7, %v3718_v18 }
 0x392   : > { %3625 = vst [vmem:[#allocation1 + $0x22] ss:$4 sm:$0xff] %v6506_v32 }
 0x393   : > { %3626 = vst [vmem:[#allocation1 + $0x23] ss:$4 sm:$0xff] %v6521_v54  ;;  %v3722_v1 = vadd.f32 %v3721_v42, %v3720_v28 }
 0x395   : > { %v3724_v13 = vadd.f32 %v3723_v46, %v3722_v1  ;;  %v3637_v53 = vld.sshfl [vmem:[#allocation1] sm:$0xff pattern:$0x73625140] }
 0x396   : > { %v3731_v7 = vsel %vm3671_vm12, %v3637_v53, 0.0 }
 0x397   : > { %v3726_v3 = vadd.f32 %v3725_v63, %v3724_v13 }
 0x399   : > { %v3728_v33 = vadd.f32 %v3727_v11, %v3726_v3  ;;  %v7549_v11 = vld [vmem:[#allocation4_spill] sm:$0xff] }
 0x39a   : > { %v3628_v47 = vld.sshfl [vmem:[#allocation1 + $0x20] sm:$0xff pattern:$0x73625140] }
 0x39b   : > { %3633 = vst [vmem:[#allocation1 + $0x20] ss:$4 sm:$0xff] %v7547_v27  ;;  %v3729_v20 = vsel %vm3671_vm12, %v3628_v47, 0.0 }
 0x39c   : > { %3634 = vst [vmem:[#allocation1 + $0x21] ss:$4 sm:$0xff] %v6574_v41  ;;  %v3730_v18 = vadd.f32 %v3729_v20, %v3728_v33 }
 0x39d   : > { %3635 = vst [vmem:[#allocation1 + $0x22] ss:$4 sm:$0xff] %v6577_v51 }
 0x39e   : > { %3636 = vst [vmem:[#allocation1 + $0x23] ss:$4 sm:$0xff] %v6580_v62  ;;  %v3732_v39 = vadd.f32 %v3731_v7, %v3730_v18 }
 0x3a5   : > { %v3638_v51 = vld.sshfl [vmem:[#allocation1 + $0x20] sm:$0xff pattern:$0x73625140] }
 0x3a6   : > { %v3733_v15 = vsel %vm3671_vm12, %v3638_v51, 0.0 }
 0x3a7   : > { %v3734_v41 = vadd.f32 %v3733_v15, %v3732_v39 }
 0x3a9   : > { %v3735_v62 = vrot.slane %v3734_v41, 4 }
 0x3ab   : > { %v3736_v28 = vadd.f32 %v3735_v62, %v3734_v41 }
 0x3ad   : > { %v3737_v42 = vrot.slane %v3736_v28, 2 }
 0x3af   : > { %v3738_v46 = vadd.f32 %v3737_v42, %v3736_v28 }
 0x3b1   : > { %v3739_v5 = vrot.slane %v3738_v46, 1 }
 0x3b3   : > { %v6809_v1 = vadd.f32 %v3739_v5, %v3738_v46 }
 0x3b5   : > { %7548 = vst [vmem:[#allocation79_spill] sm:$0xff] %v6809_v1  ;;  %v6812_v34 = vmul.f32 0.00390625, %v6809_v1 }
 0x3b7   : > { %v6815_v47 = vrot.slane %v6812_v34, 2  ;;  %v6818_v13 = vrot.slane %v6812_v34, 4  ;;  %v6821_v63 = vrot.slane %v6812_v34, 6  ;;  %v3749_v51 = vsub.f32 %v5834_v22, %v6812_v34 }
 0x3b8   : > { %v3753_v53 = vsub.f32 %v5856_v10, %v6812_v34  ;;  %v3761_v46 = vsub.f32 %v5925_v45, %v6812_v34 }
 0x3b9   : > { %v3750_v41 = vsub.f32 %v5837_v9, %v6815_v47  ;;  %v3751_v62 = vsub.f32 %v5840_v50, %v6818_v13  ;;  %v3752_v3 = vsub.f32 %v7549_v11, %v6821_v63  ;;  %v3754_v33 = vsub.f32 %v5861_v8, %v6815_v47 }
 0x3ba   : > { %v3755_v20 = vsub.f32 %v5864_v2, %v6818_v13  ;;  %v3877_v7 = vmul.f32 %v3749_v51, %v3749_v51  ;;  %v3756_v22 = vsub.f32 %v5867_v55, %v6821_v63  ;;  %v3881_v50 = vmul.f32 %v3753_v53, %v3753_v53 }
 0x3bb   : > { %v3878_v9 = vmul.f32 %v3750_v41, %v3750_v41  ;;  %v3879_v18 = vmul.f32 %v3751_v62, %v3751_v62  ;;  %v3880_v39 = vmul.f32 %v3752_v3, %v3752_v3  ;;  %v3882_v15 = vmul.f32 %v3754_v33, %v3754_v33 }
 0x3bc   : > { %4133 = vst [vmem:[#allocation1] ss:$4 sm:$0xff] %v3877_v7  ;;  %v3883_v28 = vmul.f32 %v3755_v20, %v3755_v20  ;;  %v3884_v10 = vmul.f32 %v3756_v22, %v3756_v22  ;;  %v3757_v8 = vsub.f32 %v5904_v36, %v6812_v34  ;;  %v3758_v2 = vsub.f32 %v5909_v52, %v6815_v47  ;;  %v7550_v52 = vld [vmem:[#allocation5_spill] sm:$0xff]  ;;  %v7552_v20 = vld [vmem:[#allocation7_spill] sm:$0xff] }
 0x3bd   : > { %4135 = vst [vmem:[#allocation1 + $0x1] ss:$4 sm:$0xff] %v3878_v9  ;;  %v3759_v55 = vsub.f32 %v5912_v25, %v6818_v13  ;;  %v3760_v42 = vsub.f32 %v5919_v6, %v6821_v63  ;;  %v3762_v51 = vsub.f32 %v5928_v19, %v6815_v47  ;;  %v3763_v62 = vsub.f32 %v7550_v52, %v6818_v13  ;;  %v7551_v25 = vld [vmem:[#allocation6_spill] sm:$0xff]  ;;  %v7553_v9 = vld [vmem:[#allocation8_spill] sm:$0xff] }
 0x3be   : > { %4137 = vst [vmem:[#allocation1 + $0x2] ss:$4 sm:$0xff] %v3879_v18  ;;  %v3885_v5 = vmul.f32 %v3757_v8, %v3757_v8  ;;  %v3886_v36 = vmul.f32 %v3758_v2, %v3758_v2  ;;  %v3764_v3 = vsub.f32 %v7551_v25, %v6821_v63  ;;  %v3889_v6 = vmul.f32 %v3761_v46, %v3761_v46 }
 0x3bf   : > { %4139 = vst [vmem:[#allocation1 + $0x3] ss:$4 sm:$0xff] %v3880_v39  ;;  %v3887_v11 = vmul.f32 %v3759_v55, %v3759_v55  ;;  %v3888_v53 = vmul.f32 %v3760_v42, %v3760_v42  ;;  %v3890_v45 = vmul.f32 %v3762_v51, %v3762_v51  ;;  %v3891_v19 = vmul.f32 %v3763_v62, %v3763_v62  ;;  %v7554_v39 = vld [vmem:[#allocation9_spill] sm:$0xff]  ;;  %v7557_v55 = vld [vmem:[#allocation12_spill] sm:$0xff]  ;;  %v7559_v62 = vld [vmem:[#allocation14_spill] sm:$0xff] }
 0x3c0   : > { %4141 = vst [vmem:[#allocation1 + $0x20] ss:$4 sm:$0xff] %v3881_v50  ;;  %v3765_v7 = vsub.f32 %v7552_v20, %v6812_v34  ;;  %v3892_v22 = vmul.f32 %v3764_v3, %v3764_v3  ;;  %v3766_v18 = vsub.f32 %v7553_v9, %v6815_v47  ;;  %v3767_v50 = vsub.f32 %v7554_v39, %v6818_v13  ;;  %v7558_v51 = vld [vmem:[#allocation13_spill] sm:$0xff] }
 0x3c1   : > { %4143 = vst [vmem:[#allocation1 + $0x21] ss:$4 sm:$0xff] %v3882_v15  ;;  %v7555_v15 = vld [vmem:[#allocation10_spill] sm:$0xff]  ;;  %v3770_v42 = vsub.f32 %v7557_v55, %v6815_v47 }
 0x3c2   : > { %4145 = vst [vmem:[#allocation1 + $0x22] ss:$4 sm:$0xff] %v3883_v28  ;;  %v3768_v28 = vsub.f32 %v7555_v15, %v6821_v63  ;;  %v3893_v2 = vmul.f32 %v3765_v7, %v3765_v7  ;;  %v3894_v46 = vmul.f32 %v3766_v18, %v3766_v18  ;;  %v3895_v52 = vmul.f32 %v3767_v50, %v3767_v50  ;;  %v7562_v18 = vld [vmem:[#allocation17_spill] sm:$0xff]  ;;  %v7563_v50 = vld [vmem:[#allocation18_spill] sm:$0xff] }
 0x3c3   : > { %4147 = vst [vmem:[#allocation1 + $0x23] ss:$4 sm:$0xff] %v3884_v10  ;;  %v7556_v10 = vld [vmem:[#allocation11_spill] sm:$0xff]  ;;  %v3775_v39 = vsub.f32 %v7562_v18, %v6818_v13  ;;  %v3776_v15 = vsub.f32 %v7563_v50, %v6821_v63 }
 0x3c4   : > { %v3769_v8 = vsub.f32 %v7556_v10, %v6812_v34  ;;  %v3896_v25 = vmul.f32 %v3768_v28, %v3768_v28  ;;  %v7564_v28 = vld [vmem:[#allocation19_spill] sm:$0xff] }
 0x3c5   : > { %v3777_v10 = vsub.f32 %v7564_v28, %v6812_v34 }
 0x3c6   : > { %v6851_v41 = vld.sshfl [vmem:[#allocation1] sm:$0xff pattern:$0x73625140]  ;;  %v3897_v3 = vmul.f32 %v3769_v8, %v3769_v8 }
 0x3c7   : > { %4150 = vst [vmem:[#allocation1] ss:$4 sm:$0xff] %v3885_v5 }
 0x3c8   : > { %4151 = vst [vmem:[#allocation1 + $0x1] ss:$4 sm:$0xff] %v3886_v36  ;;  %v3771_v36 = vsub.f32 %v7558_v51, %v6818_v13  ;;  %v7566_v51 = vld [vmem:[#allocation21_spill] sm:$0xff] }
 0x3c9   : > { %4152 = vst [vmem:[#allocation1 + $0x2] ss:$4 sm:$0xff] %v3887_v11  ;;  %v3772_v11 = vsub.f32 %v7559_v62, %v6821_v63  ;;  %v7567_v62 = vld [vmem:[#allocation22_spill] sm:$0xff] }
 0x3ca   : > { %v6857_v33 = vld.sshfl [vmem:[#allocation1 + $0x20] sm:$0xff pattern:$0x73625140]  ;;  %4153 = vst [vmem:[#allocation1 + $0x3] ss:$4 sm:$0xff] %v3888_v53  ;;  %v3898_v53 = vmul.f32 %v3770_v42, %v3770_v42 }
 0x3cb   : > { %4154 = vst [vmem:[#allocation1 + $0x20] ss:$4 sm:$0xff] %v3889_v6  ;;  %v3900_v7 = vmul.f32 %v3772_v11, %v3772_v11  ;;  %v3780_v11 = vsub.f32 %v7567_v62, %v6821_v63 }
 0x3cc   : > { %4155 = vst [vmem:[#allocation1 + $0x21] ss:$4 sm:$0xff] %v3890_v45  ;;  %v3899_v45 = vmul.f32 %v3771_v36, %v3771_v36  ;;  %v3779_v36 = vsub.f32 %v7566_v51, %v6818_v13 }
 0x3cd   : > { %4156 = vst [vmem:[#allocation1 + $0x22] ss:$4 sm:$0xff] %v3891_v19  ;;  %v7560_v19 = vld [vmem:[#allocation15_spill] sm:$0xff] }
 0x3ce   : > { %4157 = vst [vmem:[#allocation1 + $0x23] ss:$4 sm:$0xff] %v3892_v22  ;;  %v3773_v20 = vsub.f32 %v7560_v19, %v6812_v34  ;;  %v7561_v22 = vld [vmem:[#allocation16_spill] sm:$0xff]  ;;  %v3907_v19 = vmul.f32 %v3779_v36, %v3779_v36 }
 0x3cf   : > { %v3774_v9 = vsub.f32 %v7561_v22, %v6815_v47  ;;  %v3908_v22 = vmul.f32 %v3780_v11, %v3780_v11 }
 0x3d0   : > { %v3901_v8 = vmul.f32 %v3773_v20, %v3773_v20  ;;  %v7568_v20 = vld [vmem:[#allocation23_spill] sm:$0xff] }
 0x3d1   : > { %v6871_v5 = vld.sshfl [vmem:[#allocation1] sm:$0xff pattern:$0x73625140]  ;;  %v3902_v42 = vmul.f32 %v3774_v9, %v3774_v9  ;;  %v7569_v9 = vld [vmem:[#allocation24_spill] sm:$0xff] }
 0x3d2   : > { %4160 = vst [vmem:[#allocation1] ss:$4 sm:$0xff] %v3893_v2  ;;  %v7565_v2 = vld [vmem:[#allocation20_spill] sm:$0xff]  ;;  %v3782_v18 = vsub.f32 %v7569_v9, %v6815_v47  ;;  %v7576_v9 = vld [vmem:[#allocation31_spill] sm:$0xff] }
 0x3d3   : > { %4161 = vst [vmem:[#allocation1 + $0x1] ss:$4 sm:$0xff] %v3894_v46  ;;  %v3778_v55 = vsub.f32 %v7565_v2, %v6815_v47 }
 0x3d4   : > { %4162 = vst [vmem:[#allocation1 + $0x2] ss:$4 sm:$0xff] %v3895_v52  ;;  %v3903_v52 = vmul.f32 %v3775_v39, %v3775_v39  ;;  %v7570_v39 = vld [vmem:[#allocation25_spill] sm:$0xff]  ;;  %v3910_v51 = vmul.f32 %v3782_v18, %v3782_v18  ;;  %v3789_v18 = vsub.f32 %v7576_v9, %v6812_v34 }
 0x3d5   : > { %v6877_v6 = vld.sshfl [vmem:[#allocation1 + $0x20] sm:$0xff pattern:$0x73625140]  ;;  %4163 = vst [vmem:[#allocation1 + $0x3] ss:$4 sm:$0xff] %v3896_v25  ;;  %v3904_v25 = vmul.f32 %v3776_v15, %v3776_v15  ;;  %v3783_v50 = vsub.f32 %v7570_v39, %v6818_v13 }
 0x3d6   : > { %4164 = vst [vmem:[#allocation1 + $0x20] ss:$4 sm:$0xff] %v3897_v3  ;;  %v3905_v3 = vmul.f32 %v3777_v10, %v3777_v10  ;;  %v7571_v15 = vld [vmem:[#allocation26_spill] sm:$0xff]  ;;  %v7572_v10 = vld [vmem:[#allocation27_spill] sm:$0xff] }
 0x3d7   : > { %4165 = vst [vmem:[#allocation1 + $0x21] ss:$4 sm:$0xff] %v3898_v53  ;;  %v3906_v53 = vmul.f32 %v3778_v55, %v3778_v55  ;;  %v3784_v28 = vsub.f32 %v7571_v15, %v6821_v63  ;;  %v7573_v55 = vld [vmem:[#allocation28_spill] sm:$0xff]  ;;  %v3911_v11 = vmul.f32 %v3783_v50, %v3783_v50 }
 0x3d8   : > { %4166 = vst [vmem:[#allocation1 + $0x22] ss:$4 sm:$0xff] %v3899_v45  ;;  %v7577_v50 = vld [vmem:[#allocation32_spill] sm:$0xff] }
 0x3d9   : > { %4167 = vst [vmem:[#allocation1 + $0x23] ss:$4 sm:$0xff] %v3900_v7  ;;  %v3781_v7 = vsub.f32 %v7568_v20, %v6812_v34  ;;  %v3790_v15 = vsub.f32 %v7577_v50, %v6815_v47 }
 0x3db   : > { %v3909_v2 = vmul.f32 %v3781_v7, %v3781_v7 }
 0x3dc   : > { %v6891_v46 = vld.sshfl [vmem:[#allocation1] sm:$0xff pattern:$0x73625140] }
 0x3dd   : > { %4170 = vst [vmem:[#allocation1] ss:$4 sm:$0xff] %v3901_v8  ;;  %v3785_v8 = vsub.f32 %v7572_v10, %v6812_v34 }
 0x3de   : > { %4171 = vst [vmem:[#allocation1 + $0x1] ss:$4 sm:$0xff] %v3902_v42  ;;  %v3786_v42 = vsub.f32 %v7573_v55, %v6815_v47  ;;  %v7580_v55 = vld [vmem:[#allocation35_spill] sm:$0xff] }
 0x3df   : > { %4172 = vst [vmem:[#allocation1 + $0x2] ss:$4 sm:$0xff] %v3903_v52  ;;  %v7574_v52 = vld [vmem:[#allocation29_spill] sm:$0xff] }
 0x3e0   : > { %v6897_v45 = vld.sshfl [vmem:[#allocation1 + $0x20] sm:$0xff pattern:$0x73625140]  ;;  %4173 = vst [vmem:[#allocation1 + $0x3] ss:$4 sm:$0xff] %v3904_v25  ;;  %v3787_v62 = vsub.f32 %v7574_v52, %v6818_v13  ;;  %v3914_v20 = vmul.f32 %v3786_v42, %v3786_v42  ;;  %v3793_v42 = vsub.f32 %v7580_v55, %v6812_v34  ;;  %v7581_v52 = vld [vmem:[#allocation36_spill] sm:$0xff] }
 0x3e1   : > { %4174 = vst [vmem:[#allocation1 + $0x20] ss:$4 sm:$0xff] %v3905_v3  ;;  %v7575_v25 = vld [vmem:[#allocation30_spill] sm:$0xff] }
 0x3e2   : > { %4175 = vst [vmem:[#allocation1 + $0x21] ss:$4 sm:$0xff] %v3906_v53  ;;  %v3788_v3 = vsub.f32 %v7575_v25, %v6821_v63  ;;  %v3912_v53 = vmul.f32 %v3784_v28, %v3784_v28  ;;  %v7578_v28 = vld [vmem:[#allocation33_spill] sm:$0xff] }
 0x3e3   : > { %4176 = vst [vmem:[#allocation1 + $0x22] ss:$4 sm:$0xff] %v3907_v19  ;;  %v3913_v19 = vmul.f32 %v3785_v8, %v3785_v8  ;;  %v3791_v10 = vsub.f32 %v7578_v28, %v6818_v13  ;;  %v7579_v8 = vld [vmem:[#allocation34_spill] sm:$0xff] }
 0x3e4   : > { %4177 = vst [vmem:[#allocation1 + $0x23] ss:$4 sm:$0xff] %v3908_v22  ;;  %v3915_v22 = vmul.f32 %v3787_v62, %v3787_v62  ;;  %v3916_v39 = vmul.f32 %v3788_v3, %v3788_v3  ;;  %v3794_v62 = vsub.f32 %v7581_v52, %v6815_v47  ;;  %v7582_v3 = vld [vmem:[#allocation37_spill] sm:$0xff] }
 0x3e6   : > { %v3922_v50 = vmul.f32 %v3794_v62, %v3794_v62 }
 0x3e7   : > { %v6911_v36 = vld.sshfl [vmem:[#allocation1] sm:$0xff pattern:$0x73625140] }
 0x3e8   : > { %4180 = vst [vmem:[#allocation1] ss:$4 sm:$0xff] %v3909_v2  ;;  %v3792_v2 = vsub.f32 %v7579_v8, %v6821_v63 }
 0x3e9   : > { %4181 = vst [vmem:[#allocation1 + $0x1] ss:$4 sm:$0xff] %v3910_v51  ;;  %v3917_v51 = vmul.f32 %v3789_v18, %v3789_v18 }
 0x3ea   : > { %4182 = vst [vmem:[#allocation1 + $0x2] ss:$4 sm:$0xff] %v3911_v11  ;;  %v3918_v11 = vmul.f32 %v3790_v15, %v3790_v15  ;;  %v3920_v9 = vmul.f32 %v3792_v2, %v3792_v2  ;;  %v7584_v15 = vld [vmem:[#allocation39_spill] sm:$0xff]  ;;  %v7586_v2 = vld [vmem:[#allocation41_spill] sm:$0xff] }
 0x3eb   : > { %v6917_v7 = vld.sshfl [vmem:[#allocation1 + $0x20] sm:$0xff pattern:$0x73625140]  ;;  %4183 = vst [vmem:[#allocation1 + $0x3] ss:$4 sm:$0xff] %v3912_v53  ;;  %v3795_v53 = vsub.f32 %v7582_v3, %v6818_v13  ;;  %v3797_v8 = vsub.f32 %v7584_v15, %v6812_v34  ;;  %v3799_v52 = vsub.f32 %v7586_v2, %v6818_v13 }
 0x3ec   : > { %4184 = vst [vmem:[#allocation1 + $0x20] ss:$4 sm:$0xff] %v3913_v19  ;;  %v3919_v19 = vmul.f32 %v3791_v10, %v3791_v10  ;;  %v7585_v10 = vld [vmem:[#allocation40_spill] sm:$0xff]  ;;  %v7591_v15 = vld [vmem:[#allocation46_spill] sm:$0xff] }
 0x3ed   : > { %4185 = vst [vmem:[#allocation1 + $0x21] ss:$4 sm:$0xff] %v3914_v20  ;;  %v7583_v20 = vld [vmem:[#allocation38_spill] sm:$0xff]  ;;  %v3923_v28 = vmul.f32 %v3795_v53, %v3795_v53  ;;  %v3925_v53 = vmul.f32 %v3797_v8, %v3797_v8 }
 0x3ee   : > { %4186 = vst [vmem:[#allocation1 + $0x22] ss:$4 sm:$0xff] %v3915_v22  ;;  %v3796_v22 = vsub.f32 %v7583_v20, %v6821_v63 }
 0x3ef   : > { %4187 = vst [vmem:[#allocation1 + $0x23] ss:$4 sm:$0xff] %v3916_v39  ;;  %v3921_v39 = vmul.f32 %v3793_v42, %v3793_v42  ;;  %v7587_v42 = vld [vmem:[#allocation42_spill] sm:$0xff] }
 0x3f0   : > { %v3924_v55 = vmul.f32 %v3796_v22, %v3796_v22  ;;  %v3800_v62 = vsub.f32 %v7587_v42, %v6821_v63 }
 0x3f2   : > { %v6931_v25 = vld.sshfl [vmem:[#allocation1] sm:$0xff pattern:$0x73625140] }
 0x3f3   : > { %4190 = vst [vmem:[#allocation1] ss:$4 sm:$0xff] %v3917_v51  ;;  %v3798_v51 = vsub.f32 %v7585_v10, %v6815_v47  ;;  %v3928_v10 = vmul.f32 %v3800_v62, %v3800_v62  ;;  %v7594_v62 = vld [vmem:[#allocation49_spill] sm:$0xff] }
 0x3f4   : > { %4191 = vst [vmem:[#allocation1 + $0x1] ss:$4 sm:$0xff] %v3918_v11  ;;  %v7588_v11 = vld [vmem:[#allocation43_spill] sm:$0xff] }
 0x3f5   : > { %4192 = vst [vmem:[#allocation1 + $0x2] ss:$4 sm:$0xff] %v3919_v19  ;;  %v3801_v3 = vsub.f32 %v7588_v11, %v6812_v34  ;;  %v7589_v19 = vld [vmem:[#allocation44_spill] sm:$0xff]  ;;  %v3926_v22 = vmul.f32 %v3798_v51, %v3798_v51  ;;  %v7592_v51 = vld [vmem:[#allocation47_spill] sm:$0xff] }
 0x3f6   : > { %v6937_v18 = vld.sshfl [vmem:[#allocation1 + $0x20] sm:$0xff pattern:$0x73625140]  ;;  %4193 = vst [vmem:[#allocation1 + $0x3] ss:$4 sm:$0xff] %v3920_v9  ;;  %v3802_v20 = vsub.f32 %v7589_v19, %v6815_v47  ;;  %v3805_v19 = vsub.f32 %v7592_v51, %v6812_v34 }
 0x3f7   : > { %4194 = vst [vmem:[#allocation1 + $0x20] ss:$4 sm:$0xff] %v3921_v39  ;;  %v7590_v39 = vld [vmem:[#allocation45_spill] sm:$0xff]  ;;  %v3929_v2 = vmul.f32 %v3801_v3, %v3801_v3  ;;  %v7595_v3 = vld [vmem:[#allocation50_spill] sm:$0xff] }
 0x3f8   : > { %4195 = vst [vmem:[#allocation1 + $0x21] ss:$4 sm:$0xff] %v3922_v50  ;;  %v3803_v50 = vsub.f32 %v7590_v39, %v6818_v13  ;;  %v3930_v42 = vmul.f32 %v3802_v20, %v3802_v20  ;;  %v3808_v20 = vsub.f32 %v7595_v3, %v6821_v63  ;;  %v7596_v39 = vld [vmem:[#allocation51_spill] sm:$0xff] }
 0x3f9   : > { %4196 = vst [vmem:[#allocation1 + $0x22] ss:$4 sm:$0xff] %v3923_v28  ;;  %v3927_v28 = vmul.f32 %v3799_v52, %v3799_v52  ;;  %v7593_v52 = vld [vmem:[#allocation48_spill] sm:$0xff] }
 0x3fa   : > { %4197 = vst [vmem:[#allocation1 + $0x23] ss:$4 sm:$0xff] %v3924_v55  ;;  %v3804_v55 = vsub.f32 %v7591_v15, %v6821_v63  ;;  %v3931_v11 = vmul.f32 %v3803_v50, %v3803_v50  ;;  %v3809_v50 = vsub.f32 %v7596_v39, %v6812_v34  ;;  %v7597_v15 = vld [vmem:[#allocation52_spill] sm:$0xff] }
 0x3fc   : > { %v3932_v1 = vmul.f32 %v3804_v55, %v3804_v55  ;;  %v3937_v3 = vmul.f32 %v3809_v50, %v3809_v50  ;;  %v7603_v50 = vld [vmem:[#allocation58_spill] sm:$0xff] }
 0x3fd   : > { %v6951_v9 = vld.sshfl [vmem:[#allocation1] sm:$0xff pattern:$0x73625140] }
 0x3fe   : > { %4200 = vst [vmem:[#allocation1] ss:$4 sm:$0xff] %v3925_v53  ;;  %v3806_v53 = vsub.f32 %v7593_v52, %v6815_v47 }
 0x3ff   : > { %4201 = vst [vmem:[#allocation1 + $0x1] ss:$4 sm:$0xff] %v3926_v22  ;;  %v3807_v22 = vsub.f32 %v7594_v62, %v6818_v13  ;;  %v3936_v62 = vmul.f32 %v3808_v20, %v3808_v20  ;;  %v7602_v20 = vld [vmem:[#allocation57_spill] sm:$0xff] }
 0x400   : > { %4202 = vst [vmem:[#allocation1 + $0x2] ss:$4 sm:$0xff] %v3927_v28  ;;  %v3933_v28 = vmul.f32 %v3805_v19, %v3805_v19  ;;  %v3934_v55 = vmul.f32 %v3806_v53, %v3806_v53  ;;  %v7600_v53 = vld [vmem:[#allocation55_spill] sm:$0xff] }
 0x401   : > { %v6957_v8 = vld.sshfl [vmem:[#allocation1 + $0x20] sm:$0xff pattern:$0x73625140]  ;;  %4203 = vst [vmem:[#allocation1 + $0x3] ss:$4 sm:$0xff] %v3928_v10  ;;  %v3810_v10 = vsub.f32 %v7597_v15, %v6815_v47  ;;  %v3935_v51 = vmul.f32 %v3807_v22, %v3807_v22  ;;  %v3813_v27 = vsub.f32 %v7600_v53, %v6812_v34  ;;  %v7601_v22 = vld [vmem:[#allocation56_spill] sm:$0xff] }
 0x402   : > { %4204 = vst [vmem:[#allocation1 + $0x20] ss:$4 sm:$0xff] %v3929_v2 }
 0x403   : > { %4205 = vst [vmem:[#allocation1 + $0x21] ss:$4 sm:$0xff] %v3930_v42  ;;  %v7598_v42 = vld [vmem:[#allocation53_spill] sm:$0xff]  ;;  %v3938_v39 = vmul.f32 %v3810_v10, %v3810_v10  ;;  %v3816_v10 = vsub.f32 %v7603_v50, %v6821_v63 }
 0x404   : > { %4206 = vst [vmem:[#allocation1 + $0x22] ss:$4 sm:$0xff] %v3931_v11  ;;  %v3811_v11 = vsub.f32 %v7598_v42, %v6818_v13  ;;  %v7604_v42 = vld [vmem:[#allocation59_spill] sm:$0xff] }
 0x405   : > { %4207 = vst [vmem:[#allocation1 + $0x23] ss:$4 sm:$0xff] %v3932_v1  ;;  %v7599_v1 = vld [vmem:[#allocation54_spill] sm:$0xff]  ;;  %v3944_v50 = vmul.f32 %v3816_v10, %v3816_v10  ;;  %v7609_v10 = vld [vmem:[#allocation64_spill] sm:$0xff] }
 0x406   : > { %v3812_v52 = vsub.f32 %v7599_v1, %v6821_v63  ;;  %v3939_v15 = vmul.f32 %v3811_v11, %v3811_v11  ;;  %v3817_v11 = vsub.f32 %v7604_v42, %v6812_v34  ;;  %v7605_v1 = vld [vmem:[#allocation60_spill] sm:$0xff] }
 0x408   : > { %v6971_v2 = vld.sshfl [vmem:[#allocation1] sm:$0xff pattern:$0x73625140]  ;;  %v3940_v48 = vmul.f32 %v3812_v52, %v3812_v52  ;;  %v3945_v42 = vmul.f32 %v3817_v11, %v3817_v11  ;;  %v3822_v11 = vsub.f32 %v7609_v10, %v6815_v47 }
 0x409   : > { %4210 = vst [vmem:[#allocation1] ss:$4 sm:$0xff] %v3933_v28  ;;  %v3814_v28 = vsub.f32 %v7601_v22, %v6815_v47  ;;  %v4333_v22 = vsel %vm3671_vm12, %v6857_v33, 0.0 }
 0x40a   : > { %4211 = vst [vmem:[#allocation1 + $0x1] ss:$4 sm:$0xff] %v3934_v55  ;;  %v3815_v55 = vsub.f32 %v7602_v20, %v6818_v13  ;;  %v7607_v20 = vld [vmem:[#allocation62_spill] sm:$0xff] }
 0x40b   : > { %4212 = vst [vmem:[#allocation1 + $0x2] ss:$4 sm:$0xff] %v3935_v51  ;;  %v3941_v51 = vmul.f32 %v3813_v27, %v3813_v27  ;;  %v3942_v52 = vmul.f32 %v3814_v28, %v3814_v28  ;;  %v3820_v27 = vsub.f32 %v7607_v20, %v6821_v63  ;;  %v4335_v28 = vsel %vm3671_vm12, %v6871_v5, 0.0 }
 0x40c   : > { %v6977_v19 = vld.sshfl [vmem:[#allocation1 + $0x20] sm:$0xff pattern:$0x73625140]  ;;  %4213 = vst [vmem:[#allocation1 + $0x3] ss:$4 sm:$0xff] %v3936_v62  ;;  %v3818_v62 = vsub.f32 %v7605_v1, %v6815_v47  ;;  %v3943_v53 = vmul.f32 %v3815_v55, %v3815_v55 }
 0x40d   : > { %4214 = vst [vmem:[#allocation1 + $0x20] ss:$4 sm:$0xff] %v3937_v3  ;;  %v3948_v14 = vmul.f32 %v3820_v27, %v3820_v27 }
 0x40e   : > { %4215 = vst [vmem:[#allocation1 + $0x21] ss:$4 sm:$0xff] %v3938_v39  ;;  %v7606_v39 = vld [vmem:[#allocation61_spill] sm:$0xff]  ;;  %v3946_v1 = vmul.f32 %v3818_v62, %v3818_v62  ;;  %v7611_v62 = vld [vmem:[#allocation66_spill] sm:$0xff] }
 0x40f   : > { %4216 = vst [vmem:[#allocation1 + $0x22] ss:$4 sm:$0xff] %v3939_v15  ;;  %v3819_v15 = vsub.f32 %v7606_v39, %v6818_v13 }
 0x410   : > { %4217 = vst [vmem:[#allocation1 + $0x23] ss:$4 sm:$0xff] %v3940_v48  ;;  %v4332_v48 = vsel %vm3671_vm12, %v6851_v41, 0.0  ;;  %v7608_v41 = vld [vmem:[#allocation63_spill] sm:$0xff] }
 0x411   : > { %v4334_v55 = vadd.f32 %v4333_v22, %v4332_v48  ;;  %v3821_v33 = vsub.f32 %v7608_v41, %v6812_v34  ;;  %v4339_v48 = vsel %vm3671_vm12, %v6891_v46, 0.0  ;;  %v7612_v22 = vld [vmem:[#allocation67_spill] sm:$0xff] }
 0x412   : > { %v3825_v27 = vsub.f32 %v7612_v22, %v6812_v34 }
 0x413   : > { %v6991_v3 = vld.sshfl [vmem:[#allocation1] sm:$0xff pattern:$0x73625140]  ;;  %v4336_v20 = vadd.f32 %v4335_v28, %v4334_v55  ;;  %v7613_v28 = vld [vmem:[#allocation68_spill] sm:$0xff]  ;;  %v3950_v55 = vmul.f32 %v3822_v11, %v3822_v11 }
 0x414   : > { %4220 = vst [vmem:[#allocation1] ss:$4 sm:$0xff] %v3941_v51  ;;  %v3947_v51 = vmul.f32 %v3819_v15, %v3819_v15  ;;  %v4337_v15 = vsel %vm3671_vm12, %v6877_v6, 0.0  ;;  %v3953_v22 = vmul.f32 %v3825_v27, %v3825_v27  ;;  %v7617_v27 = vld [vmem:[#allocation72_spill] sm:$0xff] }
 0x415   : > { %4221 = vst [vmem:[#allocation1 + $0x1] ss:$4 sm:$0xff] %v3942_v52  ;;  %v7610_v52 = vld [vmem:[#allocation65_spill] sm:$0xff] }
 0x416   : > { %4222 = vst [vmem:[#allocation1 + $0x2] ss:$4 sm:$0xff] %v3943_v53  ;;  %v3823_v5 = vsub.f32 %v7610_v52, %v6818_v13  ;;  %v3824_v53 = vsub.f32 %v7611_v62, %v6821_v63  ;;  %v7615_v52 = vld [vmem:[#allocation70_spill] sm:$0xff] }
 0x417   : > { %v7003_v39 = vld.sshfl [vmem:[#allocation1 + $0x20] sm:$0xff pattern:$0x73625140]  ;;  %4223 = vst [vmem:[#allocation1 + $0x3] ss:$4 sm:$0xff] %v3944_v50  ;;  %v3949_v50 = vmul.f32 %v3821_v33, %v3821_v33  ;;  %v3828_v46 = vsub.f32 %v7615_v52, %v6821_v63  ;;  %v4341_v33 = vsel %vm3671_vm12, %v6897_v45, 0.0 }
 0x418   : > { %4224 = vst [vmem:[#allocation1 + $0x20] ss:$4 sm:$0xff] %v3945_v42  ;;  %v4338_v42 = vadd.f32 %v4337_v15, %v4336_v20  ;;  %v3951_v10 = vmul.f32 %v3823_v5, %v3823_v5  ;;  %v3952_v62 = vmul.f32 %v3824_v53, %v3824_v53  ;;  %v4343_v15 = vsel %vm3671_vm12, %v6911_v36, 0.0 }
 0x419   : > { %4225 = vst [vmem:[#allocation1 + $0x21] ss:$4 sm:$0xff] %v3946_v1  ;;  %v3826_v1 = vsub.f32 %v7613_v28, %v6815_v47  ;;  %v3956_v53 = vmul.f32 %v3828_v46, %v3828_v46  ;;  %v3830_v28 = vsub.f32 %v7617_v27, %v6815_v47  ;;  %v4347_v52 = vsel %vm3671_vm12, %v6931_v25, 0.0 }
 0x41a   : > { %4226 = vst [vmem:[#allocation1 + $0x22] ss:$4 sm:$0xff] %v3947_v51  ;;  %v4340_v6 = vadd.f32 %v4339_v48, %v4338_v42  ;;  %v3834_v46 = vsub.f32 %v7531_v40, %v6815_v47 }
 0x41b   : > { %4227 = vst [vmem:[#allocation1 + $0x23] ss:$4 sm:$0xff] %v3948_v14  ;;  %v7614_v14 = vld [vmem:[#allocation69_spill] sm:$0xff]  ;;  %v3954_v20 = vmul.f32 %v3826_v1, %v3826_v1 }
 0x41c   : > { %v3827_v41 = vsub.f32 %v7614_v14, %v6818_v13  ;;  %v4342_v48 = vadd.f32 %v4341_v33, %v4340_v6  ;;  %v7618_v1 = vld [vmem:[#allocation73_spill] sm:$0xff]  ;;  %v7619_v14 = vld [vmem:[#allocation74_spill] sm:$0xff]  ;;  %v4345_v6 = vsel %vm3671_vm12, %v6917_v7, 0.0  ;;  %v3962_v25 = vmul.f32 %v3834_v46, %v3834_v46 }
 0x41d   : > { %v3832_v36 = vsub.f32 %v7619_v14, %v6821_v63  ;;  %v4355_v46 = vsel %vm3671_vm12, %v6971_v2, 0.0 }
 0x41e   : > { %v7021_v51 = vld.sshfl [vmem:[#allocation1] sm:$0xff pattern:$0x73625140]  ;;  %v3955_v5 = vmul.f32 %v3827_v41, %v3827_v41  ;;  %v4344_v45 = vadd.f32 %v4343_v15, %v4342_v48  ;;  %v3833_v41 = vsub.f32 %v7530_v30, %v6812_v34  ;;  %v3836_v30 = vsub.f32 %v7533_v24, %v6821_v63 }
 0x41f   : > { %4230 = vst [vmem:[#allocation1] ss:$4 sm:$0xff] %v3949_v50  ;;  %v7616_v50 = vld [vmem:[#allocation71_spill] sm:$0xff]  ;;  %v3837_v24 = vsub.f32 %v7526_v17, %v6812_v34  ;;  %v3842_v17 = vsub.f32 %v7535_v31, %v6815_v47 }
 0x420   : > { %4231 = vst [vmem:[#allocation1 + $0x1] ss:$4 sm:$0xff] %v3950_v55  ;;  %v3829_v42 = vsub.f32 %v7616_v50, %v6812_v34  ;;  %v3831_v55 = vsub.f32 %v7618_v1, %v6818_v13  ;;  %v4346_v33 = vadd.f32 %v4345_v6, %v4344_v45  ;;  %v3961_v48 = vmul.f32 %v3833_v41, %v3833_v41  ;;  %v7621_v1 = vld [vmem:[#allocation81_spill] sm:$0xff] }
 0x421   : > { %4232 = vst [vmem:[#allocation1 + $0x2] ss:$4 sm:$0xff] %v3951_v10  ;;  %v3965_v41 = vmul.f32 %v3837_v24, %v3837_v24 }
 0x422   : > { %v7029_v11 = vld.sshfl [vmem:[#allocation1 + $0x20] sm:$0xff pattern:$0x73625140]  ;;  %4233 = vst [vmem:[#allocation1 + $0x3] ss:$4 sm:$0xff] %v3952_v62  ;;  %v3957_v10 = vmul.f32 %v3829_v42, %v3829_v42  ;;  %v3958_v62 = vmul.f32 %v3830_v28, %v3830_v28  ;;  %v3959_v15 = vmul.f32 %v3831_v55, %v3831_v55  ;;  %v4348_v7 = vadd.f32 %v4347_v52, %v4346_v33  ;;  %v7620_v28 = vld [vmem:[#allocation80_spill] sm:$0xff] }
 0x423   : > { %4234 = vst [vmem:[#allocation1 + $0x20] ss:$4 sm:$0xff] %v3953_v22  ;;  %v4349_v42 = vsel %vm3671_vm12, %v6937_v18, 0.0  ;;  %v3838_v45 = vsub.f32 %v7620_v28, %v6815_v47  ;;  %v3839_v55 = vsub.f32 %v7621_v1, %v6818_v13  ;;  %v7622_v18 = vld [vmem:[#allocation82_spill] sm:$0xff]  ;;  %v4353_v52 = vsel %vm3671_vm12, %v6957_v8, 0.0 }
 0x424   : > { %4235 = vst [vmem:[#allocation1 + $0x21] ss:$4 sm:$0xff] %v3954_v20  ;;  %v3835_v20 = vsub.f32 %v7532_v43, %v6818_v13  ;;  %v4351_v43 = vsel %vm3671_vm12, %v6951_v9, 0.0  ;;  %v4350_v27 = vadd.f32 %v4349_v42, %v4348_v7  ;;  %v3841_v9 = vsub.f32 %v7534_v23, %v6812_v34 }
 0x425   : > { %4236 = vst [vmem:[#allocation1 + $0x22] ss:$4 sm:$0xff] %v3955_v5  ;;  %v3960_v5 = vmul.f32 %v3832_v36, %v3832_v36  ;;  %v3840_v36 = vsub.f32 %v7622_v18, %v6821_v63  ;;  %v3967_v33 = vmul.f32 %v3839_v55, %v3839_v55  ;;  %v3844_v23 = vsub.f32 %v7537_v0, %v6821_v63 }
 0x426   : > { %4237 = vst [vmem:[#allocation1 + $0x23] ss:$4 sm:$0xff] %v3956_v53  ;;  %v3963_v40 = vmul.f32 %v3835_v20, %v3835_v20  ;;  %v3964_v53 = vmul.f32 %v3836_v30, %v3836_v30  ;;  %v4352_v14 = vadd.f32 %v4351_v43, %v4350_v27  ;;  %v3969_v31 = vmul.f32 %v3841_v9, %v3841_v9  ;;  %v7624_v43 = vld [vmem:[#allocation91_spill] sm:$0xff] }
 0x427   : > { %v3972_v2 = vmul.f32 %v3844_v23, %v3844_v23  ;;  %v4359_v0 = vsel %vm3671_vm12, %v6991_v3, 0.0  ;;  %v3847_v24 = vsub.f32 %v7624_v43, %v6818_v13  ;;  %v3849_v27 = vsub.f32 %v7538_v16, %v6812_v34 }
 0x428   : > { %v4354_v20 = vadd.f32 %v4353_v52, %v4352_v14  ;;  %v3850_v3 = vsub.f32 %v7539_v29, %v6815_v47  ;;  %v3851_v1 = vsub.f32 %v7540_v38, %v6818_v13  ;;  %v4361_v14 = vsel %vm3671_vm12, %v7003_v39, 0.0  ;;  %v7625_v39 = vld [vmem:[#allocation96_spill] sm:$0xff] }
 0x429   : > { %v7049_v22 = vld.sshfl [vmem:[#allocation1] sm:$0xff pattern:$0x73625140]  ;;  %v3975_v55 = vmul.f32 %v3847_v24, %v3847_v24  ;;  %v3852_v16 = vsub.f32 %v7541_v58, %v6821_v63  ;;  %v3977_v29 = vmul.f32 %v3849_v27, %v3849_v27  ;;  %v3854_v58 = vsub.f32 %v6492_v49, %v6815_v47  ;;  %v7628_v24 = vld [vmem:[#allocation101_spill] sm:$0xff] }
 0x42a   : > { %4240 = vst [vmem:[#allocation1] ss:$4 sm:$0xff] %v3957_v10  ;;  %v3966_v10 = vmul.f32 %v3838_v45, %v3838_v45  ;;  %v4356_v30 = vadd.f32 %v4355_v46, %v4354_v20  ;;  %v3978_v9 = vmul.f32 %v3850_v3, %v3850_v3  ;;  %v4367_v46 = vsel %vm3671_vm12, %v7049_v22, 0.0 }
 0x42b   : > { %4241 = vst [vmem:[#allocation1 + $0x1] ss:$4 sm:$0xff] %v3958_v62  ;;  %v3843_v62 = vsub.f32 %v7536_v35, %v6818_v13  ;;  %v3845_v35 = vsub.f32 %v6441_v44, %v6812_v34  ;;  %v3848_v44 = vsub.f32 %v6463_v60, %v6821_v63  ;;  %v4363_v60 = vsel %vm3671_vm12, %v7021_v51, 0.0 }
 0x42c   : > { %4242 = vst [vmem:[#allocation1 + $0x2] ss:$4 sm:$0xff] %v3959_v15  ;;  %v3968_v15 = vmul.f32 %v3840_v36, %v3840_v36  ;;  %v3980_v52 = vmul.f32 %v3852_v16, %v3852_v16  ;;  %v4365_v51 = vsel %vm3671_vm12, %v7029_v11, 0.0  ;;  %v3856_v23 = vsub.f32 %v6469_v21, %v6821_v63 }
 0x42d   : > { %v7055_v50 = vld.sshfl [vmem:[#allocation1 + $0x20] sm:$0xff pattern:$0x73625140]  ;;  %4243 = vst [vmem:[#allocation1 + $0x3] ss:$4 sm:$0xff] %v3960_v5  ;;  %v3970_v5 = vmul.f32 %v3842_v17, %v3842_v17  ;;  %v3971_v8 = vmul.f32 %v3843_v62, %v3843_v62  ;;  %v3976_v18 = vmul.f32 %v3848_v44, %v3848_v44  ;;  %v3979_v17 = vmul.f32 %v3851_v1, %v3851_v1  ;;  %v7626_v62 = vld [vmem:[#allocation97_spill] sm:$0xff] }
 0x42e   : > { %4244 = vst [vmem:[#allocation1 + $0x20] ss:$4 sm:$0xff] %v3961_v48  ;;  %v4357_v48 = vsel %vm3671_vm12, %v6977_v19, 0.0  ;;  %v3973_v19 = vmul.f32 %v3845_v35, %v3845_v35  ;;  %v3982_v11 = vmul.f32 %v3854_v58, %v3854_v58  ;;  %v3859_v22 = vsub.f32 %v7544_v4, %v6818_v13  ;;  %v7632_v58 = vld [vmem:[#allocation106_spill] sm:$0xff] }
 0x42f   : > { %4245 = vst [vmem:[#allocation1 + $0x21] ss:$4 sm:$0xff] %v3962_v25  ;;  %v7623_v25 = vld [vmem:[#allocation88_spill] sm:$0xff]  ;;  %v4358_v42 = vadd.f32 %v4357_v48, %v4356_v30  ;;  %v3858_v30 = vsub.f32 %v7543_v56, %v6815_v47  ;;  %v3860_v35 = vsub.f32 %v6487_v59, %v6821_v63  ;;  %v4369_v21 = vsel %vm3671_vm12, %v7055_v50, 0.0 }
 0x430   : > { %4246 = vst [vmem:[#allocation1 + $0x22] ss:$4 sm:$0xff] %v3963_v40  ;;  %v3846_v40 = vsub.f32 %v7623_v25, %v6815_v47  ;;  %v3987_v4 = vmul.f32 %v3859_v22, %v3859_v22  ;;  %v3862_v50 = vsub.f32 %v7628_v24, %v6815_v47  ;;  %v3864_v27 = vsub.f32 %v6536_v37, %v6821_v63 }
 0x431   : > { %4247 = vst [vmem:[#allocation1 + $0x23] ss:$4 sm:$0xff] %v3964_v53  ;;  %v4360_v53 = vadd.f32 %v4359_v0, %v4358_v42  ;;  %v3986_v0 = vmul.f32 %v3858_v30, %v3858_v30  ;;  %v7627_v42 = vld [vmem:[#allocation100_spill] sm:$0xff]  ;;  %v3988_v43 = vmul.f32 %v3860_v35, %v3860_v35  ;;  %v3865_v3 = vsub.f32 %v7545_v61, %v6812_v34 }
 0x432   : > { %v3974_v28 = vmul.f32 %v3846_v40, %v3846_v40  ;;  %v3861_v59 = vsub.f32 %v7627_v42, %v6812_v34  ;;  %v3866_v1 = vsub.f32 %v7546_v12, %v6815_v47  ;;  %v3992_v37 = vmul.f32 %v3864_v27, %v3864_v27 }
 0x433   : > { %v4362_v36 = vadd.f32 %v4361_v14, %v4360_v53  ;;  %v3993_v16 = vmul.f32 %v3865_v3, %v3865_v3 }
 0x434   : > { %v7073_v6 = vld.sshfl [vmem:[#allocation1] sm:$0xff pattern:$0x73625140] }
 0x435   : > { %4250 = vst [vmem:[#allocation1] ss:$4 sm:$0xff] %v3965_v41  ;;  %v4364_v38 = vadd.f32 %v4363_v60, %v4362_v36  ;;  %v3867_v60 = vsub.f32 %v6506_v32, %v6818_v13  ;;  %v7629_v32 = vld [vmem:[#allocation104_spill] sm:$0xff] }
 0x436   : > { %4251 = vst [vmem:[#allocation1 + $0x1] ss:$4 sm:$0xff] %v3966_v10  ;;  %v3853_v10 = vsub.f32 %v7625_v39, %v6812_v34  ;;  %v7630_v39 = vld [vmem:[#allocation102_spill] sm:$0xff] }
 0x437   : > { %4252 = vst [vmem:[#allocation1 + $0x2] ss:$4 sm:$0xff] %v3967_v33  ;;  %v3855_v33 = vsub.f32 %v7626_v62, %v6818_v13  ;;  %v4366_v20 = vadd.f32 %v4365_v51, %v4364_v38  ;;  %v3869_v38 = vsub.f32 %v7629_v32, %v6812_v34  ;;  %v3872_v51 = vsub.f32 %v7632_v58, %v6821_v63 }
 0x438   : > { %v7083_v7 = vld.sshfl [vmem:[#allocation1 + $0x20] sm:$0xff pattern:$0x73625140]  ;;  %4253 = vst [vmem:[#allocation1 + $0x3] ss:$4 sm:$0xff] %v3968_v15  ;;  %v3857_v15 = vsub.f32 %v7542_v57, %v6812_v34  ;;  %v4371_v57 = vsel %vm3671_vm12, %v7073_v6, 0.0  ;;  %v3863_v6 = vsub.f32 %v6500_v26, %v6818_v13 }
 0x439   : > { %4254 = vst [vmem:[#allocation1 + $0x20] ss:$4 sm:$0xff] %v3969_v31  ;;  %v3981_v31 = vmul.f32 %v3853_v10, %v3853_v10  ;;  %v4368_v49 = vadd.f32 %v4367_v46, %v4366_v20  ;;  %v4373_v44 = vsel %vm3671_vm12, %v7083_v7, 0.0  ;;  %v3870_v10 = vsub.f32 %v7630_v39, %v6815_v47 }
 0x43a   : > { %4255 = vst [vmem:[#allocation1 + $0x21] ss:$4 sm:$0xff] %v3970_v5  ;;  %v3985_v48 = vmul.f32 %v3857_v15, %v3857_v15  ;;  %v3991_v7 = vmul.f32 %v3863_v6, %v3863_v6 }
 0x43b   : > { %4256 = vst [vmem:[#allocation1 + $0x22] ss:$4 sm:$0xff] %v3971_v8  ;;  %v3983_v8 = vmul.f32 %v3855_v33, %v3855_v33  ;;  %v4370_v56 = vadd.f32 %v4369_v21, %v4368_v49  ;;  %v7633_v33 = vld [vmem:[#allocation103_spill] sm:$0xff]  ;;  %v3998_v30 = vmul.f32 %v3870_v10, %v3870_v10 }
 0x43c   : > { %4257 = vst [vmem:[#allocation1 + $0x23] ss:$4 sm:$0xff] %v3972_v2  ;;  %v3984_v2 = vmul.f32 %v3856_v23, %v3856_v23  ;;  %v3873_v20 = vsub.f32 %v7633_v33, %v6812_v34  ;;  %v3997_v23 = vmul.f32 %v3869_v38, %v3869_v38 }
 0x43d   : > { %v4372_v40 = vadd.f32 %v4371_v57, %v4370_v56  ;;  %v4000_v57 = vmul.f32 %v3872_v51, %v3872_v51 }
 0x43f   : > { %v4258_v45 = vld.sshfl [vmem:[#allocation1] sm:$0xff pattern:$0x73625140] }
 0x440   : > { %4260 = vst [vmem:[#allocation1] ss:$4 sm:$0xff] %v3973_v19  ;;  %v4375_v53 = vsel %vm3671_vm12, %v4258_v45, 0.0  ;;  %v4374_v19 = vadd.f32 %v4373_v44, %v4372_v40  ;;  %v3868_v45 = vsub.f32 %v6521_v54, %v6821_v63 }
 0x441   : > { %4261 = vst [vmem:[#allocation1 + $0x1] ss:$4 sm:$0xff] %v3974_v28  ;;  %v3989_v28 = vmul.f32 %v3861_v59, %v3861_v59 }
 0x442   : > { %4262 = vst [vmem:[#allocation1 + $0x2] ss:$4 sm:$0xff] %v3975_v55  ;;  %v3990_v55 = vmul.f32 %v3862_v50, %v3862_v50  ;;  %v4376_v26 = vadd.f32 %v4375_v53, %v4374_v19 }
 0x443   : > { %v7109_v41 = vld.sshfl [vmem:[#allocation1 + $0x20] sm:$0xff pattern:$0x73625140]  ;;  %4263 = vst [vmem:[#allocation1 + $0x3] ss:$4 sm:$0xff] %v3976_v18  ;;  %v3994_v18 = vmul.f32 %v3866_v1, %v3866_v1 }
 0x444   : > { %4264 = vst [vmem:[#allocation1 + $0x20] ss:$4 sm:$0xff] %v3977_v29  ;;  %v4377_v61 = vsel %vm3671_vm12, %v7109_v41, 0.0  ;;  %v7631_v41 = vld [vmem:[#allocation105_spill] sm:$0xff] }
 0x445   : > { %4265 = vst [vmem:[#allocation1 + $0x21] ss:$4 sm:$0xff] %v3978_v9  ;;  %v4378_v29 = vadd.f32 %v4377_v61, %v4376_v26  ;;  %v3995_v9 = vmul.f32 %v3867_v60, %v3867_v60 }
 0x446   : > { %4266 = vst [vmem:[#allocation1 + $0x22] ss:$4 sm:$0xff] %v3979_v17  ;;  %v3996_v17 = vmul.f32 %v3868_v45, %v3868_v45 }
 0x447   : > { %4267 = vst [vmem:[#allocation1 + $0x23] ss:$4 sm:$0xff] %v3980_v52  ;;  %v3871_v52 = vsub.f32 %v7631_v41, %v6818_v13 }
 0x44a   : > { %v4268_v5 = vld.sshfl [vmem:[#allocation1] sm:$0xff pattern:$0x73625140] }
 0x44b   : > { %4270 = vst [vmem:[#allocation1] ss:$4 sm:$0xff] %v3981_v31  ;;  %v4379_v12 = vsel %vm3671_vm12, %v4268_v5, 0.0  ;;  %v7634_v31 = vld [vmem:[#allocation107_spill] sm:$0xff]  ;;  %v7635_v5 = vld [vmem:[#allocation108_spill] sm:$0xff] }
 0x44c   : > { %4271 = vst [vmem:[#allocation1 + $0x1] ss:$4 sm:$0xff] %v3982_v11  ;;  %v4380_v54 = vadd.f32 %v4379_v12, %v4378_v29  ;;  %v3874_v49 = vsub.f32 %v7634_v31, %v6815_v47  ;;  %v3875_v22 = vsub.f32 %v7635_v5, %v6818_v13 }
 0x44d   : > { %4272 = vst [vmem:[#allocation1 + $0x2] ss:$4 sm:$0xff] %v3983_v8  ;;  %v3999_v8 = vmul.f32 %v3871_v52, %v3871_v52 }
 0x44e   : > { %v4269_v25 = vld.sshfl [vmem:[#allocation1 + $0x20] sm:$0xff pattern:$0x73625140]  ;;  %4273 = vst [vmem:[#allocation1 + $0x3] ss:$4 sm:$0xff] %v3984_v2  ;;  %v7636_v2 = vld [vmem:[#allocation109_spill] sm:$0xff]  ;;  %v4002_v56 = vmul.f32 %v3874_v49, %v3874_v49 }
 0x44f   : > { %4274 = vst [vmem:[#allocation1 + $0x20] ss:$4 sm:$0xff] %v3985_v48  ;;  %v4381_v46 = vsel %vm3671_vm12, %v4269_v25, 0.0  ;;  %v3876_v21 = vsub.f32 %v7636_v2, %v6821_v63  ;;  %v4001_v48 = vmul.f32 %v3873_v20, %v3873_v20  ;;  %v4003_v25 = vmul.f32 %v3875_v22, %v3875_v22 }
 0x450   : > { %4275 = vst [vmem:[#allocation1 + $0x21] ss:$4 sm:$0xff] %v3986_v0  ;;  %v4382_v15 = vadd.f32 %v4381_v46, %v4380_v54 }
 0x451   : > { %4276 = vst [vmem:[#allocation1 + $0x22] ss:$4 sm:$0xff] %v3987_v4  ;;  %v4004_v4 = vmul.f32 %v3876_v21, %v3876_v21 }
 0x452   : > { %4277 = vst [vmem:[#allocation1 + $0x23] ss:$4 sm:$0xff] %v3988_v43 }
 0x455   : > { %v4278_v14 = vld.sshfl [vmem:[#allocation1] sm:$0xff pattern:$0x73625140] }
 0x456   : > { %4280 = vst [vmem:[#allocation1] ss:$4 sm:$0xff] %v3989_v28  ;;  %v4383_v62 = vsel %vm3671_vm12, %v4278_v14, 0.0 }
 0x457   : > { %4281 = vst [vmem:[#allocation1 + $0x1] ss:$4 sm:$0xff] %v3990_v55  ;;  %v4384_v35 = vadd.f32 %v4383_v62, %v4382_v15  ;;  %v7637_v55 = vld [vmem:[#allocation79_spill] sm:$0xff] }
 0x458   : > { %4282 = vst [vmem:[#allocation1 + $0x2] ss:$4 sm:$0xff] %v3991_v7 }
 0x459   : > { %v4279_v36 = vld.sshfl [vmem:[#allocation1 + $0x20] sm:$0xff pattern:$0x73625140]  ;;  %4283 = vst [vmem:[#allocation1 + $0x3] ss:$4 sm:$0xff] %v3992_v37 }
 0x45a   : > { %4284 = vst [vmem:[#allocation1 + $0x20] ss:$4 sm:$0xff] %v3993_v16  ;;  %v4385_v34 = vsel %vm3671_vm12, %v4279_v36, 0.0 }
 0x45b   : > { %4285 = vst [vmem:[#allocation1 + $0x21] ss:$4 sm:$0xff] %v3994_v18  ;;  %v4386_v13 = vadd.f32 %v4385_v34, %v4384_v35 }
 0x45c   : > { %4286 = vst [vmem:[#allocation1 + $0x22] ss:$4 sm:$0xff] %v3995_v9 }
 0x45d   : > { %4287 = vst [vmem:[#allocation1 + $0x23] ss:$4 sm:$0xff] %v3996_v17 }
 0x460   : > { %v4288_v11 = vld.sshfl [vmem:[#allocation1] sm:$0xff pattern:$0x73625140] }
 0x461   : > { %4290 = vst [vmem:[#allocation1] ss:$4 sm:$0xff] %v3997_v23  ;;  %v4387_v47 = vsel %vm3671_vm12, %v4288_v11, 0.0 }
 0x462   : > { %4291 = vst [vmem:[#allocation1 + $0x1] ss:$4 sm:$0xff] %v3998_v30  ;;  %v4388_v40 = vadd.f32 %v4387_v47, %v4386_v13 }
 0x463   : > { %4292 = vst [vmem:[#allocation1 + $0x2] ss:$4 sm:$0xff] %v3999_v8 }
 0x464   : > { %v4289_v0 = vld.sshfl [vmem:[#allocation1 + $0x20] sm:$0xff pattern:$0x73625140]  ;;  %4293 = vst [vmem:[#allocation1 + $0x3] ss:$4 sm:$0xff] %v4000_v57 }
 0x465   : > { %4294 = vst [vmem:[#allocation1 + $0x20] ss:$4 sm:$0xff] %v4001_v48  ;;  %v4389_v63 = vsel %vm3671_vm12, %v4289_v0, 0.0 }
 0x466   : > { %4295 = vst [vmem:[#allocation1 + $0x21] ss:$4 sm:$0xff] %v4002_v56  ;;  %v4390_v59 = vadd.f32 %v4389_v63, %v4388_v40 }
 0x467   : > { %4296 = vst [vmem:[#allocation1 + $0x22] ss:$4 sm:$0xff] %v4003_v25 }
 0x468   : > { %4297 = vst [vmem:[#allocation1 + $0x23] ss:$4 sm:$0xff] %v4004_v4 }
 0x46b   : > { %v4298_v42 = vld.sshfl [vmem:[#allocation1] sm:$0xff pattern:$0x73625140] }
 0x46c   : > { %v4391_v43 = vsel %vm3671_vm12, %v4298_v42, 0.0 }
 0x46d   : > { %v4392_v24 = vadd.f32 %v4391_v43, %v4390_v59 }
 0x46f   : > { %v4299_v50 = vld.sshfl [vmem:[#allocation1 + $0x20] sm:$0xff pattern:$0x73625140] }
 0x470   : > { %v4393_v6 = vsel %vm3671_vm12, %v4299_v50, 0.0 }
 0x471   : > { %v4394_v44 = vadd.f32 %v4393_v6, %v4392_v24 }
 0x473   : > { %v4395_v53 = vrot.slane %v4394_v44, 4 }
 0x475   : > { %v4396_v27 = vadd.f32 %v4395_v53, %v4394_v44 }
 0x477   : > { %v4397_v19 = vrot.slane %v4396_v27, 2 }
 0x479   : > { %v4398_v3 = vadd.f32 %v4397_v19, %v4396_v27 }
 0x47b   : > { %v4399_v28 = vrot.slane %v4398_v3, 1 }
 0x47d   : > { %v4400_v1 = vadd.f32 %v4399_v28, %v4398_v3 }
 0x47f   : > { %v4402_v14 = vsel %vm449_vm3, %v7637_v55, %v4400_v1 }
 0x480   : > { %4404 = vst.msk [vmem:[%s181_s11] sm:$0x3] %vm4403_vm13, %v4402_v14 }
 0x481 PF: > { %s14_s12 = sadd.s32 1, %s4867_s12  }
 0x482   : > { %p11_p4 = scmp.ge.s32.totalorder %s14_s12, 4  }
 0x484   :  { %13 = sbr.rel (!%p11_p4) target bundleno = 1 (0x1), region = 100 }

</bundles_post_ra>
